<compile_context>
chip_gen: v5e
topology: v5e:2x2
jax: 0.10.0
libtpu: 0.0.40
codegen_flags: <defaults>
</compile_context>

<pallas_src>
import functools

import jax
import jax.numpy as jnp
from jax.experimental import pallas as pl
from jax.experimental.pallas import tpu as pltpu


LEAKY_SLOPE = 0.2
KSZ = 4          # conv kernel size (kw in the PyTorch module)
PADW = 2         # int(np.ceil((4 - 1) / 2)) exactly as in the PyTorch module
BN_EPS = 1e-5
MAX_TK = 2048    # reduction tile cap (keeps double-buffered set a few MiB)
MAX_TM = 512


def _round_up(x, m):
    return (x + m - 1) // m * m


def _pick_tk(kp):
    """Largest multiple of 128 that divides kp and is <= MAX_TK."""
    if kp <= MAX_TK:
        return kp
    tk = MAX_TK
    while kp % tk:
        tk -= 128
    return tk


# ----------------------------------------------------------------------------
# Pallas kernel: tiled bf16 matmul (f32 acc) + bias + optional LeakyReLU
#                + optional per-row-block BatchNorm partial statistics
# ----------------------------------------------------------------------------
def _mm_bias_act_kernel(a_ref, b_ref, bias_ref, *out_refs,
                        negative_slope, apply_act, compute_stats):
    if compute_stats:
        o_ref, sum_ref, sq_ref, acc_ref = out_refs
    else:
        o_ref, acc_ref = out_refs

    k = pl.program_id(2)   # reduction axis (innermost)

    @pl.when(k == 0)
    def _():
        acc_ref[...] = jnp.zeros_like(acc_ref)

    acc_ref[...] += jnp.dot(a_ref[...], b_ref[...],
                            preferred_element_type=jnp.float32)

    @pl.when(k == pl.num_programs(2) - 1)
    def _():
        # Bias added in place (BN layers have bias == 0, so padded rows still
        # contribute nothing to the statistics below).
        acc_ref[...] += bias_ref[...]

        if compute_stats:
            # Per-row-block partial column sums / sums-of-squares, reduced to
            # 8 sublane rows (pure VPU adds, no cross-lane work).  The JAX
            # wrapper finishes the reduction over all (row-block, sublane)
            # partials.  Row-block axis stays "parallel" (v7x megacore).
            tm, tn = acc_ref.shape
            a3 = acc_ref[...].reshape(tm // 8, 8, tn)
            sum_ref[...] = jnp.sum(a3, axis=0)
            sq_ref[...] = jnp.sum(a3 * a3, axis=0)

        out = acc_ref[...]
        if apply_act:
            out = jnp.where(out >= 0, out, negative_slope * out)
        o_ref[...] = out.astype(o_ref.dtype)


def matmul_bias_act(a_p, w_p, bias_p, *, tm, tk, tn, apply_act, compute_stats,
                    out_dtype, negative_slope=LEAKY_SLOPE):
    """out = A @ W + bias with bf16 MXU operands and an f32 accumulator.

    a_p:    (Mp, Kp) bf16 im2col patches, pre-padded to tile multiples
    w_p:    (Kp, Np) bf16 GEMM weights, pre-padded at parameter init
    bias_p: (1,  Np) f32,  pre-padded at parameter init

    Returns the padded (Mp, Np) output, plus per-row-block partial
    (col_sum, col_sumsq) of shape (Mp//tm * 8, Np) each if compute_stats.
    """
    mp, kp = a_p.shape
    _, np_ = w_p.shape
    n_i = mp // tm

    grid = (n_i, np_ // tn, kp // tk)   # (i, j, k): k innermost reduction

    kernel = functools.partial(
        _mm_bias_act_kernel, negative_slope=negative_slope,
        apply_act=apply_act, compute_stats=compute_stats)

    in_specs = [
        pl.BlockSpec((tm, tk), lambda i, j, k: (i, k)),
        pl.BlockSpec((tk, tn), lambda i, j, k: (k, j)),
        pl.BlockSpec((1, tn), lambda i, j, k: (0, j)),
    ]
    o_spec = pl.BlockSpec((tm, tn), lambda i, j, k: (i, j))

    if compute_stats:
        stat_spec = pl.BlockSpec((8, tn), lambda i, j, k: (i, j))
        out_shape = (jax.ShapeDtypeStruct((mp, np_), out_dtype),
                     jax.ShapeDtypeStruct((n_i * 8, np_), jnp.float32),
                     jax.ShapeDtypeStruct((n_i * 8, np_), jnp.float32))
        out_specs = [o_spec, stat_spec, stat_spec]
    else:
        out_shape = jax.ShapeDtypeStruct((mp, np_), out_dtype)
        out_specs = o_spec

    return pl.pallas_call(
        kernel,
        out_shape=out_shape,
        grid_spec=pltpu.PrefetchScalarGridSpec(
            num_scalar_prefetch=0,
            grid=grid,
            in_specs=in_specs,
            out_specs=out_specs,
            scratch_shapes=[pltpu.VMEM((tm, tn), jnp.float32)]),
        compiler_params=pltpu.CompilerParams(
            # No cross-iteration accumulation on i or j anymore, so both data
            # axes shard across TensorCores on v7x; k is the reduction.
            dimension_semantics=("parallel", "parallel", "arbitrary"),
            # Working set is ~6 MiB at tm=512, tk=2048, tn=128; 32 MiB is
            # safe headroom on v5e/v6e (128 MiB) and v7x (64 MiB) alike.
            vmem_limit_bytes=32 * 1024 * 1024),
    )(a_p, w_p, bias_p)


# ----------------------------------------------------------------------------
# Conv3d lowering: im2col (plain-JAX glue, fused under jit) feeding the GEMM
# ----------------------------------------------------------------------------
def _conv_out_dim(sz, stride):
    return (sz + 2 * PADW - KSZ) // stride + 1


def _im2col_padded(x_ndhwc, stride, mp, kp):
    """Materialized im2col in bf16, emitted already padded to (Mp, Kp).

    TODO(synk): implicit-GEMM formulation to avoid the ksz**3 read
    amplification of this patch tensor for large inputs.
    """
    n, d, h, w, c = x_ndhwc.shape
    xp = jnp.pad(x_ndhwc.astype(jnp.bfloat16),
                 ((0, 0), (PADW,) * 2, (PADW,) * 2, (PADW,) * 2, (0, 0)))
    do, ho, wo = _conv_out_dim(d, stride), _conv_out_dim(h, stride), _conv_out_dim(w, stride)
    patches = []
    for a in range(KSZ):
        for b in range(KSZ):
            for cc in range(KSZ):
                patches.append(xp[:, a:a + stride * do:stride,
                                  b:b + stride * ho:stride,
                                  cc:cc + stride * wo:stride, :])
    # (N, Do, Ho, Wo, ksz^3, C) -> (M, K); tap order matches the GEMM weights.
    m = n * do * ho * wo
    kk = KSZ ** 3 * c
    a_mat = jnp.stack(patches, axis=4).reshape(m, kk)
    # Single pad to the tile-aligned GEMM shape (no second full-copy pad).
    return jnp.pad(a_mat, ((0, mp - m), (0, kp - kk)))


# ----------------------------------------------------------------------------
# NLayerDiscriminator: parameters + forward
# ----------------------------------------------------------------------------
def init_nlayer_discriminator_params(key, input_nc, ndf=64, n_layers=3):
    # norm_layer = BatchNorm3d  =>  use_bias = False for the normed convs.
    specs = [dict(cin=input_nc, cout=ndf, stride=2,
                  use_bias=True, bn=False, act=True)]
    nf_mult = 1
    for n in range(1, n_layers):
        nf_prev, nf_mult = nf_mult, min(2 ** n, 8)
        specs.append(dict(cin=ndf * nf_prev, cout=ndf * nf_mult, stride=2,
                          use_bias=False, bn=True, act=True))
    nf_prev, nf_mult = nf_mult, min(2 ** n_layers, 8)
    specs.append(dict(cin=ndf * nf_prev, cout=ndf * nf_mult, stride=1,
                      use_bias=False, bn=True, act=True))
    specs.append(dict(cin=ndf * nf_mult, cout=1, stride=1,
                      use_bias=True, bn=False, act=False))

    params = []
    for s in specs:
        key, wk, bk = jax.random.split(key, 3)
        w = 0.02 * jax.random.normal(
            wk, (s["cout"], s["cin"], KSZ, KSZ, KSZ), jnp.float32)
        b = (0.02 * jax.random.normal(bk, (s["cout"],), jnp.float32)
             if s["use_bias"] else jnp.zeros((s["cout"],), jnp.float32))

        kk = KSZ ** 3 * s["cin"]
        n_out = s["cout"]
        kp, np_ = _round_up(kk, 128), _round_up(n_out, 128)
        # GEMM weight layout (kd, kh, kw, Cin, Cout) flattened, zero-padded to
        # tile multiples and cast to bf16 -- done once here, not per forward.
        wm = jnp.transpose(w, (2, 3, 4, 1, 0)).reshape(kk, n_out)
        w_p = jnp.pad(wm, ((0, kp - kk), (0, np_ - n_out))).astype(jnp.bfloat16)
        bias_p = jnp.pad(b.reshape(1, n_out), ((0, 0), (0, np_ - n_out)))

        params.append(dict(
            w_p=w_p, bias_p=bias_p,
            gamma=jnp.ones((n_out,), jnp.float32) if s["bn"] else None,
            beta=jnp.zeros((n_out,), jnp.float32) if s["bn"] else None,
            cout=n_out, stride=s["stride"], bn=s["bn"], act=s["act"]))
    return params


def nlayer_discriminator_forward(x_ncdhw, params):
    # NCDHW (PyTorch) in/out; NDHWC bf16 internal compute layout.
    x = jnp.transpose(x_ncdhw, (0, 2, 3, 4, 1))
    n_total = len(params)
    for li, p in enumerate(params):
        is_last = li == n_total - 1
        batch, d, h, w, _ = x.shape
        stride = p["stride"]
        do, ho, wo = (_conv_out_dim(d, stride), _conv_out_dim(h, stride),
                      _conv_out_dim(w, stride))
        m = batch * do * ho * wo

        kp, np_ = p["w_p"].shape
        tm = min(MAX_TM, _round_up(m, 8))
        mp = _round_up(m, tm)
        tk = _pick_tk(kp)
        tn = 128  # Cout <= 512 real channels; lane-dense, keeps epilogue small

        a_p = _im2col_padded(x, stride, mp, kp)

        fuse_act = p["act"] and not p["bn"]   # LeakyReLU fused in GEMM epilogue
        # Note: the final 1-channel conv still pads Cout to the 128-lane
        # minimum; cost is negligible since it runs once on the smallest map.
        res = matmul_bias_act(
            a_p, p["w_p"], p["bias_p"], tm=tm, tk=tk, tn=tn,
            apply_act=fuse_act, compute_stats=p["bn"],
            out_dtype=jnp.float32 if is_last else jnp.bfloat16)

        if p["bn"]:
            out_p, psum, psq = res
            c = p["cout"]
            col_sum = jnp.sum(psum[:, :c], axis=0)
            col_sq = jnp.sum(psq[:, :c], axis=0)
            mean = col_sum / m
            var = jnp.maximum(col_sq / m - mean * mean, 0.0)
            # TODO(synk): BatchNorm running_mean/running_var updates (training
            # side effect) are not reproduced; forward matches train-mode math.
            scale = p["gamma"] * jax.lax.rsqrt(var + BN_EPS)
            shift = p["beta"] - mean * scale
            # BN affine + LeakyReLU in plain JAX: fuses with the next layer's
            # im2col gather under jit (no extra pallas_call / HBM round trip).
            y = out_p[:m, :c].astype(jnp.float32) * scale + shift
            y = jnp.where(y >= 0, y, LEAKY_SLOPE * y)
            x = y.reshape(batch, do, ho, wo, c).astype(jnp.bfloat16)
        else:
            out_p = res
            x = out_p[:m, :p["cout"]].reshape(batch, do, ho, wo, p["cout"])
    return jnp.transpose(x, (0, 4, 1, 2, 3)).astype(jnp.float32)


if __name__ == "__main__":
    key = jax.random.PRNGKey(0)
    k_params, k_x = jax.random.split(key)

    # Small config consistent with the module: input_nc=1, ndf=8, n_layers=3.
    input_nc, ndf, n_layers = 1, 8, 3
    params = init_nlayer_discriminator_params(k_params, input_nc, ndf, n_layers)

    # batch=2, channels=input_nc, spatial 16^3 (NCDHW like PyTorch Conv3d).
    x = jax.random.normal(k_x, (2, input_nc, 16, 16, 16), jnp.float32)

    fwd = jax.jit(lambda t: nlayer_discriminator_forward(t, params))
    out = jax.block_until_ready(fwd(x))

    # Expected PatchGAN output spatial size from the conv arithmetic.
    dsz = 16
    for p in params:
        dsz = (dsz + 2 * PADW - KSZ) // p["stride"] + 1
    assert out.shape == (2, 1, dsz, dsz, dsz), out.shape
    assert bool(jnp.all(jnp.isfinite(out)))
    print("KERNEL_OK")
</pallas_src>

<mosaic_0001>
module attributes {stable_mosaic.version = 11 : i64} {
  func.func @_mm_bias_act_kernel(%arg0: i32, %arg1: i32, %arg2: i32, %arg3: memref<512x128xbf16, #tpu.memory_space<vmem>>, %arg4: memref<128x128xbf16, #tpu.memory_space<vmem>>, %arg5: memref<1x128xf32, #tpu.memory_space<vmem>>, %arg6: memref<512x128xbf16, #tpu.memory_space<vmem>>, %arg7: memref<512x128xf32, #tpu.memory_space<vmem>>) attributes {dimension_semantics = [#tpu.dimension_semantics<parallel>, #tpu.dimension_semantics<parallel>, #tpu.dimension_semantics<arbitrary>], iteration_bounds = array<i64: 3, 1, 1>, scalar_prefetch = 0 : i64, scratch_operands = 1 : i64, tpu.core_type = #tpu.core_type<tc>, window_params = [{transform_indices = @transform_0, window_bounds = array<i64: 512, 128>}, {transform_indices = @transform_1, window_bounds = array<i64: 128, 128>}, {transform_indices = @transform_2, window_bounds = array<i64: 1, 128>}, {transform_indices = @transform_3, window_bounds = array<i64: 512, 128>}]} {
    %c0_i32 = arith.constant 0 : i32
    %0 = arith.cmpi eq, %arg2, %c0_i32 : i32
    %1 = arith.extui %0 : i1 to i32
    %c0_i32_0 = arith.constant 0 : i32
    %2 = arith.cmpi ne, %1, %c0_i32_0 : i32
    scf.if %2 {
      %cst_10 = arith.constant 0.000000e+00 : f32
      %12 = vector.broadcast %cst_10 : f32 to vector<512x128xf32>
      %c0_11 = arith.constant 0 : index
      %c0_12 = arith.constant 0 : index
      %13 = vector.load %arg7[%c0_11, %c0_12] : memref<512x128xf32, #tpu.memory_space<vmem>>, vector<512x128xf32>
      tpu.vector_store %arg7[%c0_11, %c0_12], %12 {strides = array<i32>} : memref<512x128xf32, #tpu.memory_space<vmem>>, vector<512x128xf32>,
    } else {
    }
    %c0 = arith.constant 0 : index
    %c0_1 = arith.constant 0 : index
    %3 = vector.load %arg7[%c0, %c0_1] : memref<512x128xf32, #tpu.memory_space<vmem>>, vector<512x128xf32>
    %c0_2 = arith.constant 0 : index
    %c0_3 = arith.constant 0 : index
    %4 = vector.load %arg3[%c0_2, %c0_3] : memref<512x128xbf16, #tpu.memory_space<vmem>>, vector<512x128xbf16>
    %c0_4 = arith.constant 0 : index
    %c0_5 = arith.constant 0 : index
    %5 = vector.load %arg4[%c0_4, %c0_5] : memref<128x128xbf16, #tpu.memory_space<vmem>>, vector<128x128xbf16>
    %cst = arith.constant dense<0.000000e+00> : vector<512x128xf32>
    %6 = tpu.matmul %4, %5, %cst {dimension_numbers = #tpu.dot_dimension_numbers<[1], [0], [0], [1], [0, 0, 1, 1], [], []>} : vector<512x128xbf16>, vector<128x128xbf16>, vector<512x128xf32> -> vector<512x128xf32>
    %7 = arith.addf %3, %6 : vector<512x128xf32>
    %c0_6 = arith.constant 0 : index
    %c0_7 = arith.constant 0 : index
    %8 = vector.load %arg7[%c0_6, %c0_7] : memref<512x128xf32, #tpu.memory_space<vmem>>, vector<512x128xf32>
    tpu.vector_store %arg7[%c0_6, %c0_7], %7 {strides = array<i32>} : memref<512x128xf32, #tpu.memory_space<vmem>>, vector<512x128xf32>,
    %c0_i32_8 = arith.constant 0 : i32
    %9 = arith.cmpi eq, %arg2, %c0_i32_8 : i32
    %10 = arith.extui %9 : i1 to i32
    %c0_i32_9 = arith.constant 0 : i32
    %11 = arith.cmpi ne, %10, %c0_i32_9 : i32
    scf.if %11 {
      %c0_10 = arith.constant 0 : index
      %c0_11 = arith.constant 0 : index
      %12 = vector.load %arg7[%c0_10, %c0_11] : memref<512x128xf32, #tpu.memory_space<vmem>>, vector<512x128xf32>
      %c0_12 = arith.constant 0 : index
      %c0_13 = arith.constant 0 : index
      %13 = vector.load %arg5[%c0_12, %c0_13] : memref<1x128xf32, #tpu.memory_space<vmem>>, vector<1x128xf32>
      %14 = vector.broadcast %13 : vector<1x128xf32> to vector<512x128xf32>
      %15 = arith.addf %12, %14 : vector<512x128xf32>
      %c0_14 = arith.constant 0 : index
      %c0_15 = arith.constant 0 : index
      %16 = vector.load %arg7[%c0_14, %c0_15] : memref<512x128xf32, #tpu.memory_space<vmem>>, vector<512x128xf32>
      tpu.vector_store %arg7[%c0_14, %c0_15], %15 {strides = array<i32>} : memref<512x128xf32, #tpu.memory_space<vmem>>, vector<512x128xf32>,
      %c0_16 = arith.constant 0 : index
      %c0_17 = arith.constant 0 : index
      %17 = vector.load %arg7[%c0_16, %c0_17] : memref<512x128xf32, #tpu.memory_space<vmem>>, vector<512x128xf32>
      %cst_18 = arith.constant 0.000000e+00 : f32
      %18 = vector.broadcast %cst_18 : f32 to vector<512x128xf32>
      %19 = arith.cmpf oge, %17, %18 : vector<512x128xf32>
      %cst_19 = arith.constant 2.000000e-01 : f32
      %20 = vector.broadcast %cst_19 : f32 to vector<512x128xf32>
      %21 = arith.mulf %20, %17 : vector<512x128xf32>
      %22 = arith.select %19, %17, %21 : vector<512x128xi1>, vector<512x128xf32>
      %23 = arith.truncf %22 : vector<512x128xf32> to vector<512x128xbf16>
      %c0_20 = arith.constant 0 : index
      %c0_21 = arith.constant 0 : index
      %24 = vector.load %arg6[%c0_20, %c0_21] : memref<512x128xbf16, #tpu.memory_space<vmem>>, vector<512x128xbf16>
      tpu.vector_store %arg6[%c0_20, %c0_21], %23 {strides = array<i32>} : memref<512x128xbf16, #tpu.memory_space<vmem>>, vector<512x128xbf16>,
    } else {
    }
    return
  }
  func.func @transform_0(%arg0: i32, %arg1: i32, %arg2: i32) -> (i32, i32) {
    %c0_i32 = arith.constant 0 : i32
    return %arg0, %arg2 : i32, i32
  }
  func.func @transform_1(%arg0: i32, %arg1: i32, %arg2: i32) -> (i32, i32) {
    %c0_i32 = arith.constant 0 : i32
    return %arg2, %arg1 : i32, i32
  }
  func.func @transform_2(%arg0: i32, %arg1: i32, %arg2: i32) -> (i32, i32) {
    %c0_i32 = arith.constant 0 : i32
    %c0_i32_0 = arith.constant 0 : i32
    return %c0_i32, %arg1 : i32, i32
  }
  func.func @transform_3(%arg0: i32, %arg1: i32, %arg2: i32) -> (i32, i32) {
    %c0_i32 = arith.constant 0 : i32
    return %arg0, %arg1 : i32, i32
  }
}

module attributes {stable_mosaic.version = 11 : i64} {
  func.func @_mm_bias_act_kernel(%arg0: i32, %arg1: i32, %arg2: i32, %arg3: memref<256x512xbf16, #tpu.memory_space<vmem>>, %arg4: memref<512x128xbf16, #tpu.memory_space<vmem>>, %arg5: memref<1x128xf32, #tpu.memory_space<vmem>>, %arg6: memref<256x128xbf16, #tpu.memory_space<vmem>>, %arg7: memref<8x128xf32, #tpu.memory_space<vmem>>, %arg8: memref<8x128xf32, #tpu.memory_space<vmem>>, %arg9: memref<256x128xf32, #tpu.memory_space<vmem>>) attributes {dimension_semantics = [#tpu.dimension_semantics<parallel>, #tpu.dimension_semantics<parallel>, #tpu.dimension_semantics<arbitrary>], iteration_bounds = array<i64: 1, 1, 1>, scalar_prefetch = 0 : i64, scratch_operands = 1 : i64, tpu.core_type = #tpu.core_type<tc>, window_params = [{transform_indices = @transform_0, window_bounds = array<i64: 256, 512>}, {transform_indices = @transform_1, window_bounds = array<i64: 512, 128>}, {transform_indices = @transform_2, window_bounds = array<i64: 1, 128>}, {transform_indices = @transform_3, window_bounds = array<i64: 256, 128>}, {transform_indices = @transform_4, window_bounds = array<i64: 8, 128>}, {transform_indices = @transform_5, window_bounds = array<i64: 8, 128>}]} {
    %c0_i32 = arith.constant 0 : i32
    %0 = arith.cmpi eq, %arg2, %c0_i32 : i32
    %1 = arith.extui %0 : i1 to i32
    %c0_i32_0 = arith.constant 0 : i32
    %2 = arith.cmpi ne, %1, %c0_i32_0 : i32
    scf.if %2 {
      %cst_10 = arith.constant 0.000000e+00 : f32
      %12 = vector.broadcast %cst_10 : f32 to vector<256x128xf32>
      %c0_11 = arith.constant 0 : index
      %c0_12 = arith.constant 0 : index
      %13 = vector.load %arg9[%c0_11, %c0_12] : memref<256x128xf32, #tpu.memory_space<vmem>>, vector<256x128xf32>
      tpu.vector_store %arg9[%c0_11, %c0_12], %12 {strides = array<i32>} : memref<256x128xf32, #tpu.memory_space<vmem>>, vector<256x128xf32>,
    } else {
    }
    %c0 = arith.constant 0 : index
    %c0_1 = arith.constant 0 : index
    %3 = vector.load %arg9[%c0, %c0_1] : memref<256x128xf32, #tpu.memory_space<vmem>>, vector<256x128xf32>
    %c0_2 = arith.constant 0 : index
    %c0_3 = arith.constant 0 : index
    %4 = vector.load %arg3[%c0_2, %c0_3] : memref<256x512xbf16, #tpu.memory_space<vmem>>, vector<256x512xbf16>
    %c0_4 = arith.constant 0 : index
    %c0_5 = arith.constant 0 : index
    %5 = vector.load %arg4[%c0_4, %c0_5] : memref<512x128xbf16, #tpu.memory_space<vmem>>, vector<512x128xbf16>
    %cst = arith.constant dense<0.000000e+00> : vector<256x128xf32>
    %6 = tpu.matmul %4, %5, %cst {dimension_numbers = #tpu.dot_dimension_numbers<[1], [0], [0], [1], [0, 0, 1, 1], [], []>} : vector<256x512xbf16>, vector<512x128xbf16>, vector<256x128xf32> -> vector<256x128xf32>
    %7 = arith.addf %3, %6 : vector<256x128xf32>
    %c0_6 = arith.constant 0 : index
    %c0_7 = arith.constant 0 : index
    %8 = vector.load %arg9[%c0_6, %c0_7] : memref<256x128xf32, #tpu.memory_space<vmem>>, vector<256x128xf32>
    tpu.vector_store %arg9[%c0_6, %c0_7], %7 {strides = array<i32>} : memref<256x128xf32, #tpu.memory_space<vmem>>, vector<256x128xf32>,
    %c0_i32_8 = arith.constant 0 : i32
    %9 = arith.cmpi eq, %arg2, %c0_i32_8 : i32
    %10 = arith.extui %9 : i1 to i32
    %c0_i32_9 = arith.constant 0 : i32
    %11 = arith.cmpi ne, %10, %c0_i32_9 : i32
    scf.if %11 {
      %c0_10 = arith.constant 0 : index
      %c0_11 = arith.constant 0 : index
      %12 = vector.load %arg9[%c0_10, %c0_11] : memref<256x128xf32, #tpu.memory_space<vmem>>, vector<256x128xf32>
      %c0_12 = arith.constant 0 : index
      %c0_13 = arith.constant 0 : index
      %13 = vector.load %arg5[%c0_12, %c0_13] : memref<1x128xf32, #tpu.memory_space<vmem>>, vector<1x128xf32>
      %14 = vector.broadcast %13 : vector<1x128xf32> to vector<256x128xf32>
      %15 = arith.addf %12, %14 : vector<256x128xf32>
      %c0_14 = arith.constant 0 : index
      %c0_15 = arith.constant 0 : index
      %16 = vector.load %arg9[%c0_14, %c0_15] : memref<256x128xf32, #tpu.memory_space<vmem>>, vector<256x128xf32>
      tpu.vector_store %arg9[%c0_14, %c0_15], %15 {strides = array<i32>} : memref<256x128xf32, #tpu.memory_space<vmem>>, vector<256x128xf32>,
      %c0_16 = arith.constant 0 : index
      %c0_17 = arith.constant 0 : index
      %17 = vector.load %arg9[%c0_16, %c0_17] : memref<256x128xf32, #tpu.memory_space<vmem>>, vector<256x128xf32>
      %18 = vector.shape_cast %17 : vector<256x128xf32> to vector<32x8x128xf32>
      %cst_18 = arith.constant dense<0.000000e+00> : vector<8x128xf32>
      %19 = vector.multi_reduction <add>, %18, %cst_18 [0] : vector<32x8x128xf32> to vector<8x128xf32>
      %c0_19 = arith.constant 0 : index
      %c0_20 = arith.constant 0 : index
      %20 = vector.load %arg7[%c0_19, %c0_20] : memref<8x128xf32, #tpu.memory_space<vmem>>, vector<8x128xf32>
      tpu.vector_store %arg7[%c0_19, %c0_20], %19 {strides = array<i32>} : memref<8x128xf32, #tpu.memory_space<vmem>>, vector<8x128xf32>,
      %21 = arith.mulf %18, %18 : vector<32x8x128xf32>
      %cst_21 = arith.constant dense<0.000000e+00> : vector<8x128xf32>
      %22 = vector.multi_reduction <add>, %21, %cst_21 [0] : vector<32x8x128xf32> to vector<8x128xf32>
      %c0_22 = arith.constant 0 : index
      %c0_23 = arith.constant 0 : index
      %23 = vector.load %arg8[%c0_22, %c0_23] : memref<8x128xf32, #tpu.memory_space<vmem>>, vector<8x128xf32>
      tpu.vector_store %arg8[%c0_22, %c0_23], %22 {strides = array<i32>} : memref<8x128xf32, #tpu.memory_space<vmem>>, vector<8x128xf32>,
      %c0_24 = arith.constant 0 : index
      %c0_25 = arith.constant 0 : index
      %24 = vector.load %arg9[%c0_24, %c0_25] : memref<256x128xf32, #tpu.memory_space<vmem>>, vector<256x128xf32>
      %25 = arith.truncf %24 : vector<256x128xf32> to vector<256x128xbf16>
      %c0_26 = arith.constant 0 : index
      %c0_27 = arith.constant 0 : index
      %26 = vector.load %arg6[%c0_26, %c0_27] : memref<256x128xbf16, #tpu.memory_space<vmem>>, vector<256x128xbf16>
      tpu.vector_store %arg6[%c0_26, %c0_27], %25 {strides = array<i32>} : memref<256x128xbf16, #tpu.memory_space<vmem>>, vector<256x128xbf16>,
    } else {
    }
    return
  }
  func.func @transform_0(%arg0: i32, %arg1: i32, %arg2: i32) -> (i32, i32) {
    %c0_i32 = arith.constant 0 : i32
    return %arg0, %arg2 : i32, i32
  }
  func.func @transform_1(%arg0: i32, %arg1: i32, %arg2: i32) -> (i32, i32) {
    %c0_i32 = arith.constant 0 : i32
    return %arg2, %arg1 : i32, i32
  }
  func.func @transform_2(%arg0: i32, %arg1: i32, %arg2: i32) -> (i32, i32) {
    %c0_i32 = arith.constant 0 : i32
    %c0_i32_0 = arith.constant 0 : i32
    return %c0_i32, %arg1 : i32, i32
  }
  func.func @transform_3(%arg0: i32, %arg1: i32, %arg2: i32) -> (i32, i32) {
    %c0_i32 = arith.constant 0 : i32
    return %arg0, %arg1 : i32, i32
  }
  func.func @transform_4(%arg0: i32, %arg1: i32, %arg2: i32) -> (i32, i32) {
    %c0_i32 = arith.constant 0 : i32
    return %arg0, %arg1 : i32, i32
  }
  func.func @transform_5(%arg0: i32, %arg1: i32, %arg2: i32) -> (i32, i32) {
    %c0_i32 = arith.constant 0 : i32
    return %arg0, %arg1 : i32, i32
  }
}

module attributes {stable_mosaic.version = 11 : i64} {
  func.func @_mm_bias_act_kernel(%arg0: i32, %arg1: i32, %arg2: i32, %arg3: memref<56x1024xbf16, #tpu.memory_space<vmem>>, %arg4: memref<1024x128xbf16, #tpu.memory_space<vmem>>, %arg5: memref<1x128xf32, #tpu.memory_space<vmem>>, %arg6: memref<56x128xbf16, #tpu.memory_space<vmem>>, %arg7: memref<8x128xf32, #tpu.memory_space<vmem>>, %arg8: memref<8x128xf32, #tpu.memory_space<vmem>>, %arg9: memref<56x128xf32, #tpu.memory_space<vmem>>) attributes {dimension_semantics = [#tpu.dimension_semantics<parallel>, #tpu.dimension_semantics<parallel>, #tpu.dimension_semantics<arbitrary>], iteration_bounds = array<i64: 1, 1, 1>, scalar_prefetch = 0 : i64, scratch_operands = 1 : i64, tpu.core_type = #tpu.core_type<tc>, window_params = [{transform_indices = @transform_0, window_bounds = array<i64: 56, 1024>}, {transform_indices = @transform_1, window_bounds = array<i64: 1024, 128>}, {transform_indices = @transform_2, window_bounds = array<i64: 1, 128>}, {transform_indices = @transform_3, window_bounds = array<i64: 56, 128>}, {transform_indices = @transform_4, window_bounds = array<i64: 8, 128>}, {transform_indices = @transform_5, window_bounds = array<i64: 8, 128>}]} {
    %c0_i32 = arith.constant 0 : i32
    %0 = arith.cmpi eq, %arg2, %c0_i32 : i32
    %1 = arith.extui %0 : i1 to i32
    %c0_i32_0 = arith.constant 0 : i32
    %2 = arith.cmpi ne, %1, %c0_i32_0 : i32
    scf.if %2 {
      %cst_10 = arith.constant 0.000000e+00 : f32
      %12 = vector.broadcast %cst_10 : f32 to vector<56x128xf32>
      %c0_11 = arith.constant 0 : index
      %c0_12 = arith.constant 0 : index
      %13 = vector.load %arg9[%c0_11, %c0_12] : memref<56x128xf32, #tpu.memory_space<vmem>>, vector<56x128xf32>
      tpu.vector_store %arg9[%c0_11, %c0_12], %12 {strides = array<i32>} : memref<56x128xf32, #tpu.memory_space<vmem>>, vector<56x128xf32>,
    } else {
    }
    %c0 = arith.constant 0 : index
    %c0_1 = arith.constant 0 : index
    %3 = vector.load %arg9[%c0, %c0_1] : memref<56x128xf32, #tpu.memory_space<vmem>>, vector<56x128xf32>
    %c0_2 = arith.constant 0 : index
    %c0_3 = arith.constant 0 : index
    %4 = vector.load %arg3[%c0_2, %c0_3] : memref<56x1024xbf16, #tpu.memory_space<vmem>>, vector<56x1024xbf16>
    %c0_4 = arith.constant 0 : index
    %c0_5 = arith.constant 0 : index
    %5 = vector.load %arg4[%c0_4, %c0_5] : memref<1024x128xbf16, #tpu.memory_space<vmem>>, vector<1024x128xbf16>
    %cst = arith.constant dense<0.000000e+00> : vector<56x128xf32>
    %6 = tpu.matmul %4, %5, %cst {dimension_numbers = #tpu.dot_dimension_numbers<[1], [0], [0], [1], [0, 0, 1, 1], [], []>} : vector<56x1024xbf16>, vector<1024x128xbf16>, vector<56x128xf32> -> vector<56x128xf32>
    %7 = arith.addf %3, %6 : vector<56x128xf32>
    %c0_6 = arith.constant 0 : index
    %c0_7 = arith.constant 0 : index
    %8 = vector.load %arg9[%c0_6, %c0_7] : memref<56x128xf32, #tpu.memory_space<vmem>>, vector<56x128xf32>
    tpu.vector_store %arg9[%c0_6, %c0_7], %7 {strides = array<i32>} : memref<56x128xf32, #tpu.memory_space<vmem>>, vector<56x128xf32>,
    %c0_i32_8 = arith.constant 0 : i32
    %9 = arith.cmpi eq, %arg2, %c0_i32_8 : i32
    %10 = arith.extui %9 : i1 to i32
    %c0_i32_9 = arith.constant 0 : i32
    %11 = arith.cmpi ne, %10, %c0_i32_9 : i32
    scf.if %11 {
      %c0_10 = arith.constant 0 : index
      %c0_11 = arith.constant 0 : index
      %12 = vector.load %arg9[%c0_10, %c0_11] : memref<56x128xf32, #tpu.memory_space<vmem>>, vector<56x128xf32>
      %c0_12 = arith.constant 0 : index
      %c0_13 = arith.constant 0 : index
      %13 = vector.load %arg5[%c0_12, %c0_13] : memref<1x128xf32, #tpu.memory_space<vmem>>, vector<1x128xf32>
      %14 = vector.broadcast %13 : vector<1x128xf32> to vector<56x128xf32>
      %15 = arith.addf %12, %14 : vector<56x128xf32>
      %c0_14 = arith.constant 0 : index
      %c0_15 = arith.constant 0 : index
      %16 = vector.load %arg9[%c0_14, %c0_15] : memref<56x128xf32, #tpu.memory_space<vmem>>, vector<56x128xf32>
      tpu.vector_store %arg9[%c0_14, %c0_15], %15 {strides = array<i32>} : memref<56x128xf32, #tpu.memory_space<vmem>>, vector<56x128xf32>,
      %c0_16 = arith.constant 0 : index
      %c0_17 = arith.constant 0 : index
      %17 = vector.load %arg9[%c0_16, %c0_17] : memref<56x128xf32, #tpu.memory_space<vmem>>, vector<56x128xf32>
      %18 = vector.shape_cast %17 : vector<56x128xf32> to vector<7x8x128xf32>
      %cst_18 = arith.constant dense<0.000000e+00> : vector<8x128xf32>
      %19 = vector.multi_reduction <add>, %18, %cst_18 [0] : vector<7x8x128xf32> to vector<8x128xf32>
      %c0_19 = arith.constant 0 : index
      %c0_20 = arith.constant 0 : index
      %20 = vector.load %arg7[%c0_19, %c0_20] : memref<8x128xf32, #tpu.memory_space<vmem>>, vector<8x128xf32>
      tpu.vector_store %arg7[%c0_19, %c0_20], %19 {strides = array<i32>} : memref<8x128xf32, #tpu.memory_space<vmem>>, vector<8x128xf32>,
      %21 = arith.mulf %18, %18 : vector<7x8x128xf32>
      %cst_21 = arith.constant dense<0.000000e+00> : vector<8x128xf32>
      %22 = vector.multi_reduction <add>, %21, %cst_21 [0] : vector<7x8x128xf32> to vector<8x128xf32>
      %c0_22 = arith.constant 0 : index
      %c0_23 = arith.constant 0 : index
      %23 = vector.load %arg8[%c0_22, %c0_23] : memref<8x128xf32, #tpu.memory_space<vmem>>, vector<8x128xf32>
      tpu.vector_store %arg8[%c0_22, %c0_23], %22 {strides = array<i32>} : memref<8x128xf32, #tpu.memory_space<vmem>>, vector<8x128xf32>,
      %c0_24 = arith.constant 0 : index
      %c0_25 = arith.constant 0 : index
      %24 = vector.load %arg9[%c0_24, %c0_25] : memref<56x128xf32, #tpu.memory_space<vmem>>, vector<56x128xf32>
      %25 = arith.truncf %24 : vector<56x128xf32> to vector<56x128xbf16>
      %c0_26 = arith.constant 0 : index
      %c0_27 = arith.constant 0 : index
      %26 = vector.load %arg6[%c0_26, %c0_27] : memref<56x128xbf16, #tpu.memory_space<vmem>>, vector<56x128xbf16>
      tpu.vector_store %arg6[%c0_26, %c0_27], %25 {strides = array<i32>} : memref<56x128xbf16, #tpu.memory_space<vmem>>, vector<56x128xbf16>,
    } else {
    }
    return
  }
  func.func @transform_0(%arg0: i32, %arg1: i32, %arg2: i32) -> (i32, i32) {
    %c0_i32 = arith.constant 0 : i32
    return %arg0, %arg2 : i32, i32
  }
  func.func @transform_1(%arg0: i32, %arg1: i32, %arg2: i32) -> (i32, i32) {
    %c0_i32 = arith.constant 0 : i32
    return %arg2, %arg1 : i32, i32
  }
  func.func @transform_2(%arg0: i32, %arg1: i32, %arg2: i32) -> (i32, i32) {
    %c0_i32 = arith.constant 0 : i32
    %c0_i32_0 = arith.constant 0 : i32
    return %c0_i32, %arg1 : i32, i32
  }
  func.func @transform_3(%arg0: i32, %arg1: i32, %arg2: i32) -> (i32, i32) {
    %c0_i32 = arith.constant 0 : i32
    return %arg0, %arg1 : i32, i32
  }
  func.func @transform_4(%arg0: i32, %arg1: i32, %arg2: i32) -> (i32, i32) {
    %c0_i32 = arith.constant 0 : i32
    return %arg0, %arg1 : i32, i32
  }
  func.func @transform_5(%arg0: i32, %arg1: i32, %arg2: i32) -> (i32, i32) {
    %c0_i32 = arith.constant 0 : i32
    return %arg0, %arg1 : i32, i32
  }
}

module attributes {stable_mosaic.version = 11 : i64} {
  func.func @_mm_bias_act_kernel(%arg0: i32, %arg1: i32, %arg2: i32, %arg3: memref<128x2048xbf16, #tpu.memory_space<vmem>>, %arg4: memref<2048x128xbf16, #tpu.memory_space<vmem>>, %arg5: memref<1x128xf32, #tpu.memory_space<vmem>>, %arg6: memref<128x128xbf16, #tpu.memory_space<vmem>>, %arg7: memref<8x128xf32, #tpu.memory_space<vmem>>, %arg8: memref<8x128xf32, #tpu.memory_space<vmem>>, %arg9: memref<128x128xf32, #tpu.memory_space<vmem>>) attributes {dimension_semantics = [#tpu.dimension_semantics<parallel>, #tpu.dimension_semantics<parallel>, #tpu.dimension_semantics<arbitrary>], iteration_bounds = array<i64: 1, 1, 1>, scalar_prefetch = 0 : i64, scratch_operands = 1 : i64, tpu.core_type = #tpu.core_type<tc>, window_params = [{transform_indices = @transform_0, window_bounds = array<i64: 128, 2048>}, {transform_indices = @transform_1, window_bounds = array<i64: 2048, 128>}, {transform_indices = @transform_2, window_bounds = array<i64: 1, 128>}, {transform_indices = @transform_3, window_bounds = array<i64: 128, 128>}, {transform_indices = @transform_4, window_bounds = array<i64: 8, 128>}, {transform_indices = @transform_5, window_bounds = array<i64: 8, 128>}]} {
    %c0_i32 = arith.constant 0 : i32
    %0 = arith.cmpi eq, %arg2, %c0_i32 : i32
    %1 = arith.extui %0 : i1 to i32
    %c0_i32_0 = arith.constant 0 : i32
    %2 = arith.cmpi ne, %1, %c0_i32_0 : i32
    scf.if %2 {
      %cst_10 = arith.constant 0.000000e+00 : f32
      %12 = vector.broadcast %cst_10 : f32 to vector<128x128xf32>
      %c0_11 = arith.constant 0 : index
      %c0_12 = arith.constant 0 : index
      %13 = vector.load %arg9[%c0_11, %c0_12] : memref<128x128xf32, #tpu.memory_space<vmem>>, vector<128x128xf32>
      tpu.vector_store %arg9[%c0_11, %c0_12], %12 {strides = array<i32>} : memref<128x128xf32, #tpu.memory_space<vmem>>, vector<128x128xf32>,
    } else {
    }
    %c0 = arith.constant 0 : index
    %c0_1 = arith.constant 0 : index
    %3 = vector.load %arg9[%c0, %c0_1] : memref<128x128xf32, #tpu.memory_space<vmem>>, vector<128x128xf32>
    %c0_2 = arith.constant 0 : index
    %c0_3 = arith.constant 0 : index
    %4 = vector.load %arg3[%c0_2, %c0_3] : memref<128x2048xbf16, #tpu.memory_space<vmem>>, vector<128x2048xbf16>
    %c0_4 = arith.constant 0 : index
    %c0_5 = arith.constant 0 : index
    %5 = vector.load %arg4[%c0_4, %c0_5] : memref<2048x128xbf16, #tpu.memory_space<vmem>>, vector<2048x128xbf16>
    %cst = arith.constant dense<0.000000e+00> : vector<128x128xf32>
    %6 = tpu.matmul %4, %5, %cst {dimension_numbers = #tpu.dot_dimension_numbers<[1], [0], [0], [1], [0, 0, 1, 1], [], []>} : vector<128x2048xbf16>, vector<2048x128xbf16>, vector<128x128xf32> -> vector<128x128xf32>
    %7 = arith.addf %3, %6 : vector<128x128xf32>
    %c0_6 = arith.constant 0 : index
    %c0_7 = arith.constant 0 : index
    %8 = vector.load %arg9[%c0_6, %c0_7] : memref<128x128xf32, #tpu.memory_space<vmem>>, vector<128x128xf32>
    tpu.vector_store %arg9[%c0_6, %c0_7], %7 {strides = array<i32>} : memref<128x128xf32, #tpu.memory_space<vmem>>, vector<128x128xf32>,
    %c0_i32_8 = arith.constant 0 : i32
    %9 = arith.cmpi eq, %arg2, %c0_i32_8 : i32
    %10 = arith.extui %9 : i1 to i32
    %c0_i32_9 = arith.constant 0 : i32
    %11 = arith.cmpi ne, %10, %c0_i32_9 : i32
    scf.if %11 {
      %c0_10 = arith.constant 0 : index
      %c0_11 = arith.constant 0 : index
      %12 = vector.load %arg9[%c0_10, %c0_11] : memref<128x128xf32, #tpu.memory_space<vmem>>, vector<128x128xf32>
      %c0_12 = arith.constant 0 : index
      %c0_13 = arith.constant 0 : index
      %13 = vector.load %arg5[%c0_12, %c0_13] : memref<1x128xf32, #tpu.memory_space<vmem>>, vector<1x128xf32>
      %14 = vector.broadcast %13 : vector<1x128xf32> to vector<128x128xf32>
      %15 = arith.addf %12, %14 : vector<128x128xf32>
      %c0_14 = arith.constant 0 : index
      %c0_15 = arith.constant 0 : index
      %16 = vector.load %arg9[%c0_14, %c0_15] : memref<128x128xf32, #tpu.memory_space<vmem>>, vector<128x128xf32>
      tpu.vector_store %arg9[%c0_14, %c0_15], %15 {strides = array<i32>} : memref<128x128xf32, #tpu.memory_space<vmem>>, vector<128x128xf32>,
      %c0_16 = arith.constant 0 : index
      %c0_17 = arith.constant 0 : index
      %17 = vector.load %arg9[%c0_16, %c0_17] : memref<128x128xf32, #tpu.memory_space<vmem>>, vector<128x128xf32>
      %18 = vector.shape_cast %17 : vector<128x128xf32> to vector<16x8x128xf32>
      %cst_18 = arith.constant dense<0.000000e+00> : vector<8x128xf32>
      %19 = vector.multi_reduction <add>, %18, %cst_18 [0] : vector<16x8x128xf32> to vector<8x128xf32>
      %c0_19 = arith.constant 0 : index
      %c0_20 = arith.constant 0 : index
      %20 = vector.load %arg7[%c0_19, %c0_20] : memref<8x128xf32, #tpu.memory_space<vmem>>, vector<8x128xf32>
      tpu.vector_store %arg7[%c0_19, %c0_20], %19 {strides = array<i32>} : memref<8x128xf32, #tpu.memory_space<vmem>>, vector<8x128xf32>,
      %21 = arith.mulf %18, %18 : vector<16x8x128xf32>
      %cst_21 = arith.constant dense<0.000000e+00> : vector<8x128xf32>
      %22 = vector.multi_reduction <add>, %21, %cst_21 [0] : vector<16x8x128xf32> to vector<8x128xf32>
      %c0_22 = arith.constant 0 : index
      %c0_23 = arith.constant 0 : index
      %23 = vector.load %arg8[%c0_22, %c0_23] : memref<8x128xf32, #tpu.memory_space<vmem>>, vector<8x128xf32>
      tpu.vector_store %arg8[%c0_22, %c0_23], %22 {strides = array<i32>} : memref<8x128xf32, #tpu.memory_space<vmem>>, vector<8x128xf32>,
      %c0_24 = arith.constant 0 : index
      %c0_25 = arith.constant 0 : index
      %24 = vector.load %arg9[%c0_24, %c0_25] : memref<128x128xf32, #tpu.memory_space<vmem>>, vector<128x128xf32>
      %25 = arith.truncf %24 : vector<128x128xf32> to vector<128x128xbf16>
      %c0_26 = arith.constant 0 : index
      %c0_27 = arith.constant 0 : index
      %26 = vector.load %arg6[%c0_26, %c0_27] : memref<128x128xbf16, #tpu.memory_space<vmem>>, vector<128x128xbf16>
      tpu.vector_store %arg6[%c0_26, %c0_27], %25 {strides = array<i32>} : memref<128x128xbf16, #tpu.memory_space<vmem>>, vector<128x128xbf16>,
    } else {
    }
    return
  }
  func.func @transform_0(%arg0: i32, %arg1: i32, %arg2: i32) -> (i32, i32) {
    %c0_i32 = arith.constant 0 : i32
    return %arg0, %arg2 : i32, i32
  }
  func.func @transform_1(%arg0: i32, %arg1: i32, %arg2: i32) -> (i32, i32) {
    %c0_i32 = arith.constant 0 : i32
    return %arg2, %arg1 : i32, i32
  }
  func.func @transform_2(%arg0: i32, %arg1: i32, %arg2: i32) -> (i32, i32) {
    %c0_i32 = arith.constant 0 : i32
    %c0_i32_0 = arith.constant 0 : i32
    return %c0_i32, %arg1 : i32, i32
  }
  func.func @transform_3(%arg0: i32, %arg1: i32, %arg2: i32) -> (i32, i32) {
    %c0_i32 = arith.constant 0 : i32
    return %arg0, %arg1 : i32, i32
  }
  func.func @transform_4(%arg0: i32, %arg1: i32, %arg2: i32) -> (i32, i32) {
    %c0_i32 = arith.constant 0 : i32
    return %arg0, %arg1 : i32, i32
  }
  func.func @transform_5(%arg0: i32, %arg1: i32, %arg2: i32) -> (i32, i32) {
    %c0_i32 = arith.constant 0 : i32
    return %arg0, %arg1 : i32, i32
  }
}

module attributes {stable_mosaic.version = 11 : i64} {
  func.func @_mm_bias_act_kernel(%arg0: i32, %arg1: i32, %arg2: i32, %arg3: memref<256x2048xbf16, #tpu.memory_space<vmem>>, %arg4: memref<2048x128xbf16, #tpu.memory_space<vmem>>, %arg5: memref<1x128xf32, #tpu.memory_space<vmem>>, %arg6: memref<256x128xf32, #tpu.memory_space<vmem>>, %arg7: memref<256x128xf32, #tpu.memory_space<vmem>>) attributes {dimension_semantics = [#tpu.dimension_semantics<parallel>, #tpu.dimension_semantics<parallel>, #tpu.dimension_semantics<arbitrary>], iteration_bounds = array<i64: 1, 1, 2>, scalar_prefetch = 0 : i64, scratch_operands = 1 : i64, tpu.core_type = #tpu.core_type<tc>, window_params = [{transform_indices = @transform_0, window_bounds = array<i64: 256, 2048>}, {transform_indices = @transform_1, window_bounds = array<i64: 2048, 128>}, {transform_indices = @transform_2, window_bounds = array<i64: 1, 128>}, {transform_indices = @transform_3, window_bounds = array<i64: 256, 128>}]} {
    %c0_i32 = arith.constant 0 : i32
    %0 = arith.cmpi eq, %arg2, %c0_i32 : i32
    %1 = arith.extui %0 : i1 to i32
    %c0_i32_0 = arith.constant 0 : i32
    %2 = arith.cmpi ne, %1, %c0_i32_0 : i32
    scf.if %2 {
      %cst_9 = arith.constant 0.000000e+00 : f32
      %12 = vector.broadcast %cst_9 : f32 to vector<256x128xf32>
      %c0_10 = arith.constant 0 : index
      %c0_11 = arith.constant 0 : index
      %13 = vector.load %arg7[%c0_10, %c0_11] : memref<256x128xf32, #tpu.memory_space<vmem>>, vector<256x128xf32>
      tpu.vector_store %arg7[%c0_10, %c0_11], %12 {strides = array<i32>} : memref<256x128xf32, #tpu.memory_space<vmem>>, vector<256x128xf32>,
    } else {
    }
    %c0 = arith.constant 0 : index
    %c0_1 = arith.constant 0 : index
    %3 = vector.load %arg7[%c0, %c0_1] : memref<256x128xf32, #tpu.memory_space<vmem>>, vector<256x128xf32>
    %c0_2 = arith.constant 0 : index
    %c0_3 = arith.constant 0 : index
    %4 = vector.load %arg3[%c0_2, %c0_3] : memref<256x2048xbf16, #tpu.memory_space<vmem>>, vector<256x2048xbf16>
    %c0_4 = arith.constant 0 : index
    %c0_5 = arith.constant 0 : index
    %5 = vector.load %arg4[%c0_4, %c0_5] : memref<2048x128xbf16, #tpu.memory_space<vmem>>, vector<2048x128xbf16>
    %cst = arith.constant dense<0.000000e+00> : vector<256x128xf32>
    %6 = tpu.matmul %4, %5, %cst {dimension_numbers = #tpu.dot_dimension_numbers<[1], [0], [0], [1], [0, 0, 1, 1], [], []>} : vector<256x2048xbf16>, vector<2048x128xbf16>, vector<256x128xf32> -> vector<256x128xf32>
    %7 = arith.addf %3, %6 : vector<256x128xf32>
    %c0_6 = arith.constant 0 : index
    %c0_7 = arith.constant 0 : index
    %8 = vector.load %arg7[%c0_6, %c0_7] : memref<256x128xf32, #tpu.memory_space<vmem>>, vector<256x128xf32>
    tpu.vector_store %arg7[%c0_6, %c0_7], %7 {strides = array<i32>} : memref<256x128xf32, #tpu.memory_space<vmem>>, vector<256x128xf32>,
    %c1_i32 = arith.constant 1 : i32
    %9 = arith.cmpi eq, %arg2, %c1_i32 : i32
    %10 = arith.extui %9 : i1 to i32
    %c0_i32_8 = arith.constant 0 : i32
    %11 = arith.cmpi ne, %10, %c0_i32_8 : i32
    scf.if %11 {
      %c0_9 = arith.constant 0 : index
      %c0_10 = arith.constant 0 : index
      %12 = vector.load %arg7[%c0_9, %c0_10] : memref<256x128xf32, #tpu.memory_space<vmem>>, vector<256x128xf32>
      %c0_11 = arith.constant 0 : index
      %c0_12 = arith.constant 0 : index
      %13 = vector.load %arg5[%c0_11, %c0_12] : memref<1x128xf32, #tpu.memory_space<vmem>>, vector<1x128xf32>
      %14 = vector.broadcast %13 : vector<1x128xf32> to vector<256x128xf32>
      %15 = arith.addf %12, %14 : vector<256x128xf32>
      %c0_13 = arith.constant 0 : index
      %c0_14 = arith.constant 0 : index
      %16 = vector.load %arg7[%c0_13, %c0_14] : memref<256x128xf32, #tpu.memory_space<vmem>>, vector<256x128xf32>
      tpu.vector_store %arg7[%c0_13, %c0_14], %15 {strides = array<i32>} : memref<256x128xf32, #tpu.memory_space<vmem>>, vector<256x128xf32>,
      %c0_15 = arith.constant 0 : index
      %c0_16 = arith.constant 0 : index
      %17 = vector.load %arg7[%c0_15, %c0_16] : memref<256x128xf32, #tpu.memory_space<vmem>>, vector<256x128xf32>
      %c0_17 = arith.constant 0 : index
      %c0_18 = arith.constant 0 : index
      %18 = vector.load %arg6[%c0_17, %c0_18] : memref<256x128xf32, #tpu.memory_space<vmem>>, vector<256x128xf32>
      tpu.vector_store %arg6[%c0_17, %c0_18], %17 {strides = array<i32>} : memref<256x128xf32, #tpu.memory_space<vmem>>, vector<256x128xf32>,
    } else {
    }
    return
  }
  func.func @transform_0(%arg0: i32, %arg1: i32, %arg2: i32) -> (i32, i32) {
    %c0_i32 = arith.constant 0 : i32
    return %arg0, %arg2 : i32, i32
  }
  func.func @transform_1(%arg0: i32, %arg1: i32, %arg2: i32) -> (i32, i32) {
    %c0_i32 = arith.constant 0 : i32
    return %arg2, %arg1 : i32, i32
  }
  func.func @transform_2(%arg0: i32, %arg1: i32, %arg2: i32) -> (i32, i32) {
    %c0_i32 = arith.constant 0 : i32
    %c0_i32_0 = arith.constant 0 : i32
    return %c0_i32, %arg1 : i32, i32
  }
  func.func @transform_3(%arg0: i32, %arg1: i32, %arg2: i32) -> (i32, i32) {
    %c0_i32 = arith.constant 0 : i32
    return %arg0, %arg1 : i32, i32
  }
}

</mosaic_0001>

<bundles_post_ra>
// kernel: _lambda_.5
= control target key start
LH: loop header
LB: loop body
LE: loop exit
PB: predicated region body
PF: predicated region fallthrough
CT: control target
= control target key end

     0   :  { %s2199_s12 = smov 0   ;;  %s2201_s13 = smov 0   ;;  %s2403_s0 = inlined_call_operand.vmem [shape: bf16[1536,128], index: 0, kind: input, shape index: {}]   ;;  %s2404_s1 = inlined_call_operand.vmem [shape: bf16[128,128], index: 1, kind: input, shape index: {}]   ;;  %s2405_s2 = inlined_call_operand.vmem [shape: f32[1,128], index: 2, kind: input, shape index: {}]   ;;  %s2406_s3 = inlined_call_operand.vmem [shape: bf16[1536,128], index: 3, kind: output, shape index: {}]  }
   0x1   :  { %s2203_s14 = smov 0  }
   0x2 LB: > { %s32_s15 = sadd.s32 1, %s2173_s13  ;;  %p1708_p0 = scmp.ge.s32.totalorder %s2177_s14, 1  ;;  %s2177_s14 = sphi %s2203_s14, %s13_s14   ;;  %s2173_s13 = sphi %s2201_s13, %s2408_s13   ;;  %s2169_s12 = sphi %s2199_s12, %s2407_s12  }
   0x3   : > { %p34_p1 = scmp.ge.s32.totalorder %s32_s15, 3  ;;  %p188_p2 = scmp.lt.s32.totalorder %s2177_s14, 4 }
   0x5   : > { %s2410_s15 = smov (%p34_p1, %s32_s15), 0  ;;  %p189_p3 = pnand %p1708_p0, %p188_p2 }
   0x6   : > { %s1709_s24 = sshll.u32 (!%p189_p3), %s2169_s12, 6 }
   0x7   : > { %192 = sbr.rel (%p189_p3) target bundleno = 306 (0x132), region = 32  ;;  %p230_p4 = scmp.lt.s32.totalorder (!%p189_p3), %s1709_s24, 191 }
   0xc   : > { %v1914_v0 = vld [vmem:[%s2404_s1 + $0x38] sm:$0xff]  ;;  %v1913_v1 = vld [vmem:[%s2404_s1 + $0x30] sm:$0xff]  ;;  %v1912_v2 = vld [vmem:[%s2404_s1 + $0x28] sm:$0xff]  ;;  %s2412_s24 = smov (!%p230_p4, %s1709_s24), 191 }
   0xd   : > { %711 = vmatpush.bf16.msra.mxu0 %v1914_v0  ;;  %2106 = vmatpush.bf16.msra.mxu1 %v1914_v0  ;;  %v1911_v3 = vld [vmem:[%s2404_s1 + $0x20] sm:$0xff]  ;;  %v1910_v4 = vld [vmem:[%s2404_s1 + $0x18] sm:$0xff]  ;;  %v1909_v5 = vld [vmem:[%s2404_s1 + $0x10] sm:$0xff]  ;;  %s1710_s4 = sshll.u32 %s2412_s24, 2 }
   0xe   : > { %2107 = vmatpush.bf16.msra.mxu2 %v1914_v0  ;;  %2108 = vmatpush.bf16.msra.mxu3 %v1914_v0  ;;  %v1908_v6 = vld [vmem:[%s2404_s1 + $0x8] sm:$0xff]  ;;  %v1907_v7 = vld [vmem:[%s2404_s1] sm:$0xff]  ;;  %s2252_s9 = scalar_lea.vmem %s2403_s0, %s1710_s4  ;;  %s2302_s17 = scalar_lea.vmem %s2406_s3, %s1710_s4 }
   0xf   : > { %v1875_v8 = vld [vmem:[%s2252_s9] sm:$0xff]  ;;  %v1876_v12 = vld [vmem:[%s2252_s9 + $0x8] sm:$0xff]  ;;  %v1877_v16 = vld [vmem:[%s2252_s9 + $0x10] sm:$0xff] }
  0x10   : > { %v1883_v9 = vld [vmem:[%s2252_s9 + $0x40] sm:$0xff]  ;;  %v1884_v13 = vld [vmem:[%s2252_s9 + $0x48] sm:$0xff]  ;;  %v1885_v17 = vld [vmem:[%s2252_s9 + $0x50] sm:$0xff] }
  0x11   : > { %712 = vmatpush.bf16.msra.mxu0 %v1913_v1  ;;  %2109 = vmatpush.bf16.msra.mxu1 %v1913_v1  ;;  %v1891_v10 = vld [vmem:[%s2252_s9 + $0x80] sm:$0xff]  ;;  %v1892_v14 = vld [vmem:[%s2252_s9 + $0x88] sm:$0xff]  ;;  %v1893_v18 = vld [vmem:[%s2252_s9 + $0x90] sm:$0xff] }
  0x12   : > { %2110 = vmatpush.bf16.msra.mxu2 %v1913_v1  ;;  %2111 = vmatpush.bf16.msra.mxu3 %v1913_v1  ;;  %v1899_v11 = vld [vmem:[%s2252_s9 + $0xc0] sm:$0xff]  ;;  %v1900_v15 = vld [vmem:[%s2252_s9 + $0xc8] sm:$0xff]  ;;  %v1901_v19 = vld [vmem:[%s2252_s9 + $0xd0] sm:$0xff] }
  0x13   : > { %v1878_v20 = vld [vmem:[%s2252_s9 + $0x18] sm:$0xff]  ;;  %v1879_v24 = vld [vmem:[%s2252_s9 + $0x20] sm:$0xff]  ;;  %v1880_v28 = vld [vmem:[%s2252_s9 + $0x28] sm:$0xff] }
  0x14   : > { %v1886_v21 = vld [vmem:[%s2252_s9 + $0x58] sm:$0xff]  ;;  %v1887_v25 = vld [vmem:[%s2252_s9 + $0x60] sm:$0xff]  ;;  %v1888_v29 = vld [vmem:[%s2252_s9 + $0x68] sm:$0xff] }
  0x15   : > { %713 = vmatpush.bf16.msra.mxu0 %v1912_v2  ;;  %2112 = vmatpush.bf16.msra.mxu1 %v1912_v2  ;;  %v1894_v22 = vld [vmem:[%s2252_s9 + $0x98] sm:$0xff]  ;;  %v1895_v26 = vld [vmem:[%s2252_s9 + $0xa0] sm:$0xff]  ;;  %v1896_v30 = vld [vmem:[%s2252_s9 + $0xa8] sm:$0xff] }
  0x16   : > { %2113 = vmatpush.bf16.msra.mxu2 %v1912_v2  ;;  %2114 = vmatpush.bf16.msra.mxu3 %v1912_v2  ;;  %v1902_v23 = vld [vmem:[%s2252_s9 + $0xd8] sm:$0xff]  ;;  %v1903_v27 = vld [vmem:[%s2252_s9 + $0xe0] sm:$0xff]  ;;  %v1904_v31 = vld [vmem:[%s2252_s9 + $0xe8] sm:$0xff] }
  0x17   : > { %v1881_v32 = vld [vmem:[%s2252_s9 + $0x30] sm:$0xff]  ;;  %v1882_v36 = vld [vmem:[%s2252_s9 + $0x38] sm:$0xff]  ;;  %v2289_v42 = vld [vmem:[%s2405_s2] ss:$0 sm:$0xff] }
  0x18   : > { %v1889_v33 = vld [vmem:[%s2252_s9 + $0x70] sm:$0xff]  ;;  %v1890_v37 = vld [vmem:[%s2252_s9 + $0x78] sm:$0xff] }
  0x19   : > { %714 = vmatpush.bf16.msra.mxu0 %v1911_v3  ;;  %2115 = vmatpush.bf16.msra.mxu1 %v1911_v3  ;;  %v1897_v34 = vld [vmem:[%s2252_s9 + $0xb0] sm:$0xff]  ;;  %v1898_v38 = vld [vmem:[%s2252_s9 + $0xb8] sm:$0xff] }
  0x1a   : > { %2116 = vmatpush.bf16.msra.mxu2 %v1911_v3  ;;  %2117 = vmatpush.bf16.msra.mxu3 %v1911_v3  ;;  %v1905_v35 = vld [vmem:[%s2252_s9 + $0xf0] sm:$0xff]  ;;  %v1906_v39 = vld [vmem:[%s2252_s9 + $0xf8] sm:$0xff] }
  0x1d   : > { %715 = vmatpush.bf16.msra.mxu0 %v1910_v4  ;;  %2118 = vmatpush.bf16.msra.mxu1 %v1910_v4 }
  0x1e   : > { %2119 = vmatpush.bf16.msra.mxu2 %v1910_v4  ;;  %2120 = vmatpush.bf16.msra.mxu3 %v1910_v4 }
  0x21   : > { %716 = vmatpush.bf16.msra.mxu0 %v1909_v5  ;;  %2121 = vmatpush.bf16.msra.mxu1 %v1909_v5 }
  0x22   : > { %2122 = vmatpush.bf16.msra.mxu2 %v1909_v5  ;;  %2123 = vmatpush.bf16.msra.mxu3 %v1909_v5 }
  0x25   : > { %717 = vmatpush.bf16.msra.mxu0 %v1908_v6  ;;  %2124 = vmatpush.bf16.msra.mxu1 %v1908_v6 }
  0x26   : > { %2125 = vmatpush.bf16.msra.mxu2 %v1908_v6  ;;  %2126 = vmatpush.bf16.msra.mxu3 %v1908_v6 }
  0x29   : > { %718 = vmatpush.bf16.msra.mxu0 %v1907_v7  ;;  %2127 = vmatpush.bf16.msra.mxu1 %v1907_v7 }
  0x2a   : > { %2128 = vmatpush.bf16.msra.mxu2 %v1907_v7  ;;  %2129 = vmatpush.bf16.msra.mxu3 %v1907_v7 }
  0x2c   : > { %719 = vmatmul.bf16.vlgmr.msra.gmra.mxu0 %v1875_v8  ;;  %759 = vmatmul.bf16.vlgmr.msra.gmra.mxu1 %v1883_v9 }
  0x2d   : > { %799 = vmatmul.bf16.vlgmr.msra.gmra.mxu2 %v1891_v10  ;;  %839 = vmatmul.bf16.vlgmr.msra.gmra.mxu3 %v1899_v11 }
  0x3c   : > { %724 = vmatmul.bf16.gmra.mxu0 %v1876_v12  ;;  %764 = vmatmul.bf16.gmra.mxu1 %v1884_v13 }
  0x3d   : > { %804 = vmatmul.bf16.gmra.mxu2 %v1892_v14  ;;  %844 = vmatmul.bf16.gmra.mxu3 %v1900_v15 }
  0x4c   : > { %729 = vmatmul.bf16.gmra.mxu0 %v1877_v16  ;;  %769 = vmatmul.bf16.gmra.mxu1 %v1885_v17 }
  0x4d   : > { %809 = vmatmul.bf16.gmra.mxu2 %v1893_v18  ;;  %849 = vmatmul.bf16.gmra.mxu3 %v1901_v19 }
  0x5c   : > { %734 = vmatmul.bf16.gmra.mxu0 %v1878_v20  ;;  %774 = vmatmul.bf16.gmra.mxu1 %v1886_v21 }
  0x5d   : > { %814 = vmatmul.bf16.gmra.mxu2 %v1894_v22  ;;  %854 = vmatmul.bf16.gmra.mxu3 %v1902_v23 }
  0x6c   : > { %739 = vmatmul.bf16.gmra.mxu0 %v1879_v24  ;;  %779 = vmatmul.bf16.gmra.mxu1 %v1887_v25 }
  0x6d   : > { %819 = vmatmul.bf16.gmra.mxu2 %v1895_v26  ;;  %859 = vmatmul.bf16.gmra.mxu3 %v1903_v27 }
  0x7c   : > { %744 = vmatmul.bf16.gmra.mxu0 %v1880_v28  ;;  %784 = vmatmul.bf16.gmra.mxu1 %v1888_v29 }
  0x7d   : > { %824 = vmatmul.bf16.gmra.mxu2 %v1896_v30  ;;  %864 = vmatmul.bf16.gmra.mxu3 %v1904_v31 }
  0x8c   : > { %749 = vmatmul.bf16.gmra.mxu0 %v1881_v32  ;;  %789 = vmatmul.bf16.gmra.mxu1 %v1889_v33 }
  0x8d   : > { %829 = vmatmul.bf16.gmra.mxu2 %v1897_v34  ;;  %869 = vmatmul.bf16.gmra.mxu3 %v1905_v35 }
  0x9c   : > { %754 = vmatmul.bf16.gmra.mxu0 %v1882_v36  ;;  %794 = vmatmul.bf16.gmra.mxu1 %v1890_v37 }
  0x9d   : > { %834 = vmatmul.bf16.gmra.mxu2 %v1898_v38  ;;  %874 = vmatmul.bf16.gmra.mxu3 %v1906_v39 }
  0xa9   : > { %v720_v40 = vpop.f32.mrf.mxu0  ;;  %v760_v41 = vpop.f32.mrf.mxu1 }
  0xaa   : > { %v1079_v43 = vadd.f32 %v2289_v42, %v720_v40  ;;  %v1095_v44 = vadd.f32 %v2289_v42, %v760_v41 }
  0xac   : > { %v1335_v49 = vmul.f32 0.2, %v1079_v43  ;;  %v1351_v50 = vmul.f32 0.2, %v1095_v44  ;;  %vm1271_vm0 = vcmp.ge.f32.partialorder %v1079_v43, 0.0  ;;  %vm1287_vm1 = vcmp.ge.f32.partialorder %v1095_v44, 0.0 }
  0xae   : > { %v1399_v57 = vsel %vm1271_vm0, %v1079_v43, %v1335_v49  ;;  %v1415_v58 = vsel %vm1287_vm1, %v1095_v44, %v1351_v50 }
  0xb0   : > { %v800_v45 = vpop.f32.mrf.mxu2  ;;  %v840_v46 = vpop.f32.mrf.mxu3 }
  0xb1   : > { %v722_v47 = vpop.f32.mrf.mxu0  ;;  %v762_v48 = vpop.f32.mrf.mxu1  ;;  %v1111_v55 = vadd.f32 %v2289_v42, %v800_v45  ;;  %v1127_v56 = vadd.f32 %v2289_v42, %v840_v46 }
  0xb2   : > { %v1080_v51 = vadd.f32 %v2289_v42, %v722_v47  ;;  %v1096_v52 = vadd.f32 %v2289_v42, %v762_v48 }
  0xb3   : > { %v1367_v1 = vmul.f32 0.2, %v1111_v55  ;;  %v1383_v2 = vmul.f32 0.2, %v1127_v56  ;;  %vm1303_vm4 = vcmp.ge.f32.partialorder %v1111_v55, 0.0  ;;  %vm1319_vm5 = vcmp.ge.f32.partialorder %v1127_v56, 0.0 }
  0xb4   : > { %vm1272_vm2 = vcmp.ge.f32.partialorder %v1080_v51, 0.0  ;;  %v1336_v53 = vmul.f32 0.2, %v1080_v51  ;;  %vm1288_vm3 = vcmp.ge.f32.partialorder %v1096_v52, 0.0  ;;  %v1352_v54 = vmul.f32 0.2, %v1096_v52 }
  0xb5   : > { %v1431_v9 = vsel %vm1303_vm4, %v1111_v55, %v1367_v1  ;;  %v1447_v10 = vsel %vm1319_vm5, %v1127_v56, %v1383_v2 }
  0xb6   : > { %v1400_v59 = vsel %vm1272_vm2, %v1080_v51, %v1336_v53  ;;  %v1416_v60 = vsel %vm1288_vm3, %v1096_v52, %v1352_v54 }
  0xb7   : > { %v1918_v61 = vpack.c.bf16 %v1400_v59, %v1399_v57  ;;  %v1958_v62 = vpack.c.bf16 %v1416_v60, %v1415_v58 }
  0xb8   : > { %v802_v63 = vpop.f32.mrf.mxu2  ;;  %v842_v0 = vpop.f32.mrf.mxu3 }
  0xb9   : > { %1919 = vst [vmem:[%s2302_s17] sm:$0xff] %v1918_v61   ;;  %v1112_v3 = vadd.f32 %v2289_v42, %v802_v63  ;;  %v1128_v4 = vadd.f32 %v2289_v42, %v842_v0  ;;  %v725_v5 = vpop.f32.mrf.mxu0  ;;  %v765_v6 = vpop.f32.mrf.mxu1 }
  0xba   : > { %2082 = vst [vmem:[%s2302_s17 + $0x40] sm:$0xff] %v1958_v62   ;;  %v1081_v15 = vadd.f32 %v2289_v42, %v725_v5  ;;  %v1097_v16 = vadd.f32 %v2289_v42, %v765_v6 }
  0xbb   : > { %vm1304_vm6 = vcmp.ge.f32.partialorder %v1112_v3, 0.0  ;;  %v1368_v7 = vmul.f32 0.2, %v1112_v3  ;;  %vm1320_vm7 = vcmp.ge.f32.partialorder %v1128_v4, 0.0  ;;  %v1384_v8 = vmul.f32 0.2, %v1128_v4 }
  0xbc   : > { %v1337_v21 = vmul.f32 0.2, %v1081_v15  ;;  %v1353_v22 = vmul.f32 0.2, %v1097_v16  ;;  %vm1273_vm8 = vcmp.ge.f32.partialorder %v1081_v15, 0.0  ;;  %vm1289_vm9 = vcmp.ge.f32.partialorder %v1097_v16, 0.0 }
  0xbd   : > { %v1432_v11 = vsel %vm1304_vm6, %v1112_v3, %v1368_v7  ;;  %v1448_v12 = vsel %vm1320_vm7, %v1128_v4, %v1384_v8 }
  0xbe   : > { %v1998_v13 = vpack.c.bf16 %v1432_v11, %v1431_v9  ;;  %v2038_v14 = vpack.c.bf16 %v1448_v12, %v1447_v10  ;;  %v1401_v29 = vsel %vm1273_vm8, %v1081_v15, %v1337_v21  ;;  %v1417_v30 = vsel %vm1289_vm9, %v1097_v16, %v1353_v22 }
  0xc0   : > { %2090 = vst [vmem:[%s2302_s17 + $0x80] sm:$0xff] %v1998_v13   ;;  %v805_v17 = vpop.f32.mrf.mxu2  ;;  %v845_v18 = vpop.f32.mrf.mxu3 }
  0xc1   : > { %2098 = vst [vmem:[%s2302_s17 + $0xc0] sm:$0xff] %v2038_v14   ;;  %v727_v19 = vpop.f32.mrf.mxu0  ;;  %v767_v20 = vpop.f32.mrf.mxu1  ;;  %v1113_v27 = vadd.f32 %v2289_v42, %v805_v17  ;;  %v1129_v28 = vadd.f32 %v2289_v42, %v845_v18 }
  0xc2   : > { %v1082_v23 = vadd.f32 %v2289_v42, %v727_v19  ;;  %v1098_v24 = vadd.f32 %v2289_v42, %v767_v20 }
  0xc3   : > { %v1369_v37 = vmul.f32 0.2, %v1113_v27  ;;  %v1385_v38 = vmul.f32 0.2, %v1129_v28  ;;  %vm1305_vm12 = vcmp.ge.f32.partialorder %v1113_v27, 0.0  ;;  %vm1321_vm13 = vcmp.ge.f32.partialorder %v1129_v28, 0.0 }
  0xc4   : > { %vm1274_vm10 = vcmp.ge.f32.partialorder %v1082_v23, 0.0  ;;  %v1338_v25 = vmul.f32 0.2, %v1082_v23  ;;  %vm1290_vm11 = vcmp.ge.f32.partialorder %v1098_v24, 0.0  ;;  %v1354_v26 = vmul.f32 0.2, %v1098_v24 }
  0xc5   : > { %v1433_v46 = vsel %vm1305_vm12, %v1113_v27, %v1369_v37  ;;  %v1449_v47 = vsel %vm1321_vm13, %v1129_v28, %v1385_v38 }
  0xc6   : > { %v1402_v31 = vsel %vm1274_vm10, %v1082_v23, %v1338_v25  ;;  %v1418_v32 = vsel %vm1290_vm11, %v1098_v24, %v1354_v26 }
  0xc7   : > { %v1923_v33 = vpack.c.bf16 %v1402_v31, %v1401_v29  ;;  %v1963_v34 = vpack.c.bf16 %v1418_v32, %v1417_v30 }
  0xc8   : > { %v807_v35 = vpop.f32.mrf.mxu2  ;;  %v847_v36 = vpop.f32.mrf.mxu3 }
  0xc9   : > { %2075 = vst [vmem:[%s2302_s17 + $0x8] sm:$0xff] %v1923_v33   ;;  %v1114_v39 = vadd.f32 %v2289_v42, %v807_v35  ;;  %v1130_v40 = vadd.f32 %v2289_v42, %v847_v36  ;;  %v730_v41 = vpop.f32.mrf.mxu0  ;;  %v770_v43 = vpop.f32.mrf.mxu1 }
  0xca   : > { %2083 = vst [vmem:[%s2302_s17 + $0x48] sm:$0xff] %v1963_v34   ;;  %v1083_v52 = vadd.f32 %v2289_v42, %v730_v41  ;;  %v1099_v53 = vadd.f32 %v2289_v42, %v770_v43 }
  0xcb   : > { %vm1306_vm14 = vcmp.ge.f32.partialorder %v1114_v39, 0.0  ;;  %v1370_v44 = vmul.f32 0.2, %v1114_v39  ;;  %vm1322_vm15 = vcmp.ge.f32.partialorder %v1130_v40, 0.0  ;;  %v1386_v45 = vmul.f32 0.2, %v1130_v40 }
  0xcc   : > { %v1339_v58 = vmul.f32 0.2, %v1083_v52  ;;  %v1355_v59 = vmul.f32 0.2, %v1099_v53  ;;  %vm1275_vm0 = vcmp.ge.f32.partialorder %v1083_v52, 0.0  ;;  %vm1291_vm1 = vcmp.ge.f32.partialorder %v1099_v53, 0.0 }
  0xcd   : > { %v1434_v48 = vsel %vm1306_vm14, %v1114_v39, %v1370_v44  ;;  %v1450_v49 = vsel %vm1322_vm15, %v1130_v40, %v1386_v45 }
  0xce   : > { %v2003_v50 = vpack.c.bf16 %v1434_v48, %v1433_v46  ;;  %v2043_v51 = vpack.c.bf16 %v1450_v49, %v1449_v47  ;;  %v1403_v2 = vsel %vm1275_vm0, %v1083_v52, %v1339_v58  ;;  %v1419_v3 = vsel %vm1291_vm1, %v1099_v53, %v1355_v59 }
  0xd0   : > { %2091 = vst [vmem:[%s2302_s17 + $0x88] sm:$0xff] %v2003_v50   ;;  %v810_v54 = vpop.f32.mrf.mxu2  ;;  %v850_v55 = vpop.f32.mrf.mxu3 }
  0xd1   : > { %2099 = vst [vmem:[%s2302_s17 + $0xc8] sm:$0xff] %v2043_v51   ;;  %v732_v56 = vpop.f32.mrf.mxu0  ;;  %v772_v57 = vpop.f32.mrf.mxu1  ;;  %v1115_v0 = vadd.f32 %v2289_v42, %v810_v54  ;;  %v1131_v1 = vadd.f32 %v2289_v42, %v850_v55 }
  0xd2   : > { %v1084_v60 = vadd.f32 %v2289_v42, %v732_v56  ;;  %v1100_v61 = vadd.f32 %v2289_v42, %v772_v57 }
  0xd3   : > { %v1371_v10 = vmul.f32 0.2, %v1115_v0  ;;  %v1387_v11 = vmul.f32 0.2, %v1131_v1  ;;  %vm1307_vm4 = vcmp.ge.f32.partialorder %v1115_v0, 0.0  ;;  %vm1323_vm5 = vcmp.ge.f32.partialorder %v1131_v1, 0.0 }
  0xd4   : > { %vm1276_vm2 = vcmp.ge.f32.partialorder %v1084_v60, 0.0  ;;  %v1340_v62 = vmul.f32 0.2, %v1084_v60  ;;  %vm1292_vm3 = vcmp.ge.f32.partialorder %v1100_v61, 0.0  ;;  %v1356_v63 = vmul.f32 0.2, %v1100_v61 }
  0xd5   : > { %v1435_v18 = vsel %vm1307_vm4, %v1115_v0, %v1371_v10  ;;  %v1451_v19 = vsel %vm1323_vm5, %v1131_v1, %v1387_v11 }
  0xd6   : > { %v1404_v4 = vsel %vm1276_vm2, %v1084_v60, %v1340_v62  ;;  %v1420_v5 = vsel %vm1292_vm3, %v1100_v61, %v1356_v63 }
  0xd7   : > { %v1928_v6 = vpack.c.bf16 %v1404_v4, %v1403_v2  ;;  %v1968_v7 = vpack.c.bf16 %v1420_v5, %v1419_v3 }
  0xd8   : > { %v812_v8 = vpop.f32.mrf.mxu2  ;;  %v852_v9 = vpop.f32.mrf.mxu3 }
  0xd9   : > { %2076 = vst [vmem:[%s2302_s17 + $0x10] sm:$0xff] %v1928_v6   ;;  %v1116_v12 = vadd.f32 %v2289_v42, %v812_v8  ;;  %v1132_v13 = vadd.f32 %v2289_v42, %v852_v9  ;;  %v735_v14 = vpop.f32.mrf.mxu0  ;;  %v775_v15 = vpop.f32.mrf.mxu1 }
  0xda   : > { %2084 = vst [vmem:[%s2302_s17 + $0x50] sm:$0xff] %v1968_v7   ;;  %v1085_v24 = vadd.f32 %v2289_v42, %v735_v14  ;;  %v1101_v25 = vadd.f32 %v2289_v42, %v775_v15 }
  0xdb   : > { %vm1308_vm6 = vcmp.ge.f32.partialorder %v1116_v12, 0.0  ;;  %v1372_v16 = vmul.f32 0.2, %v1116_v12  ;;  %vm1324_vm7 = vcmp.ge.f32.partialorder %v1132_v13, 0.0  ;;  %v1388_v17 = vmul.f32 0.2, %v1132_v13 }
  0xdc   : > { %v1341_v30 = vmul.f32 0.2, %v1085_v24  ;;  %v1357_v31 = vmul.f32 0.2, %v1101_v25  ;;  %vm1277_vm8 = vcmp.ge.f32.partialorder %v1085_v24, 0.0  ;;  %vm1293_vm9 = vcmp.ge.f32.partialorder %v1101_v25, 0.0 }
  0xdd   : > { %v1436_v20 = vsel %vm1308_vm6, %v1116_v12, %v1372_v16  ;;  %v1452_v21 = vsel %vm1324_vm7, %v1132_v13, %v1388_v17 }
  0xde   : > { %v2008_v22 = vpack.c.bf16 %v1436_v20, %v1435_v18  ;;  %v2048_v23 = vpack.c.bf16 %v1452_v21, %v1451_v19  ;;  %v1405_v38 = vsel %vm1277_vm8, %v1085_v24, %v1341_v30  ;;  %v1421_v39 = vsel %vm1293_vm9, %v1101_v25, %v1357_v31 }
  0xe0   : > { %2092 = vst [vmem:[%s2302_s17 + $0x90] sm:$0xff] %v2008_v22   ;;  %v815_v26 = vpop.f32.mrf.mxu2  ;;  %v855_v27 = vpop.f32.mrf.mxu3 }
  0xe1   : > { %2100 = vst [vmem:[%s2302_s17 + $0xd0] sm:$0xff] %v2048_v23   ;;  %v737_v28 = vpop.f32.mrf.mxu0  ;;  %v777_v29 = vpop.f32.mrf.mxu1  ;;  %v1117_v36 = vadd.f32 %v2289_v42, %v815_v26  ;;  %v1133_v37 = vadd.f32 %v2289_v42, %v855_v27 }
  0xe2   : > { %v1086_v32 = vadd.f32 %v2289_v42, %v737_v28  ;;  %v1102_v33 = vadd.f32 %v2289_v42, %v777_v29 }
  0xe3   : > { %v1373_v47 = vmul.f32 0.2, %v1117_v36  ;;  %v1389_v48 = vmul.f32 0.2, %v1133_v37  ;;  %vm1309_vm12 = vcmp.ge.f32.partialorder %v1117_v36, 0.0  ;;  %vm1325_vm13 = vcmp.ge.f32.partialorder %v1133_v37, 0.0 }
  0xe4   : > { %vm1278_vm10 = vcmp.ge.f32.partialorder %v1086_v32, 0.0  ;;  %v1342_v34 = vmul.f32 0.2, %v1086_v32  ;;  %vm1294_vm11 = vcmp.ge.f32.partialorder %v1102_v33, 0.0  ;;  %v1358_v35 = vmul.f32 0.2, %v1102_v33 }
  0xe5   : > { %v1437_v55 = vsel %vm1309_vm12, %v1117_v36, %v1373_v47  ;;  %v1453_v56 = vsel %vm1325_vm13, %v1133_v37, %v1389_v48 }
  0xe6   : > { %v1406_v40 = vsel %vm1278_vm10, %v1086_v32, %v1342_v34  ;;  %v1422_v41 = vsel %vm1294_vm11, %v1102_v33, %v1358_v35 }
  0xe7   : > { %v1933_v43 = vpack.c.bf16 %v1406_v40, %v1405_v38  ;;  %v1973_v44 = vpack.c.bf16 %v1422_v41, %v1421_v39 }
  0xe8   : > { %v817_v45 = vpop.f32.mrf.mxu2  ;;  %v857_v46 = vpop.f32.mrf.mxu3 }
  0xe9   : > { %2077 = vst [vmem:[%s2302_s17 + $0x18] sm:$0xff] %v1933_v43   ;;  %v1118_v49 = vadd.f32 %v2289_v42, %v817_v45  ;;  %v1134_v50 = vadd.f32 %v2289_v42, %v857_v46  ;;  %v740_v51 = vpop.f32.mrf.mxu0  ;;  %v780_v52 = vpop.f32.mrf.mxu1 }
  0xea   : > { %2085 = vst [vmem:[%s2302_s17 + $0x58] sm:$0xff] %v1973_v44   ;;  %v1087_v61 = vadd.f32 %v2289_v42, %v740_v51  ;;  %v1103_v62 = vadd.f32 %v2289_v42, %v780_v52 }
  0xeb   : > { %vm1310_vm14 = vcmp.ge.f32.partialorder %v1118_v49, 0.0  ;;  %v1374_v53 = vmul.f32 0.2, %v1118_v49  ;;  %vm1326_vm15 = vcmp.ge.f32.partialorder %v1134_v50, 0.0  ;;  %v1390_v54 = vmul.f32 0.2, %v1134_v50 }
  0xec   : > { %v1343_v3 = vmul.f32 0.2, %v1087_v61  ;;  %v1359_v4 = vmul.f32 0.2, %v1103_v62  ;;  %vm1279_vm0 = vcmp.ge.f32.partialorder %v1087_v61, 0.0  ;;  %vm1295_vm1 = vcmp.ge.f32.partialorder %v1103_v62, 0.0 }
  0xed   : > { %v1438_v57 = vsel %vm1310_vm14, %v1118_v49, %v1374_v53  ;;  %v1454_v58 = vsel %vm1326_vm15, %v1134_v50, %v1390_v54 }
  0xee   : > { %v2013_v59 = vpack.c.bf16 %v1438_v57, %v1437_v55  ;;  %v2053_v60 = vpack.c.bf16 %v1454_v58, %v1453_v56  ;;  %v1407_v11 = vsel %vm1279_vm0, %v1087_v61, %v1343_v3  ;;  %v1423_v12 = vsel %vm1295_vm1, %v1103_v62, %v1359_v4 }
  0xf0   : > { %2093 = vst [vmem:[%s2302_s17 + $0x98] sm:$0xff] %v2013_v59   ;;  %v820_v63 = vpop.f32.mrf.mxu2  ;;  %v860_v0 = vpop.f32.mrf.mxu3 }
  0xf1   : > { %2101 = vst [vmem:[%s2302_s17 + $0xd8] sm:$0xff] %v2053_v60   ;;  %v742_v1 = vpop.f32.mrf.mxu0  ;;  %v782_v2 = vpop.f32.mrf.mxu1  ;;  %v1119_v9 = vadd.f32 %v2289_v42, %v820_v63  ;;  %v1135_v10 = vadd.f32 %v2289_v42, %v860_v0 }
  0xf2   : > { %v1088_v5 = vadd.f32 %v2289_v42, %v742_v1  ;;  %v1104_v6 = vadd.f32 %v2289_v42, %v782_v2 }
  0xf3   : > { %v1375_v19 = vmul.f32 0.2, %v1119_v9  ;;  %v1391_v20 = vmul.f32 0.2, %v1135_v10  ;;  %vm1311_vm4 = vcmp.ge.f32.partialorder %v1119_v9, 0.0  ;;  %vm1327_vm5 = vcmp.ge.f32.partialorder %v1135_v10, 0.0 }
  0xf4   : > { %vm1280_vm2 = vcmp.ge.f32.partialorder %v1088_v5, 0.0  ;;  %v1344_v7 = vmul.f32 0.2, %v1088_v5  ;;  %vm1296_vm3 = vcmp.ge.f32.partialorder %v1104_v6, 0.0  ;;  %v1360_v8 = vmul.f32 0.2, %v1104_v6 }
  0xf5   : > { %v1439_v27 = vsel %vm1311_vm4, %v1119_v9, %v1375_v19  ;;  %v1455_v28 = vsel %vm1327_vm5, %v1135_v10, %v1391_v20 }
  0xf6   : > { %v1408_v13 = vsel %vm1280_vm2, %v1088_v5, %v1344_v7  ;;  %v1424_v14 = vsel %vm1296_vm3, %v1104_v6, %v1360_v8 }
  0xf7   : > { %v1938_v15 = vpack.c.bf16 %v1408_v13, %v1407_v11  ;;  %v1978_v16 = vpack.c.bf16 %v1424_v14, %v1423_v12 }
  0xf8   : > { %v822_v17 = vpop.f32.mrf.mxu2  ;;  %v862_v18 = vpop.f32.mrf.mxu3 }
  0xf9   : > { %2078 = vst [vmem:[%s2302_s17 + $0x20] sm:$0xff] %v1938_v15   ;;  %v1120_v21 = vadd.f32 %v2289_v42, %v822_v17  ;;  %v1136_v22 = vadd.f32 %v2289_v42, %v862_v18  ;;  %v745_v23 = vpop.f32.mrf.mxu0  ;;  %v785_v24 = vpop.f32.mrf.mxu1 }
  0xfa   : > { %2086 = vst [vmem:[%s2302_s17 + $0x60] sm:$0xff] %v1978_v16   ;;  %v1089_v33 = vadd.f32 %v2289_v42, %v745_v23  ;;  %v1105_v34 = vadd.f32 %v2289_v42, %v785_v24 }
  0xfb   : > { %vm1312_vm6 = vcmp.ge.f32.partialorder %v1120_v21, 0.0  ;;  %v1376_v25 = vmul.f32 0.2, %v1120_v21  ;;  %vm1328_vm7 = vcmp.ge.f32.partialorder %v1136_v22, 0.0  ;;  %v1392_v26 = vmul.f32 0.2, %v1136_v22 }
  0xfc   : > { %v1345_v39 = vmul.f32 0.2, %v1089_v33  ;;  %v1361_v40 = vmul.f32 0.2, %v1105_v34  ;;  %vm1281_vm8 = vcmp.ge.f32.partialorder %v1089_v33, 0.0  ;;  %vm1297_vm9 = vcmp.ge.f32.partialorder %v1105_v34, 0.0 }
  0xfd   : > { %v1440_v29 = vsel %vm1312_vm6, %v1120_v21, %v1376_v25  ;;  %v1456_v30 = vsel %vm1328_vm7, %v1136_v22, %v1392_v26 }
  0xfe   : > { %v2018_v31 = vpack.c.bf16 %v1440_v29, %v1439_v27  ;;  %v2058_v32 = vpack.c.bf16 %v1456_v30, %v1455_v28  ;;  %v1409_v48 = vsel %vm1281_vm8, %v1089_v33, %v1345_v39  ;;  %v1425_v49 = vsel %vm1297_vm9, %v1105_v34, %v1361_v40 }
 0x100   : > { %2094 = vst [vmem:[%s2302_s17 + $0xa0] sm:$0xff] %v2018_v31   ;;  %v825_v35 = vpop.f32.mrf.mxu2  ;;  %v865_v36 = vpop.f32.mrf.mxu3 }
 0x101   : > { %2102 = vst [vmem:[%s2302_s17 + $0xe0] sm:$0xff] %v2058_v32   ;;  %v747_v37 = vpop.f32.mrf.mxu0  ;;  %v787_v38 = vpop.f32.mrf.mxu1  ;;  %v1121_v46 = vadd.f32 %v2289_v42, %v825_v35  ;;  %v1137_v47 = vadd.f32 %v2289_v42, %v865_v36 }
 0x102   : > { %v1090_v41 = vadd.f32 %v2289_v42, %v747_v37  ;;  %v1106_v43 = vadd.f32 %v2289_v42, %v787_v38 }
 0x103   : > { %v1377_v56 = vmul.f32 0.2, %v1121_v46  ;;  %v1393_v57 = vmul.f32 0.2, %v1137_v47  ;;  %vm1313_vm12 = vcmp.ge.f32.partialorder %v1121_v46, 0.0  ;;  %vm1329_vm13 = vcmp.ge.f32.partialorder %v1137_v47, 0.0 }
 0x104   : > { %vm1282_vm10 = vcmp.ge.f32.partialorder %v1090_v41, 0.0  ;;  %v1346_v44 = vmul.f32 0.2, %v1090_v41  ;;  %vm1298_vm11 = vcmp.ge.f32.partialorder %v1106_v43, 0.0  ;;  %v1362_v45 = vmul.f32 0.2, %v1106_v43 }
 0x105   : > { %v1441_v0 = vsel %vm1313_vm12, %v1121_v46, %v1377_v56  ;;  %v1457_v1 = vsel %vm1329_vm13, %v1137_v47, %v1393_v57 }
 0x106   : > { %v1410_v50 = vsel %vm1282_vm10, %v1090_v41, %v1346_v44  ;;  %v1426_v51 = vsel %vm1298_vm11, %v1106_v43, %v1362_v45 }
 0x107   : > { %v1943_v52 = vpack.c.bf16 %v1410_v50, %v1409_v48  ;;  %v1983_v53 = vpack.c.bf16 %v1426_v51, %v1425_v49 }
 0x108   : > { %v827_v54 = vpop.f32.mrf.mxu2  ;;  %v867_v55 = vpop.f32.mrf.mxu3 }
 0x109   : > { %2079 = vst [vmem:[%s2302_s17 + $0x28] sm:$0xff] %v1943_v52   ;;  %v1122_v58 = vadd.f32 %v2289_v42, %v827_v54  ;;  %v1138_v59 = vadd.f32 %v2289_v42, %v867_v55  ;;  %v750_v60 = vpop.f32.mrf.mxu0  ;;  %v790_v61 = vpop.f32.mrf.mxu1 }
 0x10a   : > { %2087 = vst [vmem:[%s2302_s17 + $0x68] sm:$0xff] %v1983_v53   ;;  %v1091_v6 = vadd.f32 %v2289_v42, %v750_v60  ;;  %v1107_v7 = vadd.f32 %v2289_v42, %v790_v61 }
 0x10b   : > { %vm1314_vm14 = vcmp.ge.f32.partialorder %v1122_v58, 0.0  ;;  %v1378_v62 = vmul.f32 0.2, %v1122_v58  ;;  %vm1330_vm15 = vcmp.ge.f32.partialorder %v1138_v59, 0.0  ;;  %v1394_v63 = vmul.f32 0.2, %v1138_v59 }
 0x10c   : > { %v1347_v12 = vmul.f32 0.2, %v1091_v6  ;;  %v1363_v13 = vmul.f32 0.2, %v1107_v7  ;;  %vm1283_vm0 = vcmp.ge.f32.partialorder %v1091_v6, 0.0  ;;  %vm1299_vm1 = vcmp.ge.f32.partialorder %v1107_v7, 0.0 }
 0x10d   : > { %v1442_v2 = vsel %vm1314_vm14, %v1122_v58, %v1378_v62  ;;  %v1458_v3 = vsel %vm1330_vm15, %v1138_v59, %v1394_v63 }
 0x10e   : > { %v2023_v4 = vpack.c.bf16 %v1442_v2, %v1441_v0  ;;  %v2063_v5 = vpack.c.bf16 %v1458_v3, %v1457_v1  ;;  %v1411_v20 = vsel %vm1283_vm0, %v1091_v6, %v1347_v12  ;;  %v1427_v21 = vsel %vm1299_vm1, %v1107_v7, %v1363_v13 }
 0x110   : > { %2095 = vst [vmem:[%s2302_s17 + $0xa8] sm:$0xff] %v2023_v4   ;;  %v830_v8 = vpop.f32.mrf.mxu2  ;;  %v870_v9 = vpop.f32.mrf.mxu3 }
 0x111   : > { %2103 = vst [vmem:[%s2302_s17 + $0xe8] sm:$0xff] %v2063_v5   ;;  %v752_v10 = vpop.f32.mrf.mxu0  ;;  %v792_v11 = vpop.f32.mrf.mxu1  ;;  %v1123_v18 = vadd.f32 %v2289_v42, %v830_v8  ;;  %v1139_v19 = vadd.f32 %v2289_v42, %v870_v9 }
 0x112   : > { %v1092_v14 = vadd.f32 %v2289_v42, %v752_v10  ;;  %v1108_v15 = vadd.f32 %v2289_v42, %v792_v11 }
 0x113   : > { %v1379_v28 = vmul.f32 0.2, %v1123_v18  ;;  %v1395_v29 = vmul.f32 0.2, %v1139_v19  ;;  %vm1315_vm4 = vcmp.ge.f32.partialorder %v1123_v18, 0.0  ;;  %vm1331_vm5 = vcmp.ge.f32.partialorder %v1139_v19, 0.0 }
 0x114   : > { %vm1284_vm2 = vcmp.ge.f32.partialorder %v1092_v14, 0.0  ;;  %v1348_v16 = vmul.f32 0.2, %v1092_v14  ;;  %vm1300_vm3 = vcmp.ge.f32.partialorder %v1108_v15, 0.0  ;;  %v1364_v17 = vmul.f32 0.2, %v1108_v15 }
 0x115   : > { %v1443_v36 = vsel %vm1315_vm4, %v1123_v18, %v1379_v28  ;;  %v1459_v37 = vsel %vm1331_vm5, %v1139_v19, %v1395_v29 }
 0x116   : > { %v1412_v22 = vsel %vm1284_vm2, %v1092_v14, %v1348_v16  ;;  %v1428_v23 = vsel %vm1300_vm3, %v1108_v15, %v1364_v17 }
 0x117   : > { %v1948_v24 = vpack.c.bf16 %v1412_v22, %v1411_v20  ;;  %v1988_v25 = vpack.c.bf16 %v1428_v23, %v1427_v21 }
 0x118   : > { %v832_v26 = vpop.f32.mrf.mxu2  ;;  %v872_v27 = vpop.f32.mrf.mxu3 }
 0x119   : > { %2080 = vst [vmem:[%s2302_s17 + $0x30] sm:$0xff] %v1948_v24   ;;  %v1124_v30 = vadd.f32 %v2289_v42, %v832_v26  ;;  %v1140_v31 = vadd.f32 %v2289_v42, %v872_v27  ;;  %v755_v32 = vpop.f32.mrf.mxu0  ;;  %v795_v33 = vpop.f32.mrf.mxu1 }
 0x11a   : > { %2088 = vst [vmem:[%s2302_s17 + $0x70] sm:$0xff] %v1988_v25   ;;  %v1093_v43 = vadd.f32 %v2289_v42, %v755_v32  ;;  %v1109_v44 = vadd.f32 %v2289_v42, %v795_v33 }
 0x11b   : > { %vm1316_vm6 = vcmp.ge.f32.partialorder %v1124_v30, 0.0  ;;  %v1380_v34 = vmul.f32 0.2, %v1124_v30  ;;  %vm1332_vm7 = vcmp.ge.f32.partialorder %v1140_v31, 0.0  ;;  %v1396_v35 = vmul.f32 0.2, %v1140_v31 }
 0x11c   : > { %v1349_v49 = vmul.f32 0.2, %v1093_v43  ;;  %v1365_v50 = vmul.f32 0.2, %v1109_v44  ;;  %vm1285_vm8 = vcmp.ge.f32.partialorder %v1093_v43, 0.0  ;;  %vm1301_vm9 = vcmp.ge.f32.partialorder %v1109_v44, 0.0 }
 0x11d   : > { %v1444_v38 = vsel %vm1316_vm6, %v1124_v30, %v1380_v34  ;;  %v1460_v39 = vsel %vm1332_vm7, %v1140_v31, %v1396_v35 }
 0x11e   : > { %v2028_v40 = vpack.c.bf16 %v1444_v38, %v1443_v36  ;;  %v2068_v41 = vpack.c.bf16 %v1460_v39, %v1459_v37  ;;  %v1413_v57 = vsel %vm1285_vm8, %v1093_v43, %v1349_v49  ;;  %v1429_v58 = vsel %vm1301_vm9, %v1109_v44, %v1365_v50 }
 0x120   : > { %2096 = vst [vmem:[%s2302_s17 + $0xb0] sm:$0xff] %v2028_v40   ;;  %v835_v45 = vpop.f32.mrf.mxu2  ;;  %v875_v46 = vpop.f32.mrf.mxu3 }
 0x121   : > { %2104 = vst [vmem:[%s2302_s17 + $0xf0] sm:$0xff] %v2068_v41   ;;  %v757_v47 = vpop.f32.mrf.mxu0  ;;  %v797_v48 = vpop.f32.mrf.mxu1  ;;  %v1125_v55 = vadd.f32 %v2289_v42, %v835_v45  ;;  %v1141_v56 = vadd.f32 %v2289_v42, %v875_v46 }
 0x122   : > { %v1094_v51 = vadd.f32 %v2289_v42, %v757_v47  ;;  %v1110_v52 = vadd.f32 %v2289_v42, %v797_v48 }
 0x123   : > { %v1381_v1 = vmul.f32 0.2, %v1125_v55  ;;  %v1397_v2 = vmul.f32 0.2, %v1141_v56  ;;  %vm1317_vm12 = vcmp.ge.f32.partialorder %v1125_v55, 0.0  ;;  %vm1333_vm13 = vcmp.ge.f32.partialorder %v1141_v56, 0.0 }
 0x124   : > { %vm1286_vm10 = vcmp.ge.f32.partialorder %v1094_v51, 0.0  ;;  %v1350_v53 = vmul.f32 0.2, %v1094_v51  ;;  %vm1302_vm11 = vcmp.ge.f32.partialorder %v1110_v52, 0.0  ;;  %v1366_v54 = vmul.f32 0.2, %v1110_v52 }
 0x125   : > { %v1445_v7 = vsel %vm1317_vm12, %v1125_v55, %v1381_v1  ;;  %v1461_v8 = vsel %vm1333_vm13, %v1141_v56, %v1397_v2 }
 0x126   : > { %v1414_v59 = vsel %vm1286_vm10, %v1094_v51, %v1350_v53  ;;  %v1430_v60 = vsel %vm1302_vm11, %v1110_v52, %v1366_v54 }
 0x127   : > { %v1953_v61 = vpack.c.bf16 %v1414_v59, %v1413_v57  ;;  %v1993_v62 = vpack.c.bf16 %v1430_v60, %v1429_v58 }
 0x128   : > { %v837_v63 = vpop.f32.mrf.mxu2  ;;  %v877_v0 = vpop.f32.mrf.mxu3 }
 0x129   : > { %2081 = vst [vmem:[%s2302_s17 + $0x38] sm:$0xff] %v1953_v61   ;;  %v1126_v3 = vadd.f32 %v2289_v42, %v837_v63  ;;  %v1142_v4 = vadd.f32 %v2289_v42, %v877_v0 }
 0x12a   : > { %2089 = vst [vmem:[%s2302_s17 + $0x78] sm:$0xff] %v1993_v62  }
 0x12b   : > { %vm1318_vm14 = vcmp.ge.f32.partialorder %v1126_v3, 0.0  ;;  %v1382_v5 = vmul.f32 0.2, %v1126_v3  ;;  %vm1334_vm15 = vcmp.ge.f32.partialorder %v1142_v4, 0.0  ;;  %v1398_v6 = vmul.f32 0.2, %v1142_v4 }
 0x12d   : > { %v1446_v9 = vsel %vm1318_vm14, %v1126_v3, %v1382_v5  ;;  %v1462_v10 = vsel %vm1334_vm15, %v1142_v4, %v1398_v6 }
 0x12e   : > { %v2033_v11 = vpack.c.bf16 %v1446_v9, %v1445_v7  ;;  %v2073_v12 = vpack.c.bf16 %v1462_v10, %v1461_v8 }
 0x130   : > { %2097 = vst [vmem:[%s2302_s17 + $0xb8] sm:$0xff] %v2033_v11  }
 0x131   : > { %2105 = vst [vmem:[%s2302_s17 + $0xf8] sm:$0xff] %v2073_v12  }
 0x132 PF: > { %s13_s14 = sadd.s32 1, %s2177_s14   ;;  %s2407_s12 = smov %s2173_s13 }
 0x133   : > { %p10_p5 = scmp.ge.s32.totalorder %s13_s14, 5   ;;  %s2408_s13 = smov %s2410_s15 }
 0x135   :  { %12 = sbr.rel (!%p10_p5) target bundleno = 2 (0x2), region = 76 }

// kernel: _lambda_.6
= control target key start
LH: loop header
LB: loop body
LE: loop exit
PB: predicated region body
PF: predicated region fallthrough
CT: control target
= control target key end

     0   :  { %s2685_s1 = inlined_call_operand.vmem [shape: bf16[512,128], index: 1, kind: input, shape index: {}]   ;;  %s2686_s0 = inlined_call_operand.vmem [shape: bf16[256,512], index: 0, kind: input, shape index: {}]   ;;  %s2687_s2 = inlined_call_operand.vmem [shape: f32[1,128], index: 2, kind: input, shape index: {}]   ;;  %s2688_s3 = inlined_call_operand.vmem [shape: bf16[256,128], index: 3, kind: output, shape index: {0}]   ;;  %s2689_s4 = inlined_call_operand.vmem [shape: f32[8,128], index: 4, kind: output, shape index: {1}]   ;;  %s2690_s5 = inlined_call_operand.vmem [shape: f32[8,128], index: 5, kind: output, shape index: {2}]  }
   0x1   :  { %v1939_v0 = vld [vmem:[%s2685_s1 + $0x38] sm:$0xff]  ;;  %v1938_v4 = vld [vmem:[%s2685_s1 + $0x30] sm:$0xff]  ;;  %v1937_v8 = vld [vmem:[%s2685_s1 + $0x28] sm:$0xff] }
   0x2   :  { %v1947_v1 = vld [vmem:[%s2685_s1 + $0x78] sm:$0xff]  ;;  %725 = vmatpush.bf16.msra.mxu0 %v1939_v0  ;;  %v1946_v5 = vld [vmem:[%s2685_s1 + $0x70] sm:$0xff]  ;;  %v1945_v9 = vld [vmem:[%s2685_s1 + $0x68] sm:$0xff] }
   0x3   :  { %v1955_v2 = vld [vmem:[%s2685_s1 + $0xb8] sm:$0xff]  ;;  %814 = vmatpush.bf16.msra.mxu1 %v1947_v1  ;;  %v1954_v6 = vld [vmem:[%s2685_s1 + $0xb0] sm:$0xff]  ;;  %v1953_v10 = vld [vmem:[%s2685_s1 + $0xa8] sm:$0xff] }
   0x4   :  { %v1963_v3 = vld [vmem:[%s2685_s1 + $0xf8] sm:$0xff]  ;;  %903 = vmatpush.bf16.msra.mxu2 %v1955_v2  ;;  %v1962_v7 = vld [vmem:[%s2685_s1 + $0xf0] sm:$0xff]  ;;  %v1961_v11 = vld [vmem:[%s2685_s1 + $0xe8] sm:$0xff] }
   0x5   :  { %992 = vmatpush.bf16.msra.mxu3 %v1963_v3  ;;  %v1936_v12 = vld [vmem:[%s2685_s1 + $0x20] sm:$0xff]  ;;  %v1935_v16 = vld [vmem:[%s2685_s1 + $0x18] sm:$0xff]  ;;  %v1934_v20 = vld [vmem:[%s2685_s1 + $0x10] sm:$0xff] }
   0x6   :  { %726 = vmatpush.bf16.msra.mxu0 %v1938_v4  ;;  %v1944_v13 = vld [vmem:[%s2685_s1 + $0x60] sm:$0xff]  ;;  %v1943_v17 = vld [vmem:[%s2685_s1 + $0x58] sm:$0xff]  ;;  %v1942_v21 = vld [vmem:[%s2685_s1 + $0x50] sm:$0xff] }
   0x7   :  { %815 = vmatpush.bf16.msra.mxu1 %v1946_v5  ;;  %v1952_v14 = vld [vmem:[%s2685_s1 + $0xa0] sm:$0xff]  ;;  %v1951_v18 = vld [vmem:[%s2685_s1 + $0x98] sm:$0xff]  ;;  %v1950_v22 = vld [vmem:[%s2685_s1 + $0x90] sm:$0xff] }
   0x8   :  { %904 = vmatpush.bf16.msra.mxu2 %v1954_v6  ;;  %v1960_v15 = vld [vmem:[%s2685_s1 + $0xe0] sm:$0xff]  ;;  %v1959_v19 = vld [vmem:[%s2685_s1 + $0xd8] sm:$0xff]  ;;  %v1958_v23 = vld [vmem:[%s2685_s1 + $0xd0] sm:$0xff] }
   0x9   :  { %993 = vmatpush.bf16.msra.mxu3 %v1962_v7  ;;  %v1933_v24 = vld [vmem:[%s2685_s1 + $0x8] sm:$0xff]  ;;  %v1932_v28 = vld [vmem:[%s2685_s1] sm:$0xff]  ;;  %v1870_v33 = vld [vmem:[%s2686_s0 + $0xc] sm:$0xf0] }
   0xa   :  { %727 = vmatpush.bf16.msra.mxu0 %v1937_v8  ;;  %v1941_v25 = vld [vmem:[%s2685_s1 + $0x48] sm:$0xff]  ;;  %v1940_v29 = vld [vmem:[%s2685_s1 + $0x40] sm:$0xff]  ;;  %v1488_v35 = vld [vmem:[%s2686_s0 + $0x10] sm:$0xf0] }
   0xb   :  { %816 = vmatpush.bf16.msra.mxu1 %v1945_v9  ;;  %v1949_v26 = vld [vmem:[%s2685_s1 + $0x88] sm:$0xff]  ;;  %v1948_v30 = vld [vmem:[%s2685_s1 + $0x80] sm:$0xff]  ;;  %v1871_v37 = vld [vmem:[%s2686_s0 + $0x14] sm:$0xf0] }
   0xc   :  { %905 = vmatpush.bf16.msra.mxu2 %v1953_v10  ;;  %v1957_v27 = vld [vmem:[%s2685_s1 + $0xc8] sm:$0xff]  ;;  %v1956_v31 = vld [vmem:[%s2685_s1 + $0xc0] sm:$0xff]  ;;  %v1496_v39 = vld [vmem:[%s2686_s0 + $0x18] sm:$0xf0] }
   0xd   :  { %994 = vmatpush.bf16.msra.mxu3 %v1961_v11  ;;  %v1486_v32 = vld [vmem:[%s2686_s0] sm:$0xf]  ;;  %v1868_v34 = vld [vmem:[%s2686_s0 + $0x4] sm:$0xf]  ;;  %v1494_v36 = vld [vmem:[%s2686_s0 + $0x8] sm:$0xf] }
   0xe   :  { %728 = vmatpush.bf16.msra.mxu0 %v1936_v12  ;;  %v1869_v38 = vld [vmem:[%s2686_s0 + $0xc] sm:$0xf]  ;;  %v1487_v40 = vor.u32 %v1870_v33, %v1486_v32  ;;  %v1491_v41 = vor.u32 %v1868_v34, %v1488_v35  ;;  %v1495_v42 = vor.u32 %v1871_v37, %v1494_v36  ;;  %v1502_v44 = vld [vmem:[%s2686_s0 + $0x20] sm:$0xf]  ;;  %v1874_v45 = vld [vmem:[%s2686_s0 + $0x2c] sm:$0xf0] }
   0xf   :  { %817 = vmatpush.bf16.msra.mxu1 %v1944_v13  ;;  %v1499_v43 = vor.u32 %v1869_v38, %v1496_v39  ;;  %v1872_v46 = vld [vmem:[%s2686_s0 + $0x24] sm:$0xf]  ;;  %v1504_v47 = vld [vmem:[%s2686_s0 + $0x30] sm:$0xf0]  ;;  %v1510_v48 = vld [vmem:[%s2686_s0 + $0x28] sm:$0xf]  ;;  %v1503_v52 = vor.u32 %v1874_v45, %v1502_v44 }
  0x10   :  { %906 = vmatpush.bf16.msra.mxu2 %v1952_v14  ;;  %v1875_v49 = vld [vmem:[%s2686_s0 + $0x34] sm:$0xf0]  ;;  %v1873_v50 = vld [vmem:[%s2686_s0 + $0x2c] sm:$0xf]  ;;  %v1512_v51 = vld [vmem:[%s2686_s0 + $0x38] sm:$0xf0]  ;;  %v1507_v53 = vor.u32 %v1872_v46, %v1504_v47 }
  0x11   :  { %995 = vmatpush.bf16.msra.mxu3 %v1960_v15  ;;  %v1511_v54 = vor.u32 %v1875_v49, %v1510_v48  ;;  %v1515_v55 = vor.u32 %v1873_v50, %v1512_v51  ;;  %v1518_v56 = vld [vmem:[%s2686_s0 + $0x40] sm:$0xf]  ;;  %v1878_v57 = vld [vmem:[%s2686_s0 + $0x4c] sm:$0xf0]  ;;  %v1876_v58 = vld [vmem:[%s2686_s0 + $0x44] sm:$0xf] }
  0x12   :  { %729 = vmatpush.bf16.msra.mxu0 %v1935_v16  ;;  %v1520_v59 = vld [vmem:[%s2686_s0 + $0x50] sm:$0xf0]  ;;  %v1526_v60 = vld [vmem:[%s2686_s0 + $0x48] sm:$0xf]  ;;  %v1879_v61 = vld [vmem:[%s2686_s0 + $0x54] sm:$0xf0]  ;;  %v1519_v0 = vor.u32 %v1878_v57, %v1518_v56 }
  0x13   :  { %818 = vmatpush.bf16.msra.mxu1 %v1943_v17  ;;  %v1877_v62 = vld [vmem:[%s2686_s0 + $0x4c] sm:$0xf]  ;;  %v1528_v63 = vld [vmem:[%s2686_s0 + $0x58] sm:$0xf0]  ;;  %v1523_v1 = vor.u32 %v1876_v58, %v1520_v59  ;;  %v1527_v2 = vor.u32 %v1879_v61, %v1526_v60  ;;  %v1534_v4 = vld [vmem:[%s2686_s0 + $0x60] sm:$0xf] }
  0x14   :  { %907 = vmatpush.bf16.msra.mxu2 %v1951_v18  ;;  %v1531_v3 = vor.u32 %v1877_v62, %v1528_v63  ;;  %v1882_v5 = vld [vmem:[%s2686_s0 + $0x6c] sm:$0xf0]  ;;  %v1880_v6 = vld [vmem:[%s2686_s0 + $0x64] sm:$0xf]  ;;  %v1536_v7 = vld [vmem:[%s2686_s0 + $0x70] sm:$0xf0] }
  0x15   :  { %996 = vmatpush.bf16.msra.mxu3 %v1959_v19  ;;  %v1542_v8 = vld [vmem:[%s2686_s0 + $0x68] sm:$0xf]  ;;  %v1883_v9 = vld [vmem:[%s2686_s0 + $0x74] sm:$0xf0]  ;;  %v1881_v10 = vld [vmem:[%s2686_s0 + $0x6c] sm:$0xf]  ;;  %v1535_v12 = vor.u32 %v1882_v5, %v1534_v4  ;;  %v1539_v13 = vor.u32 %v1880_v6, %v1536_v7 }
  0x16   :  { %730 = vmatpush.bf16.msra.mxu0 %v1934_v20  ;;  %v1544_v11 = vld [vmem:[%s2686_s0 + $0x78] sm:$0xf0]  ;;  %v1543_v14 = vor.u32 %v1883_v9, %v1542_v8  ;;  %v1550_v16 = vld [vmem:[%s2686_s0 + $0x80] sm:$0xf]  ;;  %v1886_v17 = vld [vmem:[%s2686_s0 + $0x8c] sm:$0xf0] }
  0x17   :  { %819 = vmatpush.bf16.msra.mxu1 %v1942_v21  ;;  %v1547_v15 = vor.u32 %v1881_v10, %v1544_v11  ;;  %v1884_v18 = vld [vmem:[%s2686_s0 + $0x84] sm:$0xf]  ;;  %v1552_v19 = vld [vmem:[%s2686_s0 + $0x90] sm:$0xf0]  ;;  %v1558_v20 = vld [vmem:[%s2686_s0 + $0x88] sm:$0xf] }
  0x18   :  { %908 = vmatpush.bf16.msra.mxu2 %v1950_v22  ;;  %v1887_v21 = vld [vmem:[%s2686_s0 + $0x94] sm:$0xf0]  ;;  %v1885_v22 = vld [vmem:[%s2686_s0 + $0x8c] sm:$0xf]  ;;  %v1574_v32 = vld [vmem:[%s2686_s0 + $0xa8] sm:$0xf] }
  0x19   :  { %997 = vmatpush.bf16.msra.mxu3 %v1958_v23  ;;  %v1560_v23 = vld [vmem:[%s2686_s0 + $0x98] sm:$0xf0]  ;;  %v1891_v33 = vld [vmem:[%s2686_s0 + $0xb4] sm:$0xf0]  ;;  %v1889_v34 = vld [vmem:[%s2686_s0 + $0xac] sm:$0xf] }
  0x1a   :  { %731 = vmatpush.bf16.msra.mxu0 %v1933_v24  ;;  %v1551_v24 = vor.u32 %v1886_v17, %v1550_v16  ;;  %v1576_v35 = vld [vmem:[%s2686_s0 + $0xb8] sm:$0xf0]  ;;  %v1575_v38 = vor.u32 %v1891_v33, %v1574_v32  ;;  %v1590_v44 = vld [vmem:[%s2686_s0 + $0xc8] sm:$0xf]  ;;  %v1895_v45 = vld [vmem:[%s2686_s0 + $0xd4] sm:$0xf0] }
  0x1b   :  { %820 = vmatpush.bf16.msra.mxu1 %v1941_v25  ;;  %v1555_v25 = vor.u32 %v1884_v18, %v1552_v19  ;;  %v1579_v39 = vor.u32 %v1889_v34, %v1576_v35  ;;  %v1893_v46 = vld [vmem:[%s2686_s0 + $0xcc] sm:$0xf]  ;;  %v1592_v47 = vld [vmem:[%s2686_s0 + $0xd8] sm:$0xf0]  ;;  %v1591_v50 = vor.u32 %v1895_v45, %v1590_v44  ;;  %v1606_v56 = vld [vmem:[%s2686_s0 + $0xe8] sm:$0xf] }
  0x1c   :  { %909 = vmatpush.bf16.msra.mxu2 %v1949_v26  ;;  %v1559_v26 = vor.u32 %v1887_v21, %v1558_v20  ;;  %v1595_v51 = vor.u32 %v1893_v46, %v1592_v47  ;;  %v1899_v57 = vld [vmem:[%s2686_s0 + $0xf4] sm:$0xf0]  ;;  %v1897_v58 = vld [vmem:[%s2686_s0 + $0xec] sm:$0xf]  ;;  %v1608_v59 = vld [vmem:[%s2686_s0 + $0xf8] sm:$0xf0] }
  0x1d   :  { %998 = vmatpush.bf16.msra.mxu3 %v1957_v27  ;;  %v1563_v27 = vor.u32 %v1885_v22, %v1560_v23  ;;  %v1607_v62 = vor.u32 %v1899_v57, %v1606_v56  ;;  %v1611_v63 = vor.u32 %v1897_v58, %v1608_v59  ;;  %v1622_v4 = vld [vmem:[%s2686_s0 + $0x108] sm:$0xf]  ;;  %v1903_v5 = vld [vmem:[%s2686_s0 + $0x114] sm:$0xf0]  ;;  %v1901_v6 = vld [vmem:[%s2686_s0 + $0x10c] sm:$0xf] }
  0x1e   :  { %732 = vmatpush.bf16.msra.mxu0 %v1932_v28  ;;  %v1566_v28 = vld [vmem:[%s2686_s0 + $0xa0] sm:$0xf]  ;;  %v1624_v7 = vld [vmem:[%s2686_s0 + $0x118] sm:$0xf0]  ;;  %v1906_v21 = vld [vmem:[%s2686_s0 + $0x12c] sm:$0xf0] }
  0x1f   :  { %821 = vmatpush.bf16.msra.mxu1 %v1940_v29  ;;  %v1890_v29 = vld [vmem:[%s2686_s0 + $0xac] sm:$0xf0]  ;;  %v1630_v20 = vld [vmem:[%s2686_s0 + $0x120] sm:$0xf]  ;;  %v1904_v22 = vld [vmem:[%s2686_s0 + $0x124] sm:$0xf] }
  0x20   :  { %910 = vmatpush.bf16.msra.mxu2 %v1948_v30  ;;  %v1888_v30 = vld [vmem:[%s2686_s0 + $0xa4] sm:$0xf]  ;;  %v1567_v36 = vor.u32 %v1890_v29, %v1566_v28  ;;  %v1632_v23 = vld [vmem:[%s2686_s0 + $0x130] sm:$0xf0]  ;;  %v2429_v29 = vld [vmem:[%s2687_s2] ss:$0 sm:$0xff]  ;;  %v1631_v33 = vor.u32 %v1906_v21, %v1630_v20 }
  0x21   :  { %999 = vmatpush.bf16.msra.mxu3 %v1956_v31  ;;  %733 = vmatmul.bf16.vlgmr.msra.gmra.mxu0 %v1487_v40  ;;  %v1568_v31 = vld [vmem:[%s2686_s0 + $0xb0] sm:$0xf0]  ;;  %v1582_v40 = vld [vmem:[%s2686_s0 + $0xc0] sm:$0xf]  ;;  %v1635_v34 = vor.u32 %v1904_v22, %v1632_v23  ;;  %v1910_v56 = vld [vmem:[%s2686_s0 + $0x14c] sm:$0xf0] }
  0x22   :  { %822 = vmatmul.bf16.vlgmr.msra.gmra.mxu1 %v1491_v41  ;;  %v1571_v37 = vor.u32 %v1888_v30, %v1568_v31  ;;  %v1894_v41 = vld [vmem:[%s2686_s0 + $0xcc] sm:$0xf0]  ;;  %v1908_v58 = vld [vmem:[%s2686_s0 + $0x144] sm:$0xf]  ;;  %v1648_v59 = vld [vmem:[%s2686_s0 + $0x150] sm:$0xf0] }
  0x23   :  { %911 = vmatmul.bf16.vlgmr.msra.gmra.mxu2 %v1495_v42  ;;  %v1892_v42 = vld [vmem:[%s2686_s0 + $0xc4] sm:$0xf]  ;;  %v1583_v48 = vor.u32 %v1894_v41, %v1582_v40 }
  0x24   :  { %1000 = vmatmul.bf16.vlgmr.msra.gmra.mxu3 %v1499_v43  ;;  %v1584_v43 = vld [vmem:[%s2686_s0 + $0xd0] sm:$0xf0] }
  0x25   :  { %v1587_v49 = vor.u32 %v1892_v42, %v1584_v43 }
  0x31   :  { %738 = vmatmul.bf16.gmra.mxu0 %v1503_v52  ;;  %v1598_v52 = vld [vmem:[%s2686_s0 + $0xe0] sm:$0xf] }
  0x32   :  { %827 = vmatmul.bf16.gmra.mxu1 %v1507_v53  ;;  %v1898_v53 = vld [vmem:[%s2686_s0 + $0xec] sm:$0xf0] }
  0x33   :  { %916 = vmatmul.bf16.gmra.mxu2 %v1511_v54  ;;  %v1896_v54 = vld [vmem:[%s2686_s0 + $0xe4] sm:$0xf]  ;;  %v1599_v60 = vor.u32 %v1898_v53, %v1598_v52 }
  0x34   :  { %1005 = vmatmul.bf16.gmra.mxu3 %v1515_v55  ;;  %v1600_v55 = vld [vmem:[%s2686_s0 + $0xf0] sm:$0xf0] }
  0x35   :  { %v1603_v61 = vor.u32 %v1896_v54, %v1600_v55  ;;  %v1646_v55 = vld [vmem:[%s2686_s0 + $0x140] sm:$0xf] }
  0x41   :  { %743 = vmatmul.bf16.gmra.mxu0 %v1519_v0  ;;  %v1614_v0 = vld [vmem:[%s2686_s0 + $0x100] sm:$0xf] }
  0x42   :  { %832 = vmatmul.bf16.gmra.mxu1 %v1523_v1  ;;  %v1902_v1 = vld [vmem:[%s2686_s0 + $0x10c] sm:$0xf0] }
  0x43   :  { %921 = vmatmul.bf16.gmra.mxu2 %v1527_v2  ;;  %v1900_v2 = vld [vmem:[%s2686_s0 + $0x104] sm:$0xf]  ;;  %v1615_v8 = vor.u32 %v1902_v1, %v1614_v0 }
  0x44   :  { %1010 = vmatmul.bf16.gmra.mxu3 %v1531_v3  ;;  %v1616_v3 = vld [vmem:[%s2686_s0 + $0x110] sm:$0xf0] }
  0x45   :  { %v1619_v9 = vor.u32 %v1900_v2, %v1616_v3 }
  0x51   :  { %748 = vmatmul.bf16.gmra.mxu0 %v1535_v12  ;;  %v1623_v12 = vor.u32 %v1903_v5, %v1622_v4  ;;  %v1647_v5 = vor.u32 %v1910_v56, %v1646_v55 }
  0x52   :  { %837 = vmatmul.bf16.gmra.mxu1 %v1539_v13  ;;  %v1627_v13 = vor.u32 %v1901_v6, %v1624_v7  ;;  %v1651_v6 = vor.u32 %v1908_v58, %v1648_v59 }
  0x53   :  { %926 = vmatmul.bf16.gmra.mxu2 %v1543_v14 }
  0x54   :  { %1015 = vmatmul.bf16.gmra.mxu3 %v1547_v15 }
  0x61   :  { %753 = vmatmul.bf16.gmra.mxu0 %v1551_v24  ;;  %v1638_v24 = vld [vmem:[%s2686_s0 + $0x128] sm:$0xf] }
  0x62   :  { %842 = vmatmul.bf16.gmra.mxu1 %v1555_v25  ;;  %v1907_v25 = vld [vmem:[%s2686_s0 + $0x134] sm:$0xf0] }
  0x63   :  { %931 = vmatmul.bf16.gmra.mxu2 %v1559_v26  ;;  %v1905_v26 = vld [vmem:[%s2686_s0 + $0x12c] sm:$0xf] }
  0x64   :  { %1020 = vmatmul.bf16.gmra.mxu3 %v1563_v27  ;;  %v1640_v27 = vld [vmem:[%s2686_s0 + $0x138] sm:$0xf0] }
  0x71   :  { %758 = vmatmul.bf16.gmra.mxu0 %v1567_v36 }
  0x72   :  { %847 = vmatmul.bf16.gmra.mxu1 %v1571_v37 }
  0x73   :  { %936 = vmatmul.bf16.gmra.mxu2 %v1575_v38  ;;  %v1639_v38 = vor.u32 %v1907_v25, %v1638_v24 }
  0x74   :  { %1025 = vmatmul.bf16.gmra.mxu3 %v1579_v39  ;;  %v1643_v39 = vor.u32 %v1905_v26, %v1640_v27  ;;  %v1662_v26 = vld [vmem:[%s2686_s0 + $0x160] sm:$0xf]  ;;  %v1914_v27 = vld [vmem:[%s2686_s0 + $0x16c] sm:$0xf0] }
  0x81   :  { %763 = vmatmul.bf16.gmra.mxu0 %v1583_v48 }
  0x82   :  { %852 = vmatmul.bf16.gmra.mxu1 %v1587_v49 }
  0x83   :  { %941 = vmatmul.bf16.gmra.mxu2 %v1591_v50 }
  0x84   :  { %1030 = vmatmul.bf16.gmra.mxu3 %v1595_v51 }
  0x91   :  { %768 = vmatmul.bf16.gmra.mxu0 %v1599_v60  ;;  %v1654_v60 = vld [vmem:[%s2686_s0 + $0x148] sm:$0xf] }
  0x92   :  { %857 = vmatmul.bf16.gmra.mxu1 %v1603_v61  ;;  %v1911_v61 = vld [vmem:[%s2686_s0 + $0x154] sm:$0xf0] }
  0x93   :  { %946 = vmatmul.bf16.gmra.mxu2 %v1607_v62  ;;  %v1909_v62 = vld [vmem:[%s2686_s0 + $0x14c] sm:$0xf] }
  0x94   :  { %1035 = vmatmul.bf16.gmra.mxu3 %v1611_v63  ;;  %v1656_v63 = vld [vmem:[%s2686_s0 + $0x158] sm:$0xf0] }
  0x9e   :  { %v734_v10 = vpop.f32.mrf.mxu0 }
  0x9f   :  { %v823_v11 = vpop.f32.mrf.mxu1 }
  0xa0   :  { %v824_v14 = vadd.f32 %v823_v11, %v734_v10  ;;  %v1655_v11 = vor.u32 %v1911_v61, %v1654_v60 }
  0xa1   :  { %773 = vmatmul.bf16.gmra.mxu0 %v1615_v8 }
  0xa2   :  { %862 = vmatmul.bf16.gmra.mxu1 %v1619_v9 }
  0xa3   :  { %951 = vmatmul.bf16.gmra.mxu2 %v1623_v12  ;;  %v1659_v12 = vor.u32 %v1909_v62, %v1656_v63  ;;  %v1678_v62 = vld [vmem:[%s2686_s0 + $0x180] sm:$0xf]  ;;  %v1918_v63 = vld [vmem:[%s2686_s0 + $0x18c] sm:$0xf0] }
  0xa4   :  { %1040 = vmatmul.bf16.gmra.mxu3 %v1627_v13 }
  0xa6   :  { %v912_v15 = vpop.f32.mrf.mxu2  ;;  %v736_v17 = vpop.f32.mrf.mxu0 }
  0xa7   :  { %v1001_v16 = vpop.f32.mrf.mxu3  ;;  %v825_v18 = vpop.f32.mrf.mxu1  ;;  %v913_v19 = vadd.f32 %v912_v15, %v824_v14 }
  0xa8   :  { %v826_v30 = vadd.f32 %v825_v18, %v736_v17 }
  0xa9   :  { %v1002_v28 = vadd.f32 %v1001_v16, %v913_v19 }
  0xab   :  { %v1184_v40 = vadd.f32 %v2429_v29, %v1002_v28 }
  0xad   :  { %v1312_v44 = vmul.f32 %v1184_v40, %v1184_v40 }
  0xae   :  { %v914_v31 = vpop.f32.mrf.mxu2  ;;  %v739_v36 = vpop.f32.mrf.mxu0 }
  0xaf   :  { %v1003_v32 = vpop.f32.mrf.mxu3  ;;  %v915_v35 = vadd.f32 %v914_v31, %v826_v30  ;;  %v828_v37 = vpop.f32.mrf.mxu1  ;;  %v1912_v30 = vld [vmem:[%s2686_s0 + $0x164] sm:$0xf]  ;;  %v1664_v31 = vld [vmem:[%s2686_s0 + $0x170] sm:$0xf0] }
  0xb0   :  { %v829_v43 = vadd.f32 %v828_v37, %v739_v36 }
  0xb1   :  { %v1004_v41 = vadd.f32 %v1003_v32, %v915_v35  ;;  %778 = vmatmul.bf16.gmra.mxu0 %v1631_v33  ;;  %v1670_v32 = vld [vmem:[%s2686_s0 + $0x168] sm:$0xf]  ;;  %v1915_v33 = vld [vmem:[%s2686_s0 + $0x174] sm:$0xf0]  ;;  %v1672_v35 = vld [vmem:[%s2686_s0 + $0x178] sm:$0xf0] }
  0xb2   :  { %867 = vmatmul.bf16.gmra.mxu1 %v1635_v34  ;;  %v1913_v34 = vld [vmem:[%s2686_s0 + $0x16c] sm:$0xf] }
  0xb3   :  { %v1185_v42 = vadd.f32 %v2429_v29, %v1004_v41  ;;  %956 = vmatmul.bf16.gmra.mxu2 %v1639_v38  ;;  %v1663_v41 = vor.u32 %v1914_v27, %v1662_v26 }
  0xb4   :  { %1045 = vmatmul.bf16.gmra.mxu3 %v1643_v39 }
  0xb5   :  { %v1280_v45 = vadd.f32 %v1185_v42, %v1184_v40  ;;  %v1313_v46 = vmul.f32 %v1185_v42, %v1185_v42  ;;  %v1967_v47 = vpack.c.bf16 %v1185_v42, %v1184_v40  ;;  %v1667_v42 = vor.u32 %v1912_v30, %v1664_v31 }
  0xb6   :  { %v917_v48 = vpop.f32.mrf.mxu2  ;;  %v741_v52 = vpop.f32.mrf.mxu0 }
  0xb7   :  { %v1006_v49 = vpop.f32.mrf.mxu3  ;;  %v1344_v50 = vadd.f32 %v1313_v46, %v1312_v44  ;;  %1968 = vst [vmem:[%s2688_s3] sm:$0xff] %v1967_v47   ;;  %v918_v51 = vadd.f32 %v917_v48, %v829_v43  ;;  %v830_v53 = vpop.f32.mrf.mxu1  ;;  %v1671_v47 = vor.u32 %v1915_v33, %v1670_v32  ;;  %v1675_v48 = vor.u32 %v1913_v34, %v1672_v35  ;;  %v1694_v34 = vld [vmem:[%s2686_s0 + $0x1a0] sm:$0xf]  ;;  %v1922_v35 = vld [vmem:[%s2686_s0 + $0x1ac] sm:$0xf0] }
  0xb8   :  { %v831_v2 = vadd.f32 %v830_v53, %v741_v52 }
  0xb9   :  { %v1007_v54 = vadd.f32 %v1006_v49, %v918_v51 }
  0xbb   :  { %v1186_v57 = vadd.f32 %v2429_v29, %v1007_v54 }
  0xbd   :  { %v1281_v0 = vadd.f32 %v1280_v45, %v1186_v57  ;;  %v1314_v1 = vmul.f32 %v1186_v57, %v1186_v57 }
  0xbe   :  { %v919_v3 = vpop.f32.mrf.mxu2  ;;  %v744_v9 = vpop.f32.mrf.mxu0 }
  0xbf   :  { %v1008_v4 = vpop.f32.mrf.mxu3  ;;  %v1345_v7 = vadd.f32 %v1344_v50, %v1314_v1  ;;  %v920_v8 = vadd.f32 %v919_v3, %v831_v2  ;;  %v833_v10 = vpop.f32.mrf.mxu1  ;;  %v1916_v1 = vld [vmem:[%s2686_s0 + $0x184] sm:$0xf]  ;;  %v1680_v2 = vld [vmem:[%s2686_s0 + $0x190] sm:$0xf0]  ;;  %v1686_v3 = vld [vmem:[%s2686_s0 + $0x188] sm:$0xf] }
  0xc0   :  { %v834_v15 = vadd.f32 %v833_v10, %v744_v9 }
  0xc1   :  { %v1009_v13 = vadd.f32 %v1008_v4, %v920_v8  ;;  %783 = vmatmul.bf16.gmra.mxu0 %v1647_v5  ;;  %v1919_v4 = vld [vmem:[%s2686_s0 + $0x194] sm:$0xf0]  ;;  %v1917_v5 = vld [vmem:[%s2686_s0 + $0x18c] sm:$0xf] }
  0xc2   :  { %872 = vmatmul.bf16.gmra.mxu1 %v1651_v6  ;;  %v1688_v6 = vld [vmem:[%s2686_s0 + $0x198] sm:$0xf0] }
  0xc3   :  { %v1187_v14 = vadd.f32 %v2429_v29, %v1009_v13  ;;  %961 = vmatmul.bf16.gmra.mxu2 %v1655_v11  ;;  %v1683_v13 = vor.u32 %v1916_v1, %v1680_v2 }
  0xc4   :  { %1050 = vmatmul.bf16.gmra.mxu3 %v1659_v12  ;;  %v1679_v12 = vor.u32 %v1918_v63, %v1678_v62 }
  0xc5   :  { %v1282_v16 = vadd.f32 %v1281_v0, %v1187_v14  ;;  %v1315_v17 = vmul.f32 %v1187_v14, %v1187_v14  ;;  %v1972_v18 = vpack.c.bf16 %v1187_v14, %v1186_v57 }
  0xc6   :  { %v922_v19 = vpop.f32.mrf.mxu2  ;;  %v746_v23 = vpop.f32.mrf.mxu0 }
  0xc7   :  { %v1011_v20 = vpop.f32.mrf.mxu3  ;;  %v1346_v21 = vadd.f32 %v1345_v7, %v1315_v17  ;;  %2044 = vst [vmem:[%s2688_s3 + $0x8] sm:$0xff] %v1972_v18   ;;  %v923_v22 = vadd.f32 %v922_v19, %v834_v15  ;;  %v835_v24 = vpop.f32.mrf.mxu1  ;;  %v1687_v18 = vor.u32 %v1919_v4, %v1686_v3  ;;  %v1691_v19 = vor.u32 %v1917_v5, %v1688_v6  ;;  %v1710_v5 = vld [vmem:[%s2686_s0 + $0x1c0] sm:$0xf]  ;;  %v1926_v6 = vld [vmem:[%s2686_s0 + $0x1cc] sm:$0xf0] }
  0xc8   :  { %v836_v38 = vadd.f32 %v835_v24, %v746_v23 }
  0xc9   :  { %v1012_v25 = vadd.f32 %v1011_v20, %v923_v22 }
  0xcb   :  { %v1188_v28 = vadd.f32 %v2429_v29, %v1012_v25 }
  0xcd   :  { %v1283_v36 = vadd.f32 %v1282_v16, %v1188_v28  ;;  %v1316_v37 = vmul.f32 %v1188_v28, %v1188_v28 }
  0xce   :  { %v924_v39 = vpop.f32.mrf.mxu2  ;;  %v749_v45 = vpop.f32.mrf.mxu0 }
  0xcf   :  { %v1013_v40 = vpop.f32.mrf.mxu3  ;;  %v1347_v43 = vadd.f32 %v1346_v21, %v1316_v37  ;;  %v925_v44 = vadd.f32 %v924_v39, %v836_v38  ;;  %v838_v46 = vpop.f32.mrf.mxu1  ;;  %v1920_v37 = vld [vmem:[%s2686_s0 + $0x1a4] sm:$0xf]  ;;  %v1696_v38 = vld [vmem:[%s2686_s0 + $0x1b0] sm:$0xf0]  ;;  %v1702_v39 = vld [vmem:[%s2686_s0 + $0x1a8] sm:$0xf] }
  0xd0   :  { %v839_v51 = vadd.f32 %v838_v46, %v749_v45 }
  0xd1   :  { %v1014_v49 = vadd.f32 %v1013_v40, %v925_v44  ;;  %788 = vmatmul.bf16.gmra.mxu0 %v1663_v41  ;;  %v1923_v40 = vld [vmem:[%s2686_s0 + $0x1b4] sm:$0xf0]  ;;  %v1921_v41 = vld [vmem:[%s2686_s0 + $0x1ac] sm:$0xf] }
  0xd2   :  { %877 = vmatmul.bf16.gmra.mxu1 %v1667_v42  ;;  %v1704_v42 = vld [vmem:[%s2686_s0 + $0x1b8] sm:$0xf0] }
  0xd3   :  { %v1189_v50 = vadd.f32 %v2429_v29, %v1014_v49  ;;  %966 = vmatmul.bf16.gmra.mxu2 %v1671_v47  ;;  %v1699_v49 = vor.u32 %v1920_v37, %v1696_v38 }
  0xd4   :  { %1055 = vmatmul.bf16.gmra.mxu3 %v1675_v48  ;;  %v1695_v48 = vor.u32 %v1922_v35, %v1694_v34 }
  0xd5   :  { %v1284_v52 = vadd.f32 %v1283_v36, %v1189_v50  ;;  %v1317_v53 = vmul.f32 %v1189_v50, %v1189_v50  ;;  %v1977_v54 = vpack.c.bf16 %v1189_v50, %v1188_v28 }
  0xd6   :  { %v927_v55 = vpop.f32.mrf.mxu2  ;;  %v751_v59 = vpop.f32.mrf.mxu0 }
  0xd7   :  { %v1016_v56 = vpop.f32.mrf.mxu3  ;;  %v1348_v57 = vadd.f32 %v1347_v43, %v1317_v53  ;;  %2045 = vst [vmem:[%s2688_s3 + $0x10] sm:$0xff] %v1977_v54   ;;  %v928_v58 = vadd.f32 %v927_v55, %v839_v51  ;;  %v840_v60 = vpop.f32.mrf.mxu1  ;;  %v1703_v54 = vor.u32 %v1923_v40, %v1702_v39  ;;  %v1707_v55 = vor.u32 %v1921_v41, %v1704_v42  ;;  %v1726_v41 = vld [vmem:[%s2686_s0 + $0x1e0] sm:$0xf]  ;;  %v1930_v42 = vld [vmem:[%s2686_s0 + $0x1ec] sm:$0xf0] }
  0xd8   :  { %v841_v9 = vadd.f32 %v840_v60, %v751_v59 }
  0xd9   :  { %v1017_v61 = vadd.f32 %v1016_v56, %v928_v58 }
  0xdb   :  { %v1190_v0 = vadd.f32 %v2429_v29, %v1017_v61 }
  0xdd   :  { %v1285_v7 = vadd.f32 %v1284_v52, %v1190_v0  ;;  %v1318_v8 = vmul.f32 %v1190_v0, %v1190_v0 }
  0xde   :  { %v929_v10 = vpop.f32.mrf.mxu2  ;;  %v754_v16 = vpop.f32.mrf.mxu0 }
  0xdf   :  { %v1018_v11 = vpop.f32.mrf.mxu3  ;;  %v1349_v14 = vadd.f32 %v1348_v57, %v1318_v8  ;;  %v930_v15 = vadd.f32 %v929_v10, %v841_v9  ;;  %v843_v17 = vpop.f32.mrf.mxu1  ;;  %v1924_v8 = vld [vmem:[%s2686_s0 + $0x1c4] sm:$0xf]  ;;  %v1712_v9 = vld [vmem:[%s2686_s0 + $0x1d0] sm:$0xf0]  ;;  %v1718_v10 = vld [vmem:[%s2686_s0 + $0x1c8] sm:$0xf] }
  0xe0   :  { %v844_v22 = vadd.f32 %v843_v17, %v754_v16 }
  0xe1   :  { %v1019_v20 = vadd.f32 %v1018_v11, %v930_v15  ;;  %793 = vmatmul.bf16.gmra.mxu0 %v1679_v12  ;;  %v1927_v11 = vld [vmem:[%s2686_s0 + $0x1d4] sm:$0xf0]  ;;  %v1925_v12 = vld [vmem:[%s2686_s0 + $0x1cc] sm:$0xf] }
  0xe2   :  { %882 = vmatmul.bf16.gmra.mxu1 %v1683_v13  ;;  %v1720_v13 = vld [vmem:[%s2686_s0 + $0x1d8] sm:$0xf0] }
  0xe3   :  { %v1191_v21 = vadd.f32 %v2429_v29, %v1019_v20  ;;  %971 = vmatmul.bf16.gmra.mxu2 %v1687_v18  ;;  %v1715_v20 = vor.u32 %v1924_v8, %v1712_v9 }
  0xe4   :  { %1060 = vmatmul.bf16.gmra.mxu3 %v1691_v19  ;;  %v1711_v19 = vor.u32 %v1926_v6, %v1710_v5 }
  0xe5   :  { %v1286_v23 = vadd.f32 %v1285_v7, %v1191_v21  ;;  %v1319_v24 = vmul.f32 %v1191_v21, %v1191_v21  ;;  %v1982_v25 = vpack.c.bf16 %v1191_v21, %v1190_v0 }
  0xe6   :  { %v932_v26 = vpop.f32.mrf.mxu2  ;;  %v756_v31 = vpop.f32.mrf.mxu0 }
  0xe7   :  { %v1021_v27 = vpop.f32.mrf.mxu3  ;;  %v1350_v28 = vadd.f32 %v1349_v14, %v1319_v24  ;;  %2046 = vst [vmem:[%s2688_s3 + $0x18] sm:$0xff] %v1982_v25   ;;  %v933_v30 = vadd.f32 %v932_v26, %v844_v22  ;;  %v845_v32 = vpop.f32.mrf.mxu1  ;;  %v1719_v25 = vor.u32 %v1927_v11, %v1718_v10  ;;  %v1723_v26 = vor.u32 %v1925_v12, %v1720_v13 }
  0xe8   :  { %v846_v45 = vadd.f32 %v845_v32, %v756_v31 }
  0xe9   :  { %v1022_v33 = vadd.f32 %v1021_v27, %v933_v30 }
  0xeb   :  { %v1192_v36 = vadd.f32 %v2429_v29, %v1022_v33 }
  0xed   :  { %v1287_v43 = vadd.f32 %v1286_v23, %v1192_v36  ;;  %v1320_v44 = vmul.f32 %v1192_v36, %v1192_v36 }
  0xee   :  { %v934_v46 = vpop.f32.mrf.mxu2  ;;  %v759_v52 = vpop.f32.mrf.mxu0 }
  0xef   :  { %v1023_v47 = vpop.f32.mrf.mxu3  ;;  %v1351_v50 = vadd.f32 %v1350_v28, %v1320_v44  ;;  %v935_v51 = vadd.f32 %v934_v46, %v846_v45  ;;  %v848_v53 = vpop.f32.mrf.mxu1  ;;  %v1928_v44 = vld [vmem:[%s2686_s0 + $0x1e4] sm:$0xf]  ;;  %v1728_v45 = vld [vmem:[%s2686_s0 + $0x1f0] sm:$0xf0]  ;;  %v1734_v46 = vld [vmem:[%s2686_s0 + $0x1e8] sm:$0xf] }
  0xf0   :  { %v849_v58 = vadd.f32 %v848_v53, %v759_v52 }
  0xf1   :  { %v1024_v56 = vadd.f32 %v1023_v47, %v935_v51  ;;  %798 = vmatmul.bf16.gmra.mxu0 %v1695_v48  ;;  %v1931_v47 = vld [vmem:[%s2686_s0 + $0x1f4] sm:$0xf0]  ;;  %v1929_v48 = vld [vmem:[%s2686_s0 + $0x1ec] sm:$0xf] }
  0xf2   :  { %887 = vmatmul.bf16.gmra.mxu1 %v1699_v49  ;;  %v1736_v49 = vld [vmem:[%s2686_s0 + $0x1f8] sm:$0xf0] }
  0xf3   :  { %v1193_v57 = vadd.f32 %v2429_v29, %v1024_v56  ;;  %976 = vmatmul.bf16.gmra.mxu2 %v1703_v54  ;;  %v1731_v56 = vor.u32 %v1928_v44, %v1728_v45 }
  0xf4   :  { %1065 = vmatmul.bf16.gmra.mxu3 %v1707_v55  ;;  %v1727_v55 = vor.u32 %v1930_v42, %v1726_v41 }
  0xf5   :  { %v1288_v59 = vadd.f32 %v1287_v43, %v1193_v57  ;;  %v1321_v60 = vmul.f32 %v1193_v57, %v1193_v57  ;;  %v1987_v61 = vpack.c.bf16 %v1193_v57, %v1192_v36 }
  0xf6   :  { %v937_v62 = vpop.f32.mrf.mxu2  ;;  %v761_v2 = vpop.f32.mrf.mxu0 }
  0xf7   :  { %v1026_v63 = vpop.f32.mrf.mxu3  ;;  %v1352_v0 = vadd.f32 %v1351_v50, %v1321_v60  ;;  %2047 = vst [vmem:[%s2688_s3 + $0x20] sm:$0xff] %v1987_v61   ;;  %v938_v1 = vadd.f32 %v937_v62, %v849_v58  ;;  %v850_v3 = vpop.f32.mrf.mxu1  ;;  %v1735_v61 = vor.u32 %v1931_v47, %v1734_v46  ;;  %v1739_v62 = vor.u32 %v1929_v48, %v1736_v49 }
  0xf8   :  { %v851_v16 = vadd.f32 %v850_v3, %v761_v2 }
  0xf9   :  { %v1027_v4 = vadd.f32 %v1026_v63, %v938_v1 }
  0xfb   :  { %v1194_v7 = vadd.f32 %v2429_v29, %v1027_v4 }
  0xfd   :  { %v1289_v14 = vadd.f32 %v1288_v59, %v1194_v7  ;;  %v1322_v15 = vmul.f32 %v1194_v7, %v1194_v7 }
  0xfe   :  { %v939_v17 = vpop.f32.mrf.mxu2  ;;  %v764_v23 = vpop.f32.mrf.mxu0 }
  0xff   :  { %v1028_v18 = vpop.f32.mrf.mxu3  ;;  %v1353_v21 = vadd.f32 %v1352_v0, %v1322_v15  ;;  %v940_v22 = vadd.f32 %v939_v17, %v851_v16  ;;  %v853_v24 = vpop.f32.mrf.mxu1 }
 0x100   :  { %v854_v30 = vadd.f32 %v853_v24, %v764_v23 }
 0x101   :  { %v1029_v27 = vadd.f32 %v1028_v18, %v940_v22  ;;  %803 = vmatmul.bf16.gmra.mxu0 %v1711_v19 }
 0x102   :  { %892 = vmatmul.bf16.gmra.mxu1 %v1715_v20 }
 0x103   :  { %v1195_v28 = vadd.f32 %v2429_v29, %v1029_v27  ;;  %981 = vmatmul.bf16.gmra.mxu2 %v1719_v25 }
 0x104   :  { %1070 = vmatmul.bf16.gmra.mxu3 %v1723_v26 }
 0x105   :  { %v1290_v31 = vadd.f32 %v1289_v14, %v1195_v28  ;;  %v1323_v32 = vmul.f32 %v1195_v28, %v1195_v28  ;;  %v1992_v33 = vpack.c.bf16 %v1195_v28, %v1194_v7 }
 0x106   :  { %v942_v34 = vpop.f32.mrf.mxu2  ;;  %v766_v38 = vpop.f32.mrf.mxu0 }
 0x107   :  { %v1031_v35 = vpop.f32.mrf.mxu3  ;;  %v1354_v36 = vadd.f32 %v1353_v21, %v1323_v32  ;;  %2048 = vst [vmem:[%s2688_s3 + $0x28] sm:$0xff] %v1992_v33   ;;  %v943_v37 = vadd.f32 %v942_v34, %v854_v30  ;;  %v855_v39 = vpop.f32.mrf.mxu1 }
 0x108   :  { %v856_v52 = vadd.f32 %v855_v39, %v766_v38 }
 0x109   :  { %v1032_v40 = vadd.f32 %v1031_v35, %v943_v37 }
 0x10b   :  { %v1196_v43 = vadd.f32 %v2429_v29, %v1032_v40 }
 0x10d   :  { %v1291_v50 = vadd.f32 %v1290_v31, %v1196_v43  ;;  %v1324_v51 = vmul.f32 %v1196_v43, %v1196_v43 }
 0x10e   :  { %v944_v53 = vpop.f32.mrf.mxu2  ;;  %v769_v59 = vpop.f32.mrf.mxu0 }
 0x10f   :  { %v1033_v54 = vpop.f32.mrf.mxu3  ;;  %v1355_v57 = vadd.f32 %v1354_v36, %v1324_v51  ;;  %v945_v58 = vadd.f32 %v944_v53, %v856_v52  ;;  %v858_v60 = vpop.f32.mrf.mxu1 }
 0x110   :  { %v859_v1 = vadd.f32 %v858_v60, %v769_v59 }
 0x111   :  { %v1034_v63 = vadd.f32 %v1033_v54, %v945_v58  ;;  %808 = vmatmul.bf16.gmra.mxu0 %v1727_v55 }
 0x112   :  { %897 = vmatmul.bf16.gmra.mxu1 %v1731_v56 }
 0x113   :  { %v1197_v0 = vadd.f32 %v2429_v29, %v1034_v63  ;;  %986 = vmatmul.bf16.gmra.mxu2 %v1735_v61 }
 0x114   :  { %1075 = vmatmul.bf16.gmra.mxu3 %v1739_v62 }
 0x115   :  { %v1292_v2 = vadd.f32 %v1291_v50, %v1197_v0  ;;  %v1325_v3 = vmul.f32 %v1197_v0, %v1197_v0  ;;  %v1997_v4 = vpack.c.bf16 %v1197_v0, %v1196_v43 }
 0x116   :  { %v947_v5 = vpop.f32.mrf.mxu2  ;;  %v771_v9 = vpop.f32.mrf.mxu0 }
 0x117   :  { %v1036_v6 = vpop.f32.mrf.mxu3  ;;  %v1356_v7 = vadd.f32 %v1355_v57, %v1325_v3  ;;  %2049 = vst [vmem:[%s2688_s3 + $0x30] sm:$0xff] %v1997_v4   ;;  %v948_v8 = vadd.f32 %v947_v5, %v859_v1  ;;  %v860_v10 = vpop.f32.mrf.mxu1 }
 0x118   :  { %v861_v15 = vadd.f32 %v860_v10, %v771_v9 }
 0x119   :  { %v1037_v11 = vadd.f32 %v1036_v6, %v948_v8 }
 0x11b   :  { %v1198_v12 = vadd.f32 %v2429_v29, %v1037_v11 }
 0x11d   :  { %v1293_v13 = vadd.f32 %v1292_v2, %v1198_v12  ;;  %v1326_v14 = vmul.f32 %v1198_v12, %v1198_v12 }
 0x11e   :  { %v949_v16 = vpop.f32.mrf.mxu2  ;;  %v774_v20 = vpop.f32.mrf.mxu0 }
 0x11f   :  { %v1038_v17 = vpop.f32.mrf.mxu3  ;;  %v1357_v18 = vadd.f32 %v1356_v7, %v1326_v14  ;;  %v950_v19 = vadd.f32 %v949_v16, %v861_v15  ;;  %v863_v21 = vpop.f32.mrf.mxu1 }
 0x120   :  { %v864_v24 = vadd.f32 %v863_v21, %v774_v20 }
 0x121   :  { %v1039_v22 = vadd.f32 %v1038_v17, %v950_v19 }
 0x123   :  { %v1199_v23 = vadd.f32 %v2429_v29, %v1039_v22 }
 0x125   :  { %v1294_v25 = vadd.f32 %v1293_v13, %v1199_v23  ;;  %v1327_v26 = vmul.f32 %v1199_v23, %v1199_v23  ;;  %v2002_v27 = vpack.c.bf16 %v1199_v23, %v1198_v12 }
 0x126   :  { %v952_v28 = vpop.f32.mrf.mxu2  ;;  %v776_v33 = vpop.f32.mrf.mxu0 }
 0x127   :  { %v1041_v30 = vpop.f32.mrf.mxu3  ;;  %v1358_v31 = vadd.f32 %v1357_v18, %v1327_v26  ;;  %2050 = vst [vmem:[%s2688_s3 + $0x38] sm:$0xff] %v2002_v27   ;;  %v953_v32 = vadd.f32 %v952_v28, %v864_v24  ;;  %v865_v34 = vpop.f32.mrf.mxu1 }
 0x128   :  { %v866_v39 = vadd.f32 %v865_v34, %v776_v33 }
 0x129   :  { %v1042_v35 = vadd.f32 %v1041_v30, %v953_v32 }
 0x12b   :  { %v1200_v36 = vadd.f32 %v2429_v29, %v1042_v35 }
 0x12d   :  { %v1295_v37 = vadd.f32 %v1294_v25, %v1200_v36  ;;  %v1328_v38 = vmul.f32 %v1200_v36, %v1200_v36 }
 0x12e   :  { %v954_v40 = vpop.f32.mrf.mxu2  ;;  %v779_v44 = vpop.f32.mrf.mxu0 }
 0x12f   :  { %v1043_v41 = vpop.f32.mrf.mxu3  ;;  %v1359_v42 = vadd.f32 %v1358_v31, %v1328_v38  ;;  %v955_v43 = vadd.f32 %v954_v40, %v866_v39  ;;  %v868_v45 = vpop.f32.mrf.mxu1 }
 0x130   :  { %v869_v48 = vadd.f32 %v868_v45, %v779_v44 }
 0x131   :  { %v1044_v46 = vadd.f32 %v1043_v41, %v955_v43 }
 0x133   :  { %v1201_v47 = vadd.f32 %v2429_v29, %v1044_v46 }
 0x135   :  { %v1296_v49 = vadd.f32 %v1295_v37, %v1201_v47  ;;  %v1329_v50 = vmul.f32 %v1201_v47, %v1201_v47  ;;  %v2007_v51 = vpack.c.bf16 %v1201_v47, %v1200_v36 }
 0x136   :  { %v957_v52 = vpop.f32.mrf.mxu2  ;;  %v781_v56 = vpop.f32.mrf.mxu0 }
 0x137   :  { %v1046_v53 = vpop.f32.mrf.mxu3  ;;  %v1360_v54 = vadd.f32 %v1359_v42, %v1329_v50  ;;  %2051 = vst [vmem:[%s2688_s3 + $0x40] sm:$0xff] %v2007_v51   ;;  %v958_v55 = vadd.f32 %v957_v52, %v869_v48  ;;  %v870_v57 = vpop.f32.mrf.mxu1 }
 0x138   :  { %v871_v62 = vadd.f32 %v870_v57, %v781_v56 }
 0x139   :  { %v1047_v58 = vadd.f32 %v1046_v53, %v958_v55 }
 0x13b   :  { %v1202_v59 = vadd.f32 %v2429_v29, %v1047_v58 }
 0x13d   :  { %v1297_v60 = vadd.f32 %v1296_v49, %v1202_v59  ;;  %v1330_v61 = vmul.f32 %v1202_v59, %v1202_v59 }
 0x13e   :  { %v959_v63 = vpop.f32.mrf.mxu2  ;;  %v784_v3 = vpop.f32.mrf.mxu0 }
 0x13f   :  { %v1048_v0 = vpop.f32.mrf.mxu3  ;;  %v1361_v1 = vadd.f32 %v1360_v54, %v1330_v61  ;;  %v960_v2 = vadd.f32 %v959_v63, %v871_v62  ;;  %v873_v4 = vpop.f32.mrf.mxu1 }
 0x140   :  { %v874_v13 = vadd.f32 %v873_v4, %v784_v3 }
 0x141   :  { %v1049_v5 = vadd.f32 %v1048_v0, %v960_v2 }
 0x143   :  { %v1203_v6 = vadd.f32 %v2429_v29, %v1049_v5 }
 0x145   :  { %v2622_v7 = vadd.f32 %v1297_v60, %v1203_v6  ;;  %v1331_v8 = vmul.f32 %v1203_v6, %v1203_v6  ;;  %v2012_v9 = vpack.c.bf16 %v1203_v6, %v1202_v59 }
 0x146   :  { %v962_v10 = vpop.f32.mrf.mxu2  ;;  %v786_v14 = vpop.f32.mrf.mxu0 }
 0x147   :  { %v1051_v11 = vpop.f32.mrf.mxu3  ;;  %v2624_v12 = vadd.f32 %v1361_v1, %v1331_v8  ;;  %2052 = vst [vmem:[%s2688_s3 + $0x48] sm:$0xff] %v2012_v9   ;;  %v875_v15 = vpop.f32.mrf.mxu1  ;;  %v963_v16 = vadd.f32 %v962_v10, %v874_v13 }
 0x148   :  { %v876_v17 = vadd.f32 %v875_v15, %v786_v14 }
 0x149   :  { %v1052_v20 = vadd.f32 %v1051_v11, %v963_v16 }
 0x14b   :  { %v2630_v25 = vadd.f32 %v2429_v29, %v1052_v20 }
 0x14e   :  { %v964_v18 = vpop.f32.mrf.mxu2  ;;  %v789_v22 = vpop.f32.mrf.mxu0 }
 0x14f   :  { %v1053_v19 = vpop.f32.mrf.mxu3  ;;  %v965_v21 = vadd.f32 %v964_v18, %v876_v17  ;;  %v878_v23 = vpop.f32.mrf.mxu1 }
 0x150   :  { %v879_v31 = vadd.f32 %v878_v23, %v789_v22 }
 0x151   :  { %v1054_v24 = vadd.f32 %v1053_v19, %v965_v21 }
 0x153   :  { %v2633_v26 = vadd.f32 %v2429_v29, %v1054_v24  ;;  %v1332_v24 = vmul.f32 %v2630_v25, %v2630_v25 }
 0x155   :  { %v2017_v27 = vpack.c.bf16 %v2633_v26, %v2630_v25 }
 0x156   :  { %v967_v28 = vpop.f32.mrf.mxu2  ;;  %v791_v32 = vpop.f32.mrf.mxu0 }
 0x157   :  { %v1056_v30 = vpop.f32.mrf.mxu3  ;;  %2053 = vst [vmem:[%s2688_s3 + $0x50] sm:$0xff] %v2017_v27   ;;  %v880_v33 = vpop.f32.mrf.mxu1  ;;  %v968_v34 = vadd.f32 %v967_v28, %v879_v31  ;;  %v1333_v28 = vmul.f32 %v2633_v26, %v2633_v26 }
 0x158   :  { %v881_v35 = vadd.f32 %v880_v33, %v791_v32  ;;  %v1299_v32 = vadd.f32 %v2622_v7, %v2630_v25 }
 0x159   :  { %v1057_v38 = vadd.f32 %v1056_v30, %v968_v34 }
 0x15b   :  { %v1206_v43 = vadd.f32 %v2429_v29, %v1057_v38 }
 0x15e   :  { %v969_v36 = vpop.f32.mrf.mxu2  ;;  %v794_v40 = vpop.f32.mrf.mxu0 }
 0x15f   :  { %v1058_v37 = vpop.f32.mrf.mxu3  ;;  %v970_v39 = vadd.f32 %v969_v36, %v881_v35  ;;  %v883_v41 = vpop.f32.mrf.mxu1  ;;  %v1363_v35 = vadd.f32 %v2624_v12, %v1332_v24  ;;  %v1334_v36 = vmul.f32 %v1206_v43, %v1206_v43 }
 0x160   :  { %v884_v48 = vadd.f32 %v883_v41, %v794_v40 }
 0x161   :  { %v1059_v42 = vadd.f32 %v1058_v37, %v970_v39  ;;  %v1300_v39 = vadd.f32 %v1299_v32, %v2633_v26  ;;  %v1364_v41 = vadd.f32 %v1363_v35, %v1333_v28 }
 0x163   :  { %v2642_v44 = vadd.f32 %v2429_v29, %v1059_v42  ;;  %v1365_v25 = vadd.f32 %v1364_v41, %v1334_v36 }
 0x165   :  { %v2022_v45 = vpack.c.bf16 %v2642_v44, %v1206_v43  ;;  %v1335_v42 = vmul.f32 %v2642_v44, %v2642_v44 }
 0x166   :  { %v972_v46 = vpop.f32.mrf.mxu2  ;;  %v796_v49 = vpop.f32.mrf.mxu0 }
 0x167   :  { %v1061_v47 = vpop.f32.mrf.mxu3  ;;  %2054 = vst [vmem:[%s2688_s3 + $0x58] sm:$0xff] %v2022_v45   ;;  %v885_v50 = vpop.f32.mrf.mxu1  ;;  %v973_v51 = vadd.f32 %v972_v46, %v884_v48  ;;  %v1301_v45 = vadd.f32 %v1300_v39, %v1206_v43 }
 0x168   :  { %v886_v52 = vadd.f32 %v885_v50, %v796_v49  ;;  %v1366_v50 = vadd.f32 %v1365_v25, %v1335_v42 }
 0x169   :  { %v1062_v55 = vadd.f32 %v1061_v47, %v973_v51  ;;  %v1302_v12 = vadd.f32 %v1301_v45, %v2642_v44 }
 0x16b   :  { %v1208_v60 = vadd.f32 %v2429_v29, %v1062_v55 }
 0x16d   :  { %v1336_v48 = vmul.f32 %v1208_v60, %v1208_v60 }
 0x16e   :  { %v974_v53 = vpop.f32.mrf.mxu2  ;;  %v799_v57 = vpop.f32.mrf.mxu0 }
 0x16f   :  { %v1063_v54 = vpop.f32.mrf.mxu3  ;;  %v975_v56 = vadd.f32 %v974_v53, %v886_v52  ;;  %v888_v58 = vpop.f32.mrf.mxu1  ;;  %v1303_v53 = vadd.f32 %v1302_v12, %v1208_v60 }
 0x170   :  { %v889_v1 = vadd.f32 %v888_v58, %v799_v57 }
 0x171   :  { %v1064_v59 = vadd.f32 %v1063_v54, %v975_v56  ;;  %v1367_v54 = vadd.f32 %v1366_v50, %v1336_v48 }
 0x173   :  { %v1209_v61 = vadd.f32 %v2429_v29, %v1064_v59 }
 0x175   :  { %v2027_v62 = vpack.c.bf16 %v1209_v61, %v1208_v60  ;;  %v1337_v51 = vmul.f32 %v1209_v61, %v1209_v61  ;;  %v1304_v56 = vadd.f32 %v1303_v53, %v1209_v61 }
 0x176   :  { %v977_v63 = vpop.f32.mrf.mxu2  ;;  %v801_v2 = vpop.f32.mrf.mxu0 }
 0x177   :  { %v1066_v0 = vpop.f32.mrf.mxu3  ;;  %2055 = vst [vmem:[%s2688_s3 + $0x60] sm:$0xff] %v2027_v62   ;;  %v890_v3 = vpop.f32.mrf.mxu1  ;;  %v978_v4 = vadd.f32 %v977_v63, %v889_v1  ;;  %v1368_v58 = vadd.f32 %v1367_v54, %v1337_v51 }
 0x178   :  { %v891_v5 = vadd.f32 %v890_v3, %v801_v2 }
 0x179   :  { %v1067_v9 = vadd.f32 %v1066_v0, %v978_v4 }
 0x17b   :  { %v1210_v15 = vadd.f32 %v2429_v29, %v1067_v9 }
 0x17d   :  { %v1338_v55 = vmul.f32 %v1210_v15, %v1210_v15  ;;  %v1305_v63 = vadd.f32 %v1304_v56, %v1210_v15 }
 0x17e   :  { %v979_v6 = vpop.f32.mrf.mxu2  ;;  %v804_v11 = vpop.f32.mrf.mxu0 }
 0x17f   :  { %v1068_v8 = vpop.f32.mrf.mxu3  ;;  %v980_v10 = vadd.f32 %v979_v6, %v891_v5  ;;  %v893_v13 = vpop.f32.mrf.mxu1  ;;  %v1369_v0 = vadd.f32 %v1368_v58, %v1338_v55 }
 0x180   :  { %v894_v20 = vadd.f32 %v893_v13, %v804_v11 }
 0x181   :  { %v1069_v14 = vadd.f32 %v1068_v8, %v980_v10 }
 0x183   :  { %v1211_v16 = vadd.f32 %v2429_v29, %v1069_v14 }
 0x185   :  { %v2032_v17 = vpack.c.bf16 %v1211_v16, %v1210_v15  ;;  %v1339_v44 = vmul.f32 %v1211_v16, %v1211_v16  ;;  %v1306_v1 = vadd.f32 %v1305_v63, %v1211_v16 }
 0x186   :  { %v982_v18 = vpop.f32.mrf.mxu2  ;;  %v806_v21 = vpop.f32.mrf.mxu0 }
 0x187   :  { %v1071_v19 = vpop.f32.mrf.mxu3  ;;  %2056 = vst [vmem:[%s2688_s3 + $0x68] sm:$0xff] %v2032_v17   ;;  %v895_v22 = vpop.f32.mrf.mxu1  ;;  %v983_v23 = vadd.f32 %v982_v18, %v894_v20  ;;  %v1370_v5 = vadd.f32 %v1369_v0, %v1339_v44 }
 0x188   :  { %v896_v27 = vadd.f32 %v895_v22, %v806_v21 }
 0x189   :  { %v1072_v33 = vadd.f32 %v1071_v19, %v983_v23 }
 0x18b   :  { %v1212_v46 = vadd.f32 %v2429_v29, %v1072_v33 }
 0x18d   :  { %v1340_v2 = vmul.f32 %v1212_v46, %v1212_v46  ;;  %v1307_v6 = vadd.f32 %v1306_v1, %v1212_v46 }
 0x18e   :  { %v984_v30 = vpop.f32.mrf.mxu2  ;;  %v809_v37 = vpop.f32.mrf.mxu0 }
 0x18f   :  { %v1073_v31 = vpop.f32.mrf.mxu3  ;;  %v985_v34 = vadd.f32 %v984_v30, %v896_v27  ;;  %v898_v38 = vpop.f32.mrf.mxu1  ;;  %v1371_v11 = vadd.f32 %v1370_v5, %v1340_v2 }
 0x190   :  { %v899_v7 = vadd.f32 %v898_v38, %v809_v37 }
 0x191   :  { %v1074_v40 = vadd.f32 %v1073_v31, %v985_v34 }
 0x193   :  { %v1213_v47 = vadd.f32 %v2429_v29, %v1074_v40 }
 0x195   :  { %v2037_v49 = vpack.c.bf16 %v1213_v47, %v1212_v46  ;;  %v1341_v8 = vmul.f32 %v1213_v47, %v1213_v47  ;;  %v1308_v61 = vadd.f32 %v1307_v6, %v1213_v47 }
 0x196   :  { %v987_v52 = vpop.f32.mrf.mxu2  ;;  %v811_v59 = vpop.f32.mrf.mxu0 }
 0x197   :  { %v1076_v26 = vpop.f32.mrf.mxu3  ;;  %2057 = vst [vmem:[%s2688_s3 + $0x70] sm:$0xff] %v2037_v49   ;;  %v988_v43 = vadd.f32 %v987_v52, %v899_v7  ;;  %v900_v62 = vpop.f32.mrf.mxu1  ;;  %v1372_v17 = vadd.f32 %v1371_v11, %v1341_v8 }
 0x198   :  { %v901_v60 = vadd.f32 %v900_v62, %v811_v59 }
 0x199   :  { %v1077_v57 = vadd.f32 %v1076_v26, %v988_v43 }
 0x19b   :  { %v1214_v3 = vadd.f32 %v2429_v29, %v1077_v57 }
 0x19d   :  { %v1342_v13 = vmul.f32 %v1214_v3, %v1214_v3  ;;  %v1309_v18 = vadd.f32 %v1308_v61, %v1214_v3 }
 0x19e   :  { %v989_v4 = vpop.f32.mrf.mxu2 }
 0x19f   :  { %v990_v9 = vadd.f32 %v989_v4, %v901_v60  ;;  %v1078_v10 = vpop.f32.mrf.mxu3  ;;  %v1373_v19 = vadd.f32 %v1372_v17, %v1342_v13 }
 0x1a1   :  { %v1079_v14 = vadd.f32 %v1078_v10, %v990_v9 }
 0x1a3   :  { %v1215_v15 = vadd.f32 %v2429_v29, %v1079_v14 }
 0x1a5   :  { %v1310_v16 = vadd.f32 %v1309_v18, %v1215_v15  ;;  %v1343_v20 = vmul.f32 %v1215_v15, %v1215_v15  ;;  %v2042_v21 = vpack.c.bf16 %v1215_v15, %v1214_v3 }
 0x1a7   :  { %1311 = vst [vmem:[%s2689_s4] sm:$0xff] %v1310_v16  ;;  %v1374_v22 = vadd.f32 %v1373_v19, %v1343_v20 }
 0x1a8   :  { %2058 = vst [vmem:[%s2688_s3 + $0x78] sm:$0xff] %v2042_v21  }
 0x1a9   :  { %1375 = vst [vmem:[%s2690_s5] sm:$0xff] %v1374_v22 }

// kernel: _lambda_.7
= control target key start
LH: loop header
LB: loop body
LE: loop exit
PB: predicated region body
PF: predicated region fallthrough
CT: control target
= control target key end

     0   :  { %s1943_s1 = inlined_call_operand.vmem [shape: bf16[1024,128], index: 1, kind: input, shape index: {}]   ;;  %s1944_s0 = inlined_call_operand.vmem [shape: bf16[56,1024], index: 0, kind: input, shape index: {}]   ;;  %s1945_s2 = inlined_call_operand.vmem [shape: f32[1,128], index: 2, kind: input, shape index: {}]   ;;  %s1946_s3 = inlined_call_operand.vmem [shape: bf16[56,128], index: 3, kind: output, shape index: {0}]   ;;  %s1947_s4 = inlined_call_operand.vmem [shape: f32[8,128], index: 4, kind: output, shape index: {1}]   ;;  %s1948_s5 = inlined_call_operand.vmem [shape: f32[8,128], index: 5, kind: output, shape index: {2}]  }
   0x1   :  { %v1433_v0 = vld [vmem:[%s1943_s1 + $0x38] sm:$0xff]  ;;  %v1432_v4 = vld [vmem:[%s1943_s1 + $0x30] sm:$0xff]  ;;  %v1431_v8 = vld [vmem:[%s1943_s1 + $0x28] sm:$0xff] }
   0x2   :  { %v1441_v1 = vld [vmem:[%s1943_s1 + $0x78] sm:$0xff]  ;;  %723 = vmatpush.bf16.msra.mxu0 %v1433_v0  ;;  %v1440_v5 = vld [vmem:[%s1943_s1 + $0x70] sm:$0xff]  ;;  %v1439_v9 = vld [vmem:[%s1943_s1 + $0x68] sm:$0xff] }
   0x3   :  { %v1449_v2 = vld [vmem:[%s1943_s1 + $0xb8] sm:$0xff]  ;;  %751 = vmatpush.bf16.msra.mxu1 %v1441_v1  ;;  %v1448_v6 = vld [vmem:[%s1943_s1 + $0xb0] sm:$0xff]  ;;  %v1447_v10 = vld [vmem:[%s1943_s1 + $0xa8] sm:$0xff] }
   0x4   :  { %v1457_v3 = vld [vmem:[%s1943_s1 + $0xf8] sm:$0xff]  ;;  %779 = vmatpush.bf16.msra.mxu2 %v1449_v2  ;;  %v1456_v7 = vld [vmem:[%s1943_s1 + $0xf0] sm:$0xff]  ;;  %v1455_v11 = vld [vmem:[%s1943_s1 + $0xe8] sm:$0xff] }
   0x5   :  { %807 = vmatpush.bf16.msra.mxu3 %v1457_v3  ;;  %v1430_v12 = vld [vmem:[%s1943_s1 + $0x20] sm:$0xff]  ;;  %v1429_v16 = vld [vmem:[%s1943_s1 + $0x18] sm:$0xff]  ;;  %v1428_v20 = vld [vmem:[%s1943_s1 + $0x10] sm:$0xff] }
   0x6   :  { %724 = vmatpush.bf16.msra.mxu0 %v1432_v4  ;;  %v1438_v13 = vld [vmem:[%s1943_s1 + $0x60] sm:$0xff]  ;;  %v1437_v17 = vld [vmem:[%s1943_s1 + $0x58] sm:$0xff]  ;;  %v1436_v21 = vld [vmem:[%s1943_s1 + $0x50] sm:$0xff] }
   0x7   :  { %752 = vmatpush.bf16.msra.mxu1 %v1440_v5  ;;  %v1446_v14 = vld [vmem:[%s1943_s1 + $0xa0] sm:$0xff]  ;;  %v1445_v18 = vld [vmem:[%s1943_s1 + $0x98] sm:$0xff]  ;;  %v1444_v22 = vld [vmem:[%s1943_s1 + $0x90] sm:$0xff] }
   0x8   :  { %780 = vmatpush.bf16.msra.mxu2 %v1448_v6  ;;  %v1454_v15 = vld [vmem:[%s1943_s1 + $0xe0] sm:$0xff]  ;;  %v1453_v19 = vld [vmem:[%s1943_s1 + $0xd8] sm:$0xff]  ;;  %v1452_v23 = vld [vmem:[%s1943_s1 + $0xd0] sm:$0xff] }
   0x9   :  { %808 = vmatpush.bf16.msra.mxu3 %v1456_v7  ;;  %v1427_v24 = vld [vmem:[%s1943_s1 + $0x8] sm:$0xff]  ;;  %v1426_v28 = vld [vmem:[%s1943_s1] sm:$0xff]  ;;  %v1481_v40 = vld [vmem:[%s1943_s1 + $0x1b8] sm:$0xff] }
   0xa   :  { %725 = vmatpush.bf16.msra.mxu0 %v1431_v8  ;;  %v1435_v25 = vld [vmem:[%s1943_s1 + $0x48] sm:$0xff]  ;;  %v1434_v29 = vld [vmem:[%s1943_s1 + $0x40] sm:$0xff]  ;;  %v1465_v41 = vld [vmem:[%s1943_s1 + $0x138] sm:$0xff] }
   0xb   :  { %753 = vmatpush.bf16.msra.mxu1 %v1439_v9  ;;  %v1443_v26 = vld [vmem:[%s1943_s1 + $0x88] sm:$0xff]  ;;  %v1442_v30 = vld [vmem:[%s1943_s1 + $0x80] sm:$0xff]  ;;  %v1489_v46 = vld [vmem:[%s1943_s1 + $0x1f8] sm:$0xff] }
   0xc   :  { %781 = vmatpush.bf16.msra.mxu2 %v1447_v10  ;;  %v1451_v27 = vld [vmem:[%s1943_s1 + $0xc8] sm:$0xff]  ;;  %v1450_v31 = vld [vmem:[%s1943_s1 + $0xc0] sm:$0xff]  ;;  %v1473_v47 = vld [vmem:[%s1943_s1 + $0x178] sm:$0xff] }
   0xd   :  { %809 = vmatpush.bf16.msra.mxu3 %v1455_v11  ;;  %v1052_v32 = vld [vmem:[%s1944_s0] sm:$0xf]  ;;  %v1402_v34 = vld [vmem:[%s1944_s0 + $0x4] sm:$0xf]  ;;  %v1060_v36 = vld [vmem:[%s1944_s0 + $0x8] sm:$0xf] }
   0xe   :  { %726 = vmatpush.bf16.msra.mxu0 %v1430_v12  ;;  %v1406_v33 = vld [vmem:[%s1944_s0 + $0x1c] sm:$0xf0]  ;;  %v1054_v35 = vld [vmem:[%s1944_s0 + $0x20] sm:$0xf0]  ;;  %v1407_v37 = vld [vmem:[%s1944_s0 + $0x24] sm:$0xf0] }
   0xf   :  { %754 = vmatpush.bf16.msra.mxu1 %v1438_v13  ;;  %v1403_v38 = vld [vmem:[%s1944_s0 + $0xc] sm:$0xf]  ;;  %v1053_v42 = vor.u32 %v1406_v33, %v1052_v32  ;;  %v1057_v43 = vor.u32 %v1402_v34, %v1054_v35  ;;  %v1061_v44 = vor.u32 %v1407_v37, %v1060_v36  ;;  %v1480_v48 = vld [vmem:[%s1943_s1 + $0x1b0] sm:$0xff]  ;;  %v1084_v56 = vld [vmem:[%s1944_s0 + $0x40] sm:$0xf] }
  0x10   :  { %782 = vmatpush.bf16.msra.mxu2 %v1446_v14  ;;  %v1062_v39 = vld [vmem:[%s1944_s0 + $0x28] sm:$0xf0]  ;;  %v1464_v49 = vld [vmem:[%s1943_s1 + $0x130] sm:$0xff]  ;;  %v1478_v57 = vld [vmem:[%s1943_s1 + $0x1a0] sm:$0xff] }
  0x11   :  { %810 = vmatpush.bf16.msra.mxu3 %v1454_v15  ;;  %v1065_v45 = vor.u32 %v1403_v38, %v1062_v39  ;;  %v1488_v50 = vld [vmem:[%s1943_s1 + $0x1f0] sm:$0xff]  ;;  %v1479_v52 = vld [vmem:[%s1943_s1 + $0x1a8] sm:$0xff]  ;;  %v1462_v58 = vld [vmem:[%s1943_s1 + $0x120] sm:$0xff] }
  0x12   :  { %727 = vmatpush.bf16.msra.mxu0 %v1429_v16  ;;  %v1472_v51 = vld [vmem:[%s1943_s1 + $0x170] sm:$0xff]  ;;  %v1463_v53 = vld [vmem:[%s1943_s1 + $0x128] sm:$0xff]  ;;  %v1414_v59 = vld [vmem:[%s1944_s0 + $0x5c] sm:$0xf0] }
  0x13   :  { %755 = vmatpush.bf16.msra.mxu1 %v1437_v17  ;;  %v1487_v54 = vld [vmem:[%s1943_s1 + $0x1e8] sm:$0xff]  ;;  %v1410_v60 = vld [vmem:[%s1944_s0 + $0x44] sm:$0xf]  ;;  %v1477_v4 = vld [vmem:[%s1943_s1 + $0x198] sm:$0xff]  ;;  %v1085_v6 = vor.u32 %v1414_v59, %v1084_v56 }
  0x14   :  { %783 = vmatpush.bf16.msra.mxu2 %v1445_v18  ;;  %v1471_v55 = vld [vmem:[%s1943_s1 + $0x168] sm:$0xff]  ;;  %v1086_v61 = vld [vmem:[%s1944_s0 + $0x60] sm:$0xf0]  ;;  %v1461_v5 = vld [vmem:[%s1943_s1 + $0x118] sm:$0xff] }
  0x15   :  { %811 = vmatpush.bf16.msra.mxu3 %v1453_v19  ;;  %v1092_v62 = vld [vmem:[%s1944_s0 + $0x48] sm:$0xf]  ;;  %v1411_v0 = vld [vmem:[%s1944_s0 + $0x4c] sm:$0xf]  ;;  %v1486_v2 = vld [vmem:[%s1943_s1 + $0x1e0] sm:$0xff]  ;;  %v1089_v7 = vor.u32 %v1410_v60, %v1086_v61 }
  0x16   :  { %728 = vmatpush.bf16.msra.mxu0 %v1428_v20  ;;  %v1415_v63 = vld [vmem:[%s1944_s0 + $0x64] sm:$0xf0]  ;;  %v1094_v1 = vld [vmem:[%s1944_s0 + $0x68] sm:$0xf0]  ;;  %v1470_v3 = vld [vmem:[%s1943_s1 + $0x160] sm:$0xff] }
  0x17   :  { %756 = vmatpush.bf16.msra.mxu1 %v1436_v21  ;;  %v1093_v8 = vor.u32 %v1415_v63, %v1092_v62  ;;  %v1097_v9 = vor.u32 %v1411_v0, %v1094_v1  ;;  %v1485_v10 = vld [vmem:[%s1943_s1 + $0x1d8] sm:$0xff]  ;;  %v1476_v12 = vld [vmem:[%s1943_s1 + $0x190] sm:$0xff]  ;;  %v1475_v16 = vld [vmem:[%s1943_s1 + $0x188] sm:$0xff] }
  0x18   :  { %784 = vmatpush.bf16.msra.mxu2 %v1444_v22  ;;  %v1469_v11 = vld [vmem:[%s1943_s1 + $0x158] sm:$0xff]  ;;  %v1460_v13 = vld [vmem:[%s1943_s1 + $0x110] sm:$0xff]  ;;  %v1459_v17 = vld [vmem:[%s1943_s1 + $0x108] sm:$0xff] }
  0x19   :  { %812 = vmatpush.bf16.msra.mxu3 %v1452_v23  ;;  %v1484_v14 = vld [vmem:[%s1943_s1 + $0x1d0] sm:$0xff]  ;;  %v1483_v18 = vld [vmem:[%s1943_s1 + $0x1c8] sm:$0xff]  ;;  %v1116_v20 = vld [vmem:[%s1944_s0 + $0x80] sm:$0xf] }
  0x1a   :  { %729 = vmatpush.bf16.msra.mxu0 %v1427_v24  ;;  %v1468_v15 = vld [vmem:[%s1943_s1 + $0x150] sm:$0xff]  ;;  %v1467_v19 = vld [vmem:[%s1943_s1 + $0x148] sm:$0xff]  ;;  %v1474_v21 = vld [vmem:[%s1943_s1 + $0x180] sm:$0xff] }
  0x1b   :  { %757 = vmatpush.bf16.msra.mxu1 %v1435_v25  ;;  %v1458_v22 = vld [vmem:[%s1943_s1 + $0x100] sm:$0xff]  ;;  %v60_v37 = vld [vmem:[%s1944_s0 + $0xc8] sm:$0xff]  ;;  %v1416_v59 = vld [vmem:[%s1944_s0 + $0x6c] sm:$0xf0] }
  0x1c   :  { %785 = vmatpush.bf16.msra.mxu2 %v1443_v26  ;;  %v1422_v23 = vld [vmem:[%s1944_s0 + $0x9c] sm:$0xf0]  ;;  %v1418_v24 = vld [vmem:[%s1944_s0 + $0x84] sm:$0xf]  ;;  %v1124_v26 = vld [vmem:[%s1944_s0 + $0x88] sm:$0xf] }
  0x1d   :  { %813 = vmatpush.bf16.msra.mxu3 %v1451_v27  ;;  %v1118_v25 = vld [vmem:[%s1944_s0 + $0xa0] sm:$0xf0]  ;;  %v1423_v27 = vld [vmem:[%s1944_s0 + $0xa4] sm:$0xf0]  ;;  %v1117_v32 = vor.u32 %v1422_v23, %v1116_v20  ;;  %v1412_v60 = vld [vmem:[%s1944_s0 + $0x54] sm:$0xf] }
  0x1e   :  { %730 = vmatpush.bf16.msra.mxu0 %v1426_v28  ;;  %v1419_v28 = vld [vmem:[%s1944_s0 + $0x8c] sm:$0xf]  ;;  %v1121_v33 = vor.u32 %v1418_v24, %v1118_v25  ;;  %v1125_v34 = vor.u32 %v1423_v27, %v1124_v26  ;;  %v59_v36 = vld [vmem:[%s1944_s0 + $0xc0] sm:$0xff]  ;;  %v1102_v61 = vld [vmem:[%s1944_s0 + $0x70] sm:$0xf0] }
  0x1f   :  { %758 = vmatpush.bf16.msra.mxu1 %v1434_v29  ;;  %v1126_v29 = vld [vmem:[%s1944_s0 + $0xa8] sm:$0xf0]  ;;  %v267_v38 = vunpack.c.l.b16 %v59_v36  ;;  %v268_v39 = vunpack.c.h.b16 %v59_v36  ;;  %v1108_v62 = vld [vmem:[%s1944_s0 + $0x58] sm:$0xf]  ;;  %v1413_v0 = vld [vmem:[%s1944_s0 + $0x5c] sm:$0xf] }
  0x20   :  { %786 = vmatpush.bf16.msra.mxu2 %v1442_v30  ;;  %v1482_v30 = vld [vmem:[%s1943_s1 + $0x1c0] sm:$0xff]  ;;  %v1129_v35 = vor.u32 %v1419_v28, %v1126_v29  ;;  %v1417_v63 = vld [vmem:[%s1944_s0 + $0x74] sm:$0xf0]  ;;  %v1110_v1 = vld [vmem:[%s1944_s0 + $0x78] sm:$0xf0] }
  0x21   :  { %814 = vmatpush.bf16.msra.mxu3 %v1450_v31  ;;  %731 = vmatmul.bf16.vlgmr.msra.gmra.mxu0 %v1053_v42  ;;  %v1466_v31 = vld [vmem:[%s1943_s1 + $0x140] sm:$0xff]  ;;  %v299_v42 = vpack.c.b16 %v267_v38, %v267_v38 }
  0x22   :  { %835 = vmatpush.bf16.msrb.mxu0 %v1465_v41  ;;  %759 = vmatmul.bf16.vlgmr.msra.gmra.mxu1 %v1057_v43  ;;  %v270_v41 = vunpack.c.h.b16 %v60_v37  ;;  %v300_v43 = vpack.c.b16 %v268_v39, %v268_v39 }
  0x23   :  { %787 = vmatmul.bf16.vlgmr.msra.gmra.mxu2 %v1061_v44  ;;  %863 = vmatpush.bf16.msrb.mxu1 %v1473_v47  ;;  %v1408_v47 = vld [vmem:[%s1944_s0 + $0x2c] sm:$0xf0] }
  0x24   :  { %891 = vmatpush.bf16.msrb.mxu2 %v1481_v40  ;;  %815 = vmatmul.bf16.vlgmr.msra.gmra.mxu3 %v1065_v45  ;;  %v269_v40 = vunpack.c.l.b16 %v60_v37  ;;  %v302_v45 = vpack.c.b16 %v270_v41, %v270_v41 }
  0x25   :  { %919 = vmatpush.bf16.msrb.mxu3 %v1489_v46  ;;  %v1068_v46 = vld [vmem:[%s1944_s0 + $0x10] sm:$0xf] }
  0x26   :  { %836 = vmatpush.bf16.msrb.mxu0 %v1464_v49  ;;  %v301_v44 = vpack.c.b16 %v269_v40, %v269_v40  ;;  %v1070_v49 = vld [vmem:[%s1944_s0 + $0x30] sm:$0xf0] }
  0x27   :  { %864 = vmatpush.bf16.msrb.mxu1 %v1472_v51  ;;  %v1409_v51 = vld [vmem:[%s1944_s0 + $0x34] sm:$0xf0] }
  0x28   :  { %892 = vmatpush.bf16.msrb.mxu2 %v1480_v48  ;;  %v1404_v48 = vld [vmem:[%s1944_s0 + $0x14] sm:$0xf] }
  0x29   :  { %920 = vmatpush.bf16.msrb.mxu3 %v1488_v50  ;;  %v1076_v50 = vld [vmem:[%s1944_s0 + $0x18] sm:$0xf] }
  0x2a   :  { %837 = vmatpush.bf16.msrb.mxu0 %v1463_v53  ;;  %v1078_v53 = vld [vmem:[%s1944_s0 + $0x38] sm:$0xf0]  ;;  %v1077_v56 = vor.u32 %v1409_v51, %v1076_v50 }
  0x2b   :  { %865 = vmatpush.bf16.msrb.mxu1 %v1471_v55  ;;  %v1073_v55 = vor.u32 %v1404_v48, %v1070_v49 }
  0x2c   :  { %893 = vmatpush.bf16.msrb.mxu2 %v1479_v52  ;;  %v1405_v52 = vld [vmem:[%s1944_s0 + $0x1c] sm:$0xf] }
  0x2d   :  { %921 = vmatpush.bf16.msrb.mxu3 %v1487_v54  ;;  %v1069_v54 = vor.u32 %v1408_v47, %v1068_v46 }
  0x2e   :  { %838 = vmatpush.bf16.msrb.mxu0 %v1462_v58  ;;  %v1100_v58 = vld [vmem:[%s1944_s0 + $0x50] sm:$0xf] }
  0x2f   :  { %866 = vmatpush.bf16.msrb.mxu1 %v1470_v3  ;;  %v1105_v3 = vor.u32 %v1412_v60, %v1102_v61 }
  0x30   :  { %894 = vmatpush.bf16.msrb.mxu2 %v1478_v57  ;;  %v1081_v57 = vor.u32 %v1405_v52, %v1078_v53 }
  0x31   :  { %922 = vmatpush.bf16.msrb.mxu3 %v1486_v2  ;;  %736 = vmatmul.bf16.gmra.mxu0 %v1085_v6  ;;  %v1101_v2 = vor.u32 %v1416_v59, %v1100_v58  ;;  %v1132_v6 = vld [vmem:[%s1944_s0 + $0x90] sm:$0xf] }
  0x32   :  { %839 = vmatpush.bf16.msrb.mxu0 %v1461_v5  ;;  %764 = vmatmul.bf16.gmra.mxu1 %v1089_v7  ;;  %v1113_v5 = vor.u32 %v1413_v0, %v1110_v1  ;;  %v1424_v7 = vld [vmem:[%s1944_s0 + $0xac] sm:$0xf0] }
  0x33   :  { %792 = vmatmul.bf16.gmra.mxu2 %v1093_v8  ;;  %867 = vmatpush.bf16.msrb.mxu1 %v1469_v11  ;;  %v1420_v8 = vld [vmem:[%s1944_s0 + $0x94] sm:$0xf]  ;;  %v1425_v11 = vld [vmem:[%s1944_s0 + $0xb4] sm:$0xf0] }
  0x34   :  { %895 = vmatpush.bf16.msrb.mxu2 %v1477_v4  ;;  %820 = vmatmul.bf16.gmra.mxu3 %v1097_v9  ;;  %v1109_v4 = vor.u32 %v1417_v63, %v1108_v62  ;;  %v1134_v9 = vld [vmem:[%s1944_s0 + $0xb0] sm:$0xf0] }
  0x35   :  { %923 = vmatpush.bf16.msrb.mxu3 %v1485_v10  ;;  %v1140_v10 = vld [vmem:[%s1944_s0 + $0x98] sm:$0xf] }
  0x36   :  { %840 = vmatpush.bf16.msrb.mxu0 %v1460_v13  ;;  %v1142_v13 = vld [vmem:[%s1944_s0 + $0xb8] sm:$0xf0] }
  0x37   :  { %868 = vmatpush.bf16.msrb.mxu1 %v1468_v15  ;;  %v1137_v15 = vor.u32 %v1420_v8, %v1134_v9 }
  0x38   :  { %896 = vmatpush.bf16.msrb.mxu2 %v1476_v12  ;;  %v1421_v12 = vld [vmem:[%s1944_s0 + $0x9c] sm:$0xf] }
  0x39   :  { %924 = vmatpush.bf16.msrb.mxu3 %v1484_v14  ;;  %v1133_v14 = vor.u32 %v1424_v7, %v1132_v6 }
  0x3a   :  { %841 = vmatpush.bf16.msrb.mxu0 %v1459_v17  ;;  %v1145_v17 = vor.u32 %v1421_v12, %v1142_v13 }
  0x3b   :  { %869 = vmatpush.bf16.msrb.mxu1 %v1467_v19  ;;  %v62_v19 = vld [vmem:[%s1944_s0 + $0xd8] sm:$0xff] }
  0x3c   :  { %897 = vmatpush.bf16.msrb.mxu2 %v1475_v16  ;;  %v1141_v16 = vor.u32 %v1425_v11, %v1140_v10  ;;  %v274_v23 = vunpack.c.h.b16 %v62_v19 }
  0x3d   :  { %925 = vmatpush.bf16.msrb.mxu3 %v1483_v18  ;;  %v61_v18 = vld [vmem:[%s1944_s0 + $0xd0] sm:$0xff] }
  0x3e   :  { %842 = vmatpush.bf16.msrb.mxu0 %v1458_v22  ;;  %v271_v20 = vunpack.c.l.b16 %v61_v18  ;;  %v273_v22 = vunpack.c.l.b16 %v62_v19  ;;  %v306_v27 = vpack.c.b16 %v274_v23, %v274_v23 }
  0x3f   :  { %870 = vmatpush.bf16.msrb.mxu1 %v1466_v31 }
  0x40   :  { %898 = vmatpush.bf16.msrb.mxu2 %v1474_v21  ;;  %v272_v21 = vunpack.c.h.b16 %v61_v18  ;;  %v303_v24 = vpack.c.b16 %v271_v20, %v271_v20  ;;  %v305_v26 = vpack.c.b16 %v273_v22, %v273_v22  ;;  %v1907_v22 = vld [vmem:[%s1945_s2] ss:$0 sm:$0xff] }
  0x41   :  { %926 = vmatpush.bf16.msrb.mxu3 %v1482_v30  ;;  %741 = vmatmul.bf16.gmra.mxu0 %v1117_v32 }
  0x42   :  { %769 = vmatmul.bf16.gmra.mxu1 %v1121_v33  ;;  %v304_v25 = vpack.c.b16 %v272_v21, %v272_v21 }
  0x43   :  { %797 = vmatmul.bf16.gmra.mxu2 %v1125_v34 }
  0x44   :  { %825 = vmatmul.bf16.gmra.mxu3 %v1129_v35 }
  0x51   :  { %746 = vmatmul.bf16.gmra.mxu0 %v299_v42 }
  0x52   :  { %774 = vmatmul.bf16.gmra.mxu1 %v300_v43 }
  0x53   :  { %802 = vmatmul.bf16.gmra.mxu2 %v301_v44 }
  0x54   :  { %830 = vmatmul.bf16.gmra.mxu3 %v302_v45 }
  0x61   :  { %843 = vmatmul.bf16.vlgmr.msrb.gmra.mxu0 %v1069_v54 }
  0x62   :  { %871 = vmatmul.bf16.vlgmr.msrb.gmra.mxu1 %v1073_v55 }
  0x63   :  { %899 = vmatmul.bf16.vlgmr.msrb.gmra.mxu2 %v1077_v56 }
  0x64   :  { %927 = vmatmul.bf16.vlgmr.msrb.gmra.mxu3 %v1081_v57 }
  0x71   :  { %848 = vmatmul.bf16.gmra.mxu0 %v1101_v2 }
  0x72   :  { %876 = vmatmul.bf16.gmra.mxu1 %v1105_v3 }
  0x73   :  { %904 = vmatmul.bf16.gmra.mxu2 %v1109_v4 }
  0x74   :  { %932 = vmatmul.bf16.gmra.mxu3 %v1113_v5 }
  0x81   :  { %853 = vmatmul.bf16.gmra.mxu0 %v1133_v14 }
  0x82   :  { %881 = vmatmul.bf16.gmra.mxu1 %v1137_v15 }
  0x83   :  { %909 = vmatmul.bf16.gmra.mxu2 %v1141_v16 }
  0x84   :  { %937 = vmatmul.bf16.gmra.mxu3 %v1145_v17 }
  0x91   :  { %858 = vmatmul.bf16.gmra.mxu0 %v303_v24 }
  0x92   :  { %886 = vmatmul.bf16.gmra.mxu1 %v304_v25 }
  0x93   :  { %914 = vmatmul.bf16.gmra.mxu2 %v305_v26 }
  0x94   :  { %942 = vmatmul.bf16.gmra.mxu3 %v306_v27 }
  0x9e   :  { %v732_v28 = vpop.f32.mrf.mxu0 }
  0x9f   :  { %v760_v29 = vpop.f32.mrf.mxu1 }
  0xa0   :  { %v761_v30 = vadd.f32 %v760_v29, %v732_v28 }
  0xa6   :  { %v788_v31 = vpop.f32.mrf.mxu2  ;;  %v734_v34 = vpop.f32.mrf.mxu0 }
  0xa7   :  { %v816_v32 = vpop.f32.mrf.mxu3  ;;  %v789_v33 = vadd.f32 %v788_v31, %v761_v30  ;;  %v762_v35 = vpop.f32.mrf.mxu1 }
  0xa8   :  { %v763_v7 = vadd.f32 %v762_v35, %v734_v34 }
  0xa9   :  { %v817_v36 = vadd.f32 %v816_v32, %v789_v33 }
  0xae   :  { %v790_v37 = vpop.f32.mrf.mxu2  ;;  %v737_v39 = vpop.f32.mrf.mxu0 }
  0xaf   :  { %v818_v38 = vpop.f32.mrf.mxu3  ;;  %v765_v40 = vpop.f32.mrf.mxu1  ;;  %v791_v8 = vadd.f32 %v790_v37, %v763_v7 }
  0xb0   :  { %v766_v41 = vadd.f32 %v765_v40, %v737_v39 }
  0xb1   :  { %v819_v12 = vadd.f32 %v818_v38, %v791_v8 }
  0xb6   :  { %v793_v42 = vpop.f32.mrf.mxu2  ;;  %v739_v45 = vpop.f32.mrf.mxu0 }
  0xb7   :  { %v821_v43 = vpop.f32.mrf.mxu3  ;;  %v794_v44 = vadd.f32 %v793_v42, %v766_v41  ;;  %v767_v46 = vpop.f32.mrf.mxu1 }
  0xb8   :  { %v768_v26 = vadd.f32 %v767_v46, %v739_v45 }
  0xb9   :  { %v822_v47 = vadd.f32 %v821_v43, %v794_v44 }
  0xbe   :  { %v795_v48 = vpop.f32.mrf.mxu2  ;;  %v742_v50 = vpop.f32.mrf.mxu0 }
  0xbf   :  { %v823_v49 = vpop.f32.mrf.mxu3  ;;  %v770_v51 = vpop.f32.mrf.mxu1  ;;  %v796_v29 = vadd.f32 %v795_v48, %v768_v26 }
  0xc0   :  { %v771_v52 = vadd.f32 %v770_v51, %v742_v50 }
  0xc6   :  { %v798_v53 = vpop.f32.mrf.mxu2  ;;  %v1886_v56 = vpop.f32.mrf.mxu0 }
  0xc7   :  { %v826_v54 = vpop.f32.mrf.mxu3  ;;  %v799_v55 = vadd.f32 %v798_v53, %v771_v52  ;;  %v1888_v57 = vpop.f32.mrf.mxu1 }
  0xc9   :  { %v1890_v58 = vadd.f32 %v826_v54, %v799_v55 }
  0xce   :  { %v1892_v59 = vpop.f32.mrf.mxu2  ;;  %v1896_v61 = vpop.f32.mrf.mxu0 }
  0xcf   :  { %v1894_v60 = vpop.f32.mrf.mxu3  ;;  %v1898_v62 = vpop.f32.mrf.mxu1 }
  0xd6   :  { %v1900_v63 = vpop.f32.mrf.mxu2  ;;  %v749_v1 = vpop.f32.mrf.mxu0 }
  0xd7   :  { %v1902_v0 = vpop.f32.mrf.mxu3  ;;  %v777_v2 = vpop.f32.mrf.mxu1  ;;  %v773_v1 = vadd.f32 %v1888_v57, %v1886_v56  ;;  %v776_v57 = vadd.f32 %v1898_v62, %v1896_v61 }
  0xde   :  { %v805_v3 = vpop.f32.mrf.mxu2  ;;  %v844_v5 = vpop.f32.mrf.mxu0 }
  0xdf   :  { %v833_v4 = vpop.f32.mrf.mxu3  ;;  %v872_v6 = vpop.f32.mrf.mxu1  ;;  %v845_v9 = vadd.f32 %v844_v5, %v817_v36  ;;  %v824_v36 = vadd.f32 %v823_v49, %v796_v29 }
  0xe0   :  { %v801_v4 = vadd.f32 %v1892_v59, %v773_v1 }
  0xe1   :  { %v873_v15 = vadd.f32 %v872_v6, %v845_v9 }
  0xe6   :  { %v900_v10 = vpop.f32.mrf.mxu2  ;;  %v846_v13 = vpop.f32.mrf.mxu0 }
  0xe7   :  { %v928_v11 = vpop.f32.mrf.mxu3  ;;  %v874_v14 = vpop.f32.mrf.mxu1  ;;  %v847_v16 = vadd.f32 %v846_v13, %v819_v12  ;;  %v901_v17 = vadd.f32 %v900_v10, %v873_v15  ;;  %v829_v10 = vadd.f32 %v1894_v60, %v801_v4 }
  0xe9   :  { %v875_v18 = vadd.f32 %v874_v14, %v847_v16  ;;  %v929_v21 = vadd.f32 %v928_v11, %v901_v17  ;;  %v804_v14 = vadd.f32 %v1900_v63, %v776_v57 }
  0xeb   :  { %v975_v30 = vadd.f32 %v1907_v22, %v929_v21 }
  0xed   :  { %v1003_v43 = vmul.f32 %v975_v30, %v975_v30 }
  0xee   :  { %v902_v19 = vpop.f32.mrf.mxu2  ;;  %v849_v24 = vpop.f32.mrf.mxu0 }
  0xef   :  { %v930_v20 = vpop.f32.mrf.mxu3  ;;  %v903_v23 = vadd.f32 %v902_v19, %v875_v18  ;;  %v877_v25 = vpop.f32.mrf.mxu1  ;;  %v850_v28 = vadd.f32 %v849_v24, %v822_v47 }
  0xf1   :  { %v931_v27 = vadd.f32 %v930_v20, %v903_v23  ;;  %v878_v33 = vadd.f32 %v877_v25, %v850_v28  ;;  %v832_v23 = vadd.f32 %v1902_v0, %v804_v14 }
  0xf3   :  { %v976_v31 = vadd.f32 %v1907_v22, %v931_v27 }
  0xf5   :  { %v1493_v32 = vpack.c.bf16 %v976_v31, %v975_v30  ;;  %v1004_v40 = vmul.f32 %v976_v31, %v976_v31  ;;  %v996_v44 = vadd.f32 %v976_v31, %v975_v30 }
  0xf6   :  { %v905_v34 = vpop.f32.mrf.mxu2  ;;  %v851_v38 = vpop.f32.mrf.mxu0 }
  0xf7   :  { %v933_v35 = vpop.f32.mrf.mxu3  ;;  %1494 = vst [vmem:[%s1946_s3] sm:$0xff] %v1493_v32   ;;  %v906_v37 = vadd.f32 %v905_v34, %v878_v33  ;;  %v879_v39 = vpop.f32.mrf.mxu1  ;;  %v852_v42 = vadd.f32 %v851_v38, %v824_v36  ;;  %v1010_v46 = vadd.f32 %v1004_v40, %v1003_v43 }
  0xf9   :  { %v934_v41 = vadd.f32 %v933_v35, %v906_v37  ;;  %v880_v50 = vadd.f32 %v879_v39, %v852_v42 }
  0xfb   :  { %v977_v45 = vadd.f32 %v1907_v22, %v934_v41 }
  0xfd   :  { %v997_v47 = vadd.f32 %v996_v44, %v977_v45  ;;  %v1005_v48 = vmul.f32 %v977_v45, %v977_v45 }
  0xfe   :  { %v907_v51 = vpop.f32.mrf.mxu2  ;;  %v854_v54 = vpop.f32.mrf.mxu0 }
  0xff   :  { %v935_v49 = vpop.f32.mrf.mxu3  ;;  %v1011_v52 = vadd.f32 %v1010_v46, %v1005_v48  ;;  %v908_v53 = vadd.f32 %v907_v51, %v880_v50  ;;  %v882_v55 = vpop.f32.mrf.mxu1  ;;  %v855_v3 = vadd.f32 %v854_v54, %v1890_v58 }
 0x101   :  { %v936_v2 = vadd.f32 %v935_v49, %v908_v53  ;;  %v883_v7 = vadd.f32 %v882_v55, %v855_v3 }
 0x103   :  { %v978_v5 = vadd.f32 %v1907_v22, %v936_v2 }
 0x105   :  { %v1498_v6 = vpack.c.bf16 %v978_v5, %v977_v45  ;;  %v1006_v58 = vmul.f32 %v978_v5, %v978_v5  ;;  %v998_v15 = vadd.f32 %v997_v47, %v978_v5 }
 0x106   :  { %v910_v8 = vpop.f32.mrf.mxu2  ;;  %v856_v12 = vpop.f32.mrf.mxu0 }
 0x107   :  { %v938_v9 = vpop.f32.mrf.mxu3  ;;  %1505 = vst [vmem:[%s1946_s3 + $0x8] sm:$0xff] %v1498_v6   ;;  %v911_v11 = vadd.f32 %v910_v8, %v883_v7  ;;  %v884_v56 = vpop.f32.mrf.mxu1  ;;  %v857_v13 = vadd.f32 %v856_v12, %v829_v10  ;;  %v1012_v17 = vadd.f32 %v1011_v52, %v1006_v58 }
 0x109   :  { %v939_v59 = vadd.f32 %v938_v9, %v911_v11  ;;  %v885_v19 = vadd.f32 %v884_v56, %v857_v13 }
 0x10b   :  { %v979_v16 = vadd.f32 %v1907_v22, %v939_v59 }
 0x10d   :  { %v999_v60 = vadd.f32 %v998_v15, %v979_v16  ;;  %v1007_v18 = vmul.f32 %v979_v16, %v979_v16 }
 0x10e   :  { %v912_v20 = vpop.f32.mrf.mxu2  ;;  %v859_v26 = vpop.f32.mrf.mxu0 }
 0x10f   :  { %v940_v21 = vpop.f32.mrf.mxu3  ;;  %v1013_v24 = vadd.f32 %v1012_v17, %v1007_v18  ;;  %v913_v25 = vadd.f32 %v912_v20, %v885_v19  ;;  %v887_v61 = vpop.f32.mrf.mxu1  ;;  %v860_v27 = vadd.f32 %v859_v26, %v832_v23 }
 0x111   :  { %v941_v62 = vadd.f32 %v940_v21, %v913_v25  ;;  %v888_v29 = vadd.f32 %v887_v61, %v860_v27 }
 0x113   :  { %v980_v28 = vadd.f32 %v1907_v22, %v941_v62 }
 0x115   :  { %v1503_v63 = vpack.c.bf16 %v980_v28, %v979_v16  ;;  %v1008_v0 = vmul.f32 %v980_v28, %v980_v28  ;;  %v1000_v36 = vadd.f32 %v999_v60, %v980_v28 }
 0x116   :  { %v915_v30 = vpop.f32.mrf.mxu2  ;;  %v861_v33 = vpop.f32.mrf.mxu0 }
 0x117   :  { %v943_v31 = vpop.f32.mrf.mxu3  ;;  %1506 = vst [vmem:[%s1946_s3 + $0x10] sm:$0xff] %v1503_v63   ;;  %v916_v32 = vadd.f32 %v915_v30, %v888_v29  ;;  %v889_v34 = vpop.f32.mrf.mxu1  ;;  %v1014_v38 = vadd.f32 %v1013_v24, %v1008_v0 }
 0x119   :  { %v944_v35 = vadd.f32 %v943_v31, %v916_v32 }
 0x11b   :  { %v981_v37 = vadd.f32 %v1907_v22, %v944_v35 }
 0x11d   :  { %v1001_v39 = vadd.f32 %v1000_v36, %v981_v37  ;;  %v1009_v40 = vmul.f32 %v981_v37, %v981_v37  ;;  %v1030_v41 = vpack.c.bf16 %v981_v37, %v981_v37 }
 0x11e   :  { %v917_v42 = vpop.f32.mrf.mxu2 }
 0x11f   :  { %v945_v43 = vpop.f32.mrf.mxu3  ;;  %1002 = vst [vmem:[%s1947_s4] sm:$0xff] %v1001_v39  ;;  %v1015_v44 = vadd.f32 %v1014_v38, %v1009_v40 }
 0x120   :  { %1037 = vst [vmem:[%s1946_s3 + $0x18] sm:$0xf] %v1030_v41 }
 0x121   :  { %1016 = vst [vmem:[%s1948_s5] sm:$0xff] %v1015_v44 }

// kernel: _lambda_.8
= control target key start
LH: loop header
LB: loop body
LE: loop exit
PB: predicated region body
PF: predicated region fallthrough
CT: control target
= control target key end

     0   :  { %s5545_s1 = inlined_call_operand.vmem [shape: bf16[2048,128], index: 1, kind: input, shape index: {}]   ;;  %s5546_s0 = inlined_call_operand.vmem [shape: bf16[128,2048], index: 0, kind: input, shape index: {}]   ;;  %s5547_s2 = inlined_call_operand.vmem [shape: f32[1,128], index: 2, kind: input, shape index: {}]   ;;  %s5548_s3 = inlined_call_operand.vmem [shape: bf16[128,128], index: 3, kind: output, shape index: {0}]   ;;  %s5549_s4 = inlined_call_operand.vmem [shape: f32[8,128], index: 4, kind: output, shape index: {1}]   ;;  %s5550_s5 = inlined_call_operand.vmem [shape: f32[8,128], index: 5, kind: output, shape index: {2}]  }
   0x1   :  { %v3999_v0 = vld [vmem:[%s5545_s1 + $0x38] sm:$0xff]  ;;  %v3998_v4 = vld [vmem:[%s5545_s1 + $0x30] sm:$0xff]  ;;  %v3997_v8 = vld [vmem:[%s5545_s1 + $0x28] sm:$0xff] }
   0x2   :  { %v4007_v1 = vld [vmem:[%s5545_s1 + $0x78] sm:$0xff]  ;;  %1845 = vmatpush.bf16.msra.mxu0 %v3999_v0  ;;  %v4006_v5 = vld [vmem:[%s5545_s1 + $0x70] sm:$0xff]  ;;  %v4005_v9 = vld [vmem:[%s5545_s1 + $0x68] sm:$0xff] }
   0x3   :  { %v4015_v2 = vld [vmem:[%s5545_s1 + $0xb8] sm:$0xff]  ;;  %1894 = vmatpush.bf16.msra.mxu1 %v4007_v1  ;;  %v4014_v6 = vld [vmem:[%s5545_s1 + $0xb0] sm:$0xff]  ;;  %v4013_v10 = vld [vmem:[%s5545_s1 + $0xa8] sm:$0xff] }
   0x4   :  { %v4023_v3 = vld [vmem:[%s5545_s1 + $0xf8] sm:$0xff]  ;;  %1943 = vmatpush.bf16.msra.mxu2 %v4015_v2  ;;  %v4022_v7 = vld [vmem:[%s5545_s1 + $0xf0] sm:$0xff]  ;;  %v4021_v11 = vld [vmem:[%s5545_s1 + $0xe8] sm:$0xff] }
   0x5   :  { %1992 = vmatpush.bf16.msra.mxu3 %v4023_v3  ;;  %v3996_v12 = vld [vmem:[%s5545_s1 + $0x20] sm:$0xff]  ;;  %v3995_v16 = vld [vmem:[%s5545_s1 + $0x18] sm:$0xff]  ;;  %v3994_v20 = vld [vmem:[%s5545_s1 + $0x10] sm:$0xff] }
   0x6   :  { %1846 = vmatpush.bf16.msra.mxu0 %v3998_v4  ;;  %v4004_v13 = vld [vmem:[%s5545_s1 + $0x60] sm:$0xff]  ;;  %v4003_v17 = vld [vmem:[%s5545_s1 + $0x58] sm:$0xff]  ;;  %v4002_v21 = vld [vmem:[%s5545_s1 + $0x50] sm:$0xff] }
   0x7   :  { %1895 = vmatpush.bf16.msra.mxu1 %v4006_v5  ;;  %v4012_v14 = vld [vmem:[%s5545_s1 + $0xa0] sm:$0xff]  ;;  %v4011_v18 = vld [vmem:[%s5545_s1 + $0x98] sm:$0xff]  ;;  %v4010_v22 = vld [vmem:[%s5545_s1 + $0x90] sm:$0xff] }
   0x8   :  { %1944 = vmatpush.bf16.msra.mxu2 %v4014_v6  ;;  %v4020_v15 = vld [vmem:[%s5545_s1 + $0xe0] sm:$0xff]  ;;  %v4019_v19 = vld [vmem:[%s5545_s1 + $0xd8] sm:$0xff]  ;;  %v4018_v23 = vld [vmem:[%s5545_s1 + $0xd0] sm:$0xff] }
   0x9   :  { %1993 = vmatpush.bf16.msra.mxu3 %v4022_v7  ;;  %v3993_v24 = vld [vmem:[%s5545_s1 + $0x8] sm:$0xff]  ;;  %v3992_v28 = vld [vmem:[%s5545_s1] sm:$0xff]  ;;  %v4047_v40 = vld [vmem:[%s5545_s1 + $0x1b8] sm:$0xff] }
   0xa   :  { %1847 = vmatpush.bf16.msra.mxu0 %v3997_v8  ;;  %v4001_v25 = vld [vmem:[%s5545_s1 + $0x48] sm:$0xff]  ;;  %v4000_v29 = vld [vmem:[%s5545_s1 + $0x40] sm:$0xff]  ;;  %v4031_v41 = vld [vmem:[%s5545_s1 + $0x138] sm:$0xff] }
   0xb   :  { %1896 = vmatpush.bf16.msra.mxu1 %v4005_v9  ;;  %v4009_v26 = vld [vmem:[%s5545_s1 + $0x88] sm:$0xff]  ;;  %v4008_v30 = vld [vmem:[%s5545_s1 + $0x80] sm:$0xff]  ;;  %v4055_v46 = vld [vmem:[%s5545_s1 + $0x1f8] sm:$0xff] }
   0xc   :  { %1945 = vmatpush.bf16.msra.mxu2 %v4013_v10  ;;  %v4017_v27 = vld [vmem:[%s5545_s1 + $0xc8] sm:$0xff]  ;;  %v4016_v31 = vld [vmem:[%s5545_s1 + $0xc0] sm:$0xff]  ;;  %v4039_v47 = vld [vmem:[%s5545_s1 + $0x178] sm:$0xff] }
   0xd   :  { %1994 = vmatpush.bf16.msra.mxu3 %v4021_v11  ;;  %v2842_v32 = vld [vmem:[%s5546_s0] sm:$0xf]  ;;  %v3864_v34 = vld [vmem:[%s5546_s0 + $0x4] sm:$0xf]  ;;  %v2850_v36 = vld [vmem:[%s5546_s0 + $0x8] sm:$0xf] }
   0xe   :  { %1848 = vmatpush.bf16.msra.mxu0 %v3996_v12  ;;  %v3872_v33 = vld [vmem:[%s5546_s0 + $0x3c] sm:$0xf0]  ;;  %v2844_v35 = vld [vmem:[%s5546_s0 + $0x40] sm:$0xf0]  ;;  %v3873_v37 = vld [vmem:[%s5546_s0 + $0x44] sm:$0xf0] }
   0xf   :  { %1897 = vmatpush.bf16.msra.mxu1 %v4004_v13  ;;  %v3865_v38 = vld [vmem:[%s5546_s0 + $0xc] sm:$0xf]  ;;  %v2843_v42 = vor.u32 %v3872_v33, %v2842_v32  ;;  %v2847_v43 = vor.u32 %v3864_v34, %v2844_v35  ;;  %v2851_v44 = vor.u32 %v3873_v37, %v2850_v36  ;;  %v4046_v48 = vld [vmem:[%s5545_s1 + $0x1b0] sm:$0xff]  ;;  %v2906_v56 = vld [vmem:[%s5546_s0 + $0x80] sm:$0xf] }
  0x10   :  { %1946 = vmatpush.bf16.msra.mxu2 %v4012_v14  ;;  %v2852_v39 = vld [vmem:[%s5546_s0 + $0x48] sm:$0xf0]  ;;  %v4030_v49 = vld [vmem:[%s5545_s1 + $0x130] sm:$0xff]  ;;  %v3888_v57 = vld [vmem:[%s5546_s0 + $0xbc] sm:$0xf0] }
  0x11   :  { %1995 = vmatpush.bf16.msra.mxu3 %v4020_v15  ;;  %v2855_v45 = vor.u32 %v3865_v38, %v2852_v39  ;;  %v4054_v50 = vld [vmem:[%s5545_s1 + $0x1f0] sm:$0xff]  ;;  %v4045_v52 = vld [vmem:[%s5545_s1 + $0x1a8] sm:$0xff]  ;;  %v3880_v58 = vld [vmem:[%s5546_s0 + $0x84] sm:$0xf]  ;;  %v2907_v0 = vor.u32 %v3888_v57, %v2906_v56 }
  0x12   :  { %1849 = vmatpush.bf16.msra.mxu0 %v3995_v16  ;;  %v4038_v51 = vld [vmem:[%s5545_s1 + $0x170] sm:$0xff]  ;;  %v4029_v53 = vld [vmem:[%s5545_s1 + $0x128] sm:$0xff]  ;;  %v2908_v59 = vld [vmem:[%s5546_s0 + $0xc0] sm:$0xf0] }
  0x13   :  { %1898 = vmatpush.bf16.msra.mxu1 %v4003_v17  ;;  %v4053_v54 = vld [vmem:[%s5545_s1 + $0x1e8] sm:$0xff]  ;;  %v2911_v1 = vor.u32 %v3880_v58, %v2908_v59  ;;  %v4044_v4 = vld [vmem:[%s5545_s1 + $0x1a0] sm:$0xff]  ;;  %v4042_v36 = vld [vmem:[%s5545_s1 + $0x190] sm:$0xff] }
  0x14   :  { %1947 = vmatpush.bf16.msra.mxu2 %v4011_v18  ;;  %v4037_v55 = vld [vmem:[%s5545_s1 + $0x168] sm:$0xff]  ;;  %v4028_v5 = vld [vmem:[%s5545_s1 + $0x120] sm:$0xff]  ;;  %v4026_v37 = vld [vmem:[%s5545_s1 + $0x110] sm:$0xff] }
  0x15   :  { %1996 = vmatpush.bf16.msra.mxu3 %v4019_v19  ;;  %v2914_v60 = vld [vmem:[%s5546_s0 + $0x88] sm:$0xf]  ;;  %v3881_v62 = vld [vmem:[%s5546_s0 + $0x8c] sm:$0xf]  ;;  %v4052_v6 = vld [vmem:[%s5545_s1 + $0x1e0] sm:$0xff] }
  0x16   :  { %1850 = vmatpush.bf16.msra.mxu0 %v3994_v20  ;;  %v3889_v61 = vld [vmem:[%s5546_s0 + $0xc4] sm:$0xf0]  ;;  %v2916_v63 = vld [vmem:[%s5546_s0 + $0xc8] sm:$0xf0]  ;;  %v4036_v7 = vld [vmem:[%s5545_s1 + $0x160] sm:$0xff] }
  0x17   :  { %1899 = vmatpush.bf16.msra.mxu1 %v4002_v21  ;;  %v2915_v2 = vor.u32 %v3889_v61, %v2914_v60  ;;  %v2919_v3 = vor.u32 %v3881_v62, %v2916_v63  ;;  %v2970_v8 = vld [vmem:[%s5546_s0 + $0x100] sm:$0xf]  ;;  %v3896_v10 = vld [vmem:[%s5546_s0 + $0x104] sm:$0xf]  ;;  %v2978_v12 = vld [vmem:[%s5546_s0 + $0x108] sm:$0xf] }
  0x18   :  { %1948 = vmatpush.bf16.msra.mxu2 %v4010_v22  ;;  %v3904_v9 = vld [vmem:[%s5546_s0 + $0x13c] sm:$0xf0]  ;;  %v2972_v11 = vld [vmem:[%s5546_s0 + $0x140] sm:$0xf0]  ;;  %v3905_v13 = vld [vmem:[%s5546_s0 + $0x144] sm:$0xf0] }
  0x19   :  { %1997 = vmatpush.bf16.msra.mxu3 %v4018_v23  ;;  %v3897_v14 = vld [vmem:[%s5546_s0 + $0x10c] sm:$0xf]  ;;  %v2971_v16 = vor.u32 %v3904_v9, %v2970_v8  ;;  %v2975_v17 = vor.u32 %v3896_v10, %v2972_v11  ;;  %v2979_v18 = vor.u32 %v3905_v13, %v2978_v12  ;;  %v4043_v20 = vld [vmem:[%s5545_s1 + $0x198] sm:$0xff]  ;;  %v4050_v38 = vld [vmem:[%s5545_s1 + $0x1d0] sm:$0xff] }
  0x1a   :  { %1851 = vmatpush.bf16.msra.mxu0 %v3993_v24  ;;  %v2980_v15 = vld [vmem:[%s5546_s0 + $0x148] sm:$0xf0]  ;;  %v4027_v21 = vld [vmem:[%s5545_s1 + $0x118] sm:$0xff]  ;;  %v3034_v24 = vld [vmem:[%s5546_s0 + $0x180] sm:$0xf] }
  0x1b   :  { %1900 = vmatpush.bf16.msra.mxu1 %v4001_v25  ;;  %v2983_v19 = vor.u32 %v3897_v14, %v2980_v15  ;;  %v4051_v22 = vld [vmem:[%s5545_s1 + $0x1d8] sm:$0xff]  ;;  %v3920_v25 = vld [vmem:[%s5546_s0 + $0x1bc] sm:$0xf0]  ;;  %v4034_v39 = vld [vmem:[%s5545_s1 + $0x150] sm:$0xff] }
  0x1c   :  { %1949 = vmatpush.bf16.msra.mxu2 %v4009_v26  ;;  %v4035_v23 = vld [vmem:[%s5545_s1 + $0x158] sm:$0xff]  ;;  %v3912_v26 = vld [vmem:[%s5546_s0 + $0x184] sm:$0xf]  ;;  %v3035_v32 = vor.u32 %v3920_v25, %v3034_v24  ;;  %v3162_v56 = vld [vmem:[%s5546_s0 + $0x280] sm:$0xf] }
  0x1d   :  { %1998 = vmatpush.bf16.msra.mxu3 %v4017_v27  ;;  %v3036_v27 = vld [vmem:[%s5546_s0 + $0x1c0] sm:$0xf0]  ;;  %v3952_v57 = vld [vmem:[%s5546_s0 + $0x2bc] sm:$0xf0]  ;;  %v3170_v60 = vld [vmem:[%s5546_s0 + $0x288] sm:$0xf] }
  0x1e   :  { %1852 = vmatpush.bf16.msra.mxu0 %v3992_v28  ;;  %v3042_v28 = vld [vmem:[%s5546_s0 + $0x188] sm:$0xf]  ;;  %v3039_v33 = vor.u32 %v3912_v26, %v3036_v27  ;;  %v3944_v58 = vld [vmem:[%s5546_s0 + $0x284] sm:$0xf]  ;;  %v3945_v62 = vld [vmem:[%s5546_s0 + $0x28c] sm:$0xf] }
  0x1f   :  { %1901 = vmatpush.bf16.msra.mxu1 %v4000_v29  ;;  %v3921_v29 = vld [vmem:[%s5546_s0 + $0x1c4] sm:$0xf0]  ;;  %v3164_v59 = vld [vmem:[%s5546_s0 + $0x2c0] sm:$0xf0]  ;;  %v3172_v63 = vld [vmem:[%s5546_s0 + $0x2c8] sm:$0xf0] }
  0x20   :  { %1950 = vmatpush.bf16.msra.mxu2 %v4008_v30  ;;  %v3913_v30 = vld [vmem:[%s5546_s0 + $0x18c] sm:$0xf]  ;;  %v3043_v34 = vor.u32 %v3921_v29, %v3042_v28  ;;  %v3953_v61 = vld [vmem:[%s5546_s0 + $0x2c4] sm:$0xf0]  ;;  %v3226_v8 = vld [vmem:[%s5546_s0 + $0x300] sm:$0xf] }
  0x21   :  { %1999 = vmatpush.bf16.msra.mxu3 %v4016_v31  ;;  %1853 = vmatmul.bf16.vlgmr.msra.gmra.mxu0 %v2843_v42  ;;  %v3044_v31 = vld [vmem:[%s5546_s0 + $0x1c8] sm:$0xf0]  ;;  %v3928_v42 = vld [vmem:[%s5546_s0 + $0x204] sm:$0xf]  ;;  %v3968_v9 = vld [vmem:[%s5546_s0 + $0x33c] sm:$0xf0] }
  0x22   :  { %2041 = vmatpush.bf16.msrb.mxu0 %v4031_v41  ;;  %1902 = vmatmul.bf16.vlgmr.msra.gmra.mxu1 %v2847_v43  ;;  %v3047_v35 = vor.u32 %v3913_v30, %v3044_v31  ;;  %v3936_v41 = vld [vmem:[%s5546_s0 + $0x23c] sm:$0xf0]  ;;  %v3100_v43 = vld [vmem:[%s5546_s0 + $0x240] sm:$0xf0]  ;;  %v3234_v12 = vld [vmem:[%s5546_s0 + $0x308] sm:$0xf] }
  0x23   :  { %1951 = vmatmul.bf16.vlgmr.msra.gmra.mxu2 %v2851_v44  ;;  %2090 = vmatpush.bf16.msrb.mxu1 %v4039_v47  ;;  %v3106_v44 = vld [vmem:[%s5546_s0 + $0x208] sm:$0xf]  ;;  %v3108_v47 = vld [vmem:[%s5546_s0 + $0x248] sm:$0xf0]  ;;  %v3960_v10 = vld [vmem:[%s5546_s0 + $0x304] sm:$0xf] }
  0x24   :  { %2139 = vmatpush.bf16.msrb.mxu2 %v4047_v40  ;;  %2000 = vmatmul.bf16.vlgmr.msra.gmra.mxu3 %v2855_v45  ;;  %v3098_v40 = vld [vmem:[%s5546_s0 + $0x200] sm:$0xf]  ;;  %v3937_v45 = vld [vmem:[%s5546_s0 + $0x244] sm:$0xf0]  ;;  %v3228_v11 = vld [vmem:[%s5546_s0 + $0x340] sm:$0xf0] }
  0x25   :  { %2188 = vmatpush.bf16.msrb.mxu3 %v4055_v46  ;;  %v3929_v46 = vld [vmem:[%s5546_s0 + $0x20c] sm:$0xf]  ;;  %v3969_v13 = vld [vmem:[%s5546_s0 + $0x344] sm:$0xf0]  ;;  %v3290_v24 = vld [vmem:[%s5546_s0 + $0x380] sm:$0xf] }
  0x26   :  { %2042 = vmatpush.bf16.msrb.mxu0 %v4030_v49  ;;  %v3103_v49 = vor.u32 %v3928_v42, %v3100_v43  ;;  %v3961_v14 = vld [vmem:[%s5546_s0 + $0x30c] sm:$0xf]  ;;  %v3984_v25 = vld [vmem:[%s5546_s0 + $0x3bc] sm:$0xf0]  ;;  %v3976_v26 = vld [vmem:[%s5546_s0 + $0x384] sm:$0xf] }
  0x27   :  { %2091 = vmatpush.bf16.msrb.mxu1 %v4038_v51  ;;  %v3111_v51 = vor.u32 %v3929_v46, %v3108_v47  ;;  %v3236_v15 = vld [vmem:[%s5546_s0 + $0x348] sm:$0xf0]  ;;  %v3292_v27 = vld [vmem:[%s5546_s0 + $0x3c0] sm:$0xf0]  ;;  %v3298_v28 = vld [vmem:[%s5546_s0 + $0x388] sm:$0xf] }
  0x28   :  { %2140 = vmatpush.bf16.msrb.mxu2 %v4046_v48  ;;  %v3099_v48 = vor.u32 %v3936_v41, %v3098_v40  ;;  %v3985_v29 = vld [vmem:[%s5546_s0 + $0x3c4] sm:$0xf0]  ;;  %v3977_v30 = vld [vmem:[%s5546_s0 + $0x38c] sm:$0xf]  ;;  %v2858_v40 = vld [vmem:[%s5546_s0 + $0x10] sm:$0xf] }
  0x29   :  { %2189 = vmatpush.bf16.msrb.mxu3 %v4054_v50  ;;  %v3107_v50 = vor.u32 %v3937_v45, %v3106_v44  ;;  %v3300_v31 = vld [vmem:[%s5546_s0 + $0x3c8] sm:$0xf0]  ;;  %v3874_v41 = vld [vmem:[%s5546_s0 + $0x4c] sm:$0xf0]  ;;  %v3866_v42 = vld [vmem:[%s5546_s0 + $0x14] sm:$0xf] }
  0x2a   :  { %2043 = vmatpush.bf16.msrb.mxu0 %v4029_v53  ;;  %v4025_v53 = vld [vmem:[%s5545_s1 + $0x108] sm:$0xff]  ;;  %v2860_v43 = vld [vmem:[%s5546_s0 + $0x50] sm:$0xf0]  ;;  %v2866_v44 = vld [vmem:[%s5546_s0 + $0x18] sm:$0xf] }
  0x2b   :  { %2092 = vmatpush.bf16.msrb.mxu1 %v4037_v55  ;;  %v4033_v55 = vld [vmem:[%s5545_s1 + $0x148] sm:$0xff]  ;;  %v3875_v45 = vld [vmem:[%s5546_s0 + $0x54] sm:$0xf0]  ;;  %v3867_v46 = vld [vmem:[%s5546_s0 + $0x1c] sm:$0xf] }
  0x2c   :  { %2141 = vmatpush.bf16.msrb.mxu2 %v4045_v52  ;;  %v4041_v52 = vld [vmem:[%s5545_s1 + $0x188] sm:$0xff]  ;;  %v2868_v47 = vld [vmem:[%s5546_s0 + $0x58] sm:$0xf0] }
  0x2d   :  { %2190 = vmatpush.bf16.msrb.mxu3 %v4053_v54  ;;  %v4049_v54 = vld [vmem:[%s5545_s1 + $0x1c8] sm:$0xff] }
  0x2e   :  { %2044 = vmatpush.bf16.msrb.mxu0 %v4028_v5  ;;  %v4024_v5 = vld [vmem:[%s5545_s1 + $0x100] sm:$0xff] }
  0x2f   :  { %2093 = vmatpush.bf16.msrb.mxu1 %v4036_v7  ;;  %v4032_v7 = vld [vmem:[%s5545_s1 + $0x140] sm:$0xff] }
  0x30   :  { %2142 = vmatpush.bf16.msrb.mxu2 %v4044_v4  ;;  %v4040_v4 = vld [vmem:[%s5545_s1 + $0x180] sm:$0xff] }
  0x31   :  { %1858 = vmatmul.bf16.gmra.mxu0 %v2907_v0  ;;  %2191 = vmatpush.bf16.msrb.mxu3 %v4052_v6  ;;  %v3163_v0 = vor.u32 %v3952_v57, %v3162_v56  ;;  %v4048_v6 = vld [vmem:[%s5545_s1 + $0x1c0] sm:$0xff]  ;;  %v4061_v56 = vld [vmem:[%s5545_s1 + $0x228] sm:$0xff] }
  0x32   :  { %1907 = vmatmul.bf16.gmra.mxu1 %v2911_v1  ;;  %2045 = vmatpush.bf16.msrb.mxu0 %v4027_v21  ;;  %v3167_v1 = vor.u32 %v3944_v58, %v3164_v59  ;;  %v4063_v21 = vld [vmem:[%s5545_s1 + $0x238] sm:$0xff]  ;;  %v4085_v57 = vld [vmem:[%s5545_s1 + $0x2e8] sm:$0xff] }
  0x33   :  { %1956 = vmatmul.bf16.gmra.mxu2 %v2915_v2  ;;  %2094 = vmatpush.bf16.msrb.mxu1 %v4035_v23  ;;  %v3171_v2 = vor.u32 %v3953_v61, %v3170_v60  ;;  %v4071_v23 = vld [vmem:[%s5545_s1 + $0x278] sm:$0xff] }
  0x34   :  { %2005 = vmatmul.bf16.gmra.mxu3 %v2919_v3  ;;  %2143 = vmatpush.bf16.msrb.mxu2 %v4043_v20  ;;  %v3175_v3 = vor.u32 %v3945_v62, %v3172_v63  ;;  %v4079_v20 = vld [vmem:[%s5545_s1 + $0x2b8] sm:$0xff] }
  0x35   :  { %2192 = vmatpush.bf16.msrb.mxu3 %v4051_v22  ;;  %v4087_v22 = vld [vmem:[%s5545_s1 + $0x2f8] sm:$0xff] }
  0x36   :  { %2046 = vmatpush.bf16.msrb.mxu0 %v4026_v37  ;;  %v4062_v37 = vld [vmem:[%s5545_s1 + $0x230] sm:$0xff] }
  0x37   :  { %2095 = vmatpush.bf16.msrb.mxu1 %v4034_v39  ;;  %v4070_v39 = vld [vmem:[%s5545_s1 + $0x270] sm:$0xff] }
  0x38   :  { %2144 = vmatpush.bf16.msrb.mxu2 %v4042_v36  ;;  %v4078_v36 = vld [vmem:[%s5545_s1 + $0x2b0] sm:$0xff] }
  0x39   :  { %2193 = vmatpush.bf16.msrb.mxu3 %v4050_v38  ;;  %v4086_v38 = vld [vmem:[%s5545_s1 + $0x2f0] sm:$0xff] }
  0x3a   :  { %2047 = vmatpush.bf16.msrb.mxu0 %v4025_v53  ;;  %v2871_v53 = vor.u32 %v3867_v46, %v2868_v47 }
  0x3b   :  { %2096 = vmatpush.bf16.msrb.mxu1 %v4033_v55  ;;  %v4077_v55 = vld [vmem:[%s5545_s1 + $0x2a8] sm:$0xff] }
  0x3c   :  { %2145 = vmatpush.bf16.msrb.mxu2 %v4041_v52  ;;  %v2867_v52 = vor.u32 %v3875_v45, %v2866_v44 }
  0x3d   :  { %2194 = vmatpush.bf16.msrb.mxu3 %v4049_v54 }
  0x3e   :  { %2048 = vmatpush.bf16.msrb.mxu0 %v4024_v5  ;;  %v2924_v5 = vld [vmem:[%s5546_s0 + $0xd0] sm:$0xf0] }
  0x3f   :  { %2097 = vmatpush.bf16.msrb.mxu1 %v4032_v7  ;;  %v3891_v7 = vld [vmem:[%s5546_s0 + $0xd4] sm:$0xf0] }
  0x40   :  { %2146 = vmatpush.bf16.msrb.mxu2 %v4040_v4  ;;  %v3882_v4 = vld [vmem:[%s5546_s0 + $0x94] sm:$0xf] }
  0x41   :  { %1863 = vmatmul.bf16.gmra.mxu0 %v2971_v16  ;;  %2195 = vmatpush.bf16.msrb.mxu3 %v4048_v6  ;;  %v3227_v16 = vor.u32 %v3968_v9, %v3226_v8  ;;  %v2930_v6 = vld [vmem:[%s5546_s0 + $0x98] sm:$0xf]  ;;  %v3883_v8 = vld [vmem:[%s5546_s0 + $0x9c] sm:$0xf] }
  0x42   :  { %1912 = vmatmul.bf16.gmra.mxu1 %v2975_v17  ;;  %v3231_v17 = vor.u32 %v3960_v10, %v3228_v11  ;;  %2237 = vmatpush.bf16.msra.mxu0 %v4063_v21  ;;  %v2932_v9 = vld [vmem:[%s5546_s0 + $0xd8] sm:$0xf0]  ;;  %v4076_v21 = vld [vmem:[%s5545_s1 + $0x2a0] sm:$0xff] }
  0x43   :  { %1961 = vmatmul.bf16.gmra.mxu2 %v2979_v18  ;;  %v3235_v18 = vor.u32 %v3969_v13, %v3234_v12  ;;  %2286 = vmatpush.bf16.msra.mxu1 %v4071_v23  ;;  %v2927_v13 = vor.u32 %v3882_v4, %v2924_v5  ;;  %v4084_v23 = vld [vmem:[%s5545_s1 + $0x2e0] sm:$0xff]  ;;  %v3923_v4 = vld [vmem:[%s5546_s0 + $0x1d4] sm:$0xf0]  ;;  %v3915_v5 = vld [vmem:[%s5546_s0 + $0x19c] sm:$0xf] }
  0x44   :  { %2010 = vmatmul.bf16.gmra.mxu3 %v2983_v19  ;;  %v3239_v19 = vor.u32 %v3961_v14, %v3236_v15  ;;  %2335 = vmatpush.bf16.msra.mxu2 %v4079_v20 }
  0x45   :  { %2384 = vmatpush.bf16.msra.mxu3 %v4087_v22  ;;  %v4060_v22 = vld [vmem:[%s5545_s1 + $0x220] sm:$0xff] }
  0x46   :  { %2238 = vmatpush.bf16.msra.mxu0 %v4062_v37  ;;  %v3907_v37 = vld [vmem:[%s5546_s0 + $0x154] sm:$0xf0] }
  0x47   :  { %2287 = vmatpush.bf16.msra.mxu1 %v4070_v39  ;;  %v2996_v39 = vld [vmem:[%s5546_s0 + $0x158] sm:$0xf0] }
  0x48   :  { %2336 = vmatpush.bf16.msra.mxu2 %v4078_v36  ;;  %v2994_v36 = vld [vmem:[%s5546_s0 + $0x118] sm:$0xf] }
  0x49   :  { %2385 = vmatpush.bf16.msra.mxu3 %v4086_v38  ;;  %v3899_v38 = vld [vmem:[%s5546_s0 + $0x11c] sm:$0xf]  ;;  %v2995_v47 = vor.u32 %v3907_v37, %v2994_v36  ;;  %v3939_v36 = vld [vmem:[%s5546_s0 + $0x254] sm:$0xf0] }
  0x4a   :  { %2239 = vmatpush.bf16.msra.mxu0 %v4061_v56  ;;  %v3931_v37 = vld [vmem:[%s5546_s0 + $0x21c] sm:$0xf] }
  0x4c   :  { %2337 = vmatpush.bf16.msra.mxu2 %v4077_v55 }
  0x4d   :  { %2386 = vmatpush.bf16.msra.mxu3 %v4085_v57 }
  0x4e   :  { %2240 = vmatpush.bf16.msra.mxu0 %v4060_v22 }
  0x50   :  { %2338 = vmatpush.bf16.msra.mxu2 %v4076_v21  ;;  %v4082_v21 = vld [vmem:[%s5545_s1 + $0x2d0] sm:$0xff] }
  0x51   :  { %1868 = vmatmul.bf16.gmra.mxu0 %v3035_v32  ;;  %v3291_v32 = vor.u32 %v3984_v25, %v3290_v24  ;;  %2387 = vmatpush.bf16.msra.mxu3 %v4084_v23 }
  0x52   :  { %1917 = vmatmul.bf16.gmra.mxu1 %v3039_v33  ;;  %v3295_v33 = vor.u32 %v3976_v26, %v3292_v27 }
  0x53   :  { %1966 = vmatmul.bf16.gmra.mxu2 %v3043_v34  ;;  %v3299_v34 = vor.u32 %v3985_v29, %v3298_v28 }
  0x54   :  { %2015 = vmatmul.bf16.gmra.mxu3 %v3047_v35  ;;  %v3303_v35 = vor.u32 %v3977_v30, %v3300_v31  ;;  %v4068_v31 = vld [vmem:[%s5545_s1 + $0x260] sm:$0xff] }
  0x61   :  { %1873 = vmatmul.bf16.gmra.mxu0 %v3099_v48  ;;  %v2859_v48 = vor.u32 %v3874_v41, %v2858_v40 }
  0x62   :  { %1922 = vmatmul.bf16.gmra.mxu1 %v3103_v49  ;;  %v2863_v49 = vor.u32 %v3866_v42, %v2860_v43 }
  0x63   :  { %1971 = vmatmul.bf16.gmra.mxu2 %v3107_v50 }
  0x64   :  { %2020 = vmatmul.bf16.gmra.mxu3 %v3111_v51 }
  0x71   :  { %1878 = vmatmul.bf16.gmra.mxu0 %v3163_v0 }
  0x72   :  { %1927 = vmatmul.bf16.gmra.mxu1 %v3167_v1  ;;  %v4069_v1 = vld [vmem:[%s5545_s1 + $0x268] sm:$0xff] }
  0x73   :  { %1976 = vmatmul.bf16.gmra.mxu2 %v3171_v2  ;;  %v2922_v2 = vld [vmem:[%s5546_s0 + $0x90] sm:$0xf]  ;;  %2288 = vmatpush.bf16.msra.mxu1 %v4069_v1  ;;  %v3914_v1 = vld [vmem:[%s5546_s0 + $0x194] sm:$0xf] }
  0x74   :  { %2025 = vmatmul.bf16.gmra.mxu3 %v3175_v3  ;;  %v3890_v3 = vld [vmem:[%s5546_s0 + $0xcc] sm:$0xf0] }
  0x75   :  { %v2923_v12 = vor.u32 %v3890_v3, %v2922_v2  ;;  %v3052_v2 = vld [vmem:[%s5546_s0 + $0x1d0] sm:$0xf0]  ;;  %v3058_v3 = vld [vmem:[%s5546_s0 + $0x198] sm:$0xf] }
  0x77   :  { %2289 = vmatpush.bf16.msra.mxu1 %v4068_v31  ;;  %v3114_v31 = vld [vmem:[%s5546_s0 + $0x210] sm:$0xf] }
  0x81   :  { %1883 = vmatmul.bf16.gmra.mxu0 %v3227_v16 }
  0x82   :  { %1932 = vmatmul.bf16.gmra.mxu1 %v3231_v17  ;;  %v2931_v17 = vor.u32 %v3891_v7, %v2930_v6  ;;  %v3060_v6 = vld [vmem:[%s5546_s0 + $0x1d8] sm:$0xf0] }
  0x83   :  { %1981 = vmatmul.bf16.gmra.mxu2 %v3235_v18  ;;  %v2935_v18 = vor.u32 %v3883_v8, %v2932_v9 }
  0x84   :  { %2030 = vmatmul.bf16.gmra.mxu3 %v3239_v19 }
  0x91   :  { %1888 = vmatmul.bf16.gmra.mxu0 %v3291_v32  ;;  %v2986_v32 = vld [vmem:[%s5546_s0 + $0x110] sm:$0xf] }
  0x92   :  { %1937 = vmatmul.bf16.gmra.mxu1 %v3295_v33  ;;  %v3906_v33 = vld [vmem:[%s5546_s0 + $0x14c] sm:$0xf0] }
  0x93   :  { %1986 = vmatmul.bf16.gmra.mxu2 %v3299_v34  ;;  %v3898_v34 = vld [vmem:[%s5546_s0 + $0x114] sm:$0xf]  ;;  %v2987_v42 = vor.u32 %v3906_v33, %v2986_v32  ;;  %v3938_v32 = vld [vmem:[%s5546_s0 + $0x24c] sm:$0xf0] }
  0x94   :  { %2035 = vmatmul.bf16.gmra.mxu3 %v3303_v35  ;;  %v2988_v35 = vld [vmem:[%s5546_s0 + $0x150] sm:$0xf0] }
  0x95   :  { %v2991_v43 = vor.u32 %v3898_v34, %v2988_v35  ;;  %v3930_v33 = vld [vmem:[%s5546_s0 + $0x214] sm:$0xf]  ;;  %v3122_v35 = vld [vmem:[%s5546_s0 + $0x218] sm:$0xf] }
  0x96   :  { %v3116_v34 = vld [vmem:[%s5546_s0 + $0x250] sm:$0xf0] }
  0x9e   :  { %v1854_v50 = vpop.f32.mrf.mxu0 }
  0x9f   :  { %v1903_v51 = vpop.f32.mrf.mxu1 }
  0xa0   :  { %v1904_v54 = vadd.f32 %v1903_v51, %v1854_v50  ;;  %v4075_v51 = vld [vmem:[%s5545_s1 + $0x298] sm:$0xff] }
  0xa1   :  { %2049 = vmatmul.bf16.vlgmr.msrb.gmra.mxu0 %v2859_v48  ;;  %v2999_v48 = vor.u32 %v3899_v38, %v2996_v39  ;;  %2339 = vmatpush.bf16.msra.mxu2 %v4075_v51  ;;  %v3124_v38 = vld [vmem:[%s5546_s0 + $0x258] sm:$0xf0]  ;;  %v4073_v51 = vld [vmem:[%s5545_s1 + $0x288] sm:$0xff] }
  0xa2   :  { %2098 = vmatmul.bf16.vlgmr.msrb.gmra.mxu1 %v2863_v49 }
  0xa3   :  { %2147 = vmatmul.bf16.vlgmr.msrb.gmra.mxu2 %v2867_v52  ;;  %v4059_v52 = vld [vmem:[%s5545_s1 + $0x218] sm:$0xff] }
  0xa4   :  { %2196 = vmatmul.bf16.vlgmr.msrb.gmra.mxu3 %v2871_v53  ;;  %v4083_v53 = vld [vmem:[%s5545_s1 + $0x2d8] sm:$0xff]  ;;  %2241 = vmatpush.bf16.msra.mxu0 %v4059_v52  ;;  %v4057_v52 = vld [vmem:[%s5545_s1 + $0x208] sm:$0xff] }
  0xa5   :  { %2388 = vmatpush.bf16.msra.mxu3 %v4083_v53  ;;  %v4081_v53 = vld [vmem:[%s5545_s1 + $0x2c8] sm:$0xff] }
  0xa6   :  { %v1952_v58 = vpop.f32.mrf.mxu2  ;;  %v1856_v61 = vpop.f32.mrf.mxu0 }
  0xa7   :  { %v2001_v59 = vpop.f32.mrf.mxu3  ;;  %v1953_v60 = vadd.f32 %v1952_v58, %v1904_v54  ;;  %v1905_v62 = vpop.f32.mrf.mxu1 }
  0xa8   :  { %v1906_v63 = vadd.f32 %v1905_v62, %v1856_v61  ;;  %v4067_v61 = vld [vmem:[%s5545_s1 + $0x258] sm:$0xff]  ;;  %v3050_v62 = vld [vmem:[%s5546_s0 + $0x190] sm:$0xf] }
  0xa9   :  { %v4639_v0 = vadd.f32 %v2001_v59, %v1953_v60  ;;  %2290 = vmatpush.bf16.msra.mxu1 %v4067_v61  ;;  %2389 = vmatpush.bf16.msra.mxu3 %v4082_v21  ;;  %v4072_v21 = vld [vmem:[%s5545_s1 + $0x280] sm:$0xff] }
  0xad   :  { %2390 = vmatpush.bf16.msra.mxu3 %v4081_v53 }
  0xae   :  { %v1954_v10 = vpop.f32.mrf.mxu2  ;;  %v1859_v15 = vpop.f32.mrf.mxu0 }
  0xaf   :  { %v2003_v11 = vpop.f32.mrf.mxu3  ;;  %v1955_v14 = vadd.f32 %v1954_v10, %v1906_v63  ;;  %v1908_v16 = vpop.f32.mrf.mxu1  ;;  %v3922_v63 = vld [vmem:[%s5546_s0 + $0x1cc] sm:$0xf0]  ;;  %v3055_v10 = vor.u32 %v3914_v1, %v3052_v2  ;;  %v3946_v2 = vld [vmem:[%s5546_s0 + $0x294] sm:$0xf] }
  0xb0   :  { %v1909_v19 = vadd.f32 %v1908_v16, %v1859_v15  ;;  %v3051_v9 = vor.u32 %v3922_v63, %v3050_v62  ;;  %v3063_v15 = vor.u32 %v3915_v5, %v3060_v6  ;;  %v4065_v62 = vld [vmem:[%s5545_s1 + $0x248] sm:$0xff]  ;;  %v3178_v63 = vld [vmem:[%s5546_s0 + $0x290] sm:$0xf]  ;;  %v3955_v5 = vld [vmem:[%s5546_s0 + $0x2d4] sm:$0xf0] }
  0xb1   :  { %v4668_v20 = vadd.f32 %v2003_v11, %v1955_v14  ;;  %2054 = vmatmul.bf16.gmra.mxu0 %v2923_v12  ;;  %v3059_v14 = vor.u32 %v3923_v4, %v3058_v3  ;;  %v3954_v1 = vld [vmem:[%s5546_s0 + $0x2cc] sm:$0xf0]  ;;  %v3180_v3 = vld [vmem:[%s5546_s0 + $0x2d0] sm:$0xf0]  ;;  %v3186_v4 = vld [vmem:[%s5546_s0 + $0x298] sm:$0xf] }
  0xb2   :  { %2103 = vmatmul.bf16.gmra.mxu1 %v2927_v13  ;;  %v3947_v6 = vld [vmem:[%s5546_s0 + $0x29c] sm:$0xf] }
  0xb3   :  { %2152 = vmatmul.bf16.gmra.mxu2 %v2931_v17 }
  0xb4   :  { %2201 = vmatmul.bf16.gmra.mxu3 %v2935_v18  ;;  %v4074_v18 = vld [vmem:[%s5545_s1 + $0x290] sm:$0xff] }
  0xb5   :  { %2340 = vmatpush.bf16.msra.mxu2 %v4074_v18 }
  0xb6   :  { %v1957_v24 = vpop.f32.mrf.mxu2  ;;  %v1861_v27 = vpop.f32.mrf.mxu0 }
  0xb7   :  { %v2006_v25 = vpop.f32.mrf.mxu3  ;;  %v1958_v26 = vadd.f32 %v1957_v24, %v1909_v19  ;;  %v1910_v28 = vpop.f32.mrf.mxu1  ;;  %v4058_v19 = vld [vmem:[%s5545_s1 + $0x210] sm:$0xff] }
  0xb8   :  { %v1911_v29 = vadd.f32 %v1910_v28, %v1861_v27  ;;  %2242 = vmatpush.bf16.msra.mxu0 %v4058_v19 }
  0xb9   :  { %v4679_v30 = vadd.f32 %v2006_v25, %v1958_v26  ;;  %2341 = vmatpush.bf16.msra.mxu2 %v4073_v51 }
  0xbc   :  { %2243 = vmatpush.bf16.msra.mxu0 %v4057_v52 }
  0xbd   :  { %2342 = vmatpush.bf16.msra.mxu2 %v4072_v21 }
  0xbe   :  { %v1959_v40 = vpop.f32.mrf.mxu2  ;;  %v1864_v45 = vpop.f32.mrf.mxu0 }
  0xbf   :  { %v2008_v41 = vpop.f32.mrf.mxu3  ;;  %v1960_v44 = vadd.f32 %v1959_v40, %v1911_v29  ;;  %v1913_v46 = vpop.f32.mrf.mxu1  ;;  %v4066_v29 = vld [vmem:[%s5545_s1 + $0x250] sm:$0xff] }
  0xc0   :  { %v1914_v49 = vadd.f32 %v1913_v46, %v1864_v45  ;;  %2291 = vmatpush.bf16.msra.mxu1 %v4066_v29  ;;  %v3123_v46 = vor.u32 %v3939_v36, %v3122_v35  ;;  %v3970_v35 = vld [vmem:[%s5546_s0 + $0x34c] sm:$0xf0]  ;;  %v3962_v36 = vld [vmem:[%s5546_s0 + $0x314] sm:$0xf] }
  0xc1   :  { %v4708_v50 = vadd.f32 %v2008_v41, %v1960_v44  ;;  %2059 = vmatmul.bf16.gmra.mxu0 %v2987_v42  ;;  %v3115_v41 = vor.u32 %v3938_v32, %v3114_v31  ;;  %v3119_v42 = vor.u32 %v3930_v33, %v3116_v34  ;;  %v4064_v33 = vld [vmem:[%s5545_s1 + $0x240] sm:$0xff]  ;;  %v3242_v34 = vld [vmem:[%s5546_s0 + $0x310] sm:$0xf] }
  0xc2   :  { %2108 = vmatmul.bf16.gmra.mxu1 %v2991_v43 }
  0xc3   :  { %2157 = vmatmul.bf16.gmra.mxu2 %v2995_v47  ;;  %v3127_v47 = vor.u32 %v3931_v37, %v3124_v38  ;;  %v3244_v37 = vld [vmem:[%s5546_s0 + $0x350] sm:$0xf0]  ;;  %v3250_v38 = vld [vmem:[%s5546_s0 + $0x318] sm:$0xf] }
  0xc4   :  { %2206 = vmatmul.bf16.gmra.mxu3 %v2999_v48  ;;  %2292 = vmatpush.bf16.msra.mxu1 %v4065_v62 }
  0xc6   :  { %v1962_v54 = vpop.f32.mrf.mxu2  ;;  %v1866_v57 = vpop.f32.mrf.mxu0 }
  0xc7   :  { %v2011_v55 = vpop.f32.mrf.mxu3  ;;  %v1963_v56 = vadd.f32 %v1962_v54, %v1914_v49  ;;  %v1915_v58 = vpop.f32.mrf.mxu1 }
  0xc8   :  { %v1916_v59 = vadd.f32 %v1915_v58, %v1866_v57  ;;  %2293 = vmatpush.bf16.msra.mxu1 %v4064_v33 }
  0xc9   :  { %v4719_v60 = vadd.f32 %v2011_v55, %v1963_v56 }
  0xce   :  { %v1964_v7 = vpop.f32.mrf.mxu2  ;;  %v1869_v12 = vpop.f32.mrf.mxu0 }
  0xcf   :  { %v2013_v8 = vpop.f32.mrf.mxu3  ;;  %v1965_v11 = vadd.f32 %v1964_v7, %v1916_v59  ;;  %v1918_v13 = vpop.f32.mrf.mxu1  ;;  %v3188_v7 = vld [vmem:[%s5546_s0 + $0x2d8] sm:$0xf0] }
  0xd0   :  { %v1919_v16 = vadd.f32 %v1918_v13, %v1869_v12 }
  0xd1   :  { %v4748_v17 = vadd.f32 %v2013_v8, %v1965_v11  ;;  %2064 = vmatmul.bf16.gmra.mxu0 %v3051_v9  ;;  %v3183_v11 = vor.u32 %v3946_v2, %v3180_v3 }
  0xd2   :  { %2113 = vmatmul.bf16.gmra.mxu1 %v3055_v10  ;;  %v3179_v10 = vor.u32 %v3954_v1, %v3178_v63 }
  0xd3   :  { %2162 = vmatmul.bf16.gmra.mxu2 %v3059_v14 }
  0xd4   :  { %2211 = vmatmul.bf16.gmra.mxu3 %v3063_v15  ;;  %v3187_v15 = vor.u32 %v3955_v5, %v3186_v4  ;;  %v4103_v4 = vld [vmem:[%s5545_s1 + $0x378] sm:$0xff]  ;;  %v3306_v5 = vld [vmem:[%s5546_s0 + $0x390] sm:$0xf] }
  0xd5   :  { %2482 = vmatpush.bf16.msrb.mxu1 %v4103_v4  ;;  %v4109_v4 = vld [vmem:[%s5545_s1 + $0x3a8] sm:$0xff] }
  0xd6   :  { %v1967_v22 = vpop.f32.mrf.mxu2  ;;  %v1871_v25 = vpop.f32.mrf.mxu0 }
  0xd7   :  { %v2016_v23 = vpop.f32.mrf.mxu3  ;;  %v1968_v24 = vadd.f32 %v1967_v22, %v1919_v16  ;;  %v1920_v26 = vpop.f32.mrf.mxu1  ;;  %v3191_v16 = vor.u32 %v3947_v6, %v3188_v7  ;;  %v4056_v22 = vld [vmem:[%s5545_s1 + $0x200] sm:$0xff]  ;;  %v3986_v6 = vld [vmem:[%s5546_s0 + $0x3cc] sm:$0xf0]  ;;  %v3978_v7 = vld [vmem:[%s5546_s0 + $0x394] sm:$0xf] }
  0xd8   :  { %v1921_v27 = vadd.f32 %v1920_v26, %v1871_v25  ;;  %2244 = vmatpush.bf16.msra.mxu0 %v4056_v22 }
  0xd9   :  { %v4759_v28 = vadd.f32 %v2016_v23, %v1968_v24  ;;  %v4080_v23 = vld [vmem:[%s5545_s1 + $0x2c0] sm:$0xff] }
  0xda   :  { %2391 = vmatpush.bf16.msra.mxu3 %v4080_v23 }
  0xde   :  { %v1969_v39 = vpop.f32.mrf.mxu2  ;;  %v1874_v44 = vpop.f32.mrf.mxu0 }
  0xdf   :  { %v2018_v40 = vpop.f32.mrf.mxu3  ;;  %v1970_v43 = vadd.f32 %v1969_v39, %v1921_v27  ;;  %v1923_v45 = vpop.f32.mrf.mxu1  ;;  %v3971_v39 = vld [vmem:[%s5546_s0 + $0x354] sm:$0xf0] }
  0xe0   :  { %v1924_v48 = vadd.f32 %v1923_v45, %v1874_v44  ;;  %v3243_v44 = vor.u32 %v3970_v35, %v3242_v34  ;;  %v3247_v45 = vor.u32 %v3962_v36, %v3244_v37  ;;  %v3251_v51 = vor.u32 %v3971_v39, %v3250_v38 }
  0xe1   :  { %v4788_v49 = vadd.f32 %v2018_v40, %v1970_v43  ;;  %2069 = vmatmul.bf16.gmra.mxu0 %v3115_v41  ;;  %v3963_v40 = vld [vmem:[%s5546_s0 + $0x31c] sm:$0xf] }
  0xe2   :  { %2118 = vmatmul.bf16.gmra.mxu1 %v3119_v42  ;;  %v3252_v41 = vld [vmem:[%s5546_s0 + $0x358] sm:$0xf0] }
  0xe3   :  { %2167 = vmatmul.bf16.gmra.mxu2 %v3123_v46  ;;  %v3255_v52 = vor.u32 %v3963_v40, %v3252_v41  ;;  %v4102_v40 = vld [vmem:[%s5545_s1 + $0x370] sm:$0xff]  ;;  %v2874_v41 = vld [vmem:[%s5546_s0 + $0x20] sm:$0xf] }
  0xe4   :  { %2216 = vmatmul.bf16.gmra.mxu3 %v3127_v47  ;;  %2483 = vmatpush.bf16.msrb.mxu1 %v4102_v40 }
  0xe6   :  { %v1972_v54 = vpop.f32.mrf.mxu2  ;;  %v1876_v57 = vpop.f32.mrf.mxu0 }
  0xe7   :  { %v2021_v55 = vpop.f32.mrf.mxu3  ;;  %v1973_v56 = vadd.f32 %v1972_v54, %v1924_v48  ;;  %v1925_v58 = vpop.f32.mrf.mxu1 }
  0xe8   :  { %v1926_v59 = vadd.f32 %v1925_v58, %v1876_v57  ;;  %v4119_v57 = vld [vmem:[%s5545_s1 + $0x3f8] sm:$0xff] }
  0xe9   :  { %v4799_v61 = vadd.f32 %v2021_v55, %v1973_v56  ;;  %v4111_v55 = vld [vmem:[%s5545_s1 + $0x3b8] sm:$0xff]  ;;  %2580 = vmatpush.bf16.msrb.mxu3 %v4119_v57 }
  0xea   :  { %v4095_v56 = vld [vmem:[%s5545_s1 + $0x338] sm:$0xff]  ;;  %2531 = vmatpush.bf16.msrb.mxu2 %v4111_v55 }
  0xeb   :  { %2433 = vmatpush.bf16.msrb.mxu0 %v4095_v56 }
  0xee   :  { %v1974_v8 = vpop.f32.mrf.mxu2  ;;  %v1879_v13 = vpop.f32.mrf.mxu0 }
  0xef   :  { %v2023_v9 = vpop.f32.mrf.mxu3  ;;  %v1975_v12 = vadd.f32 %v1974_v8, %v1926_v59  ;;  %v1928_v14 = vpop.f32.mrf.mxu1  ;;  %v3308_v8 = vld [vmem:[%s5546_s0 + $0x3d0] sm:$0xf0] }
  0xf0   :  { %v1929_v18 = vadd.f32 %v1928_v14, %v1879_v13 }
  0xf1   :  { %v4828_v19 = vadd.f32 %v2023_v9, %v1975_v12  ;;  %2074 = vmatmul.bf16.gmra.mxu0 %v3179_v10  ;;  %v3314_v9 = vld [vmem:[%s5546_s0 + $0x398] sm:$0xf]  ;;  %v3316_v12 = vld [vmem:[%s5546_s0 + $0x3d8] sm:$0xf0] }
  0xf2   :  { %2123 = vmatmul.bf16.gmra.mxu1 %v3183_v11  ;;  %v3987_v10 = vld [vmem:[%s5546_s0 + $0x3d4] sm:$0xf0]  ;;  %v3979_v11 = vld [vmem:[%s5546_s0 + $0x39c] sm:$0xf] }
  0xf3   :  { %2172 = vmatmul.bf16.gmra.mxu2 %v3187_v15  ;;  %v3307_v15 = vor.u32 %v3986_v6, %v3306_v5  ;;  %v3315_v23 = vor.u32 %v3987_v10, %v3314_v9  ;;  %v4093_v5 = vld [vmem:[%s5545_s1 + $0x328] sm:$0xff] }
  0xf4   :  { %2221 = vmatmul.bf16.gmra.mxu3 %v3191_v16  ;;  %v3311_v16 = vor.u32 %v3978_v7, %v3308_v8  ;;  %v4117_v6 = vld [vmem:[%s5545_s1 + $0x3e8] sm:$0xff] }
  0xf6   :  { %v1977_v24 = vpop.f32.mrf.mxu2  ;;  %v1881_v27 = vpop.f32.mrf.mxu0 }
  0xf7   :  { %v2026_v25 = vpop.f32.mrf.mxu3  ;;  %v1978_v26 = vadd.f32 %v1977_v24, %v1929_v18  ;;  %v1930_v29 = vpop.f32.mrf.mxu1  ;;  %v3319_v24 = vor.u32 %v3979_v11, %v3316_v12 }
  0xf8   :  { %v1931_v31 = vadd.f32 %v1930_v29, %v1881_v27  ;;  %v4110_v27 = vld [vmem:[%s5545_s1 + $0x3b0] sm:$0xff] }
  0xf9   :  { %v4839_v32 = vadd.f32 %v2026_v25, %v1978_v26  ;;  %v4094_v29 = vld [vmem:[%s5545_s1 + $0x330] sm:$0xff]  ;;  %2532 = vmatpush.bf16.msrb.mxu2 %v4110_v27 }
  0xfa   :  { %2434 = vmatpush.bf16.msrb.mxu0 %v4094_v29 }
  0xfd   :  { %2533 = vmatpush.bf16.msrb.mxu2 %v4109_v4 }
  0xfe   :  { %v1979_v42 = vpop.f32.mrf.mxu2  ;;  %v1884_v47 = vpop.f32.mrf.mxu0  ;;  %2435 = vmatpush.bf16.msrb.mxu0 %v4093_v5 }
  0xff   :  { %v2028_v43 = vpop.f32.mrf.mxu3  ;;  %v1980_v46 = vadd.f32 %v1979_v42, %v1931_v31  ;;  %v1933_v48 = vpop.f32.mrf.mxu1  ;;  %v4118_v31 = vld [vmem:[%s5545_s1 + $0x3f0] sm:$0xff]  ;;  %v3876_v42 = vld [vmem:[%s5546_s0 + $0x5c] sm:$0xf0] }
 0x100   :  { %v1934_v53 = vadd.f32 %v1933_v48, %v1884_v47  ;;  %2581 = vmatpush.bf16.msrb.mxu3 %v4118_v31  ;;  %v3869_v47 = vld [vmem:[%s5546_s0 + $0x2c] sm:$0xf] }
 0x101   :  { %v4868_v54 = vadd.f32 %v2028_v43, %v1980_v46  ;;  %2079 = vmatmul.bf16.gmra.mxu0 %v3243_v44  ;;  %v3868_v43 = vld [vmem:[%s5546_s0 + $0x24] sm:$0xf]  ;;  %v3877_v46 = vld [vmem:[%s5546_s0 + $0x64] sm:$0xf0]  ;;  %v2884_v48 = vld [vmem:[%s5546_s0 + $0x68] sm:$0xf0] }
 0x102   :  { %2128 = vmatmul.bf16.gmra.mxu1 %v3247_v45  ;;  %v2876_v44 = vld [vmem:[%s5546_s0 + $0x60] sm:$0xf0]  ;;  %v2882_v45 = vld [vmem:[%s5546_s0 + $0x28] sm:$0xf] }
 0x103   :  { %2177 = vmatmul.bf16.gmra.mxu2 %v3251_v51  ;;  %v2879_v55 = vor.u32 %v3868_v43, %v2876_v44  ;;  %v4092_v43 = vld [vmem:[%s5545_s1 + $0x320] sm:$0xff] }
 0x104   :  { %2226 = vmatmul.bf16.gmra.mxu3 %v3255_v52  ;;  %v4116_v44 = vld [vmem:[%s5545_s1 + $0x3e0] sm:$0xff]  ;;  %2436 = vmatpush.bf16.msrb.mxu0 %v4092_v43 }
 0x105   :  { %2582 = vmatpush.bf16.msrb.mxu3 %v4117_v6 }
 0x106   :  { %v1982_v58 = vpop.f32.mrf.mxu2  ;;  %v1886_v63 = vpop.f32.mrf.mxu0 }
 0x107   :  { %v2031_v59 = vpop.f32.mrf.mxu3  ;;  %v1983_v62 = vadd.f32 %v1982_v58, %v1934_v53  ;;  %v1935_v1 = vpop.f32.mrf.mxu1  ;;  %v2875_v53 = vor.u32 %v3876_v42, %v2874_v41  ;;  %v4108_v42 = vld [vmem:[%s5545_s1 + $0x3a0] sm:$0xff] }
 0x108   :  { %v1936_v2 = vadd.f32 %v1935_v1, %v1886_v63  ;;  %2534 = vmatpush.bf16.msrb.mxu2 %v4108_v42 }
 0x109   :  { %v4879_v3 = vadd.f32 %v2031_v59, %v1983_v62  ;;  %v2883_v59 = vor.u32 %v3877_v46, %v2882_v45  ;;  %v2887_v62 = vor.u32 %v3869_v47, %v2884_v48  ;;  %2583 = vmatpush.bf16.msrb.mxu3 %v4116_v44 }
 0x10e   :  { %v1984_v13 = vpop.f32.mrf.mxu2  ;;  %v1889_v21 = vpop.f32.mrf.mxu0 }
 0x10f   :  { %v2033_v14 = vpop.f32.mrf.mxu3  ;;  %v1985_v18 = vadd.f32 %v1984_v13, %v1936_v2  ;;  %v1938_v22 = vpop.f32.mrf.mxu1  ;;  %v4101_v13 = vld [vmem:[%s5545_s1 + $0x368] sm:$0xff] }
 0x110   :  { %v1939_v25 = vadd.f32 %v1938_v22, %v1889_v21  ;;  %v2946_v21 = vld [vmem:[%s5546_s0 + $0xa8] sm:$0xf]  ;;  %2484 = vmatpush.bf16.msrb.mxu1 %v4101_v13 }
 0x111   :  { %v4908_v26 = vadd.f32 %v2033_v14, %v1985_v18  ;;  %2084 = vmatmul.bf16.gmra.mxu0 %v3307_v15  ;;  %v2938_v15 = vld [vmem:[%s5546_s0 + $0xa0] sm:$0xf]  ;;  %v3884_v18 = vld [vmem:[%s5546_s0 + $0xa4] sm:$0xf]  ;;  %v3893_v22 = vld [vmem:[%s5546_s0 + $0xe4] sm:$0xf0] }
 0x112   :  { %2133 = vmatmul.bf16.gmra.mxu1 %v3311_v16  ;;  %v3892_v16 = vld [vmem:[%s5546_s0 + $0xdc] sm:$0xf0] }
 0x113   :  { %2182 = vmatmul.bf16.gmra.mxu2 %v3315_v23  ;;  %v3885_v23 = vld [vmem:[%s5546_s0 + $0xac] sm:$0xf]  ;;  %v2939_v29 = vor.u32 %v3892_v16, %v2938_v15  ;;  %v4107_v16 = vld [vmem:[%s5545_s1 + $0x398] sm:$0xff] }
 0x114   :  { %2231 = vmatmul.bf16.gmra.mxu3 %v3319_v24  ;;  %v2948_v24 = vld [vmem:[%s5546_s0 + $0xe8] sm:$0xf0]  ;;  %2535 = vmatpush.bf16.msrb.mxu2 %v4107_v16 }
 0x116   :  { %v1987_v33 = vpop.f32.mrf.mxu2  ;;  %v1891_v36 = vpop.f32.mrf.mxu0 }
 0x117   :  { %v2036_v34 = vpop.f32.mrf.mxu3  ;;  %v1988_v35 = vadd.f32 %v1987_v33, %v1939_v25  ;;  %v1940_v37 = vpop.f32.mrf.mxu1 }
 0x118   :  { %v1941_v38 = vadd.f32 %v1940_v37, %v1891_v36  ;;  %v2947_v36 = vor.u32 %v3893_v22, %v2946_v21  ;;  %v2951_v37 = vor.u32 %v3885_v23, %v2948_v24 }
 0x119   :  { %v4919_v39 = vadd.f32 %v2036_v34, %v1988_v35 }
 0x11e   :  { %v1989_v51 = vpop.f32.mrf.mxu2  ;;  %v2050_v57 = vpop.f32.mrf.mxu0 }
 0x11f   :  { %v2038_v52 = vpop.f32.mrf.mxu3  ;;  %v1990_v56 = vadd.f32 %v1989_v51, %v1941_v38  ;;  %v2099_v58 = vpop.f32.mrf.mxu1  ;;  %v2051_v63 = vadd.f32 %v2050_v57, %v4639_v0  ;;  %v3908_v57 = vld [vmem:[%s5546_s0 + $0x15c] sm:$0xf0] }
 0x121   :  { %v4949_v1 = vadd.f32 %v2038_v52, %v1990_v56  ;;  %v2100_v2 = vadd.f32 %v2099_v58, %v2051_v63  ;;  %2245 = vmatmul.bf16.vlgmr.msra.gmra.mxu0 %v2875_v53  ;;  %v4100_v53 = vld [vmem:[%s5545_s1 + $0x360] sm:$0xff]  ;;  %v3901_v63 = vld [vmem:[%s5546_s0 + $0x12c] sm:$0xf] }
 0x122   :  { %2294 = vmatmul.bf16.vlgmr.msra.gmra.mxu1 %v2879_v55  ;;  %v3002_v56 = vld [vmem:[%s5546_s0 + $0x120] sm:$0xf]  ;;  %v3900_v58 = vld [vmem:[%s5546_s0 + $0x124] sm:$0xf] }
 0x123   :  { %2343 = vmatmul.bf16.vlgmr.msra.gmra.mxu2 %v2883_v59  ;;  %v3010_v59 = vld [vmem:[%s5546_s0 + $0x128] sm:$0xf]  ;;  %2485 = vmatpush.bf16.msrb.mxu1 %v4100_v53  ;;  %v3003_v6 = vor.u32 %v3908_v57, %v3002_v56  ;;  %v4106_v57 = vld [vmem:[%s5545_s1 + $0x390] sm:$0xff] }
 0x124   :  { %2392 = vmatmul.bf16.vlgmr.msra.gmra.mxu3 %v2887_v62  ;;  %v3909_v62 = vld [vmem:[%s5546_s0 + $0x164] sm:$0xf0]  ;;  %2536 = vmatpush.bf16.msrb.mxu2 %v4106_v57 }
 0x126   :  { %v2148_v0 = vpop.f32.mrf.mxu2  ;;  %v2052_v9 = vpop.f32.mrf.mxu0 }
 0x127   :  { %v2197_v7 = vpop.f32.mrf.mxu3  ;;  %v2149_v8 = vadd.f32 %v2148_v0, %v2100_v2  ;;  %v2101_v10 = vpop.f32.mrf.mxu1  ;;  %v2053_v11 = vadd.f32 %v2052_v9, %v4668_v20  ;;  %v2940_v20 = vld [vmem:[%s5546_s0 + $0xe0] sm:$0xf0]  ;;  %v3012_v2 = vld [vmem:[%s5546_s0 + $0x168] sm:$0xf0] }
 0x128   :  { %v2943_v31 = vor.u32 %v3884_v18, %v2940_v20  ;;  %v4091_v18 = vld [vmem:[%s5545_s1 + $0x318] sm:$0xff] }
 0x129   :  { %v4961_v12 = vadd.f32 %v2197_v7, %v2149_v8  ;;  %v2102_v14 = vadd.f32 %v2101_v10, %v2053_v11  ;;  %v3011_v10 = vor.u32 %v3909_v62, %v3010_v59  ;;  %v3015_v11 = vor.u32 %v3901_v63, %v3012_v2  ;;  %v4115_v20 = vld [vmem:[%s5545_s1 + $0x3d8] sm:$0xff]  ;;  %2437 = vmatpush.bf16.msrb.mxu0 %v4091_v18 }
 0x12a   :  { %2584 = vmatpush.bf16.msrb.mxu3 %v4115_v20 }
 0x12e   :  { %v2150_v25 = vpop.f32.mrf.mxu2  ;;  %v2055_v34 = vpop.f32.mrf.mxu0 }
 0x12f   :  { %v2199_v27 = vpop.f32.mrf.mxu3  ;;  %v2151_v33 = vadd.f32 %v2150_v25, %v2102_v14  ;;  %v2104_v35 = vpop.f32.mrf.mxu1  ;;  %v2056_v38 = vadd.f32 %v2055_v34, %v4679_v30  ;;  %v3924_v34 = vld [vmem:[%s5546_s0 + $0x1dc] sm:$0xf0] }
 0x131   :  { %v4991_v40 = vadd.f32 %v2199_v27, %v2151_v33  ;;  %v2105_v41 = vadd.f32 %v2104_v35, %v2056_v38  ;;  %2250 = vmatmul.bf16.gmra.mxu0 %v2939_v29  ;;  %v4099_v29 = vld [vmem:[%s5545_s1 + $0x358] sm:$0xff]  ;;  %v3066_v33 = vld [vmem:[%s5546_s0 + $0x1a0] sm:$0xf]  ;;  %v3916_v35 = vld [vmem:[%s5546_s0 + $0x1a4] sm:$0xf] }
 0x132   :  { %2299 = vmatmul.bf16.gmra.mxu1 %v2943_v31  ;;  %v3917_v38 = vld [vmem:[%s5546_s0 + $0x1ac] sm:$0xf]  ;;  %v3067_v44 = vor.u32 %v3924_v34, %v3066_v33 }
 0x133   :  { %2348 = vmatmul.bf16.gmra.mxu2 %v2947_v36  ;;  %v3074_v36 = vld [vmem:[%s5546_s0 + $0x1a8] sm:$0xf]  ;;  %2486 = vmatpush.bf16.msrb.mxu1 %v4099_v29 }
 0x134   :  { %2397 = vmatmul.bf16.gmra.mxu3 %v2951_v37  ;;  %v3925_v37 = vld [vmem:[%s5546_s0 + $0x1e4] sm:$0xf0] }
 0x135   :  { %v4105_v34 = vld [vmem:[%s5545_s1 + $0x388] sm:$0xff] }
 0x136   :  { %v2153_v30 = vpop.f32.mrf.mxu2  ;;  %v2057_v47 = vpop.f32.mrf.mxu0  ;;  %2537 = vmatpush.bf16.msrb.mxu2 %v4105_v34 }
 0x137   :  { %v2202_v45 = vpop.f32.mrf.mxu3  ;;  %v2154_v46 = vadd.f32 %v2153_v30, %v2105_v41  ;;  %v2106_v48 = vpop.f32.mrf.mxu1  ;;  %v2058_v51 = vadd.f32 %v2057_v47, %v4708_v50  ;;  %v3004_v50 = vld [vmem:[%s5546_s0 + $0x160] sm:$0xf0]  ;;  %v3076_v41 = vld [vmem:[%s5546_s0 + $0x1e8] sm:$0xf0] }
 0x138   :  { %v3007_v0 = vor.u32 %v3900_v58, %v3004_v50  ;;  %v4090_v58 = vld [vmem:[%s5545_s1 + $0x310] sm:$0xff] }
 0x139   :  { %v5003_v52 = vadd.f32 %v2202_v45, %v2154_v46  ;;  %v2107_v55 = vadd.f32 %v2106_v48, %v2058_v51  ;;  %v3075_v48 = vor.u32 %v3925_v37, %v3074_v36  ;;  %v3079_v51 = vor.u32 %v3917_v38, %v3076_v41  ;;  %v4114_v50 = vld [vmem:[%s5545_s1 + $0x3d0] sm:$0xff]  ;;  %2438 = vmatpush.bf16.msrb.mxu0 %v4090_v58 }
 0x13a   :  { %2585 = vmatpush.bf16.msrb.mxu3 %v4114_v50 }
 0x13e   :  { %v2155_v4 = vpop.f32.mrf.mxu2  ;;  %v2060_v8 = vpop.f32.mrf.mxu0 }
 0x13f   :  { %v2204_v5 = vpop.f32.mrf.mxu3  ;;  %v2156_v7 = vadd.f32 %v2155_v4, %v2107_v55  ;;  %v2109_v9 = vpop.f32.mrf.mxu1  ;;  %v2061_v13 = vadd.f32 %v2060_v8, %v4719_v60  ;;  %v3940_v8 = vld [vmem:[%s5546_s0 + $0x25c] sm:$0xf0] }
 0x141   :  { %v5033_v14 = vadd.f32 %v2204_v5, %v2156_v7  ;;  %v2110_v15 = vadd.f32 %v2109_v9, %v2061_v13  ;;  %2255 = vmatmul.bf16.gmra.mxu0 %v3003_v6  ;;  %v4098_v6 = vld [vmem:[%s5545_s1 + $0x350] sm:$0xff]  ;;  %v3130_v7 = vld [vmem:[%s5546_s0 + $0x220] sm:$0xf]  ;;  %v3932_v9 = vld [vmem:[%s5546_s0 + $0x224] sm:$0xf] }
 0x142   :  { %2304 = vmatmul.bf16.gmra.mxu1 %v3007_v0  ;;  %v3933_v13 = vld [vmem:[%s5546_s0 + $0x22c] sm:$0xf]  ;;  %v3131_v20 = vor.u32 %v3940_v8, %v3130_v7  ;;  %v4104_v8 = vld [vmem:[%s5545_s1 + $0x380] sm:$0xff] }
 0x143   :  { %2353 = vmatmul.bf16.gmra.mxu2 %v3011_v10  ;;  %v3138_v10 = vld [vmem:[%s5546_s0 + $0x228] sm:$0xf]  ;;  %2487 = vmatpush.bf16.msrb.mxu1 %v4098_v6 }
 0x144   :  { %2402 = vmatmul.bf16.gmra.mxu3 %v3015_v11  ;;  %v3941_v11 = vld [vmem:[%s5546_s0 + $0x264] sm:$0xf0]  ;;  %2538 = vmatpush.bf16.msrb.mxu2 %v4104_v8 }
 0x146   :  { %v2158_v60 = vpop.f32.mrf.mxu2  ;;  %v2062_v23 = vpop.f32.mrf.mxu0 }
 0x147   :  { %v2207_v21 = vpop.f32.mrf.mxu3  ;;  %v2159_v22 = vadd.f32 %v2158_v60, %v2110_v15  ;;  %v2111_v24 = vpop.f32.mrf.mxu1  ;;  %v2063_v25 = vadd.f32 %v2062_v23, %v4748_v17  ;;  %v3068_v17 = vld [vmem:[%s5546_s0 + $0x1e0] sm:$0xf0]  ;;  %v3140_v15 = vld [vmem:[%s5546_s0 + $0x268] sm:$0xf0] }
 0x148   :  { %v3071_v30 = vor.u32 %v3916_v35, %v3068_v17  ;;  %v4089_v35 = vld [vmem:[%s5545_s1 + $0x308] sm:$0xff] }
 0x149   :  { %v5045_v27 = vadd.f32 %v2207_v21, %v2159_v22  ;;  %v2112_v31 = vadd.f32 %v2111_v24, %v2063_v25  ;;  %v3139_v24 = vor.u32 %v3941_v11, %v3138_v10  ;;  %v3143_v25 = vor.u32 %v3933_v13, %v3140_v15  ;;  %v4113_v17 = vld [vmem:[%s5545_s1 + $0x3c8] sm:$0xff]  ;;  %2439 = vmatpush.bf16.msrb.mxu0 %v4089_v35 }
 0x14a   :  { %2586 = vmatpush.bf16.msrb.mxu3 %v4113_v17 }
 0x14e   :  { %v2160_v42 = vpop.f32.mrf.mxu2  ;;  %v2065_v46 = vpop.f32.mrf.mxu0 }
 0x14f   :  { %v2209_v43 = vpop.f32.mrf.mxu3  ;;  %v2161_v45 = vadd.f32 %v2160_v42, %v2112_v31  ;;  %v2114_v47 = vpop.f32.mrf.mxu1  ;;  %v2066_v53 = vadd.f32 %v2065_v46, %v4759_v28  ;;  %v3956_v46 = vld [vmem:[%s5546_s0 + $0x2dc] sm:$0xf0] }
 0x151   :  { %v5075_v55 = vadd.f32 %v2209_v43, %v2161_v45  ;;  %v2115_v56 = vadd.f32 %v2114_v47, %v2066_v53  ;;  %2260 = vmatmul.bf16.gmra.mxu0 %v3067_v44  ;;  %v4097_v44 = vld [vmem:[%s5545_s1 + $0x348] sm:$0xff]  ;;  %v3194_v45 = vld [vmem:[%s5546_s0 + $0x2a0] sm:$0xf]  ;;  %v3948_v47 = vld [vmem:[%s5546_s0 + $0x2a4] sm:$0xf] }
 0x152   :  { %2309 = vmatmul.bf16.gmra.mxu1 %v3071_v30  ;;  %v3949_v53 = vld [vmem:[%s5546_s0 + $0x2ac] sm:$0xf]  ;;  %v3195_v50 = vor.u32 %v3956_v46, %v3194_v45 }
 0x153   :  { %2358 = vmatmul.bf16.gmra.mxu2 %v3075_v48  ;;  %v3202_v48 = vld [vmem:[%s5546_s0 + $0x2a8] sm:$0xf]  ;;  %2488 = vmatpush.bf16.msrb.mxu1 %v4097_v44 }
 0x154   :  { %2407 = vmatmul.bf16.gmra.mxu3 %v3079_v51  ;;  %v3957_v51 = vld [vmem:[%s5546_s0 + $0x2e4] sm:$0xf0] }
 0x156   :  { %v2163_v28 = vpop.f32.mrf.mxu2  ;;  %v2067_v63 = vpop.f32.mrf.mxu0 }
 0x157   :  { %v2212_v59 = vpop.f32.mrf.mxu3  ;;  %v2164_v62 = vadd.f32 %v2163_v28, %v2115_v56  ;;  %v2116_v2 = vpop.f32.mrf.mxu1  ;;  %v2068_v4 = vadd.f32 %v2067_v63, %v4788_v49  ;;  %v3132_v49 = vld [vmem:[%s5546_s0 + $0x260] sm:$0xf0]  ;;  %v3204_v56 = vld [vmem:[%s5546_s0 + $0x2e8] sm:$0xf0] }
 0x158   :  { %v3135_v60 = vor.u32 %v3932_v9, %v3132_v49  ;;  %v4088_v9 = vld [vmem:[%s5545_s1 + $0x300] sm:$0xff] }
 0x159   :  { %v5087_v5 = vadd.f32 %v2212_v59, %v2164_v62  ;;  %v2117_v0 = vadd.f32 %v2116_v2, %v2068_v4  ;;  %v3203_v2 = vor.u32 %v3957_v51, %v3202_v48  ;;  %v3207_v4 = vor.u32 %v3949_v53, %v3204_v56  ;;  %v4112_v49 = vld [vmem:[%s5545_s1 + $0x3c0] sm:$0xff]  ;;  %2440 = vmatpush.bf16.msrb.mxu0 %v4088_v9 }
 0x15a   :  { %2587 = vmatpush.bf16.msrb.mxu3 %v4112_v49 }
 0x15e   :  { %v2165_v16 = vpop.f32.mrf.mxu2  ;;  %v2070_v22 = vpop.f32.mrf.mxu0 }
 0x15f   :  { %v2214_v18 = vpop.f32.mrf.mxu3  ;;  %v2166_v21 = vadd.f32 %v2165_v16, %v2117_v0  ;;  %v2119_v23 = vpop.f32.mrf.mxu1  ;;  %v2071_v29 = vadd.f32 %v2070_v22, %v4799_v61  ;;  %v3972_v22 = vld [vmem:[%s5546_s0 + $0x35c] sm:$0xf0] }
 0x161   :  { %v5117_v31 = vadd.f32 %v2214_v18, %v2166_v21  ;;  %v2120_v33 = vadd.f32 %v2119_v23, %v2071_v29  ;;  %2265 = vmatmul.bf16.gmra.mxu0 %v3131_v20  ;;  %v4096_v20 = vld [vmem:[%s5545_s1 + $0x340] sm:$0xff]  ;;  %v3965_v29 = vld [vmem:[%s5546_s0 + $0x32c] sm:$0xf] }
 0x162   :  { %2314 = vmatmul.bf16.gmra.mxu1 %v3135_v60  ;;  %v3258_v21 = vld [vmem:[%s5546_s0 + $0x320] sm:$0xf]  ;;  %v3964_v23 = vld [vmem:[%s5546_s0 + $0x324] sm:$0xf] }
 0x163   :  { %2363 = vmatmul.bf16.gmra.mxu2 %v3139_v24  ;;  %v3266_v24 = vld [vmem:[%s5546_s0 + $0x328] sm:$0xf]  ;;  %2489 = vmatpush.bf16.msrb.mxu1 %v4096_v20  ;;  %v3259_v17 = vor.u32 %v3972_v22, %v3258_v21 }
 0x164   :  { %2412 = vmatmul.bf16.gmra.mxu3 %v3143_v25  ;;  %v3973_v25 = vld [vmem:[%s5546_s0 + $0x364] sm:$0xf0] }
 0x166   :  { %v2168_v61 = vpop.f32.mrf.mxu2  ;;  %v2072_v38 = vpop.f32.mrf.mxu0 }
 0x167   :  { %v2217_v36 = vpop.f32.mrf.mxu3  ;;  %v2169_v37 = vadd.f32 %v2168_v61, %v2120_v33  ;;  %v2121_v41 = vpop.f32.mrf.mxu1  ;;  %v2073_v42 = vadd.f32 %v2072_v38, %v4828_v19  ;;  %v3196_v19 = vld [vmem:[%s5546_s0 + $0x2e0] sm:$0xf0]  ;;  %v3268_v33 = vld [vmem:[%s5546_s0 + $0x368] sm:$0xf0] }
 0x168   :  { %v3199_v28 = vor.u32 %v3948_v47, %v3196_v19 }
 0x169   :  { %v5129_v43 = vadd.f32 %v2217_v36, %v2169_v37  ;;  %v2122_v30 = vadd.f32 %v2121_v41, %v2073_v42  ;;  %v3267_v41 = vor.u32 %v3973_v25, %v3266_v24  ;;  %v3271_v42 = vor.u32 %v3965_v29, %v3268_v33  ;;  %v3878_v25 = vld [vmem:[%s5546_s0 + $0x6c] sm:$0xf0]  ;;  %v3870_v29 = vld [vmem:[%s5546_s0 + $0x34] sm:$0xf] }
 0x16a   :  { %v2892_v33 = vld [vmem:[%s5546_s0 + $0x70] sm:$0xf0] }
 0x16e   :  { %v2170_v57 = vpop.f32.mrf.mxu2  ;;  %v2075_v62 = vpop.f32.mrf.mxu0 }
 0x16f   :  { %v2219_v58 = vpop.f32.mrf.mxu3  ;;  %v2171_v59 = vadd.f32 %v2170_v57, %v2122_v30  ;;  %v2124_v63 = vpop.f32.mrf.mxu1  ;;  %v2076_v6 = vadd.f32 %v2075_v62, %v4839_v32  ;;  %v3981_v62 = vld [vmem:[%s5546_s0 + $0x3ac] sm:$0xf] }
 0x171   :  { %v5159_v0 = vadd.f32 %v2219_v58, %v2171_v59  ;;  %v2125_v7 = vadd.f32 %v2124_v63, %v2076_v6  ;;  %2270 = vmatmul.bf16.gmra.mxu0 %v3195_v50  ;;  %v3988_v58 = vld [vmem:[%s5546_s0 + $0x3dc] sm:$0xf0]  ;;  %v3980_v50 = vld [vmem:[%s5546_s0 + $0x3a4] sm:$0xf]  ;;  %v3989_v59 = vld [vmem:[%s5546_s0 + $0x3e4] sm:$0xf0] }
 0x172   :  { %2319 = vmatmul.bf16.gmra.mxu1 %v3199_v28  ;;  %v3324_v28 = vld [vmem:[%s5546_s0 + $0x3e0] sm:$0xf0]  ;;  %v3332_v63 = vld [vmem:[%s5546_s0 + $0x3e8] sm:$0xf0] }
 0x173   :  { %2368 = vmatmul.bf16.gmra.mxu2 %v3203_v2 }
 0x174   :  { %2417 = vmatmul.bf16.gmra.mxu3 %v3207_v4 }
 0x176   :  { %v2173_v32 = vpop.f32.mrf.mxu2  ;;  %v2077_v13 = vpop.f32.mrf.mxu0 }
 0x177   :  { %v2222_v10 = vpop.f32.mrf.mxu3  ;;  %v2174_v11 = vadd.f32 %v2173_v32, %v2125_v7  ;;  %v2126_v15 = vpop.f32.mrf.mxu1  ;;  %v2078_v16 = vadd.f32 %v2077_v13, %v4868_v54  ;;  %v3260_v54 = vld [vmem:[%s5546_s0 + $0x360] sm:$0xf0]  ;;  %v3327_v7 = vor.u32 %v3980_v50, %v3324_v28 }
 0x178   :  { %v3263_v61 = vor.u32 %v3964_v23, %v3260_v54 }
 0x179   :  { %v5171_v18 = vadd.f32 %v2222_v10, %v2174_v11  ;;  %v2127_v60 = vadd.f32 %v2126_v15, %v2078_v16  ;;  %v3335_v10 = vor.u32 %v3981_v62, %v3332_v63  ;;  %v3886_v62 = vld [vmem:[%s5546_s0 + $0xb4] sm:$0xf] }
 0x17a   :  { %v2956_v63 = vld [vmem:[%s5546_s0 + $0xf0] sm:$0xf0] }
 0x17e   :  { %v2175_v34 = vpop.f32.mrf.mxu2  ;;  %v2080_v37 = vpop.f32.mrf.mxu0 }
 0x17f   :  { %v2224_v35 = vpop.f32.mrf.mxu3  ;;  %v2176_v36 = vadd.f32 %v2175_v34, %v2127_v60  ;;  %v2129_v38 = vpop.f32.mrf.mxu1  ;;  %v2081_v44 = vadd.f32 %v2080_v37, %v4879_v3  ;;  %v3322_v3 = vld [vmem:[%s5546_s0 + $0x3a0] sm:$0xf]  ;;  %v3879_v34 = vld [vmem:[%s5546_s0 + $0x74] sm:$0xf0] }
 0x180   :  { %v3323_v6 = vor.u32 %v3988_v58, %v3322_v3 }
 0x181   :  { %v5201_v30 = vadd.f32 %v2224_v35, %v2176_v36  ;;  %v2130_v45 = vadd.f32 %v2129_v38, %v2081_v44  ;;  %2275 = vmatmul.bf16.gmra.mxu0 %v3259_v17  ;;  %v3871_v35 = vld [vmem:[%s5546_s0 + $0x3c] sm:$0xf]  ;;  %v2895_v38 = vor.u32 %v3870_v29, %v2892_v33 }
 0x182   :  { %2324 = vmatmul.bf16.gmra.mxu1 %v3263_v61  ;;  %v2900_v17 = vld [vmem:[%s5546_s0 + $0x78] sm:$0xf0] }
 0x183   :  { %2373 = vmatmul.bf16.gmra.mxu2 %v3267_v41 }
 0x184   :  { %2422 = vmatmul.bf16.gmra.mxu3 %v3271_v42 }
 0x186   :  { %v2178_v46 = vpop.f32.mrf.mxu2  ;;  %v2082_v48 = vpop.f32.mrf.mxu0 }
 0x187   :  { %v2227_v47 = vpop.f32.mrf.mxu3  ;;  %v2179_v19 = vadd.f32 %v2178_v46, %v2130_v45  ;;  %v2131_v51 = vpop.f32.mrf.mxu1  ;;  %v2083_v53 = vadd.f32 %v2082_v48, %v4908_v26  ;;  %v3330_v26 = vld [vmem:[%s5546_s0 + $0x3a8] sm:$0xf]  ;;  %v2903_v46 = vor.u32 %v3871_v35, %v2900_v17  ;;  %v3902_v35 = vld [vmem:[%s5546_s0 + $0x134] sm:$0xf] }
 0x188   :  { %v3331_v32 = vor.u32 %v3989_v59, %v3330_v26  ;;  %v3894_v59 = vld [vmem:[%s5546_s0 + $0xec] sm:$0xf0]  ;;  %v3020_v17 = vld [vmem:[%s5546_s0 + $0x170] sm:$0xf0] }
 0x189   :  { %v5204_v56 = vadd.f32 %v2227_v47, %v2179_v19  ;;  %v2132_v57 = vadd.f32 %v2131_v51, %v2083_v53 }
 0x18e   :  { %v2180_v2 = vpop.f32.mrf.mxu2  ;;  %v2085_v9 = vpop.f32.mrf.mxu0 }
 0x18f   :  { %v2229_v4 = vpop.f32.mrf.mxu3  ;;  %v2181_v8 = vadd.f32 %v2180_v2, %v2132_v57  ;;  %v2134_v49 = vpop.f32.mrf.mxu1  ;;  %v2086_v11 = vadd.f32 %v2085_v9, %v4919_v39  ;;  %v2890_v39 = vld [vmem:[%s5546_s0 + $0x30] sm:$0xf]  ;;  %v3895_v2 = vld [vmem:[%s5546_s0 + $0xf4] sm:$0xf0] }
 0x190   :  { %v2891_v37 = vor.u32 %v3878_v25, %v2890_v39 }
 0x191   :  { %v5231_v13 = vadd.f32 %v2229_v4, %v2181_v8  ;;  %v2135_v15 = vadd.f32 %v2134_v49, %v2086_v11  ;;  %2280 = vmatmul.bf16.gmra.mxu0 %v3323_v6  ;;  %v3887_v4 = vld [vmem:[%s5546_s0 + $0xbc] sm:$0xf]  ;;  %v2959_v49 = vor.u32 %v3886_v62, %v2956_v63 }
 0x192   :  { %2329 = vmatmul.bf16.gmra.mxu1 %v3327_v7  ;;  %v2964_v6 = vld [vmem:[%s5546_s0 + $0xf8] sm:$0xf0] }
 0x193   :  { %2378 = vmatmul.bf16.gmra.mxu2 %v3331_v32 }
 0x194   :  { %2427 = vmatmul.bf16.gmra.mxu3 %v3335_v10 }
 0x196   :  { %v2183_v16 = vpop.f32.mrf.mxu2  ;;  %v2087_v21 = vpop.f32.mrf.mxu0 }
 0x197   :  { %v2232_v20 = vpop.f32.mrf.mxu3  ;;  %v2184_v60 = vadd.f32 %v2183_v16, %v2135_v15  ;;  %v2136_v22 = vpop.f32.mrf.mxu1  ;;  %v2088_v23 = vadd.f32 %v2087_v21, %v4949_v1  ;;  %v2898_v1 = vld [vmem:[%s5546_s0 + $0x38] sm:$0xf]  ;;  %v2967_v16 = vor.u32 %v3887_v4, %v2964_v6  ;;  %v3918_v4 = vld [vmem:[%s5546_s0 + $0x1b4] sm:$0xf] }
 0x198   :  { %v2899_v45 = vor.u32 %v3879_v34, %v2898_v1  ;;  %v3910_v34 = vld [vmem:[%s5546_s0 + $0x16c] sm:$0xf0]  ;;  %v3084_v6 = vld [vmem:[%s5546_s0 + $0x1f0] sm:$0xf0] }
 0x199   :  { %v5234_v54 = vadd.f32 %v2232_v20, %v2184_v60  ;;  %v2137_v24 = vadd.f32 %v2136_v22, %v2088_v23 }
 0x19e   :  { %v2185_v61 = vpop.f32.mrf.mxu2  ;;  %v2246_v42 = vpop.f32.mrf.mxu0 }
 0x19f   :  { %v2234_v36 = vpop.f32.mrf.mxu3  ;;  %v2186_v41 = vadd.f32 %v2185_v61, %v2137_v24  ;;  %v2295_v44 = vpop.f32.mrf.mxu1  ;;  %v2247_v47 = vadd.f32 %v2246_v42, %v4961_v12  ;;  %v2954_v12 = vld [vmem:[%s5546_s0 + $0xb0] sm:$0xf]  ;;  %v3911_v61 = vld [vmem:[%s5546_s0 + $0x174] sm:$0xf0] }
 0x1a0   :  { %v2955_v9 = vor.u32 %v3894_v59, %v2954_v12 }
 0x1a1   :  { %v5261_v19 = vadd.f32 %v2234_v36, %v2186_v41  ;;  %v2296_v48 = vadd.f32 %v2295_v44, %v2247_v47  ;;  %2441 = vmatmul.bf16.vlgmr.msrb.gmra.mxu0 %v2891_v37  ;;  %v3903_v36 = vld [vmem:[%s5546_s0 + $0x13c] sm:$0xf]  ;;  %v3023_v44 = vor.u32 %v3902_v35, %v3020_v17 }
 0x1a2   :  { %2490 = vmatmul.bf16.vlgmr.msrb.gmra.mxu1 %v2895_v38  ;;  %v3028_v37 = vld [vmem:[%s5546_s0 + $0x178] sm:$0xf0] }
 0x1a3   :  { %2539 = vmatmul.bf16.vlgmr.msrb.gmra.mxu2 %v2899_v45 }
 0x1a4   :  { %2588 = vmatmul.bf16.vlgmr.msrb.gmra.mxu3 %v2903_v46 }
 0x1a6   :  { %v2344_v51 = vpop.f32.mrf.mxu2  ;;  %v2248_v3 = vpop.f32.mrf.mxu0 }
 0x1a7   :  { %v2393_v53 = vpop.f32.mrf.mxu3  ;;  %v2345_v57 = vadd.f32 %v2344_v51, %v2296_v48  ;;  %v2297_v58 = vpop.f32.mrf.mxu1  ;;  %v2249_v50 = vadd.f32 %v2248_v3, %v4991_v40  ;;  %v2962_v40 = vld [vmem:[%s5546_s0 + $0xb8] sm:$0xf]  ;;  %v3031_v51 = vor.u32 %v3903_v36, %v3028_v37  ;;  %v3934_v36 = vld [vmem:[%s5546_s0 + $0x234] sm:$0xf] }
 0x1a8   :  { %v2963_v15 = vor.u32 %v3895_v2, %v2962_v40  ;;  %v3926_v2 = vld [vmem:[%s5546_s0 + $0x1ec] sm:$0xf0]  ;;  %v3148_v37 = vld [vmem:[%s5546_s0 + $0x270] sm:$0xf0] }
 0x1a9   :  { %v5264_v28 = vadd.f32 %v2393_v53, %v2345_v57  ;;  %v2298_v26 = vadd.f32 %v2297_v58, %v2249_v50 }
 0x1ae   :  { %v2346_v7 = vpop.f32.mrf.mxu2  ;;  %v2251_v10 = vpop.f32.mrf.mxu0 }
 0x1af   :  { %v2395_v8 = vpop.f32.mrf.mxu3  ;;  %v2347_v32 = vadd.f32 %v2346_v7, %v2298_v26  ;;  %v2300_v11 = vpop.f32.mrf.mxu1  ;;  %v2252_v20 = vadd.f32 %v2251_v10, %v5003_v52  ;;  %v3018_v52 = vld [vmem:[%s5546_s0 + $0x130] sm:$0xf]  ;;  %v3927_v7 = vld [vmem:[%s5546_s0 + $0x1f4] sm:$0xf0] }
 0x1b0   :  { %v3019_v42 = vor.u32 %v3910_v34, %v3018_v52 }
 0x1b1   :  { %v5291_v60 = vadd.f32 %v2395_v8, %v2347_v32  ;;  %v2301_v21 = vadd.f32 %v2300_v11, %v2252_v20  ;;  %2446 = vmatmul.bf16.gmra.mxu0 %v2955_v9  ;;  %v3919_v8 = vld [vmem:[%s5546_s0 + $0x1bc] sm:$0xf]  ;;  %v3087_v11 = vor.u32 %v3918_v4, %v3084_v6 }
 0x1b2   :  { %2495 = vmatmul.bf16.gmra.mxu1 %v2959_v49  ;;  %v3092_v9 = vld [vmem:[%s5546_s0 + $0x1f8] sm:$0xf0] }
 0x1b3   :  { %2544 = vmatmul.bf16.gmra.mxu2 %v2963_v15 }
 0x1b4   :  { %2593 = vmatmul.bf16.gmra.mxu3 %v2967_v16 }
 0x1b6   :  { %v2349_v22 = vpop.f32.mrf.mxu2  ;;  %v2253_v39 = vpop.f32.mrf.mxu0 }
 0x1b7   :  { %v2398_v23 = vpop.f32.mrf.mxu3  ;;  %v2350_v24 = vadd.f32 %v2349_v22, %v2301_v21  ;;  %v2302_v25 = vpop.f32.mrf.mxu1  ;;  %v2254_v29 = vadd.f32 %v2253_v39, %v5033_v14  ;;  %v3026_v14 = vld [vmem:[%s5546_s0 + $0x138] sm:$0xf]  ;;  %v3095_v22 = vor.u32 %v3919_v8, %v3092_v9  ;;  %v3950_v8 = vld [vmem:[%s5546_s0 + $0x2b4] sm:$0xf] }
 0x1b8   :  { %v3027_v48 = vor.u32 %v3911_v61, %v3026_v14  ;;  %v3942_v61 = vld [vmem:[%s5546_s0 + $0x26c] sm:$0xf0]  ;;  %v3212_v9 = vld [vmem:[%s5546_s0 + $0x2f0] sm:$0xf0] }
 0x1b9   :  { %v5294_v33 = vadd.f32 %v2398_v23, %v2350_v24  ;;  %v2303_v1 = vadd.f32 %v2302_v25, %v2254_v29 }
 0x1be   :  { %v2351_v38 = vpop.f32.mrf.mxu2  ;;  %v2256_v46 = vpop.f32.mrf.mxu0 }
 0x1bf   :  { %v2400_v41 = vpop.f32.mrf.mxu3  ;;  %v2352_v45 = vadd.f32 %v2351_v38, %v2303_v1  ;;  %v2305_v47 = vpop.f32.mrf.mxu1  ;;  %v2257_v53 = vadd.f32 %v2256_v46, %v5045_v27  ;;  %v3082_v27 = vld [vmem:[%s5546_s0 + $0x1b0] sm:$0xf]  ;;  %v3943_v38 = vld [vmem:[%s5546_s0 + $0x274] sm:$0xf0] }
 0x1c0   :  { %v3083_v10 = vor.u32 %v3926_v2, %v3082_v27 }
 0x1c1   :  { %v5321_v57 = vadd.f32 %v2400_v41, %v2352_v45  ;;  %v2306_v3 = vadd.f32 %v2305_v47, %v2257_v53  ;;  %2451 = vmatmul.bf16.gmra.mxu0 %v3019_v42  ;;  %v3935_v41 = vld [vmem:[%s5546_s0 + $0x23c] sm:$0xf]  ;;  %v3151_v47 = vor.u32 %v3934_v36, %v3148_v37 }
 0x1c2   :  { %2500 = vmatmul.bf16.gmra.mxu1 %v3023_v44  ;;  %v3156_v42 = vld [vmem:[%s5546_s0 + $0x278] sm:$0xf0] }
 0x1c3   :  { %2549 = vmatmul.bf16.gmra.mxu2 %v3027_v48 }
 0x1c4   :  { %2598 = vmatmul.bf16.gmra.mxu3 %v3031_v51 }
 0x1c6   :  { %v2354_v58 = vpop.f32.mrf.mxu2  ;;  %v2258_v12 = vpop.f32.mrf.mxu0 }
 0x1c7   :  { %v2403_v50 = vpop.f32.mrf.mxu3  ;;  %v2355_v26 = vadd.f32 %v2354_v58, %v2306_v3  ;;  %v2307_v59 = vpop.f32.mrf.mxu1  ;;  %v2259_v62 = vadd.f32 %v2258_v12, %v5075_v55  ;;  %v3090_v55 = vld [vmem:[%s5546_s0 + $0x1b8] sm:$0xf]  ;;  %v3159_v58 = vor.u32 %v3935_v41, %v3156_v42  ;;  %v3966_v41 = vld [vmem:[%s5546_s0 + $0x334] sm:$0xf] }
 0x1c8   :  { %v3091_v21 = vor.u32 %v3927_v7, %v3090_v55  ;;  %v3958_v7 = vld [vmem:[%s5546_s0 + $0x2ec] sm:$0xf0]  ;;  %v3276_v42 = vld [vmem:[%s5546_s0 + $0x370] sm:$0xf0] }
 0x1c9   :  { %v5324_v63 = vadd.f32 %v2403_v50, %v2355_v26  ;;  %v2308_v40 = vadd.f32 %v2307_v59, %v2259_v62 }
 0x1ce   :  { %v2356_v49 = vpop.f32.mrf.mxu2  ;;  %v2261_v16 = vpop.f32.mrf.mxu0 }
 0x1cf   :  { %v2405_v32 = vpop.f32.mrf.mxu3  ;;  %v2357_v15 = vadd.f32 %v2356_v49, %v2308_v40  ;;  %v2310_v20 = vpop.f32.mrf.mxu1  ;;  %v2262_v23 = vadd.f32 %v2261_v16, %v5087_v5  ;;  %v3146_v5 = vld [vmem:[%s5546_s0 + $0x230] sm:$0xf]  ;;  %v3959_v49 = vld [vmem:[%s5546_s0 + $0x2f4] sm:$0xf0] }
 0x1d0   :  { %v3147_v46 = vor.u32 %v3942_v61, %v3146_v5 }
 0x1d1   :  { %v5351_v24 = vadd.f32 %v2405_v32, %v2357_v15  ;;  %v2311_v39 = vadd.f32 %v2310_v20, %v2262_v23  ;;  %2456 = vmatmul.bf16.gmra.mxu0 %v3083_v10  ;;  %v3951_v32 = vld [vmem:[%s5546_s0 + $0x2bc] sm:$0xf]  ;;  %v3215_v20 = vor.u32 %v3950_v8, %v3212_v9 }
 0x1d2   :  { %2505 = vmatmul.bf16.gmra.mxu1 %v3087_v11  ;;  %v3220_v10 = vld [vmem:[%s5546_s0 + $0x2f8] sm:$0xf0] }
 0x1d3   :  { %2554 = vmatmul.bf16.gmra.mxu2 %v3091_v21 }
 0x1d4   :  { %2603 = vmatmul.bf16.gmra.mxu3 %v3095_v22 }
 0x1d6   :  { %v2359_v25 = vpop.f32.mrf.mxu2  ;;  %v2263_v52 = vpop.f32.mrf.mxu0 }
 0x1d7   :  { %v2408_v29 = vpop.f32.mrf.mxu3  ;;  %v2360_v1 = vadd.f32 %v2359_v25, %v2311_v39  ;;  %v2312_v34 = vpop.f32.mrf.mxu1  ;;  %v2264_v35 = vadd.f32 %v2263_v52, %v5117_v31  ;;  %v3154_v31 = vld [vmem:[%s5546_s0 + $0x238] sm:$0xf]  ;;  %v3223_v25 = vor.u32 %v3951_v32, %v3220_v10  ;;  %v3982_v32 = vld [vmem:[%s5546_s0 + $0x3b4] sm:$0xf] }
 0x1d8   :  { %v3155_v3 = vor.u32 %v3943_v38, %v3154_v31  ;;  %v3974_v38 = vld [vmem:[%s5546_s0 + $0x36c] sm:$0xf0]  ;;  %v3340_v10 = vld [vmem:[%s5546_s0 + $0x3f0] sm:$0xf0] }
 0x1d9   :  { %v5354_v17 = vadd.f32 %v2408_v29, %v2360_v1  ;;  %v2313_v14 = vadd.f32 %v2312_v34, %v2264_v35 }
 0x1de   :  { %v2361_v44 = vpop.f32.mrf.mxu2  ;;  %v2266_v51 = vpop.f32.mrf.mxu0 }
 0x1df   :  { %v2410_v45 = vpop.f32.mrf.mxu3  ;;  %v2362_v48 = vadd.f32 %v2361_v44, %v2313_v14  ;;  %v2315_v53 = vpop.f32.mrf.mxu1  ;;  %v2267_v50 = vadd.f32 %v2266_v51, %v5129_v43  ;;  %v3210_v43 = vld [vmem:[%s5546_s0 + $0x2b0] sm:$0xf]  ;;  %v3975_v44 = vld [vmem:[%s5546_s0 + $0x374] sm:$0xf0] }
 0x1e0   :  { %v3211_v16 = vor.u32 %v3958_v7, %v3210_v43 }
 0x1e1   :  { %v5381_v26 = vadd.f32 %v2410_v45, %v2362_v48  ;;  %v2316_v12 = vadd.f32 %v2315_v53, %v2267_v50  ;;  %2461 = vmatmul.bf16.gmra.mxu0 %v3147_v46  ;;  %v3967_v45 = vld [vmem:[%s5546_s0 + $0x33c] sm:$0xf]  ;;  %v3279_v53 = vor.u32 %v3966_v41, %v3276_v42 }
 0x1e2   :  { %2510 = vmatmul.bf16.gmra.mxu1 %v3151_v47  ;;  %v3284_v46 = vld [vmem:[%s5546_s0 + $0x378] sm:$0xf0] }
 0x1e3   :  { %2559 = vmatmul.bf16.gmra.mxu2 %v3155_v3 }
 0x1e4   :  { %2608 = vmatmul.bf16.gmra.mxu3 %v3159_v58 }
 0x1e6   :  { %v2364_v59 = vpop.f32.mrf.mxu2  ;;  %v2268_v27 = vpop.f32.mrf.mxu0 }
 0x1e7   :  { %v2413_v62 = vpop.f32.mrf.mxu3  ;;  %v2365_v40 = vadd.f32 %v2364_v59, %v2316_v12  ;;  %v2317_v2 = vpop.f32.mrf.mxu1  ;;  %v2269_v4 = vadd.f32 %v2268_v27, %v5159_v0  ;;  %v3218_v0 = vld [vmem:[%s5546_s0 + $0x2b8] sm:$0xf]  ;;  %v3287_v59 = vor.u32 %v3967_v45, %v3284_v46 }
 0x1e8   :  { %v3219_v39 = vor.u32 %v3959_v49, %v3218_v0  ;;  %v3990_v49 = vld [vmem:[%s5546_s0 + $0x3ec] sm:$0xf0] }
 0x1e9   :  { %v5384_v6 = vadd.f32 %v2413_v62, %v2365_v40  ;;  %v2318_v55 = vadd.f32 %v2317_v2, %v2269_v4 }
 0x1ee   :  { %v2366_v11 = vpop.f32.mrf.mxu2  ;;  %v2271_v22 = vpop.f32.mrf.mxu0 }
 0x1ef   :  { %v2415_v15 = vpop.f32.mrf.mxu3  ;;  %v2367_v21 = vadd.f32 %v2366_v11, %v2318_v55  ;;  %v2320_v23 = vpop.f32.mrf.mxu1  ;;  %v2272_v29 = vadd.f32 %v2271_v22, %v5171_v18  ;;  %v3274_v18 = vld [vmem:[%s5546_s0 + $0x330] sm:$0xf]  ;;  %v3991_v11 = vld [vmem:[%s5546_s0 + $0x3f4] sm:$0xf0] }
 0x1f0   :  { %v3275_v51 = vor.u32 %v3974_v38, %v3274_v18 }
 0x1f1   :  { %v5411_v1 = vadd.f32 %v2415_v15, %v2367_v21  ;;  %v2321_v52 = vadd.f32 %v2320_v23, %v2272_v29  ;;  %2466 = vmatmul.bf16.gmra.mxu0 %v3211_v16  ;;  %v3983_v15 = vld [vmem:[%s5546_s0 + $0x3bc] sm:$0xf]  ;;  %v3343_v23 = vor.u32 %v3982_v32, %v3340_v10 }
 0x1f2   :  { %2515 = vmatmul.bf16.gmra.mxu1 %v3215_v20  ;;  %v3348_v16 = vld [vmem:[%s5546_s0 + $0x3f8] sm:$0xf0] }
 0x1f3   :  { %2564 = vmatmul.bf16.gmra.mxu2 %v3219_v39 }
 0x1f4   :  { %2613 = vmatmul.bf16.gmra.mxu3 %v3223_v25 }
 0x1f6   :  { %v2369_v34 = vpop.f32.mrf.mxu2  ;;  %v2273_v5 = vpop.f32.mrf.mxu0 }
 0x1f7   :  { %v2418_v35 = vpop.f32.mrf.mxu3  ;;  %v2370_v14 = vadd.f32 %v2369_v34, %v2321_v52  ;;  %v2322_v61 = vpop.f32.mrf.mxu1  ;;  %v2274_v36 = vadd.f32 %v2273_v5, %v5201_v30  ;;  %v3282_v30 = vld [vmem:[%s5546_s0 + $0x338] sm:$0xf]  ;;  %v3351_v34 = vor.u32 %v3983_v15, %v3348_v16 }
 0x1f8   :  { %v3283_v12 = vor.u32 %v3975_v44, %v3282_v30 }
 0x1f9   :  { %v5414_v37 = vadd.f32 %v2418_v35, %v2370_v14  ;;  %v2323_v31 = vadd.f32 %v2322_v61, %v2274_v36 }
 0x1fe   :  { %v2371_v47 = vpop.f32.mrf.mxu2  ;;  %v2276_v58 = vpop.f32.mrf.mxu0 }
 0x1ff   :  { %v2420_v48 = vpop.f32.mrf.mxu3  ;;  %v2372_v3 = vadd.f32 %v2371_v47, %v2323_v31  ;;  %v2325_v50 = vpop.f32.mrf.mxu1  ;;  %v2277_v62 = vadd.f32 %v2276_v58, %v5204_v56  ;;  %v3338_v56 = vld [vmem:[%s5546_s0 + $0x3b0] sm:$0xf] }
 0x200   :  { %v3339_v22 = vor.u32 %v3990_v49, %v3338_v56 }
 0x201   :  { %v5441_v40 = vadd.f32 %v2420_v48, %v2372_v3  ;;  %v2326_v27 = vadd.f32 %v2325_v50, %v2277_v62  ;;  %2471 = vmatmul.bf16.gmra.mxu0 %v3275_v51 }
 0x202   :  { %2520 = vmatmul.bf16.gmra.mxu1 %v3279_v53 }
 0x203   :  { %2569 = vmatmul.bf16.gmra.mxu2 %v3283_v12 }
 0x204   :  { %2618 = vmatmul.bf16.gmra.mxu3 %v3287_v59 }
 0x206   :  { %v2374_v2 = vpop.f32.mrf.mxu2  ;;  %v2278_v43 = vpop.f32.mrf.mxu0 }
 0x207   :  { %v2423_v4 = vpop.f32.mrf.mxu3  ;;  %v2375_v55 = vadd.f32 %v2374_v2, %v2326_v27  ;;  %v2327_v7 = vpop.f32.mrf.mxu1  ;;  %v2279_v8 = vadd.f32 %v2278_v43, %v5231_v13  ;;  %v3346_v13 = vld [vmem:[%s5546_s0 + $0x3b8] sm:$0xf]  ;;  %v5483_v27 = vld [vmem:[%s5547_s2] ss:$0 sm:$0xff] }
 0x208   :  { %v3347_v52 = vor.u32 %v3991_v11, %v3346_v13 }
 0x209   :  { %v5444_v9 = vadd.f32 %v2423_v4, %v2375_v55  ;;  %v2328_v0 = vadd.f32 %v2327_v7, %v2279_v8 }
 0x20e   :  { %v2376_v20 = vpop.f32.mrf.mxu2  ;;  %v2281_v25 = vpop.f32.mrf.mxu0 }
 0x20f   :  { %v2425_v21 = vpop.f32.mrf.mxu3  ;;  %v2377_v39 = vadd.f32 %v2376_v20, %v2328_v0  ;;  %v2330_v29 = vpop.f32.mrf.mxu1  ;;  %v2282_v35 = vadd.f32 %v2281_v25, %v5234_v54 }
 0x211   :  { %v5471_v14 = vadd.f32 %v2425_v21, %v2377_v39  ;;  %v2331_v5 = vadd.f32 %v2330_v29, %v2282_v35  ;;  %2476 = vmatmul.bf16.gmra.mxu0 %v3339_v22 }
 0x212   :  { %2525 = vmatmul.bf16.gmra.mxu1 %v3343_v23 }
 0x213   :  { %2574 = vmatmul.bf16.gmra.mxu2 %v3347_v52 }
 0x214   :  { %2623 = vmatmul.bf16.gmra.mxu3 %v3351_v34 }
 0x216   :  { %v2379_v61 = vpop.f32.mrf.mxu2  ;;  %v2283_v18 = vpop.f32.mrf.mxu0 }
 0x217   :  { %v2428_v36 = vpop.f32.mrf.mxu3  ;;  %v2380_v31 = vadd.f32 %v2379_v61, %v2331_v5  ;;  %v2332_v38 = vpop.f32.mrf.mxu1  ;;  %v2284_v41 = vadd.f32 %v2283_v18, %v5261_v19 }
 0x219   :  { %v5474_v42 = vadd.f32 %v2428_v36, %v2380_v31  ;;  %v2333_v30 = vadd.f32 %v2332_v38, %v2284_v41 }
 0x21e   :  { %v2381_v44 = vpop.f32.mrf.mxu2  ;;  %v2442_v46 = vpop.f32.mrf.mxu0 }
 0x21f   :  { %v2430_v45 = vpop.f32.mrf.mxu3  ;;  %v2382_v54 = vadd.f32 %v2381_v44, %v2333_v30  ;;  %v2491_v47 = vpop.f32.mrf.mxu1  ;;  %v2443_v51 = vadd.f32 %v2442_v46, %v5264_v28 }
 0x221   :  { %v5476_v48 = vadd.f32 %v2430_v45, %v2382_v54  ;;  %v2492_v53 = vadd.f32 %v2491_v47, %v2443_v51 }
 0x226   :  { %v2540_v3 = vpop.f32.mrf.mxu2  ;;  %v2444_v50 = vpop.f32.mrf.mxu0 }
 0x227   :  { %v2589_v58 = vpop.f32.mrf.mxu3  ;;  %v2493_v12 = vpop.f32.mrf.mxu1  ;;  %v2541_v59 = vadd.f32 %v2540_v3, %v2492_v53  ;;  %v2445_v19 = vadd.f32 %v2444_v50, %v5291_v60 }
 0x229   :  { %v2590_v62 = vadd.f32 %v2589_v58, %v2541_v59  ;;  %v2494_v2 = vadd.f32 %v2493_v12, %v2445_v19 }
 0x22b   :  { %v2684_v8 = vadd.f32 %v5483_v27, %v2590_v62 }
 0x22d   :  { %v2748_v60 = vmul.f32 %v2684_v8, %v2684_v8 }
 0x22e   :  { %v2542_v4 = vpop.f32.mrf.mxu2  ;;  %v2447_v7 = vpop.f32.mrf.mxu0 }
 0x22f   :  { %v2591_v55 = vpop.f32.mrf.mxu3  ;;  %v2543_v43 = vadd.f32 %v2542_v4, %v2494_v2  ;;  %v2496_v28 = vpop.f32.mrf.mxu1  ;;  %v2448_v56 = vadd.f32 %v2447_v7, %v5294_v33 }
 0x231   :  { %v2592_v0 = vadd.f32 %v2591_v55, %v2543_v43  ;;  %v2497_v11 = vadd.f32 %v2496_v28, %v2448_v56 }
 0x233   :  { %v2685_v49 = vadd.f32 %v5483_v27, %v2592_v0 }
 0x235   :  { %v2732_v32 = vadd.f32 %v2685_v49, %v2684_v8  ;;  %v2749_v10 = vmul.f32 %v2685_v49, %v2685_v49  ;;  %v4123_v13 = vpack.c.bf16 %v2685_v49, %v2684_v8 }
 0x236   :  { %v2545_v15 = vpop.f32.mrf.mxu2  ;;  %v2449_v22 = vpop.f32.mrf.mxu0 }
 0x237   :  { %v2594_v16 = vpop.f32.mrf.mxu3  ;;  %v2764_v20 = vadd.f32 %v2749_v10, %v2748_v60  ;;  %4124 = vst [vmem:[%s5548_s3] sm:$0xff] %v4123_v13   ;;  %v2546_v21 = vadd.f32 %v2545_v15, %v2497_v11  ;;  %v2498_v23 = vpop.f32.mrf.mxu1  ;;  %v2450_v33 = vadd.f32 %v2449_v22, %v5321_v57 }
 0x239   :  { %v2595_v39 = vadd.f32 %v2594_v16, %v2546_v21  ;;  %v2499_v34 = vadd.f32 %v2498_v23, %v2450_v33 }
 0x23b   :  { %v2686_v25 = vadd.f32 %v5483_v27, %v2595_v39 }
 0x23d   :  { %v2733_v29 = vadd.f32 %v2732_v32, %v2686_v25  ;;  %v2750_v52 = vmul.f32 %v2686_v25, %v2686_v25 }
 0x23e   :  { %v2547_v35 = vpop.f32.mrf.mxu2  ;;  %v2452_v31 = vpop.f32.mrf.mxu0 }
 0x23f   :  { %v2596_v5 = vpop.f32.mrf.mxu3  ;;  %v2765_v61 = vadd.f32 %v2764_v20, %v2750_v52  ;;  %v2548_v36 = vadd.f32 %v2547_v35, %v2499_v34  ;;  %v2501_v18 = vpop.f32.mrf.mxu1  ;;  %v2453_v41 = vadd.f32 %v2452_v31, %v5324_v63 }
 0x241   :  { %v2597_v38 = vadd.f32 %v2596_v5, %v2548_v36  ;;  %v2502_v57 = vadd.f32 %v2501_v18, %v2453_v41 }
 0x243   :  { %v2687_v30 = vadd.f32 %v5483_v27, %v2597_v38 }
 0x245   :  { %v2734_v44 = vadd.f32 %v2733_v29, %v2687_v30  ;;  %v2751_v45 = vmul.f32 %v2687_v30, %v2687_v30  ;;  %v4128_v54 = vpack.c.bf16 %v2687_v30, %v2686_v25 }
 0x246   :  { %v2550_v46 = vpop.f32.mrf.mxu2  ;;  %v2454_v3 = vpop.f32.mrf.mxu0 }
 0x247   :  { %v2599_v47 = vpop.f32.mrf.mxu3  ;;  %v2766_v51 = vadd.f32 %v2765_v61, %v2751_v45  ;;  %4160 = vst [vmem:[%s5548_s3 + $0x8] sm:$0xff] %v4128_v54   ;;  %v2551_v53 = vadd.f32 %v2550_v46, %v2502_v57  ;;  %v2503_v58 = vpop.f32.mrf.mxu1  ;;  %v2455_v12 = vadd.f32 %v2454_v3, %v5351_v24 }
 0x249   :  { %v2600_v50 = vadd.f32 %v2599_v47, %v2551_v53  ;;  %v2504_v62 = vadd.f32 %v2503_v58, %v2455_v12 }
 0x24b   :  { %v2688_v63 = vadd.f32 %v5483_v27, %v2600_v50 }
 0x24d   :  { %v2735_v59 = vadd.f32 %v2734_v44, %v2688_v63  ;;  %v2752_v19 = vmul.f32 %v2688_v63, %v2688_v63 }
 0x24e   :  { %v2552_v2 = vpop.f32.mrf.mxu2  ;;  %v2457_v7 = vpop.f32.mrf.mxu0 }
 0x24f   :  { %v2601_v4 = vpop.f32.mrf.mxu3  ;;  %v2767_v55 = vadd.f32 %v2766_v51, %v2752_v19  ;;  %v2553_v43 = vadd.f32 %v2552_v2, %v2504_v62  ;;  %v2506_v28 = vpop.f32.mrf.mxu1  ;;  %v2458_v0 = vadd.f32 %v2457_v7, %v5354_v17 }
 0x251   :  { %v2602_v8 = vadd.f32 %v2601_v4, %v2553_v43  ;;  %v2507_v24 = vadd.f32 %v2506_v28, %v2458_v0 }
 0x253   :  { %v2689_v56 = vadd.f32 %v5483_v27, %v2602_v8 }
 0x255   :  { %v2736_v49 = vadd.f32 %v2735_v59, %v2689_v56  ;;  %v2753_v60 = vmul.f32 %v2689_v56, %v2689_v56  ;;  %v4133_v32 = vpack.c.bf16 %v2689_v56, %v2688_v63 }
 0x256   :  { %v2555_v10 = vpop.f32.mrf.mxu2  ;;  %v2459_v16 = vpop.f32.mrf.mxu0 }
 0x257   :  { %v2604_v13 = vpop.f32.mrf.mxu3  ;;  %v2768_v11 = vadd.f32 %v2767_v55, %v2753_v60  ;;  %4161 = vst [vmem:[%s5548_s3 + $0x10] sm:$0xff] %v4133_v32   ;;  %v2556_v15 = vadd.f32 %v2555_v10, %v2507_v24  ;;  %v2508_v20 = vpop.f32.mrf.mxu1  ;;  %v2460_v22 = vadd.f32 %v2459_v16, %v5381_v26 }
 0x259   :  { %v2605_v21 = vadd.f32 %v2604_v13, %v2556_v15  ;;  %v2509_v33 = vadd.f32 %v2508_v20, %v2460_v22 }
 0x25b   :  { %v2690_v17 = vadd.f32 %v5483_v27, %v2605_v21 }
 0x25d   :  { %v2737_v23 = vadd.f32 %v2736_v49, %v2690_v17  ;;  %v2754_v39 = vmul.f32 %v2690_v17, %v2690_v17 }
 0x25e   :  { %v2557_v25 = vpop.f32.mrf.mxu2  ;;  %v2462_v35 = vpop.f32.mrf.mxu0 }
 0x25f   :  { %v2606_v29 = vpop.f32.mrf.mxu3  ;;  %v2769_v52 = vadd.f32 %v2768_v11, %v2754_v39  ;;  %v2558_v34 = vadd.f32 %v2557_v25, %v2509_v33  ;;  %v2511_v5 = vpop.f32.mrf.mxu1  ;;  %v2463_v36 = vadd.f32 %v2462_v35, %v5384_v6 }
 0x261   :  { %v2607_v61 = vadd.f32 %v2606_v29, %v2558_v34  ;;  %v2512_v26 = vadd.f32 %v2511_v5, %v2463_v36 }
 0x263   :  { %v2691_v31 = vadd.f32 %v5483_v27, %v2607_v61 }
 0x265   :  { %v2738_v18 = vadd.f32 %v2737_v23, %v2691_v31  ;;  %v2755_v38 = vmul.f32 %v2691_v31, %v2691_v31  ;;  %v4138_v41 = vpack.c.bf16 %v2691_v31, %v2690_v17 }
 0x266   :  { %v2560_v30 = vpop.f32.mrf.mxu2  ;;  %v2464_v57 = vpop.f32.mrf.mxu0 }
 0x267   :  { %v2609_v44 = vpop.f32.mrf.mxu3  ;;  %v2770_v45 = vadd.f32 %v2769_v52, %v2755_v38  ;;  %4162 = vst [vmem:[%s5548_s3 + $0x18] sm:$0xff] %v4138_v41   ;;  %v2561_v54 = vadd.f32 %v2560_v30, %v2512_v26  ;;  %v2513_v46 = vpop.f32.mrf.mxu1  ;;  %v2465_v51 = vadd.f32 %v2464_v57, %v5411_v1 }
 0x269   :  { %v2610_v47 = vadd.f32 %v2609_v44, %v2561_v54  ;;  %v2514_v58 = vadd.f32 %v2513_v46, %v2465_v51 }
 0x26b   :  { %v2692_v6 = vadd.f32 %v5483_v27, %v2610_v47 }
 0x26d   :  { %v2739_v53 = vadd.f32 %v2738_v18, %v2692_v6  ;;  %v2756_v3 = vmul.f32 %v2692_v6, %v2692_v6 }
 0x26e   :  { %v2562_v50 = vpop.f32.mrf.mxu2  ;;  %v2467_v19 = vpop.f32.mrf.mxu0 }
 0x26f   :  { %v2611_v12 = vpop.f32.mrf.mxu3  ;;  %v2771_v63 = vadd.f32 %v2770_v45, %v2756_v3  ;;  %v2563_v59 = vadd.f32 %v2562_v50, %v2514_v58  ;;  %v2516_v62 = vpop.f32.mrf.mxu1  ;;  %v2468_v4 = vadd.f32 %v2467_v19, %v5414_v37 }
 0x271   :  { %v2612_v2 = vadd.f32 %v2611_v12, %v2563_v59  ;;  %v2517_v1 = vadd.f32 %v2516_v62, %v2468_v4 }
 0x273   :  { %v2693_v55 = vadd.f32 %v5483_v27, %v2612_v2 }
 0x275   :  { %v2740_v43 = vadd.f32 %v2739_v53, %v2693_v55  ;;  %v2757_v7 = vmul.f32 %v2693_v55, %v2693_v55  ;;  %v4143_v28 = vpack.c.bf16 %v2693_v55, %v2692_v6 }
 0x276   :  { %v2565_v8 = vpop.f32.mrf.mxu2  ;;  %v2469_v60 = vpop.f32.mrf.mxu0 }
 0x277   :  { %v2614_v0 = vpop.f32.mrf.mxu3  ;;  %v2772_v56 = vadd.f32 %v2771_v63, %v2757_v7  ;;  %4163 = vst [vmem:[%s5548_s3 + $0x20] sm:$0xff] %v4143_v28   ;;  %v2566_v49 = vadd.f32 %v2565_v8, %v2517_v1  ;;  %v2518_v32 = vpop.f32.mrf.mxu1  ;;  %v2470_v10 = vadd.f32 %v2469_v60, %v5441_v40 }
 0x279   :  { %v2615_v24 = vadd.f32 %v2614_v0, %v2566_v49  ;;  %v2519_v15 = vadd.f32 %v2518_v32, %v2470_v10 }
 0x27b   :  { %v2694_v37 = vadd.f32 %v5483_v27, %v2615_v24 }
 0x27d   :  { %v2741_v13 = vadd.f32 %v2740_v43, %v2694_v37  ;;  %v2758_v11 = vmul.f32 %v2694_v37, %v2694_v37 }
 0x27e   :  { %v2567_v16 = vpop.f32.mrf.mxu2  ;;  %v2472_v17 = vpop.f32.mrf.mxu0 }
 0x27f   :  { %v2616_v20 = vpop.f32.mrf.mxu3  ;;  %v2773_v21 = vadd.f32 %v2772_v56, %v2758_v11  ;;  %v2568_v22 = vadd.f32 %v2567_v16, %v2519_v15  ;;  %v2521_v23 = vpop.f32.mrf.mxu1  ;;  %v2473_v33 = vadd.f32 %v2472_v17, %v5444_v9 }
 0x281   :  { %v2617_v39 = vadd.f32 %v2616_v20, %v2568_v22  ;;  %v2522_v40 = vadd.f32 %v2521_v23, %v2473_v33 }
 0x283   :  { %v2695_v25 = vadd.f32 %v5483_v27, %v2617_v39 }
 0x285   :  { %v2742_v29 = vadd.f32 %v2741_v13, %v2695_v25  ;;  %v2759_v52 = vmul.f32 %v2695_v25, %v2695_v25  ;;  %v4148_v34 = vpack.c.bf16 %v2695_v25, %v2694_v37 }
 0x286   :  { %v2570_v35 = vpop.f32.mrf.mxu2  ;;  %v2474_v31 = vpop.f32.mrf.mxu0 }
 0x287   :  { %v2619_v5 = vpop.f32.mrf.mxu3  ;;  %v2774_v61 = vadd.f32 %v2773_v21, %v2759_v52  ;;  %4164 = vst [vmem:[%s5548_s3 + $0x28] sm:$0xff] %v4148_v34   ;;  %v2571_v36 = vadd.f32 %v2570_v35, %v2522_v40  ;;  %v2523_v18 = vpop.f32.mrf.mxu1  ;;  %v2475_v41 = vadd.f32 %v2474_v31, %v5471_v14 }
 0x289   :  { %v2620_v38 = vadd.f32 %v2619_v5, %v2571_v36  ;;  %v2524_v44 = vadd.f32 %v2523_v18, %v2475_v41 }
 0x28b   :  { %v2696_v9 = vadd.f32 %v5483_v27, %v2620_v38 }
 0x28d   :  { %v2743_v26 = vadd.f32 %v2742_v29, %v2696_v9  ;;  %v2760_v30 = vmul.f32 %v2696_v9, %v2696_v9 }
 0x28e   :  { %v2572_v45 = vpop.f32.mrf.mxu2  ;;  %v2477_v47 = vpop.f32.mrf.mxu0 }
 0x28f   :  { %v2621_v54 = vpop.f32.mrf.mxu3  ;;  %v2775_v57 = vadd.f32 %v2774_v61, %v2760_v30  ;;  %v2573_v46 = vadd.f32 %v2572_v45, %v2524_v44  ;;  %v2478_v6 = vadd.f32 %v2477_v47, %v5474_v42  ;;  %v2526_v53 = vpop.f32.mrf.mxu1 }
 0x291   :  { %v2622_v51 = vadd.f32 %v2621_v54, %v2573_v46  ;;  %v2527_v14 = vadd.f32 %v2526_v53, %v2478_v6 }
 0x293   :  { %v2697_v3 = vadd.f32 %v5483_v27, %v2622_v51 }
 0x295   :  { %v2744_v58 = vadd.f32 %v2743_v26, %v2697_v3  ;;  %v2761_v50 = vmul.f32 %v2697_v3, %v2697_v3  ;;  %v4153_v12 = vpack.c.bf16 %v2697_v3, %v2696_v9 }
 0x296   :  { %v2575_v63 = vpop.f32.mrf.mxu2  ;;  %v2479_v2 = vpop.f32.mrf.mxu0 }
 0x297   :  { %v2624_v59 = vpop.f32.mrf.mxu3  ;;  %v2776_v19 = vadd.f32 %v2775_v57, %v2761_v50  ;;  %4165 = vst [vmem:[%s5548_s3 + $0x30] sm:$0xff] %v4153_v12   ;;  %v2576_v62 = vadd.f32 %v2575_v63, %v2527_v14  ;;  %v2480_v55 = vadd.f32 %v2479_v2, %v5476_v48  ;;  %v2528_v43 = vpop.f32.mrf.mxu1 }
 0x299   :  { %v2625_v4 = vadd.f32 %v2624_v59, %v2576_v62  ;;  %v2529_v1 = vadd.f32 %v2528_v43, %v2480_v55 }
 0x29b   :  { %v2698_v42 = vadd.f32 %v5483_v27, %v2625_v4 }
 0x29d   :  { %v2745_v7 = vadd.f32 %v2744_v58, %v2698_v42  ;;  %v2762_v28 = vmul.f32 %v2698_v42, %v2698_v42 }
 0x29e   :  { %v2577_v8 = vpop.f32.mrf.mxu2 }
 0x29f   :  { %v2777_v0 = vadd.f32 %v2776_v19, %v2762_v28  ;;  %v2578_v56 = vadd.f32 %v2577_v8, %v2529_v1  ;;  %v2626_v49 = vpop.f32.mrf.mxu3 }
 0x2a1   :  { %v2627_v60 = vadd.f32 %v2626_v49, %v2578_v56 }
 0x2a3   :  { %v2699_v32 = vadd.f32 %v5483_v27, %v2627_v60 }
 0x2a5   :  { %v2746_v24 = vadd.f32 %v2745_v7, %v2699_v32  ;;  %v2763_v10 = vmul.f32 %v2699_v32, %v2699_v32  ;;  %v4158_v37 = vpack.c.bf16 %v2699_v32, %v2698_v42 }
 0x2a7   :  { %2747 = vst [vmem:[%s5549_s4] sm:$0xff] %v2746_v24  ;;  %v2778_v48 = vadd.f32 %v2777_v0, %v2763_v10 }
 0x2a8   :  { %4166 = vst [vmem:[%s5548_s3 + $0x38] sm:$0xff] %v4158_v37  }
 0x2a9   :  { %2779 = vst [vmem:[%s5550_s5] sm:$0xff] %v2778_v48 }

// kernel: _lambda_.9
= control target key start
LH: loop header
LB: loop body
LE: loop exit
PB: predicated region body
PF: predicated region fallthrough
CT: control target
= control target key end

     0   :  { %s7219_s12 = smov 0   ;;  %s7221_s13 = smov 0   ;;  %s8935_s0 = inlined_call_operand.vmem [shape: bf16[256,4096], index: 0, kind: input, shape index: {}]   ;;  %s8936_s1 = inlined_call_operand.vmem [shape: bf16[4096,128], index: 1, kind: input, shape index: {}]   ;;  %s8937_s2 = inlined_call_operand.vmem [shape: f32[1,128], index: 2, kind: input, shape index: {}]   ;;  %s8938_s3 = inlined_call_operand.vmem [shape: f32[256,128], index: 3, kind: output, shape index: {}]  }
   0x1   :  { %s7223_s14 = smov 0   ;;  %s7225_s15 = smov 0  }
   0x2   :  { %s7227_s16 = smov 0  }
   0x3 LB: > { %s25_s17 = sadd.s32 1, %s7192_s15  ;;  %p48_p1 = scmp.ne.s32.totalorder %s7184_s13, %s7180_s12  ;;  %s7196_s16 = sphi %s7227_s16, %s13_s16   ;;  %s7192_s15 = sphi %s7225_s15, %s8942_s15   ;;  %s7188_s14 = sphi %s7223_s14, %s8941_s14   ;;  %s7184_s13 = sphi %s7221_s13, %s8940_s13   ;;  %s7180_s12 = sphi %s7219_s12, %s8939_s12  }
   0x4   : > { %p26_p0 = scmp.ge.s32.totalorder %s25_s17, 2  ;;  %p49_p2 = scmp.eq.s32.totalorder %s7196_s16, 0 }
   0x5   : > { %s41_s19 = sadd.s32 1, %s7184_s13  ;;  %p5181_p5 = scmp.ge.s32.totalorder %s7196_s16, 2 }
   0x6   : > { %s8944_s17 = smov (%p26_p0, %s25_s17), 0  ;;  %p50_p3 = por %p49_p2, %p48_p1 }
   0x7   : > { %s37_s18 = ssub.s32 %s7192_s15, %s8944_s17  ;;  %162 = sbr.rel (%p5181_p5) target bundleno = 272 (0x110), region = 20 }
   0x8   : > { %p39_p4 = scmp.eq.s32.totalorder %s37_s18, 0 }
   0xa   : > { %s7254_s20 = scalar_select %p39_p4, %s7184_s13, %s41_s19  }
   0xc   : > { %165 = sbr.rel (!%p50_p3) target bundleno = 272 (0x110), region = 24  ;;  %s167_s21 = sand.u32 (%p50_p3), 1, %s7184_s13  }
   0xd   : > { %s6731_s22 = sshll.u32 (%p50_p3), %s7192_s15, 6  ;;  %s5182_s23 = sshll.u32 (%p50_p3), %s167_s21, 11 }
   0xe   : > { %s7262_s26 = scalar_lea.vmem (%p50_p3), %s8935_s0, %s6731_s22  ;;  %s7267_s27 = scalar_lea.vmem (%p50_p3), [#allocation3], %s5182_s23 }
   0xf   : > { %v188_v0 = vld [vmem:[%s7262_s26] sm:$0xff] (%p50_p3)  ;;  %v190_v1 = vld [vmem:[%s7262_s26 + $0x8] sm:$0xff] (%p50_p3)  ;;  %v192_v2 = vld [vmem:[%s7262_s26 + $0x10] sm:$0xff] (%p50_p3) }
  0x10   : > { %189 = vst [vmem:[%s7267_s27] sm:$0xff] (%p50_p3), %v188_v0  ;;  %v194_v3 = vld [vmem:[%s7262_s26 + $0x18] sm:$0xff] (%p50_p3)  ;;  %v196_v4 = vld [vmem:[%s7262_s26 + $0x20] sm:$0xff] (%p50_p3)  ;;  %v198_v5 = vld [vmem:[%s7262_s26 + $0x28] sm:$0xff] (%p50_p3) }
  0x11   : > { %191 = vst [vmem:[%s7267_s27 + $0x8] sm:$0xff] %v190_v1  ;;  %v200_v6 = vld [vmem:[%s7262_s26 + $0x30] sm:$0xff]  ;;  %v202_v7 = vld [vmem:[%s7262_s26 + $0x38] sm:$0xff]  ;;  %v204_v8 = vld [vmem:[%s7262_s26 + $0x80] sm:$0xff] }
  0x12   : > { %193 = vst [vmem:[%s7267_s27 + $0x10] sm:$0xff] %v192_v2  ;;  %v206_v9 = vld [vmem:[%s7262_s26 + $0x88] sm:$0xff]  ;;  %v208_v10 = vld [vmem:[%s7262_s26 + $0x90] sm:$0xff]  ;;  %v210_v11 = vld [vmem:[%s7262_s26 + $0x98] sm:$0xff] }
  0x13   : > { %195 = vst [vmem:[%s7267_s27 + $0x18] sm:$0xff] %v194_v3  ;;  %v212_v12 = vld [vmem:[%s7262_s26 + $0xa0] sm:$0xff]  ;;  %v214_v13 = vld [vmem:[%s7262_s26 + $0xa8] sm:$0xff]  ;;  %v216_v14 = vld [vmem:[%s7262_s26 + $0xb0] sm:$0xff] }
  0x14   : > { %197 = vst [vmem:[%s7267_s27 + $0x20] sm:$0xff] %v196_v4  ;;  %v218_v15 = vld [vmem:[%s7262_s26 + $0xb8] sm:$0xff]  ;;  %v220_v16 = vld [vmem:[%s7262_s26 + $0x100] sm:$0xff]  ;;  %v222_v17 = vld [vmem:[%s7262_s26 + $0x108] sm:$0xff] }
  0x15   : > { %199 = vst [vmem:[%s7267_s27 + $0x28] sm:$0xff] %v198_v5  ;;  %v224_v18 = vld [vmem:[%s7262_s26 + $0x110] sm:$0xff]  ;;  %v226_v19 = vld [vmem:[%s7262_s26 + $0x118] sm:$0xff]  ;;  %v228_v20 = vld [vmem:[%s7262_s26 + $0x120] sm:$0xff] }
  0x16   : > { %201 = vst [vmem:[%s7267_s27 + $0x30] sm:$0xff] %v200_v6  ;;  %v230_v21 = vld [vmem:[%s7262_s26 + $0x128] sm:$0xff]  ;;  %v232_v22 = vld [vmem:[%s7262_s26 + $0x130] sm:$0xff]  ;;  %v234_v23 = vld [vmem:[%s7262_s26 + $0x138] sm:$0xff] }
  0x17   : > { %203 = vst [vmem:[%s7267_s27 + $0x38] sm:$0xff] %v202_v7  ;;  %v236_v24 = vld [vmem:[%s7262_s26 + $0x180] sm:$0xff]  ;;  %v238_v25 = vld [vmem:[%s7262_s26 + $0x188] sm:$0xff]  ;;  %v240_v26 = vld [vmem:[%s7262_s26 + $0x190] sm:$0xff] }
  0x18   : > { %205 = vst [vmem:[%s7267_s27 + $0x40] sm:$0xff] %v204_v8  ;;  %v242_v27 = vld [vmem:[%s7262_s26 + $0x198] sm:$0xff]  ;;  %v244_v28 = vld [vmem:[%s7262_s26 + $0x1a0] sm:$0xff]  ;;  %v246_v29 = vld [vmem:[%s7262_s26 + $0x1a8] sm:$0xff] }
  0x19   : > { %207 = vst [vmem:[%s7267_s27 + $0x48] sm:$0xff] %v206_v9  ;;  %v248_v30 = vld [vmem:[%s7262_s26 + $0x1b0] sm:$0xff]  ;;  %v250_v31 = vld [vmem:[%s7262_s26 + $0x1b8] sm:$0xff]  ;;  %v252_v32 = vld [vmem:[%s7262_s26 + $0x200] sm:$0xff] }
  0x1a   : > { %209 = vst [vmem:[%s7267_s27 + $0x50] sm:$0xff] %v208_v10  ;;  %v254_v33 = vld [vmem:[%s7262_s26 + $0x208] sm:$0xff]  ;;  %v256_v34 = vld [vmem:[%s7262_s26 + $0x210] sm:$0xff]  ;;  %v258_v35 = vld [vmem:[%s7262_s26 + $0x218] sm:$0xff] }
  0x1b   : > { %211 = vst [vmem:[%s7267_s27 + $0x58] sm:$0xff] %v210_v11  ;;  %v260_v36 = vld [vmem:[%s7262_s26 + $0x220] sm:$0xff]  ;;  %v262_v37 = vld [vmem:[%s7262_s26 + $0x228] sm:$0xff]  ;;  %v264_v38 = vld [vmem:[%s7262_s26 + $0x230] sm:$0xff] }
  0x1c   : > { %213 = vst [vmem:[%s7267_s27 + $0x60] sm:$0xff] %v212_v12  ;;  %v266_v39 = vld [vmem:[%s7262_s26 + $0x238] sm:$0xff]  ;;  %v268_v40 = vld [vmem:[%s7262_s26 + $0x280] sm:$0xff]  ;;  %v270_v41 = vld [vmem:[%s7262_s26 + $0x288] sm:$0xff] }
  0x1d   : > { %215 = vst [vmem:[%s7267_s27 + $0x68] sm:$0xff] %v214_v13  ;;  %v272_v42 = vld [vmem:[%s7262_s26 + $0x290] sm:$0xff]  ;;  %v274_v43 = vld [vmem:[%s7262_s26 + $0x298] sm:$0xff]  ;;  %v276_v44 = vld [vmem:[%s7262_s26 + $0x2a0] sm:$0xff] }
  0x1e   : > { %217 = vst [vmem:[%s7267_s27 + $0x70] sm:$0xff] %v216_v14  ;;  %v278_v45 = vld [vmem:[%s7262_s26 + $0x2a8] sm:$0xff]  ;;  %v280_v46 = vld [vmem:[%s7262_s26 + $0x2b0] sm:$0xff]  ;;  %v282_v47 = vld [vmem:[%s7262_s26 + $0x2b8] sm:$0xff] }
  0x1f   : > { %219 = vst [vmem:[%s7267_s27 + $0x78] sm:$0xff] %v218_v15  ;;  %v284_v48 = vld [vmem:[%s7262_s26 + $0x300] sm:$0xff]  ;;  %v286_v49 = vld [vmem:[%s7262_s26 + $0x308] sm:$0xff]  ;;  %v288_v50 = vld [vmem:[%s7262_s26 + $0x310] sm:$0xff] }
  0x20   : > { %221 = vst [vmem:[%s7267_s27 + $0x80] sm:$0xff] %v220_v16  ;;  %v290_v51 = vld [vmem:[%s7262_s26 + $0x318] sm:$0xff]  ;;  %v292_v52 = vld [vmem:[%s7262_s26 + $0x320] sm:$0xff]  ;;  %v294_v53 = vld [vmem:[%s7262_s26 + $0x328] sm:$0xff] }
  0x21   : > { %223 = vst [vmem:[%s7267_s27 + $0x88] sm:$0xff] %v222_v17  ;;  %v296_v54 = vld [vmem:[%s7262_s26 + $0x330] sm:$0xff]  ;;  %v298_v55 = vld [vmem:[%s7262_s26 + $0x338] sm:$0xff]  ;;  %v300_v56 = vld [vmem:[%s7262_s26 + $0x380] sm:$0xff] }
  0x22   : > { %225 = vst [vmem:[%s7267_s27 + $0x90] sm:$0xff] %v224_v18  ;;  %v302_v57 = vld [vmem:[%s7262_s26 + $0x388] sm:$0xff]  ;;  %v304_v58 = vld [vmem:[%s7262_s26 + $0x390] sm:$0xff]  ;;  %v306_v59 = vld [vmem:[%s7262_s26 + $0x398] sm:$0xff] }
  0x23   : > { %227 = vst [vmem:[%s7267_s27 + $0x98] sm:$0xff] %v226_v19  ;;  %v308_v60 = vld [vmem:[%s7262_s26 + $0x3a0] sm:$0xff]  ;;  %v310_v61 = vld [vmem:[%s7262_s26 + $0x3a8] sm:$0xff]  ;;  %v312_v62 = vld [vmem:[%s7262_s26 + $0x3b0] sm:$0xff] }
  0x24   : > { %229 = vst [vmem:[%s7267_s27 + $0xa0] sm:$0xff] %v228_v20  ;;  %v314_v63 = vld [vmem:[%s7262_s26 + $0x3b8] sm:$0xff]  ;;  %v316_v0 = vld [vmem:[%s7262_s26 + $0x400] sm:$0xff]  ;;  %v318_v1 = vld [vmem:[%s7262_s26 + $0x408] sm:$0xff] }
  0x25   : > { %231 = vst [vmem:[%s7267_s27 + $0xa8] sm:$0xff] %v230_v21  ;;  %v320_v2 = vld [vmem:[%s7262_s26 + $0x410] sm:$0xff]  ;;  %v322_v3 = vld [vmem:[%s7262_s26 + $0x418] sm:$0xff]  ;;  %v324_v4 = vld [vmem:[%s7262_s26 + $0x420] sm:$0xff] }
  0x26   : > { %233 = vst [vmem:[%s7267_s27 + $0xb0] sm:$0xff] %v232_v22  ;;  %v326_v5 = vld [vmem:[%s7262_s26 + $0x428] sm:$0xff]  ;;  %v328_v6 = vld [vmem:[%s7262_s26 + $0x430] sm:$0xff]  ;;  %v330_v7 = vld [vmem:[%s7262_s26 + $0x438] sm:$0xff] }
  0x27   : > { %235 = vst [vmem:[%s7267_s27 + $0xb8] sm:$0xff] %v234_v23  ;;  %v332_v8 = vld [vmem:[%s7262_s26 + $0x480] sm:$0xff]  ;;  %v334_v9 = vld [vmem:[%s7262_s26 + $0x488] sm:$0xff]  ;;  %v336_v10 = vld [vmem:[%s7262_s26 + $0x490] sm:$0xff] }
  0x28   : > { %237 = vst [vmem:[%s7267_s27 + $0xc0] sm:$0xff] %v236_v24  ;;  %v338_v11 = vld [vmem:[%s7262_s26 + $0x498] sm:$0xff]  ;;  %v340_v12 = vld [vmem:[%s7262_s26 + $0x4a0] sm:$0xff]  ;;  %v342_v13 = vld [vmem:[%s7262_s26 + $0x4a8] sm:$0xff] }
  0x29   : > { %239 = vst [vmem:[%s7267_s27 + $0xc8] sm:$0xff] %v238_v25  ;;  %v344_v14 = vld [vmem:[%s7262_s26 + $0x4b0] sm:$0xff]  ;;  %v346_v15 = vld [vmem:[%s7262_s26 + $0x4b8] sm:$0xff]  ;;  %v348_v16 = vld [vmem:[%s7262_s26 + $0x500] sm:$0xff] }
  0x2a   : > { %241 = vst [vmem:[%s7267_s27 + $0xd0] sm:$0xff] %v240_v26  ;;  %v350_v17 = vld [vmem:[%s7262_s26 + $0x508] sm:$0xff]  ;;  %v352_v18 = vld [vmem:[%s7262_s26 + $0x510] sm:$0xff]  ;;  %v354_v19 = vld [vmem:[%s7262_s26 + $0x518] sm:$0xff] }
  0x2b   : > { %243 = vst [vmem:[%s7267_s27 + $0xd8] sm:$0xff] %v242_v27  ;;  %v356_v20 = vld [vmem:[%s7262_s26 + $0x520] sm:$0xff]  ;;  %v358_v21 = vld [vmem:[%s7262_s26 + $0x528] sm:$0xff]  ;;  %v360_v22 = vld [vmem:[%s7262_s26 + $0x530] sm:$0xff] }
  0x2c   : > { %245 = vst [vmem:[%s7267_s27 + $0xe0] sm:$0xff] %v244_v28  ;;  %v362_v23 = vld [vmem:[%s7262_s26 + $0x538] sm:$0xff]  ;;  %v364_v24 = vld [vmem:[%s7262_s26 + $0x580] sm:$0xff]  ;;  %v366_v25 = vld [vmem:[%s7262_s26 + $0x588] sm:$0xff] }
  0x2d   : > { %247 = vst [vmem:[%s7267_s27 + $0xe8] sm:$0xff] %v246_v29  ;;  %v368_v26 = vld [vmem:[%s7262_s26 + $0x590] sm:$0xff]  ;;  %v370_v27 = vld [vmem:[%s7262_s26 + $0x598] sm:$0xff]  ;;  %v372_v28 = vld [vmem:[%s7262_s26 + $0x5a0] sm:$0xff] }
  0x2e   : > { %249 = vst [vmem:[%s7267_s27 + $0xf0] sm:$0xff] %v248_v30  ;;  %v374_v29 = vld [vmem:[%s7262_s26 + $0x5a8] sm:$0xff]  ;;  %v376_v30 = vld [vmem:[%s7262_s26 + $0x5b0] sm:$0xff] }
  0x2f   : > { %251 = vst [vmem:[%s7267_s27 + $0xf8] sm:$0xff] %v250_v31  ;;  %v378_v31 = vld [vmem:[%s7262_s26 + $0x5b8] sm:$0xff] }
  0x30   : > { %253 = vst [vmem:[%s7267_s27 + $0x100] sm:$0xff] %v252_v32  ;;  %v380_v32 = vld [vmem:[%s7262_s26 + $0x600] sm:$0xff] }
  0x31   : > { %255 = vst [vmem:[%s7267_s27 + $0x108] sm:$0xff] %v254_v33  ;;  %v382_v33 = vld [vmem:[%s7262_s26 + $0x608] sm:$0xff] }
  0x32   : > { %257 = vst [vmem:[%s7267_s27 + $0x110] sm:$0xff] %v256_v34  ;;  %v384_v34 = vld [vmem:[%s7262_s26 + $0x610] sm:$0xff] }
  0x33   : > { %259 = vst [vmem:[%s7267_s27 + $0x118] sm:$0xff] %v258_v35  ;;  %v386_v35 = vld [vmem:[%s7262_s26 + $0x618] sm:$0xff] }
  0x34   : > { %261 = vst [vmem:[%s7267_s27 + $0x120] sm:$0xff] %v260_v36  ;;  %v388_v36 = vld [vmem:[%s7262_s26 + $0x620] sm:$0xff] }
  0x35   : > { %263 = vst [vmem:[%s7267_s27 + $0x128] sm:$0xff] %v262_v37  ;;  %v390_v37 = vld [vmem:[%s7262_s26 + $0x628] sm:$0xff] }
  0x36   : > { %265 = vst [vmem:[%s7267_s27 + $0x130] sm:$0xff] %v264_v38  ;;  %v392_v38 = vld [vmem:[%s7262_s26 + $0x630] sm:$0xff] }
  0x37   : > { %267 = vst [vmem:[%s7267_s27 + $0x138] sm:$0xff] %v266_v39  ;;  %v394_v39 = vld [vmem:[%s7262_s26 + $0x638] sm:$0xff] }
  0x38   : > { %269 = vst [vmem:[%s7267_s27 + $0x140] sm:$0xff] %v268_v40  ;;  %v396_v40 = vld [vmem:[%s7262_s26 + $0x680] sm:$0xff] }
  0x39   : > { %271 = vst [vmem:[%s7267_s27 + $0x148] sm:$0xff] %v270_v41  ;;  %v398_v41 = vld [vmem:[%s7262_s26 + $0x688] sm:$0xff] }
  0x3a   : > { %273 = vst [vmem:[%s7267_s27 + $0x150] sm:$0xff] %v272_v42  ;;  %v400_v42 = vld [vmem:[%s7262_s26 + $0x690] sm:$0xff] }
  0x3b   : > { %275 = vst [vmem:[%s7267_s27 + $0x158] sm:$0xff] %v274_v43  ;;  %v402_v43 = vld [vmem:[%s7262_s26 + $0x698] sm:$0xff] }
  0x3c   : > { %277 = vst [vmem:[%s7267_s27 + $0x160] sm:$0xff] %v276_v44  ;;  %v404_v44 = vld [vmem:[%s7262_s26 + $0x6a0] sm:$0xff] }
  0x3d   : > { %279 = vst [vmem:[%s7267_s27 + $0x168] sm:$0xff] %v278_v45  ;;  %v406_v45 = vld [vmem:[%s7262_s26 + $0x6a8] sm:$0xff] }
  0x3e   : > { %281 = vst [vmem:[%s7267_s27 + $0x170] sm:$0xff] %v280_v46  ;;  %v408_v46 = vld [vmem:[%s7262_s26 + $0x6b0] sm:$0xff] }
  0x3f   : > { %283 = vst [vmem:[%s7267_s27 + $0x178] sm:$0xff] %v282_v47  ;;  %v410_v47 = vld [vmem:[%s7262_s26 + $0x6b8] sm:$0xff] }
  0x40   : > { %285 = vst [vmem:[%s7267_s27 + $0x180] sm:$0xff] %v284_v48  ;;  %v412_v48 = vld [vmem:[%s7262_s26 + $0x700] sm:$0xff] }
  0x41   : > { %287 = vst [vmem:[%s7267_s27 + $0x188] sm:$0xff] %v286_v49  ;;  %v414_v49 = vld [vmem:[%s7262_s26 + $0x708] sm:$0xff] }
  0x42   : > { %289 = vst [vmem:[%s7267_s27 + $0x190] sm:$0xff] %v288_v50  ;;  %v416_v50 = vld [vmem:[%s7262_s26 + $0x710] sm:$0xff] }
  0x43   : > { %291 = vst [vmem:[%s7267_s27 + $0x198] sm:$0xff] %v290_v51  ;;  %v418_v51 = vld [vmem:[%s7262_s26 + $0x718] sm:$0xff] }
  0x44   : > { %293 = vst [vmem:[%s7267_s27 + $0x1a0] sm:$0xff] %v292_v52  ;;  %v420_v52 = vld [vmem:[%s7262_s26 + $0x720] sm:$0xff] }
  0x45   : > { %295 = vst [vmem:[%s7267_s27 + $0x1a8] sm:$0xff] %v294_v53  ;;  %v422_v53 = vld [vmem:[%s7262_s26 + $0x728] sm:$0xff] }
  0x46   : > { %297 = vst [vmem:[%s7267_s27 + $0x1b0] sm:$0xff] %v296_v54  ;;  %v424_v54 = vld [vmem:[%s7262_s26 + $0x730] sm:$0xff] }
  0x47   : > { %299 = vst [vmem:[%s7267_s27 + $0x1b8] sm:$0xff] %v298_v55  ;;  %v426_v55 = vld [vmem:[%s7262_s26 + $0x738] sm:$0xff] }
  0x48   : > { %301 = vst [vmem:[%s7267_s27 + $0x1c0] sm:$0xff] %v300_v56  ;;  %v428_v56 = vld [vmem:[%s7262_s26 + $0x780] sm:$0xff] }
  0x49   : > { %303 = vst [vmem:[%s7267_s27 + $0x1c8] sm:$0xff] %v302_v57  ;;  %v430_v57 = vld [vmem:[%s7262_s26 + $0x788] sm:$0xff] }
  0x4a   : > { %305 = vst [vmem:[%s7267_s27 + $0x1d0] sm:$0xff] %v304_v58  ;;  %v432_v58 = vld [vmem:[%s7262_s26 + $0x790] sm:$0xff] }
  0x4b   : > { %307 = vst [vmem:[%s7267_s27 + $0x1d8] sm:$0xff] %v306_v59  ;;  %v434_v59 = vld [vmem:[%s7262_s26 + $0x798] sm:$0xff] }
  0x4c   : > { %309 = vst [vmem:[%s7267_s27 + $0x1e0] sm:$0xff] %v308_v60  ;;  %v436_v60 = vld [vmem:[%s7262_s26 + $0x7a0] sm:$0xff] }
  0x4d   : > { %311 = vst [vmem:[%s7267_s27 + $0x1e8] sm:$0xff] %v310_v61  ;;  %v438_v61 = vld [vmem:[%s7262_s26 + $0x7a8] sm:$0xff] }
  0x4e   : > { %313 = vst [vmem:[%s7267_s27 + $0x1f0] sm:$0xff] %v312_v62  ;;  %v440_v62 = vld [vmem:[%s7262_s26 + $0x7b0] sm:$0xff] }
  0x4f   : > { %315 = vst [vmem:[%s7267_s27 + $0x1f8] sm:$0xff] %v314_v63  ;;  %v442_v63 = vld [vmem:[%s7262_s26 + $0x7b8] sm:$0xff] }
  0x50   : > { %317 = vst [vmem:[%s7267_s27 + $0x200] sm:$0xff] %v316_v0  ;;  %v444_v0 = vld [vmem:[%s7262_s26 + $0x800] sm:$0xff] }
  0x51   : > { %319 = vst [vmem:[%s7267_s27 + $0x208] sm:$0xff] %v318_v1  ;;  %v446_v1 = vld [vmem:[%s7262_s26 + $0x808] sm:$0xff] }
  0x52   : > { %321 = vst [vmem:[%s7267_s27 + $0x210] sm:$0xff] %v320_v2  ;;  %v448_v2 = vld [vmem:[%s7262_s26 + $0x810] sm:$0xff] }
  0x53   : > { %323 = vst [vmem:[%s7267_s27 + $0x218] sm:$0xff] %v322_v3  ;;  %v450_v3 = vld [vmem:[%s7262_s26 + $0x818] sm:$0xff] }
  0x54   : > { %325 = vst [vmem:[%s7267_s27 + $0x220] sm:$0xff] %v324_v4  ;;  %v452_v4 = vld [vmem:[%s7262_s26 + $0x820] sm:$0xff] }
  0x55   : > { %327 = vst [vmem:[%s7267_s27 + $0x228] sm:$0xff] %v326_v5  ;;  %v454_v5 = vld [vmem:[%s7262_s26 + $0x828] sm:$0xff] }
  0x56   : > { %329 = vst [vmem:[%s7267_s27 + $0x230] sm:$0xff] %v328_v6  ;;  %v456_v6 = vld [vmem:[%s7262_s26 + $0x830] sm:$0xff] }
  0x57   : > { %331 = vst [vmem:[%s7267_s27 + $0x238] sm:$0xff] %v330_v7  ;;  %v458_v7 = vld [vmem:[%s7262_s26 + $0x838] sm:$0xff] }
  0x58   : > { %333 = vst [vmem:[%s7267_s27 + $0x240] sm:$0xff] %v332_v8  ;;  %v460_v8 = vld [vmem:[%s7262_s26 + $0x880] sm:$0xff] }
  0x59   : > { %335 = vst [vmem:[%s7267_s27 + $0x248] sm:$0xff] %v334_v9  ;;  %v462_v9 = vld [vmem:[%s7262_s26 + $0x888] sm:$0xff] }
  0x5a   : > { %337 = vst [vmem:[%s7267_s27 + $0x250] sm:$0xff] %v336_v10  ;;  %v464_v10 = vld [vmem:[%s7262_s26 + $0x890] sm:$0xff] }
  0x5b   : > { %339 = vst [vmem:[%s7267_s27 + $0x258] sm:$0xff] %v338_v11  ;;  %v466_v11 = vld [vmem:[%s7262_s26 + $0x898] sm:$0xff] }
  0x5c   : > { %341 = vst [vmem:[%s7267_s27 + $0x260] sm:$0xff] %v340_v12  ;;  %v468_v12 = vld [vmem:[%s7262_s26 + $0x8a0] sm:$0xff] }
  0x5d   : > { %343 = vst [vmem:[%s7267_s27 + $0x268] sm:$0xff] %v342_v13  ;;  %v470_v13 = vld [vmem:[%s7262_s26 + $0x8a8] sm:$0xff] }
  0x5e   : > { %345 = vst [vmem:[%s7267_s27 + $0x270] sm:$0xff] %v344_v14  ;;  %v472_v14 = vld [vmem:[%s7262_s26 + $0x8b0] sm:$0xff] }
  0x5f   : > { %347 = vst [vmem:[%s7267_s27 + $0x278] sm:$0xff] %v346_v15  ;;  %v474_v15 = vld [vmem:[%s7262_s26 + $0x8b8] sm:$0xff] }
  0x60   : > { %349 = vst [vmem:[%s7267_s27 + $0x280] sm:$0xff] %v348_v16  ;;  %v476_v16 = vld [vmem:[%s7262_s26 + $0x900] sm:$0xff] }
  0x61   : > { %351 = vst [vmem:[%s7267_s27 + $0x288] sm:$0xff] %v350_v17  ;;  %v478_v17 = vld [vmem:[%s7262_s26 + $0x908] sm:$0xff] }
  0x62   : > { %353 = vst [vmem:[%s7267_s27 + $0x290] sm:$0xff] %v352_v18  ;;  %v480_v18 = vld [vmem:[%s7262_s26 + $0x910] sm:$0xff] }
  0x63   : > { %355 = vst [vmem:[%s7267_s27 + $0x298] sm:$0xff] %v354_v19  ;;  %v482_v19 = vld [vmem:[%s7262_s26 + $0x918] sm:$0xff] }
  0x64   : > { %357 = vst [vmem:[%s7267_s27 + $0x2a0] sm:$0xff] %v356_v20  ;;  %v484_v20 = vld [vmem:[%s7262_s26 + $0x920] sm:$0xff] }
  0x65   : > { %359 = vst [vmem:[%s7267_s27 + $0x2a8] sm:$0xff] %v358_v21  ;;  %v486_v21 = vld [vmem:[%s7262_s26 + $0x928] sm:$0xff] }
  0x66   : > { %361 = vst [vmem:[%s7267_s27 + $0x2b0] sm:$0xff] %v360_v22  ;;  %v488_v22 = vld [vmem:[%s7262_s26 + $0x930] sm:$0xff] }
  0x67   : > { %363 = vst [vmem:[%s7267_s27 + $0x2b8] sm:$0xff] %v362_v23  ;;  %v490_v23 = vld [vmem:[%s7262_s26 + $0x938] sm:$0xff] }
  0x68   : > { %365 = vst [vmem:[%s7267_s27 + $0x2c0] sm:$0xff] %v364_v24  ;;  %v492_v24 = vld [vmem:[%s7262_s26 + $0x980] sm:$0xff] }
  0x69   : > { %367 = vst [vmem:[%s7267_s27 + $0x2c8] sm:$0xff] %v366_v25  ;;  %v494_v25 = vld [vmem:[%s7262_s26 + $0x988] sm:$0xff] }
  0x6a   : > { %369 = vst [vmem:[%s7267_s27 + $0x2d0] sm:$0xff] %v368_v26  ;;  %v496_v26 = vld [vmem:[%s7262_s26 + $0x990] sm:$0xff] }
  0x6b   : > { %371 = vst [vmem:[%s7267_s27 + $0x2d8] sm:$0xff] %v370_v27  ;;  %v498_v27 = vld [vmem:[%s7262_s26 + $0x998] sm:$0xff] }
  0x6c   : > { %373 = vst [vmem:[%s7267_s27 + $0x2e0] sm:$0xff] %v372_v28  ;;  %v500_v28 = vld [vmem:[%s7262_s26 + $0x9a0] sm:$0xff] }
  0x6d   : > { %375 = vst [vmem:[%s7267_s27 + $0x2e8] sm:$0xff] %v374_v29  ;;  %v502_v29 = vld [vmem:[%s7262_s26 + $0x9a8] sm:$0xff] }
  0x6e   : > { %377 = vst [vmem:[%s7267_s27 + $0x2f0] sm:$0xff] %v376_v30  ;;  %v504_v30 = vld [vmem:[%s7262_s26 + $0x9b0] sm:$0xff] }
  0x6f   : > { %379 = vst [vmem:[%s7267_s27 + $0x2f8] sm:$0xff] %v378_v31  ;;  %v506_v31 = vld [vmem:[%s7262_s26 + $0x9b8] sm:$0xff] }
  0x70   : > { %381 = vst [vmem:[%s7267_s27 + $0x300] sm:$0xff] %v380_v32  ;;  %v508_v32 = vld [vmem:[%s7262_s26 + $0xa00] sm:$0xff] }
  0x71   : > { %383 = vst [vmem:[%s7267_s27 + $0x308] sm:$0xff] %v382_v33  ;;  %v510_v33 = vld [vmem:[%s7262_s26 + $0xa08] sm:$0xff] }
  0x72   : > { %385 = vst [vmem:[%s7267_s27 + $0x310] sm:$0xff] %v384_v34  ;;  %v512_v34 = vld [vmem:[%s7262_s26 + $0xa10] sm:$0xff] }
  0x73   : > { %387 = vst [vmem:[%s7267_s27 + $0x318] sm:$0xff] %v386_v35  ;;  %v514_v35 = vld [vmem:[%s7262_s26 + $0xa18] sm:$0xff] }
  0x74   : > { %389 = vst [vmem:[%s7267_s27 + $0x320] sm:$0xff] %v388_v36  ;;  %v516_v36 = vld [vmem:[%s7262_s26 + $0xa20] sm:$0xff] }
  0x75   : > { %391 = vst [vmem:[%s7267_s27 + $0x328] sm:$0xff] %v390_v37  ;;  %v518_v37 = vld [vmem:[%s7262_s26 + $0xa28] sm:$0xff] }
  0x76   : > { %393 = vst [vmem:[%s7267_s27 + $0x330] sm:$0xff] %v392_v38  ;;  %v520_v38 = vld [vmem:[%s7262_s26 + $0xa30] sm:$0xff] }
  0x77   : > { %395 = vst [vmem:[%s7267_s27 + $0x338] sm:$0xff] %v394_v39  ;;  %v522_v39 = vld [vmem:[%s7262_s26 + $0xa38] sm:$0xff] }
  0x78   : > { %397 = vst [vmem:[%s7267_s27 + $0x340] sm:$0xff] %v396_v40  ;;  %v524_v40 = vld [vmem:[%s7262_s26 + $0xa80] sm:$0xff] }
  0x79   : > { %399 = vst [vmem:[%s7267_s27 + $0x348] sm:$0xff] %v398_v41  ;;  %v526_v41 = vld [vmem:[%s7262_s26 + $0xa88] sm:$0xff] }
  0x7a   : > { %401 = vst [vmem:[%s7267_s27 + $0x350] sm:$0xff] %v400_v42  ;;  %v528_v42 = vld [vmem:[%s7262_s26 + $0xa90] sm:$0xff] }
  0x7b   : > { %403 = vst [vmem:[%s7267_s27 + $0x358] sm:$0xff] %v402_v43  ;;  %v530_v43 = vld [vmem:[%s7262_s26 + $0xa98] sm:$0xff] }
  0x7c   : > { %405 = vst [vmem:[%s7267_s27 + $0x360] sm:$0xff] %v404_v44  ;;  %v532_v44 = vld [vmem:[%s7262_s26 + $0xaa0] sm:$0xff] }
  0x7d   : > { %407 = vst [vmem:[%s7267_s27 + $0x368] sm:$0xff] %v406_v45  ;;  %v534_v45 = vld [vmem:[%s7262_s26 + $0xaa8] sm:$0xff] }
  0x7e   : > { %409 = vst [vmem:[%s7267_s27 + $0x370] sm:$0xff] %v408_v46  ;;  %v536_v46 = vld [vmem:[%s7262_s26 + $0xab0] sm:$0xff] }
  0x7f   : > { %411 = vst [vmem:[%s7267_s27 + $0x378] sm:$0xff] %v410_v47  ;;  %v538_v47 = vld [vmem:[%s7262_s26 + $0xab8] sm:$0xff] }
  0x80   : > { %413 = vst [vmem:[%s7267_s27 + $0x380] sm:$0xff] %v412_v48  ;;  %v540_v48 = vld [vmem:[%s7262_s26 + $0xb00] sm:$0xff] }
  0x81   : > { %415 = vst [vmem:[%s7267_s27 + $0x388] sm:$0xff] %v414_v49  ;;  %v542_v49 = vld [vmem:[%s7262_s26 + $0xb08] sm:$0xff] }
  0x82   : > { %417 = vst [vmem:[%s7267_s27 + $0x390] sm:$0xff] %v416_v50  ;;  %v544_v50 = vld [vmem:[%s7262_s26 + $0xb10] sm:$0xff] }
  0x83   : > { %419 = vst [vmem:[%s7267_s27 + $0x398] sm:$0xff] %v418_v51  ;;  %v546_v51 = vld [vmem:[%s7262_s26 + $0xb18] sm:$0xff] }
  0x84   : > { %421 = vst [vmem:[%s7267_s27 + $0x3a0] sm:$0xff] %v420_v52  ;;  %v548_v52 = vld [vmem:[%s7262_s26 + $0xb20] sm:$0xff] }
  0x85   : > { %423 = vst [vmem:[%s7267_s27 + $0x3a8] sm:$0xff] %v422_v53  ;;  %v550_v53 = vld [vmem:[%s7262_s26 + $0xb28] sm:$0xff] }
  0x86   : > { %425 = vst [vmem:[%s7267_s27 + $0x3b0] sm:$0xff] %v424_v54  ;;  %v552_v54 = vld [vmem:[%s7262_s26 + $0xb30] sm:$0xff] }
  0x87   : > { %427 = vst [vmem:[%s7267_s27 + $0x3b8] sm:$0xff] %v426_v55  ;;  %v554_v55 = vld [vmem:[%s7262_s26 + $0xb38] sm:$0xff] }
  0x88   : > { %429 = vst [vmem:[%s7267_s27 + $0x3c0] sm:$0xff] %v428_v56  ;;  %v556_v56 = vld [vmem:[%s7262_s26 + $0xb80] sm:$0xff] }
  0x89   : > { %431 = vst [vmem:[%s7267_s27 + $0x3c8] sm:$0xff] %v430_v57  ;;  %v558_v57 = vld [vmem:[%s7262_s26 + $0xb88] sm:$0xff] }
  0x8a   : > { %433 = vst [vmem:[%s7267_s27 + $0x3d0] sm:$0xff] %v432_v58  ;;  %v560_v58 = vld [vmem:[%s7262_s26 + $0xb90] sm:$0xff] }
  0x8b   : > { %435 = vst [vmem:[%s7267_s27 + $0x3d8] sm:$0xff] %v434_v59  ;;  %v562_v59 = vld [vmem:[%s7262_s26 + $0xb98] sm:$0xff] }
  0x8c   : > { %437 = vst [vmem:[%s7267_s27 + $0x3e0] sm:$0xff] %v436_v60  ;;  %v564_v60 = vld [vmem:[%s7262_s26 + $0xba0] sm:$0xff] }
  0x8d   : > { %439 = vst [vmem:[%s7267_s27 + $0x3e8] sm:$0xff] %v438_v61  ;;  %v566_v61 = vld [vmem:[%s7262_s26 + $0xba8] sm:$0xff] }
  0x8e   : > { %441 = vst [vmem:[%s7267_s27 + $0x3f0] sm:$0xff] %v440_v62  ;;  %v568_v62 = vld [vmem:[%s7262_s26 + $0xbb0] sm:$0xff] }
  0x8f   : > { %443 = vst [vmem:[%s7267_s27 + $0x3f8] sm:$0xff] %v442_v63  ;;  %v570_v63 = vld [vmem:[%s7262_s26 + $0xbb8] sm:$0xff] }
  0x90   : > { %445 = vst [vmem:[%s7267_s27 + $0x400] sm:$0xff] %v444_v0  ;;  %v572_v0 = vld [vmem:[%s7262_s26 + $0xc00] sm:$0xff] }
  0x91   : > { %447 = vst [vmem:[%s7267_s27 + $0x408] sm:$0xff] %v446_v1  ;;  %v574_v1 = vld [vmem:[%s7262_s26 + $0xc08] sm:$0xff] }
  0x92   : > { %449 = vst [vmem:[%s7267_s27 + $0x410] sm:$0xff] %v448_v2  ;;  %v576_v2 = vld [vmem:[%s7262_s26 + $0xc10] sm:$0xff] }
  0x93   : > { %451 = vst [vmem:[%s7267_s27 + $0x418] sm:$0xff] %v450_v3  ;;  %v578_v3 = vld [vmem:[%s7262_s26 + $0xc18] sm:$0xff] }
  0x94   : > { %453 = vst [vmem:[%s7267_s27 + $0x420] sm:$0xff] %v452_v4  ;;  %v580_v4 = vld [vmem:[%s7262_s26 + $0xc20] sm:$0xff] }
  0x95   : > { %455 = vst [vmem:[%s7267_s27 + $0x428] sm:$0xff] %v454_v5  ;;  %v582_v5 = vld [vmem:[%s7262_s26 + $0xc28] sm:$0xff] }
  0x96   : > { %457 = vst [vmem:[%s7267_s27 + $0x430] sm:$0xff] %v456_v6  ;;  %v584_v6 = vld [vmem:[%s7262_s26 + $0xc30] sm:$0xff] }
  0x97   : > { %459 = vst [vmem:[%s7267_s27 + $0x438] sm:$0xff] %v458_v7  ;;  %v586_v7 = vld [vmem:[%s7262_s26 + $0xc38] sm:$0xff] }
  0x98   : > { %461 = vst [vmem:[%s7267_s27 + $0x440] sm:$0xff] %v460_v8  ;;  %v588_v8 = vld [vmem:[%s7262_s26 + $0xc80] sm:$0xff] }
  0x99   : > { %463 = vst [vmem:[%s7267_s27 + $0x448] sm:$0xff] %v462_v9  ;;  %v590_v9 = vld [vmem:[%s7262_s26 + $0xc88] sm:$0xff] }
  0x9a   : > { %465 = vst [vmem:[%s7267_s27 + $0x450] sm:$0xff] %v464_v10  ;;  %v592_v10 = vld [vmem:[%s7262_s26 + $0xc90] sm:$0xff] }
  0x9b   : > { %467 = vst [vmem:[%s7267_s27 + $0x458] sm:$0xff] %v466_v11  ;;  %v594_v11 = vld [vmem:[%s7262_s26 + $0xc98] sm:$0xff] }
  0x9c   : > { %469 = vst [vmem:[%s7267_s27 + $0x460] sm:$0xff] %v468_v12  ;;  %v596_v12 = vld [vmem:[%s7262_s26 + $0xca0] sm:$0xff] }
  0x9d   : > { %471 = vst [vmem:[%s7267_s27 + $0x468] sm:$0xff] %v470_v13  ;;  %v598_v13 = vld [vmem:[%s7262_s26 + $0xca8] sm:$0xff] }
  0x9e   : > { %473 = vst [vmem:[%s7267_s27 + $0x470] sm:$0xff] %v472_v14  ;;  %v600_v14 = vld [vmem:[%s7262_s26 + $0xcb0] sm:$0xff] }
  0x9f   : > { %475 = vst [vmem:[%s7267_s27 + $0x478] sm:$0xff] %v474_v15  ;;  %v602_v15 = vld [vmem:[%s7262_s26 + $0xcb8] sm:$0xff] }
  0xa0   : > { %477 = vst [vmem:[%s7267_s27 + $0x480] sm:$0xff] %v476_v16  ;;  %v604_v16 = vld [vmem:[%s7262_s26 + $0xd00] sm:$0xff] }
  0xa1   : > { %479 = vst [vmem:[%s7267_s27 + $0x488] sm:$0xff] %v478_v17  ;;  %v606_v17 = vld [vmem:[%s7262_s26 + $0xd08] sm:$0xff] }
  0xa2   : > { %481 = vst [vmem:[%s7267_s27 + $0x490] sm:$0xff] %v480_v18  ;;  %v608_v18 = vld [vmem:[%s7262_s26 + $0xd10] sm:$0xff] }
  0xa3   : > { %483 = vst [vmem:[%s7267_s27 + $0x498] sm:$0xff] %v482_v19  ;;  %v610_v19 = vld [vmem:[%s7262_s26 + $0xd18] sm:$0xff] }
  0xa4   : > { %485 = vst [vmem:[%s7267_s27 + $0x4a0] sm:$0xff] %v484_v20  ;;  %v612_v20 = vld [vmem:[%s7262_s26 + $0xd20] sm:$0xff] }
  0xa5   : > { %487 = vst [vmem:[%s7267_s27 + $0x4a8] sm:$0xff] %v486_v21  ;;  %v614_v21 = vld [vmem:[%s7262_s26 + $0xd28] sm:$0xff] }
  0xa6   : > { %489 = vst [vmem:[%s7267_s27 + $0x4b0] sm:$0xff] %v488_v22  ;;  %v616_v22 = vld [vmem:[%s7262_s26 + $0xd30] sm:$0xff] }
  0xa7   : > { %491 = vst [vmem:[%s7267_s27 + $0x4b8] sm:$0xff] %v490_v23  ;;  %v618_v23 = vld [vmem:[%s7262_s26 + $0xd38] sm:$0xff] }
  0xa8   : > { %493 = vst [vmem:[%s7267_s27 + $0x4c0] sm:$0xff] %v492_v24  ;;  %v620_v24 = vld [vmem:[%s7262_s26 + $0xd80] sm:$0xff] }
  0xa9   : > { %495 = vst [vmem:[%s7267_s27 + $0x4c8] sm:$0xff] %v494_v25  ;;  %v622_v25 = vld [vmem:[%s7262_s26 + $0xd88] sm:$0xff] }
  0xaa   : > { %497 = vst [vmem:[%s7267_s27 + $0x4d0] sm:$0xff] %v496_v26  ;;  %v624_v26 = vld [vmem:[%s7262_s26 + $0xd90] sm:$0xff] }
  0xab   : > { %499 = vst [vmem:[%s7267_s27 + $0x4d8] sm:$0xff] %v498_v27  ;;  %v626_v27 = vld [vmem:[%s7262_s26 + $0xd98] sm:$0xff] }
  0xac   : > { %501 = vst [vmem:[%s7267_s27 + $0x4e0] sm:$0xff] %v500_v28  ;;  %v628_v28 = vld [vmem:[%s7262_s26 + $0xda0] sm:$0xff] }
  0xad   : > { %503 = vst [vmem:[%s7267_s27 + $0x4e8] sm:$0xff] %v502_v29  ;;  %v630_v29 = vld [vmem:[%s7262_s26 + $0xda8] sm:$0xff] }
  0xae   : > { %505 = vst [vmem:[%s7267_s27 + $0x4f0] sm:$0xff] %v504_v30  ;;  %v632_v30 = vld [vmem:[%s7262_s26 + $0xdb0] sm:$0xff] }
  0xaf   : > { %507 = vst [vmem:[%s7267_s27 + $0x4f8] sm:$0xff] %v506_v31  ;;  %v634_v31 = vld [vmem:[%s7262_s26 + $0xdb8] sm:$0xff] }
  0xb0   : > { %509 = vst [vmem:[%s7267_s27 + $0x500] sm:$0xff] %v508_v32  ;;  %v636_v32 = vld [vmem:[%s7262_s26 + $0xe00] sm:$0xff] }
  0xb1   : > { %511 = vst [vmem:[%s7267_s27 + $0x508] sm:$0xff] %v510_v33  ;;  %v638_v33 = vld [vmem:[%s7262_s26 + $0xe08] sm:$0xff] }
  0xb2   : > { %513 = vst [vmem:[%s7267_s27 + $0x510] sm:$0xff] %v512_v34  ;;  %v640_v34 = vld [vmem:[%s7262_s26 + $0xe10] sm:$0xff] }
  0xb3   : > { %515 = vst [vmem:[%s7267_s27 + $0x518] sm:$0xff] %v514_v35  ;;  %v642_v35 = vld [vmem:[%s7262_s26 + $0xe18] sm:$0xff] }
  0xb4   : > { %517 = vst [vmem:[%s7267_s27 + $0x520] sm:$0xff] %v516_v36  ;;  %v644_v36 = vld [vmem:[%s7262_s26 + $0xe20] sm:$0xff] }
  0xb5   : > { %519 = vst [vmem:[%s7267_s27 + $0x528] sm:$0xff] %v518_v37  ;;  %v646_v37 = vld [vmem:[%s7262_s26 + $0xe28] sm:$0xff] }
  0xb6   : > { %521 = vst [vmem:[%s7267_s27 + $0x530] sm:$0xff] %v520_v38  ;;  %v648_v38 = vld [vmem:[%s7262_s26 + $0xe30] sm:$0xff] }
  0xb7   : > { %523 = vst [vmem:[%s7267_s27 + $0x538] sm:$0xff] %v522_v39  ;;  %v650_v39 = vld [vmem:[%s7262_s26 + $0xe38] sm:$0xff] }
  0xb8   : > { %525 = vst [vmem:[%s7267_s27 + $0x540] sm:$0xff] %v524_v40  ;;  %v652_v40 = vld [vmem:[%s7262_s26 + $0xe80] sm:$0xff] }
  0xb9   : > { %527 = vst [vmem:[%s7267_s27 + $0x548] sm:$0xff] %v526_v41  ;;  %v654_v41 = vld [vmem:[%s7262_s26 + $0xe88] sm:$0xff] }
  0xba   : > { %529 = vst [vmem:[%s7267_s27 + $0x550] sm:$0xff] %v528_v42  ;;  %v656_v42 = vld [vmem:[%s7262_s26 + $0xe90] sm:$0xff] }
  0xbb   : > { %531 = vst [vmem:[%s7267_s27 + $0x558] sm:$0xff] %v530_v43  ;;  %v658_v43 = vld [vmem:[%s7262_s26 + $0xe98] sm:$0xff] }
  0xbc   : > { %533 = vst [vmem:[%s7267_s27 + $0x560] sm:$0xff] %v532_v44  ;;  %v660_v44 = vld [vmem:[%s7262_s26 + $0xea0] sm:$0xff] }
  0xbd   : > { %535 = vst [vmem:[%s7267_s27 + $0x568] sm:$0xff] %v534_v45  ;;  %v662_v45 = vld [vmem:[%s7262_s26 + $0xea8] sm:$0xff] }
  0xbe   : > { %537 = vst [vmem:[%s7267_s27 + $0x570] sm:$0xff] %v536_v46  ;;  %v664_v46 = vld [vmem:[%s7262_s26 + $0xeb0] sm:$0xff] }
  0xbf   : > { %539 = vst [vmem:[%s7267_s27 + $0x578] sm:$0xff] %v538_v47  ;;  %v666_v47 = vld [vmem:[%s7262_s26 + $0xeb8] sm:$0xff] }
  0xc0   : > { %541 = vst [vmem:[%s7267_s27 + $0x580] sm:$0xff] %v540_v48  ;;  %v668_v48 = vld [vmem:[%s7262_s26 + $0xf00] sm:$0xff] }
  0xc1   : > { %543 = vst [vmem:[%s7267_s27 + $0x588] sm:$0xff] %v542_v49  ;;  %v670_v49 = vld [vmem:[%s7262_s26 + $0xf08] sm:$0xff] }
  0xc2   : > { %545 = vst [vmem:[%s7267_s27 + $0x590] sm:$0xff] %v544_v50  ;;  %v672_v50 = vld [vmem:[%s7262_s26 + $0xf10] sm:$0xff] }
  0xc3   : > { %547 = vst [vmem:[%s7267_s27 + $0x598] sm:$0xff] %v546_v51  ;;  %v674_v51 = vld [vmem:[%s7262_s26 + $0xf18] sm:$0xff] }
  0xc4   : > { %549 = vst [vmem:[%s7267_s27 + $0x5a0] sm:$0xff] %v548_v52  ;;  %v676_v52 = vld [vmem:[%s7262_s26 + $0xf20] sm:$0xff] }
  0xc5   : > { %551 = vst [vmem:[%s7267_s27 + $0x5a8] sm:$0xff] %v550_v53  ;;  %v678_v53 = vld [vmem:[%s7262_s26 + $0xf28] sm:$0xff] }
  0xc6   : > { %553 = vst [vmem:[%s7267_s27 + $0x5b0] sm:$0xff] %v552_v54  ;;  %v680_v54 = vld [vmem:[%s7262_s26 + $0xf30] sm:$0xff] }
  0xc7   : > { %555 = vst [vmem:[%s7267_s27 + $0x5b8] sm:$0xff] %v554_v55  ;;  %v682_v55 = vld [vmem:[%s7262_s26 + $0xf38] sm:$0xff] }
  0xc8   : > { %557 = vst [vmem:[%s7267_s27 + $0x5c0] sm:$0xff] %v556_v56  ;;  %v684_v56 = vld [vmem:[%s7262_s26 + $0xf80] sm:$0xff] }
  0xc9   : > { %559 = vst [vmem:[%s7267_s27 + $0x5c8] sm:$0xff] %v558_v57  ;;  %v686_v57 = vld [vmem:[%s7262_s26 + $0xf88] sm:$0xff] }
  0xca   : > { %561 = vst [vmem:[%s7267_s27 + $0x5d0] sm:$0xff] %v560_v58  ;;  %v688_v58 = vld [vmem:[%s7262_s26 + $0xf90] sm:$0xff] }
  0xcb   : > { %563 = vst [vmem:[%s7267_s27 + $0x5d8] sm:$0xff] %v562_v59  ;;  %v690_v59 = vld [vmem:[%s7262_s26 + $0xf98] sm:$0xff] }
  0xcc   : > { %565 = vst [vmem:[%s7267_s27 + $0x5e0] sm:$0xff] %v564_v60  ;;  %v692_v60 = vld [vmem:[%s7262_s26 + $0xfa0] sm:$0xff] }
  0xcd   : > { %567 = vst [vmem:[%s7267_s27 + $0x5e8] sm:$0xff] %v566_v61  ;;  %v694_v61 = vld [vmem:[%s7262_s26 + $0xfa8] sm:$0xff] }
  0xce   : > { %569 = vst [vmem:[%s7267_s27 + $0x5f0] sm:$0xff] %v568_v62  ;;  %v696_v62 = vld [vmem:[%s7262_s26 + $0xfb0] sm:$0xff] }
  0xcf   : > { %571 = vst [vmem:[%s7267_s27 + $0x5f8] sm:$0xff] %v570_v63  ;;  %v698_v63 = vld [vmem:[%s7262_s26 + $0xfb8] sm:$0xff] }
  0xd0   : > { %573 = vst [vmem:[%s7267_s27 + $0x600] sm:$0xff] %v572_v0 }
  0xd1   : > { %575 = vst [vmem:[%s7267_s27 + $0x608] sm:$0xff] %v574_v1 }
  0xd2   : > { %577 = vst [vmem:[%s7267_s27 + $0x610] sm:$0xff] %v576_v2 }
  0xd3   : > { %579 = vst [vmem:[%s7267_s27 + $0x618] sm:$0xff] %v578_v3 }
  0xd4   : > { %581 = vst [vmem:[%s7267_s27 + $0x620] sm:$0xff] %v580_v4 }
  0xd5   : > { %583 = vst [vmem:[%s7267_s27 + $0x628] sm:$0xff] %v582_v5 }
  0xd6   : > { %585 = vst [vmem:[%s7267_s27 + $0x630] sm:$0xff] %v584_v6 }
  0xd7   : > { %587 = vst [vmem:[%s7267_s27 + $0x638] sm:$0xff] %v586_v7 }
  0xd8   : > { %589 = vst [vmem:[%s7267_s27 + $0x640] sm:$0xff] %v588_v8 }
  0xd9   : > { %591 = vst [vmem:[%s7267_s27 + $0x648] sm:$0xff] %v590_v9 }
  0xda   : > { %593 = vst [vmem:[%s7267_s27 + $0x650] sm:$0xff] %v592_v10 }
  0xdb   : > { %595 = vst [vmem:[%s7267_s27 + $0x658] sm:$0xff] %v594_v11 }
  0xdc   : > { %597 = vst [vmem:[%s7267_s27 + $0x660] sm:$0xff] %v596_v12 }
  0xdd   : > { %599 = vst [vmem:[%s7267_s27 + $0x668] sm:$0xff] %v598_v13 }
  0xde   : > { %601 = vst [vmem:[%s7267_s27 + $0x670] sm:$0xff] %v600_v14 }
  0xdf   : > { %603 = vst [vmem:[%s7267_s27 + $0x678] sm:$0xff] %v602_v15 }
  0xe0   : > { %605 = vst [vmem:[%s7267_s27 + $0x680] sm:$0xff] %v604_v16 }
  0xe1   : > { %607 = vst [vmem:[%s7267_s27 + $0x688] sm:$0xff] %v606_v17 }
  0xe2   : > { %609 = vst [vmem:[%s7267_s27 + $0x690] sm:$0xff] %v608_v18 }
  0xe3   : > { %611 = vst [vmem:[%s7267_s27 + $0x698] sm:$0xff] %v610_v19 }
  0xe4   : > { %613 = vst [vmem:[%s7267_s27 + $0x6a0] sm:$0xff] %v612_v20 }
  0xe5   : > { %615 = vst [vmem:[%s7267_s27 + $0x6a8] sm:$0xff] %v614_v21 }
  0xe6   : > { %617 = vst [vmem:[%s7267_s27 + $0x6b0] sm:$0xff] %v616_v22 }
  0xe7   : > { %619 = vst [vmem:[%s7267_s27 + $0x6b8] sm:$0xff] %v618_v23 }
  0xe8   : > { %621 = vst [vmem:[%s7267_s27 + $0x6c0] sm:$0xff] %v620_v24 }
  0xe9   : > { %623 = vst [vmem:[%s7267_s27 + $0x6c8] sm:$0xff] %v622_v25 }
  0xea   : > { %625 = vst [vmem:[%s7267_s27 + $0x6d0] sm:$0xff] %v624_v26 }
  0xeb   : > { %627 = vst [vmem:[%s7267_s27 + $0x6d8] sm:$0xff] %v626_v27 }
  0xec   : > { %629 = vst [vmem:[%s7267_s27 + $0x6e0] sm:$0xff] %v628_v28 }
  0xed   : > { %631 = vst [vmem:[%s7267_s27 + $0x6e8] sm:$0xff] %v630_v29 }
  0xee   : > { %633 = vst [vmem:[%s7267_s27 + $0x6f0] sm:$0xff] %v632_v30 }
  0xef   : > { %635 = vst [vmem:[%s7267_s27 + $0x6f8] sm:$0xff] %v634_v31 }
  0xf0   : > { %637 = vst [vmem:[%s7267_s27 + $0x700] sm:$0xff] %v636_v32 }
  0xf1   : > { %639 = vst [vmem:[%s7267_s27 + $0x708] sm:$0xff] %v638_v33 }
  0xf2   : > { %641 = vst [vmem:[%s7267_s27 + $0x710] sm:$0xff] %v640_v34 }
  0xf3   : > { %643 = vst [vmem:[%s7267_s27 + $0x718] sm:$0xff] %v642_v35 }
  0xf4   : > { %645 = vst [vmem:[%s7267_s27 + $0x720] sm:$0xff] %v644_v36 }
  0xf5   : > { %647 = vst [vmem:[%s7267_s27 + $0x728] sm:$0xff] %v646_v37 }
  0xf6   : > { %649 = vst [vmem:[%s7267_s27 + $0x730] sm:$0xff] %v648_v38 }
  0xf7   : > { %651 = vst [vmem:[%s7267_s27 + $0x738] sm:$0xff] %v650_v39 }
  0xf8   : > { %653 = vst [vmem:[%s7267_s27 + $0x740] sm:$0xff] %v652_v40 }
  0xf9   : > { %655 = vst [vmem:[%s7267_s27 + $0x748] sm:$0xff] %v654_v41 }
  0xfa   : > { %657 = vst [vmem:[%s7267_s27 + $0x750] sm:$0xff] %v656_v42 }
  0xfb   : > { %659 = vst [vmem:[%s7267_s27 + $0x758] sm:$0xff] %v658_v43 }
  0xfc   : > { %661 = vst [vmem:[%s7267_s27 + $0x760] sm:$0xff] %v660_v44 }
  0xfd   : > { %663 = vst [vmem:[%s7267_s27 + $0x768] sm:$0xff] %v662_v45 }
  0xfe   : > { %665 = vst [vmem:[%s7267_s27 + $0x770] sm:$0xff] %v664_v46 }
  0xff   : > { %667 = vst [vmem:[%s7267_s27 + $0x778] sm:$0xff] %v666_v47 }
 0x100   : > { %669 = vst [vmem:[%s7267_s27 + $0x780] sm:$0xff] %v668_v48 }
 0x101   : > { %671 = vst [vmem:[%s7267_s27 + $0x788] sm:$0xff] %v670_v49 }
 0x102   : > { %673 = vst [vmem:[%s7267_s27 + $0x790] sm:$0xff] %v672_v50 }
 0x103   : > { %675 = vst [vmem:[%s7267_s27 + $0x798] sm:$0xff] %v674_v51 }
 0x104   : > { %677 = vst [vmem:[%s7267_s27 + $0x7a0] sm:$0xff] %v676_v52 }
 0x105   : > { %679 = vst [vmem:[%s7267_s27 + $0x7a8] sm:$0xff] %v678_v53 }
 0x106   : > { %681 = vst [vmem:[%s7267_s27 + $0x7b0] sm:$0xff] %v680_v54 }
 0x107   : > { %683 = vst [vmem:[%s7267_s27 + $0x7b8] sm:$0xff] %v682_v55 }
 0x108   : > { %685 = vst [vmem:[%s7267_s27 + $0x7c0] sm:$0xff] %v684_v56 }
 0x109   : > { %687 = vst [vmem:[%s7267_s27 + $0x7c8] sm:$0xff] %v686_v57 }
 0x10a   : > { %689 = vst [vmem:[%s7267_s27 + $0x7d0] sm:$0xff] %v688_v58 }
 0x10b   : > { %691 = vst [vmem:[%s7267_s27 + $0x7d8] sm:$0xff] %v690_v59 }
 0x10c   : > { %693 = vst [vmem:[%s7267_s27 + $0x7e0] sm:$0xff] %v692_v60 }
 0x10d   : > { %695 = vst [vmem:[%s7267_s27 + $0x7e8] sm:$0xff] %v694_v61 }
 0x10e   : > { %697 = vst [vmem:[%s7267_s27 + $0x7f0] sm:$0xff] %v696_v62 }
 0x10f   : > { %699 = vst [vmem:[%s7267_s27 + $0x7f8] sm:$0xff] %v698_v63 }
 0x110 PF: > { %p5185_p6 = scmp.ge.s32.totalorder %s7196_s16, 1  ;;  %p716_p7 = scmp.lt.s32.totalorder %s7196_s16, 3 }
 0x112   : > { %p717_p8 = pnand %p5185_p6, %p716_p7 }
 0x113   : > { %s723_s28 = sand.u32 (!%p717_p8), 1, %s7180_s12   ;;  %s5187_s29 = sshll.u32 (!%p717_p8), %s7188_s14, 8 }
 0x114   : > { %720 = sbr.rel (%p717_p8) target bundleno = 1575 (0x627), region = 51  ;;  %s5186_s30 = sshll.u32 (!%p717_p8), %s723_s28, 11 }
 0x115   : > { %p763_p9 = scmp.lt.s32.totalorder (!%p717_p8), %s5187_s29, 511  ;;  %s7787_s8 = scalar_lea.vmem (!%p717_p8), [#allocation3], %s5186_s30 }
 0x116   : > { %p5189_p10 = scmp.ne.s32.totalorder (!%p717_p8), %s7188_s14, 0 }
 0x119   : > { %s8946_s29 = smov (!%p763_p9, %s5187_s29), 511  ;;  %786 = sbr.rel (%p5189_p10) target bundleno = 319 (0x13f), region = 59 }
 0x11a   : > { %s5188_s4 = sshll.u32 %s8946_s29, 2 }
 0x11b   : > { %s7785_s7 = scalar_lea.vmem %s8936_s1, %s5188_s4 }
 0x11e   : > { %v7198_v0 = vmov 0.0  }
 0x11f   : > { %787 = vst [vmem:[#allocation2 + $0xb0] sm:$0xff] %v7198_v0 }
 0x120   : > { %788 = vst [vmem:[#allocation2] sm:$0xff] %v7198_v0 }
 0x121   : > { %789 = vst [vmem:[#allocation2 + $0xd8] sm:$0xff] %v7198_v0 }
 0x122   : > { %790 = vst [vmem:[#allocation2 + $0x18] sm:$0xff] %v7198_v0 }
 0x123   : > { %791 = vst [vmem:[#allocation2 + $0x50] sm:$0xff] %v7198_v0 }
 0x124   : > { %792 = vst [vmem:[#allocation2 + $0x68] sm:$0xff] %v7198_v0 }
 0x125   : > { %793 = vst [vmem:[#allocation2 + $0x30] sm:$0xff] %v7198_v0 }
 0x126   : > { %794 = vst [vmem:[#allocation2 + $0x48] sm:$0xff] %v7198_v0 }
 0x127   : > { %795 = vst [vmem:[#allocation2 + $0x80] sm:$0xff] %v7198_v0 }
 0x128   : > { %796 = vst [vmem:[#allocation2 + $0x88] sm:$0xff] %v7198_v0 }
 0x129   : > { %797 = vst [vmem:[#allocation2 + $0xe8] sm:$0xff] %v7198_v0 }
 0x12a   : > { %798 = vst [vmem:[#allocation2 + $0xb8] sm:$0xff] %v7198_v0 }
 0x12b   : > { %799 = vst [vmem:[#allocation2 + $0x60] sm:$0xff] %v7198_v0 }
 0x12c   : > { %800 = vst [vmem:[#allocation2 + $0xf0] sm:$0xff] %v7198_v0 }
 0x12d   : > { %801 = vst [vmem:[#allocation2 + $0x8] sm:$0xff] %v7198_v0 }
 0x12e   : > { %802 = vst [vmem:[#allocation2 + $0x78] sm:$0xff] %v7198_v0 }
 0x12f   : > { %803 = vst [vmem:[#allocation2 + $0x38] sm:$0xff] %v7198_v0 }
 0x130   : > { %804 = vst [vmem:[#allocation2 + $0x58] sm:$0xff] %v7198_v0 }
 0x131   : > { %805 = vst [vmem:[#allocation2 + $0x40] sm:$0xff] %v7198_v0 }
 0x132   : > { %806 = vst [vmem:[#allocation2 + $0xc8] sm:$0xff] %v7198_v0 }
 0x133   : > { %807 = vst [vmem:[#allocation2 + $0xe0] sm:$0xff] %v7198_v0 }
 0x134   : > { %808 = vst [vmem:[#allocation2 + $0x90] sm:$0xff] %v7198_v0 }
 0x135   : > { %809 = vst [vmem:[#allocation2 + $0x70] sm:$0xff] %v7198_v0 }
 0x136   : > { %810 = vst [vmem:[#allocation2 + $0xc0] sm:$0xff] %v7198_v0 }
 0x137   : > { %811 = vst [vmem:[#allocation2 + $0xa8] sm:$0xff] %v7198_v0 }
 0x138   : > { %812 = vst [vmem:[#allocation2 + $0xd0] sm:$0xff] %v7198_v0 }
 0x139   : > { %813 = vst [vmem:[#allocation2 + $0x10] sm:$0xff] %v7198_v0 }
 0x13a   : > { %814 = vst [vmem:[#allocation2 + $0x28] sm:$0xff] %v7198_v0 }
 0x13b   : > { %815 = vst [vmem:[#allocation2 + $0xa0] sm:$0xff] %v7198_v0 }
 0x13c   : > { %816 = vst [vmem:[#allocation2 + $0xf8] sm:$0xff] %v7198_v0 }
 0x13d   : > { %817 = vst [vmem:[#allocation2 + $0x20] sm:$0xff] %v7198_v0 }
 0x13e   : > { %818 = vst [vmem:[#allocation2 + $0x98] sm:$0xff] %v7198_v0 }
 0x13f PF: > { %v6995_v1 = vld [vmem:[%s7785_s7 + $0x38] sm:$0xff]  ;;  %v6994_v5 = vld [vmem:[%s7785_s7 + $0x30] sm:$0xff]  ;;  %v6993_v9 = vld [vmem:[%s7785_s7 + $0x28] sm:$0xff]  ;;  %p6726_p11 = scmp.ne.s32.totalorder %s7188_s14, 1 }
 0x140   : > { %v7003_v2 = vld [vmem:[%s7785_s7 + $0x78] sm:$0xff]  ;;  %3411 = vmatpush.bf16.msra.mxu0 %v6995_v1  ;;  %v7002_v6 = vld [vmem:[%s7785_s7 + $0x70] sm:$0xff]  ;;  %v7001_v10 = vld [vmem:[%s7785_s7 + $0x68] sm:$0xff] }
 0x141   : > { %v7011_v3 = vld [vmem:[%s7785_s7 + $0xb8] sm:$0xff]  ;;  %3500 = vmatpush.bf16.msra.mxu1 %v7003_v2  ;;  %v7010_v7 = vld [vmem:[%s7785_s7 + $0xb0] sm:$0xff]  ;;  %v7009_v11 = vld [vmem:[%s7785_s7 + $0xa8] sm:$0xff] }
 0x142   : > { %v7019_v4 = vld [vmem:[%s7785_s7 + $0xf8] sm:$0xff]  ;;  %3589 = vmatpush.bf16.msra.mxu2 %v7011_v3  ;;  %v7018_v8 = vld [vmem:[%s7785_s7 + $0xf0] sm:$0xff]  ;;  %v7017_v12 = vld [vmem:[%s7785_s7 + $0xe8] sm:$0xff] }
 0x143   : > { %3678 = vmatpush.bf16.msra.mxu3 %v7019_v4  ;;  %v6992_v13 = vld [vmem:[%s7785_s7 + $0x20] sm:$0xff]  ;;  %v6991_v17 = vld [vmem:[%s7785_s7 + $0x18] sm:$0xff]  ;;  %v6990_v21 = vld [vmem:[%s7785_s7 + $0x10] sm:$0xff] }
 0x144   : > { %3412 = vmatpush.bf16.msra.mxu0 %v6994_v5  ;;  %v7000_v14 = vld [vmem:[%s7785_s7 + $0x60] sm:$0xff]  ;;  %v6999_v18 = vld [vmem:[%s7785_s7 + $0x58] sm:$0xff]  ;;  %v6998_v22 = vld [vmem:[%s7785_s7 + $0x50] sm:$0xff] }
 0x145   : > { %3501 = vmatpush.bf16.msra.mxu1 %v7002_v6  ;;  %v7008_v15 = vld [vmem:[%s7785_s7 + $0xa0] sm:$0xff]  ;;  %v7007_v19 = vld [vmem:[%s7785_s7 + $0x98] sm:$0xff]  ;;  %v7006_v23 = vld [vmem:[%s7785_s7 + $0x90] sm:$0xff] }
 0x146   : > { %3590 = vmatpush.bf16.msra.mxu2 %v7010_v7  ;;  %v7016_v16 = vld [vmem:[%s7785_s7 + $0xe0] sm:$0xff]  ;;  %v7015_v20 = vld [vmem:[%s7785_s7 + $0xd8] sm:$0xff]  ;;  %v7014_v24 = vld [vmem:[%s7785_s7 + $0xd0] sm:$0xff] }
 0x147   : > { %3679 = vmatpush.bf16.msra.mxu3 %v7018_v8  ;;  %v6989_v25 = vld [vmem:[%s7785_s7 + $0x8] sm:$0xff]  ;;  %v6988_v29 = vld [vmem:[%s7785_s7] sm:$0xff]  ;;  %v7043_v41 = vld [vmem:[%s7785_s7 + $0x1b8] sm:$0xff] }
 0x148   : > { %3413 = vmatpush.bf16.msra.mxu0 %v6993_v9  ;;  %v6997_v26 = vld [vmem:[%s7785_s7 + $0x48] sm:$0xff]  ;;  %v6996_v30 = vld [vmem:[%s7785_s7 + $0x40] sm:$0xff]  ;;  %v7027_v42 = vld [vmem:[%s7785_s7 + $0x138] sm:$0xff] }
 0x149   : > { %3502 = vmatpush.bf16.msra.mxu1 %v7001_v10  ;;  %v7005_v27 = vld [vmem:[%s7785_s7 + $0x88] sm:$0xff]  ;;  %v7004_v31 = vld [vmem:[%s7785_s7 + $0x80] sm:$0xff]  ;;  %v7051_v47 = vld [vmem:[%s7785_s7 + $0x1f8] sm:$0xff] }
 0x14a   : > { %3591 = vmatpush.bf16.msra.mxu2 %v7009_v11  ;;  %v7013_v28 = vld [vmem:[%s7785_s7 + $0xc8] sm:$0xff]  ;;  %v7012_v32 = vld [vmem:[%s7785_s7 + $0xc0] sm:$0xff]  ;;  %v7035_v48 = vld [vmem:[%s7785_s7 + $0x178] sm:$0xff] }
 0x14b   : > { %3680 = vmatpush.bf16.msra.mxu3 %v7017_v12  ;;  %v5192_v33 = vld [vmem:[%s7787_s8] sm:$0xf]  ;;  %v6732_v35 = vld [vmem:[%s7787_s8 + $0x4] sm:$0xf]  ;;  %v5200_v37 = vld [vmem:[%s7787_s8 + $0x8] sm:$0xf] }
 0x14c   : > { %3414 = vmatpush.bf16.msra.mxu0 %v6992_v13  ;;  %v6740_v34 = vld [vmem:[%s7787_s8 + $0x3c] sm:$0xf0]  ;;  %v5194_v36 = vld [vmem:[%s7787_s8 + $0x40] sm:$0xf0]  ;;  %v6741_v38 = vld [vmem:[%s7787_s8 + $0x44] sm:$0xf0] }
 0x14d   : > { %3503 = vmatpush.bf16.msra.mxu1 %v7000_v14  ;;  %v6733_v39 = vld [vmem:[%s7787_s8 + $0xc] sm:$0xf]  ;;  %v5193_v43 = vor.u32 %v6740_v34, %v5192_v33  ;;  %v5197_v44 = vor.u32 %v6732_v35, %v5194_v36  ;;  %v5201_v45 = vor.u32 %v6741_v38, %v5200_v37  ;;  %v7042_v49 = vld [vmem:[%s7785_s7 + $0x1b0] sm:$0xff]  ;;  %v5256_v53 = vld [vmem:[%s7787_s8 + $0x80] sm:$0xf] }
 0x14e   : > { %3592 = vmatpush.bf16.msra.mxu2 %v7008_v15  ;;  %v5202_v40 = vld [vmem:[%s7787_s8 + $0x48] sm:$0xf0]  ;;  %v7026_v50 = vld [vmem:[%s7785_s7 + $0x130] sm:$0xff]  ;;  %v6756_v54 = vld [vmem:[%s7787_s8 + $0xbc] sm:$0xf0] }
 0x14f   : > { %3681 = vmatpush.bf16.msra.mxu3 %v7016_v16  ;;  %v5205_v46 = vor.u32 %v6733_v39, %v5202_v40  ;;  %v7050_v51 = vld [vmem:[%s7785_s7 + $0x1f0] sm:$0xff]  ;;  %v6748_v55 = vld [vmem:[%s7787_s8 + $0x84] sm:$0xf]  ;;  %v5264_v57 = vld [vmem:[%s7787_s8 + $0x88] sm:$0xf]  ;;  %v5257_v61 = vor.u32 %v6756_v54, %v5256_v53 }
 0x150   : > { %3415 = vmatpush.bf16.msra.mxu0 %v6991_v17  ;;  %v7034_v52 = vld [vmem:[%s7785_s7 + $0x170] sm:$0xff]  ;;  %v5258_v56 = vld [vmem:[%s7787_s8 + $0xc0] sm:$0xf0]  ;;  %v6757_v58 = vld [vmem:[%s7787_s8 + $0xc4] sm:$0xf0] }
 0x151   : > { %3504 = vmatpush.bf16.msra.mxu1 %v6999_v18  ;;  %v6749_v59 = vld [vmem:[%s7787_s8 + $0x8c] sm:$0xf]  ;;  %v5261_v62 = vor.u32 %v6748_v55, %v5258_v56  ;;  %v5265_v63 = vor.u32 %v6757_v58, %v5264_v57  ;;  %v5320_v1 = vld [vmem:[%s7787_s8 + $0x100] sm:$0xf]  ;;  %v6764_v3 = vld [vmem:[%s7787_s8 + $0x104] sm:$0xf] }
 0x152   : > { %3593 = vmatpush.bf16.msra.mxu2 %v7007_v19  ;;  %v5266_v60 = vld [vmem:[%s7787_s8 + $0xc8] sm:$0xf0]  ;;  %v6772_v2 = vld [vmem:[%s7787_s8 + $0x13c] sm:$0xf0]  ;;  %v5322_v4 = vld [vmem:[%s7787_s8 + $0x140] sm:$0xf0] }
 0x153   : > { %3682 = vmatpush.bf16.msra.mxu3 %v7015_v20  ;;  %v5269_v0 = vor.u32 %v6749_v59, %v5266_v60  ;;  %v5328_v5 = vld [vmem:[%s7787_s8 + $0x108] sm:$0xf]  ;;  %v6765_v7 = vld [vmem:[%s7787_s8 + $0x10c] sm:$0xf]  ;;  %v5321_v9 = vor.u32 %v6772_v2, %v5320_v1  ;;  %v5325_v10 = vor.u32 %v6764_v3, %v5322_v4  ;;  %v5384_v17 = vld [vmem:[%s7787_s8 + $0x180] sm:$0xf] }
 0x154   : > { %3416 = vmatpush.bf16.msra.mxu0 %v6990_v21  ;;  %v6773_v6 = vld [vmem:[%s7787_s8 + $0x144] sm:$0xf0]  ;;  %v5330_v8 = vld [vmem:[%s7787_s8 + $0x148] sm:$0xf0]  ;;  %v6788_v18 = vld [vmem:[%s7787_s8 + $0x1bc] sm:$0xf0] }
 0x155   : > { %3505 = vmatpush.bf16.msra.mxu1 %v6998_v22  ;;  %v5329_v11 = vor.u32 %v6773_v6, %v5328_v5  ;;  %v5333_v12 = vor.u32 %v6765_v7, %v5330_v8  ;;  %v7041_v13 = vld [vmem:[%s7785_s7 + $0x1a8] sm:$0xff]  ;;  %v6780_v19 = vld [vmem:[%s7787_s8 + $0x184] sm:$0xf]  ;;  %v5576_v57 = vld [vmem:[%s7787_s8 + $0x300] sm:$0xf] }
 0x156   : > { %3594 = vmatpush.bf16.msra.mxu2 %v7006_v23  ;;  %v7025_v14 = vld [vmem:[%s7785_s7 + $0x128] sm:$0xff]  ;;  %v5386_v20 = vld [vmem:[%s7787_s8 + $0x1c0] sm:$0xf0]  ;;  %v6836_v58 = vld [vmem:[%s7787_s8 + $0x33c] sm:$0xf0] }
 0x157   : > { %3683 = vmatpush.bf16.msra.mxu3 %v7014_v24  ;;  %v7049_v15 = vld [vmem:[%s7785_s7 + $0x1e8] sm:$0xff]  ;;  %v6828_v59 = vld [vmem:[%s7787_s8 + $0x304] sm:$0xf]  ;;  %v5577_v1 = vor.u32 %v6836_v58, %v5576_v57  ;;  %v7039_v5 = vld [vmem:[%s7785_s7 + $0x198] sm:$0xff] }
 0x158   : > { %3417 = vmatpush.bf16.msra.mxu0 %v6989_v25  ;;  %v7033_v16 = vld [vmem:[%s7785_s7 + $0x168] sm:$0xff]  ;;  %v5385_v25 = vor.u32 %v6788_v18, %v5384_v17  ;;  %v5578_v60 = vld [vmem:[%s7787_s8 + $0x340] sm:$0xf0]  ;;  %v7023_v6 = vld [vmem:[%s7785_s7 + $0x118] sm:$0xff] }
 0x159   : > { %3506 = vmatpush.bf16.msra.mxu1 %v6997_v26  ;;  %v5392_v21 = vld [vmem:[%s7787_s8 + $0x188] sm:$0xf]  ;;  %v6781_v23 = vld [vmem:[%s7787_s8 + $0x18c] sm:$0xf]  ;;  %v5389_v26 = vor.u32 %v6780_v19, %v5386_v20  ;;  %v5581_v2 = vor.u32 %v6828_v59, %v5578_v60  ;;  %v7047_v7 = vld [vmem:[%s7785_s7 + $0x1d8] sm:$0xff] }
 0x15a   : > { %3595 = vmatpush.bf16.msra.mxu2 %v7005_v27  ;;  %v6789_v22 = vld [vmem:[%s7787_s8 + $0x1c4] sm:$0xf0]  ;;  %v5394_v24 = vld [vmem:[%s7787_s8 + $0x1c8] sm:$0xf0]  ;;  %v7031_v8 = vld [vmem:[%s7785_s7 + $0x158] sm:$0xff] }
 0x15b   : > { %3684 = vmatpush.bf16.msra.mxu3 %v7013_v28  ;;  %v5393_v27 = vor.u32 %v6789_v22, %v5392_v21  ;;  %v5397_v28 = vor.u32 %v6781_v23, %v5394_v24  ;;  %v5456_v33 = vld [vmem:[%s7787_s8 + $0x208] sm:$0xf]  ;;  %v6797_v35 = vld [vmem:[%s7787_s8 + $0x20c] sm:$0xf]  ;;  %v5704_v21 = vld [vmem:[%s7787_s8 + $0x400] sm:$0xf] }
 0x15c   : > { %3418 = vmatpush.bf16.msra.mxu0 %v6988_v29  ;;  %v5448_v29 = vld [vmem:[%s7787_s8 + $0x200] sm:$0xf]  ;;  %v6805_v34 = vld [vmem:[%s7787_s8 + $0x244] sm:$0xf0]  ;;  %v5458_v36 = vld [vmem:[%s7787_s8 + $0x248] sm:$0xf0] }
 0x15d   : > { %3507 = vmatpush.bf16.msra.mxu1 %v6996_v30  ;;  %v6804_v30 = vld [vmem:[%s7787_s8 + $0x23c] sm:$0xf0]  ;;  %v5457_v39 = vor.u32 %v6805_v34, %v5456_v33  ;;  %v5461_v40 = vor.u32 %v6797_v35, %v5458_v36  ;;  %v6860_v23 = vld [vmem:[%s7787_s8 + $0x404] sm:$0xf]  ;;  %v7038_v36 = vld [vmem:[%s7785_s7 + $0x190] sm:$0xff] }
 0x15e   : > { %3596 = vmatpush.bf16.msra.mxu2 %v7004_v31  ;;  %v6796_v31 = vld [vmem:[%s7787_s8 + $0x204] sm:$0xf]  ;;  %v5449_v37 = vor.u32 %v6804_v30, %v5448_v29  ;;  %v6868_v22 = vld [vmem:[%s7787_s8 + $0x43c] sm:$0xf0] }
 0x15f   : > { %3685 = vmatpush.bf16.msra.mxu3 %v7012_v32  ;;  %3419 = vmatmul.bf16.vlgmr.msra.gmra.mxu0 %v5193_v43  ;;  %v5450_v32 = vld [vmem:[%s7787_s8 + $0x240] sm:$0xf0]  ;;  %v5705_v29 = vor.u32 %v6868_v22, %v5704_v21 }
 0x160   : > { %3767 = vmatpush.bf16.msrb.mxu0 %v7027_v42  ;;  %3508 = vmatmul.bf16.vlgmr.msra.gmra.mxu1 %v5197_v44  ;;  %v5453_v38 = vor.u32 %v6796_v31, %v5450_v32  ;;  %v7024_v42 = vld [vmem:[%s7785_s7 + $0x120] sm:$0xff] }
 0x161   : > { %3597 = vmatmul.bf16.vlgmr.msra.gmra.mxu2 %v5201_v45  ;;  %3856 = vmatpush.bf16.msrb.mxu1 %v7035_v48  ;;  %v7048_v43 = vld [vmem:[%s7785_s7 + $0x1e0] sm:$0xff] }
 0x162   : > { %3945 = vmatpush.bf16.msrb.mxu2 %v7043_v41  ;;  %3686 = vmatmul.bf16.vlgmr.msra.gmra.mxu3 %v5205_v46  ;;  %v7040_v41 = vld [vmem:[%s7785_s7 + $0x1a0] sm:$0xff] }
 0x163   : > { %4034 = vmatpush.bf16.msrb.mxu3 %v7051_v47  ;;  %v7032_v44 = vld [vmem:[%s7785_s7 + $0x160] sm:$0xff] }
 0x164   : > { %3768 = vmatpush.bf16.msrb.mxu0 %v7026_v50  ;;  %v5512_v45 = vld [vmem:[%s7787_s8 + $0x280] sm:$0xf]  ;;  %v6812_v47 = vld [vmem:[%s7787_s8 + $0x284] sm:$0xf]  ;;  %v6821_v50 = vld [vmem:[%s7787_s8 + $0x2c4] sm:$0xf0] }
 0x165   : > { %3857 = vmatpush.bf16.msrb.mxu1 %v7034_v52  ;;  %v6820_v46 = vld [vmem:[%s7787_s8 + $0x2bc] sm:$0xf0]  ;;  %v5514_v48 = vld [vmem:[%s7787_s8 + $0x2c0] sm:$0xf0]  ;;  %v5522_v52 = vld [vmem:[%s7787_s8 + $0x2c8] sm:$0xf0] }
 0x166   : > { %3946 = vmatpush.bf16.msrb.mxu2 %v7042_v49  ;;  %v5520_v49 = vld [vmem:[%s7787_s8 + $0x288] sm:$0xf]  ;;  %v5513_v53 = vor.u32 %v6820_v46, %v5512_v45  ;;  %v5517_v54 = vor.u32 %v6812_v47, %v5514_v48  ;;  %v5706_v24 = vld [vmem:[%s7787_s8 + $0x440] sm:$0xf0]  ;;  %v7030_v46 = vld [vmem:[%s7785_s7 + $0x150] sm:$0xff] }
 0x167   : > { %4035 = vmatpush.bf16.msrb.mxu3 %v7050_v51  ;;  %v6813_v51 = vld [vmem:[%s7787_s8 + $0x28c] sm:$0xf]  ;;  %v5521_v55 = vor.u32 %v6821_v50, %v5520_v49  ;;  %v5709_v30 = vor.u32 %v6860_v23, %v5706_v24  ;;  %v5768_v47 = vld [vmem:[%s7787_s8 + $0x480] sm:$0xf]  ;;  %v6876_v49 = vld [vmem:[%s7787_s8 + $0x484] sm:$0xf] }
 0x168   : > { %3769 = vmatpush.bf16.msrb.mxu0 %v7025_v14  ;;  %v5525_v56 = vor.u32 %v6813_v51, %v5522_v52  ;;  %v6853_v14 = vld [vmem:[%s7787_s8 + $0x3c4] sm:$0xf0]  ;;  %v6884_v48 = vld [vmem:[%s7787_s8 + $0x4bc] sm:$0xf0]  ;;  %v5770_v50 = vld [vmem:[%s7787_s8 + $0x4c0] sm:$0xf0] }
 0x169   : > { %3858 = vmatpush.bf16.msrb.mxu1 %v7033_v16  ;;  %v5650_v16 = vld [vmem:[%s7787_s8 + $0x3c8] sm:$0xf0]  ;;  %v5776_v51 = vld [vmem:[%s7787_s8 + $0x488] sm:$0xf]  ;;  %v5769_v57 = vor.u32 %v6884_v48, %v5768_v47  ;;  %v5773_v58 = vor.u32 %v6876_v49, %v5770_v50 }
 0x16a   : > { %3947 = vmatpush.bf16.msrb.mxu2 %v7041_v13  ;;  %v5648_v13 = vld [vmem:[%s7787_s8 + $0x388] sm:$0xf]  ;;  %v5906_v47 = vld [vmem:[%s7787_s8 + $0x5c8] sm:$0xf0] }
 0x16b   : > { %4036 = vmatpush.bf16.msrb.mxu3 %v7049_v15  ;;  %v6845_v15 = vld [vmem:[%s7787_s8 + $0x38c] sm:$0xf]  ;;  %v5649_v19 = vor.u32 %v6853_v14, %v5648_v13  ;;  %v6885_v52 = vld [vmem:[%s7787_s8 + $0x4c4] sm:$0xf0] }
 0x16c   : > { %3770 = vmatpush.bf16.msrb.mxu0 %v7024_v42  ;;  %v5653_v20 = vor.u32 %v6845_v15, %v5650_v16  ;;  %v5840_v13 = vld [vmem:[%s7787_s8 + $0x508] sm:$0xf]  ;;  %v6893_v15 = vld [vmem:[%s7787_s8 + $0x50c] sm:$0xf] }
 0x16d   : > { %3859 = vmatpush.bf16.msrb.mxu1 %v7032_v44  ;;  %v6901_v14 = vld [vmem:[%s7787_s8 + $0x544] sm:$0xf0]  ;;  %v5842_v16 = vld [vmem:[%s7787_s8 + $0x548] sm:$0xf0] }
 0x16e   : > { %3948 = vmatpush.bf16.msrb.mxu2 %v7040_v41  ;;  %v5841_v24 = vor.u32 %v6901_v14, %v5840_v13 }
 0x16f   : > { %3424 = vmatmul.bf16.gmra.mxu0 %v5257_v61  ;;  %4037 = vmatpush.bf16.msrb.mxu3 %v7048_v43  ;;  %v5584_v61 = vld [vmem:[%s7787_s8 + $0x308] sm:$0xf] }
 0x170   : > { %3513 = vmatmul.bf16.gmra.mxu1 %v5261_v62  ;;  %v6837_v62 = vld [vmem:[%s7787_s8 + $0x344] sm:$0xf0]  ;;  %3771 = vmatpush.bf16.msrb.mxu0 %v7023_v6 }
 0x171   : > { %3602 = vmatmul.bf16.gmra.mxu2 %v5265_v63  ;;  %v6829_v63 = vld [vmem:[%s7787_s8 + $0x30c] sm:$0xf]  ;;  %v5585_v3 = vor.u32 %v6837_v62, %v5584_v61  ;;  %3860 = vmatpush.bf16.msrb.mxu1 %v7031_v8  ;;  %v5777_v62 = vor.u32 %v6885_v52, %v5776_v51 }
 0x172   : > { %3691 = vmatmul.bf16.gmra.mxu3 %v5269_v0  ;;  %v5586_v0 = vld [vmem:[%s7787_s8 + $0x348] sm:$0xf0]  ;;  %3949 = vmatpush.bf16.msrb.mxu2 %v7039_v5 }
 0x173   : > { %v5589_v4 = vor.u32 %v6829_v63, %v5586_v0  ;;  %4038 = vmatpush.bf16.msrb.mxu3 %v7047_v7 }
 0x175   : > { %3861 = vmatpush.bf16.msrb.mxu1 %v7030_v46  ;;  %v6909_v46 = vld [vmem:[%s7787_s8 + $0x58c] sm:$0xf] }
 0x176   : > { %3950 = vmatpush.bf16.msrb.mxu2 %v7038_v36 }
 0x17f   : > { %3429 = vmatmul.bf16.gmra.mxu0 %v5321_v9  ;;  %v5640_v9 = vld [vmem:[%s7787_s8 + $0x380] sm:$0xf] }
 0x180   : > { %3518 = vmatmul.bf16.gmra.mxu1 %v5325_v10  ;;  %v6852_v10 = vld [vmem:[%s7787_s8 + $0x3bc] sm:$0xf0] }
 0x181   : > { %3607 = vmatmul.bf16.gmra.mxu2 %v5329_v11  ;;  %v6844_v11 = vld [vmem:[%s7787_s8 + $0x384] sm:$0xf]  ;;  %v5641_v17 = vor.u32 %v6852_v10, %v5640_v9  ;;  %v5832_v9 = vld [vmem:[%s7787_s8 + $0x500] sm:$0xf] }
 0x182   : > { %3696 = vmatmul.bf16.gmra.mxu3 %v5333_v12  ;;  %v5642_v12 = vld [vmem:[%s7787_s8 + $0x3c0] sm:$0xf0]  ;;  %v6900_v10 = vld [vmem:[%s7787_s8 + $0x53c] sm:$0xf0] }
 0x183   : > { %v5645_v18 = vor.u32 %v6844_v11, %v5642_v12  ;;  %v6892_v11 = vld [vmem:[%s7787_s8 + $0x504] sm:$0xf] }
 0x184   : > { %v5834_v12 = vld [vmem:[%s7787_s8 + $0x540] sm:$0xf0] }
 0x18f   : > { %3434 = vmatmul.bf16.gmra.mxu0 %v5385_v25  ;;  %v5712_v25 = vld [vmem:[%s7787_s8 + $0x408] sm:$0xf] }
 0x190   : > { %3523 = vmatmul.bf16.gmra.mxu1 %v5389_v26  ;;  %v6869_v26 = vld [vmem:[%s7787_s8 + $0x444] sm:$0xf0] }
 0x191   : > { %3612 = vmatmul.bf16.gmra.mxu2 %v5393_v27  ;;  %v6861_v27 = vld [vmem:[%s7787_s8 + $0x40c] sm:$0xf]  ;;  %v5713_v33 = vor.u32 %v6869_v26, %v5712_v25  ;;  %v5845_v25 = vor.u32 %v6893_v15, %v5842_v16 }
 0x192   : > { %3701 = vmatmul.bf16.gmra.mxu3 %v5397_v28  ;;  %v5714_v28 = vld [vmem:[%s7787_s8 + $0x448] sm:$0xf0] }
 0x193   : > { %v5717_v34 = vor.u32 %v6861_v27, %v5714_v28  ;;  %v7037_v28 = vld [vmem:[%s7785_s7 + $0x188] sm:$0xff] }
 0x194   : > { %3951 = vmatpush.bf16.msrb.mxu2 %v7037_v28 }
 0x19f   : > { %3439 = vmatmul.bf16.gmra.mxu0 %v5449_v37  ;;  %v7022_v37 = vld [vmem:[%s7785_s7 + $0x110] sm:$0xff] }
 0x1a0   : > { %3528 = vmatmul.bf16.gmra.mxu1 %v5453_v38  ;;  %v7046_v38 = vld [vmem:[%s7785_s7 + $0x1d0] sm:$0xff]  ;;  %3772 = vmatpush.bf16.msrb.mxu0 %v7022_v37 }
 0x1a1   : > { %3617 = vmatmul.bf16.gmra.mxu2 %v5457_v39  ;;  %4039 = vmatpush.bf16.msrb.mxu3 %v7046_v38  ;;  %v7029_v38 = vld [vmem:[%s7785_s7 + $0x148] sm:$0xff] }
 0x1a2   : > { %3706 = vmatmul.bf16.gmra.mxu3 %v5461_v40  ;;  %3862 = vmatpush.bf16.msrb.mxu1 %v7029_v38  ;;  %v6940_v38 = vld [vmem:[%s7787_s8 + $0x684] sm:$0xf] }
 0x1af   : > { %3444 = vmatmul.bf16.gmra.mxu0 %v5513_v53  ;;  %v6877_v53 = vld [vmem:[%s7787_s8 + $0x48c] sm:$0xf] }
 0x1b0   : > { %3533 = vmatmul.bf16.gmra.mxu1 %v5517_v54  ;;  %v5778_v54 = vld [vmem:[%s7787_s8 + $0x4c8] sm:$0xf0] }
 0x1b1   : > { %3622 = vmatmul.bf16.gmra.mxu2 %v5521_v55  ;;  %v5781_v63 = vor.u32 %v6877_v53, %v5778_v54 }
 0x1b2   : > { %3711 = vmatmul.bf16.gmra.mxu3 %v5525_v56 }
 0x1bf   : > { %3449 = vmatmul.bf16.gmra.mxu0 %v5577_v1 }
 0x1c0   : > { %3538 = vmatmul.bf16.gmra.mxu1 %v5581_v2 }
 0x1c1   : > { %3627 = vmatmul.bf16.gmra.mxu2 %v5585_v3 }
 0x1c2   : > { %3716 = vmatmul.bf16.gmra.mxu3 %v5589_v4 }
 0x1cf   : > { %3454 = vmatmul.bf16.gmra.mxu0 %v5641_v17 }
 0x1d0   : > { %3543 = vmatmul.bf16.gmra.mxu1 %v5645_v18 }
 0x1d1   : > { %3632 = vmatmul.bf16.gmra.mxu2 %v5649_v19  ;;  %v5833_v19 = vor.u32 %v6900_v10, %v5832_v9  ;;  %v6933_v9 = vld [vmem:[%s7787_s8 + $0x644] sm:$0xf0]  ;;  %v6925_v10 = vld [vmem:[%s7787_s8 + $0x60c] sm:$0xf] }
 0x1d2   : > { %3721 = vmatmul.bf16.gmra.mxu3 %v5653_v20  ;;  %v5837_v20 = vor.u32 %v6892_v11, %v5834_v12  ;;  %v5970_v11 = vld [vmem:[%s7787_s8 + $0x648] sm:$0xf0] }
 0x1dc   : > { %v3420_v31 = vpop.f32.mrf.mxu0 }
 0x1dd   : > { %v3509_v32 = vpop.f32.mrf.mxu1 }
 0x1de   : > { %v3510_v35 = vadd.f32 %v3509_v32, %v3420_v31 }
 0x1df   : > { %3459 = vmatmul.bf16.gmra.mxu0 %v5705_v29  ;;  %v7021_v29 = vld [vmem:[%s7785_s7 + $0x108] sm:$0xff] }
 0x1e0   : > { %3548 = vmatmul.bf16.gmra.mxu1 %v5709_v30  ;;  %v7045_v30 = vld [vmem:[%s7785_s7 + $0x1c8] sm:$0xff]  ;;  %3773 = vmatpush.bf16.msrb.mxu0 %v7021_v29 }
 0x1e1   : > { %3637 = vmatmul.bf16.gmra.mxu2 %v5713_v33  ;;  %4040 = vmatpush.bf16.msrb.mxu3 %v7045_v30 }
 0x1e2   : > { %3726 = vmatmul.bf16.gmra.mxu3 %v5717_v34 }
 0x1e4   : > { %v3598_v39 = vpop.f32.mrf.mxu2  ;;  %v3422_v42 = vpop.f32.mrf.mxu0 }
 0x1e5   : > { %v3687_v40 = vpop.f32.mrf.mxu3  ;;  %v3599_v41 = vadd.f32 %v3598_v39, %v3510_v35  ;;  %v3511_v43 = vpop.f32.mrf.mxu1  ;;  %v5896_v39 = vld [vmem:[%s7787_s8 + $0x580] sm:$0xf] }
 0x1e6   : > { %v3512_v44 = vadd.f32 %v3511_v43, %v3422_v42  ;;  %v5898_v42 = vld [vmem:[%s7787_s8 + $0x5c0] sm:$0xf0]  ;;  %v5904_v43 = vld [vmem:[%s7787_s8 + $0x588] sm:$0xf] }
 0x1e7   : > { %v7917_v45 = vadd.f32 %v3687_v40, %v3599_v41  ;;  %v6916_v40 = vld [vmem:[%s7787_s8 + $0x5bc] sm:$0xf0]  ;;  %v6908_v41 = vld [vmem:[%s7787_s8 + $0x584] sm:$0xf] }
 0x1e8   : > { %v5897_v50 = vor.u32 %v6916_v40, %v5896_v39  ;;  %v5901_v51 = vor.u32 %v6908_v41, %v5898_v42  ;;  %v6026_v39 = vld [vmem:[%s7787_s8 + $0x6c0] sm:$0xf0]  ;;  %v6032_v40 = vld [vmem:[%s7787_s8 + $0x688] sm:$0xf]  ;;  %v6941_v42 = vld [vmem:[%s7787_s8 + $0x68c] sm:$0xf] }
 0x1e9   : > { %v6949_v41 = vld [vmem:[%s7787_s8 + $0x6c4] sm:$0xf0] }
 0x1ec   : > { %v3600_v55 = vpop.f32.mrf.mxu2  ;;  %v3425_v60 = vpop.f32.mrf.mxu0 }
 0x1ed   : > { %v3689_v56 = vpop.f32.mrf.mxu3  ;;  %v3601_v59 = vadd.f32 %v3600_v55, %v3512_v44  ;;  %v3514_v61 = vpop.f32.mrf.mxu1  ;;  %v6917_v44 = vld [vmem:[%s7787_s8 + $0x5c4] sm:$0xf0] }
 0x1ee   : > { %v3515_v0 = vadd.f32 %v3514_v61, %v3425_v60  ;;  %v5905_v55 = vor.u32 %v6917_v44, %v5904_v43  ;;  %v6034_v43 = vld [vmem:[%s7787_s8 + $0x6c8] sm:$0xf0] }
 0x1ef   : > { %v7928_v1 = vadd.f32 %v3689_v56, %v3601_v59  ;;  %3464 = vmatmul.bf16.gmra.mxu0 %v5769_v57  ;;  %v5909_v56 = vor.u32 %v6909_v46, %v5906_v47 }
 0x1f0   : > { %3553 = vmatmul.bf16.gmra.mxu1 %v5773_v58 }
 0x1f1   : > { %3642 = vmatmul.bf16.gmra.mxu2 %v5777_v62 }
 0x1f2   : > { %3731 = vmatmul.bf16.gmra.mxu3 %v5781_v63 }
 0x1f4   : > { %v3603_v2 = vpop.f32.mrf.mxu2  ;;  %v3427_v5 = vpop.f32.mrf.mxu0 }
 0x1f5   : > { %v3692_v3 = vpop.f32.mrf.mxu3  ;;  %v3604_v4 = vadd.f32 %v3603_v2, %v3515_v0  ;;  %v3516_v6 = vpop.f32.mrf.mxu1 }
 0x1f6   : > { %v3517_v7 = vadd.f32 %v3516_v6, %v3427_v5  ;;  %v6924_v5 = vld [vmem:[%s7787_s8 + $0x604] sm:$0xf] }
 0x1f7   : > { %v7930_v8 = vadd.f32 %v3692_v3, %v3604_v4  ;;  %v5960_v3 = vld [vmem:[%s7787_s8 + $0x600] sm:$0xf]  ;;  %v5962_v6 = vld [vmem:[%s7787_s8 + $0x640] sm:$0xf0] }
 0x1f8   : > { %v6932_v4 = vld [vmem:[%s7787_s8 + $0x63c] sm:$0xf0]  ;;  %v5965_v15 = vor.u32 %v6924_v5, %v5962_v6  ;;  %v6090_v5 = vld [vmem:[%s7787_s8 + $0x740] sm:$0xf0]  ;;  %v6096_v6 = vld [vmem:[%s7787_s8 + $0x708] sm:$0xf] }
 0x1f9   : > { %v5961_v14 = vor.u32 %v6932_v4, %v5960_v3  ;;  %v6964_v3 = vld [vmem:[%s7787_s8 + $0x73c] sm:$0xf0]  ;;  %v6956_v4 = vld [vmem:[%s7787_s8 + $0x704] sm:$0xf] }
 0x1fc   : > { %v3605_v17 = vpop.f32.mrf.mxu2  ;;  %v3430_v22 = vpop.f32.mrf.mxu0 }
 0x1fd   : > { %v3694_v18 = vpop.f32.mrf.mxu3  ;;  %v3606_v21 = vadd.f32 %v3605_v17, %v3517_v7  ;;  %v3519_v23 = vpop.f32.mrf.mxu1  ;;  %v5968_v7 = vld [vmem:[%s7787_s8 + $0x608] sm:$0xf] }
 0x1fe   : > { %v3520_v26 = vadd.f32 %v3519_v23, %v3430_v22  ;;  %v7036_v23 = vld [vmem:[%s7785_s7 + $0x180] sm:$0xff] }
 0x1ff   : > { %v7940_v27 = vadd.f32 %v3694_v18, %v3606_v21  ;;  %3469 = vmatmul.bf16.gmra.mxu0 %v5833_v19  ;;  %v5969_v19 = vor.u32 %v6933_v9, %v5968_v7  ;;  %3952 = vmatpush.bf16.msrb.mxu2 %v7036_v23  ;;  %v6965_v7 = vld [vmem:[%s7787_s8 + $0x744] sm:$0xf0]  ;;  %v6957_v9 = vld [vmem:[%s7787_s8 + $0x70c] sm:$0xf]  ;;  %v7075_v23 = vld [vmem:[%s7785_s7 + $0x2b8] sm:$0xff] }
 0x200   : > { %3558 = vmatmul.bf16.gmra.mxu1 %v5837_v20  ;;  %v5973_v20 = vor.u32 %v6925_v10, %v5970_v11  ;;  %v6098_v10 = vld [vmem:[%s7787_s8 + $0x748] sm:$0xf0] }
 0x201   : > { %3647 = vmatmul.bf16.gmra.mxu2 %v5841_v24  ;;  %v7020_v24 = vld [vmem:[%s7785_s7 + $0x100] sm:$0xff] }
 0x202   : > { %3736 = vmatmul.bf16.gmra.mxu3 %v5845_v25  ;;  %v7044_v25 = vld [vmem:[%s7785_s7 + $0x1c0] sm:$0xff]  ;;  %3774 = vmatpush.bf16.msrb.mxu0 %v7020_v24  ;;  %v7059_v24 = vld [vmem:[%s7785_s7 + $0x238] sm:$0xff] }
 0x203   : > { %4041 = vmatpush.bf16.msrb.mxu3 %v7044_v25  ;;  %v7083_v25 = vld [vmem:[%s7785_s7 + $0x2f8] sm:$0xff]  ;;  %4301 = vmatpush.bf16.msra.mxu2 %v7075_v23 }
 0x204   : > { %v3608_v31 = vpop.f32.mrf.mxu2  ;;  %v3432_v34 = vpop.f32.mrf.mxu0 }
 0x205   : > { %v3697_v32 = vpop.f32.mrf.mxu3  ;;  %v3609_v33 = vadd.f32 %v3608_v31, %v3520_v26  ;;  %v3521_v35 = vpop.f32.mrf.mxu1 }
 0x206   : > { %v3522_v36 = vadd.f32 %v3521_v35, %v3432_v34  ;;  %v7028_v34 = vld [vmem:[%s7785_s7 + $0x140] sm:$0xff]  ;;  %4123 = vmatpush.bf16.msra.mxu0 %v7059_v24 }
 0x207   : > { %v7945_v37 = vadd.f32 %v3697_v32, %v3609_v33  ;;  %v6024_v35 = vld [vmem:[%s7787_s8 + $0x680] sm:$0xf]  ;;  %3863 = vmatpush.bf16.msrb.mxu1 %v7028_v34  ;;  %4390 = vmatpush.bf16.msra.mxu3 %v7083_v25 }
 0x20c   : > { %v3610_v48 = vpop.f32.mrf.mxu2  ;;  %v3435_v53 = vpop.f32.mrf.mxu0 }
 0x20d   : > { %v3699_v49 = vpop.f32.mrf.mxu3  ;;  %v3611_v52 = vadd.f32 %v3610_v48, %v3522_v36  ;;  %v3524_v54 = vpop.f32.mrf.mxu1  ;;  %v6948_v36 = vld [vmem:[%s7787_s8 + $0x6bc] sm:$0xf0]  ;;  %v6029_v48 = vor.u32 %v6940_v38, %v6026_v39  ;;  %v6972_v39 = vld [vmem:[%s7787_s8 + $0x784] sm:$0xf] }
 0x20e   : > { %v3525_v57 = vadd.f32 %v3524_v54, %v3435_v53  ;;  %v6025_v47 = vor.u32 %v6948_v36, %v6024_v35  ;;  %v6037_v53 = vor.u32 %v6941_v42, %v6034_v43  ;;  %v7067_v35 = vld [vmem:[%s7785_s7 + $0x278] sm:$0xff]  ;;  %v6152_v36 = vld [vmem:[%s7787_s8 + $0x780] sm:$0xf]  ;;  %v6981_v42 = vld [vmem:[%s7787_s8 + $0x7c4] sm:$0xf0] }
 0x20f   : > { %v7956_v58 = vadd.f32 %v3699_v49, %v3611_v52  ;;  %3474 = vmatmul.bf16.gmra.mxu0 %v5897_v50  ;;  %v6033_v52 = vor.u32 %v6949_v41, %v6032_v40  ;;  %v6980_v38 = vld [vmem:[%s7787_s8 + $0x7bc] sm:$0xf0]  ;;  %v6154_v40 = vld [vmem:[%s7787_s8 + $0x7c0] sm:$0xf0]  ;;  %v6160_v41 = vld [vmem:[%s7787_s8 + $0x788] sm:$0xf]  ;;  %4212 = vmatpush.bf16.msra.mxu1 %v7067_v35 }
 0x210   : > { %3563 = vmatmul.bf16.gmra.mxu1 %v5901_v51  ;;  %v6973_v43 = vld [vmem:[%s7787_s8 + $0x78c] sm:$0xf] }
 0x211   : > { %3652 = vmatmul.bf16.gmra.mxu2 %v5905_v55 }
 0x212   : > { %3741 = vmatmul.bf16.gmra.mxu3 %v5909_v56 }
 0x214   : > { %v3613_v59 = vpop.f32.mrf.mxu2  ;;  %v3437_v62 = vpop.f32.mrf.mxu0 }
 0x215   : > { %v3702_v60 = vpop.f32.mrf.mxu3  ;;  %v3614_v61 = vadd.f32 %v3613_v59, %v3525_v57  ;;  %v3526_v63 = vpop.f32.mrf.mxu1 }
 0x216   : > { %v3527_v0 = vadd.f32 %v3526_v63, %v3437_v62 }
 0x217   : > { %v7958_v2 = vadd.f32 %v3702_v60, %v3614_v61 }
 0x21c   : > { %v3615_v12 = vpop.f32.mrf.mxu2  ;;  %v3440_v17 = vpop.f32.mrf.mxu0 }
 0x21d   : > { %v3704_v13 = vpop.f32.mrf.mxu3  ;;  %v3616_v16 = vadd.f32 %v3615_v12, %v3527_v0  ;;  %v3529_v18 = vpop.f32.mrf.mxu1  ;;  %v6088_v0 = vld [vmem:[%s7787_s8 + $0x700] sm:$0xf] }
 0x21e   : > { %v3530_v21 = vadd.f32 %v3529_v18, %v3440_v17  ;;  %v6097_v18 = vor.u32 %v6965_v7, %v6096_v6  ;;  %v6742_v6 = vld [vmem:[%s7787_s8 + $0x4c] sm:$0xf0]  ;;  %v6734_v7 = vld [vmem:[%s7787_s8 + $0x14] sm:$0xf] }
 0x21f   : > { %v7968_v22 = vadd.f32 %v3704_v13, %v3616_v16  ;;  %3479 = vmatmul.bf16.gmra.mxu0 %v5961_v14  ;;  %v6089_v13 = vor.u32 %v6964_v3, %v6088_v0  ;;  %v6093_v14 = vor.u32 %v6956_v4, %v6090_v5  ;;  %v5208_v5 = vld [vmem:[%s7787_s8 + $0x10] sm:$0xf] }
 0x220   : > { %3568 = vmatmul.bf16.gmra.mxu1 %v5965_v15 }
 0x221   : > { %3657 = vmatmul.bf16.gmra.mxu2 %v5969_v19  ;;  %v6101_v19 = vor.u32 %v6957_v9, %v6098_v10  ;;  %v5210_v9 = vld [vmem:[%s7787_s8 + $0x50] sm:$0xf0]  ;;  %v5216_v10 = vld [vmem:[%s7787_s8 + $0x18] sm:$0xf] }
 0x222   : > { %3746 = vmatmul.bf16.gmra.mxu3 %v5973_v20 }
 0x224   : > { %v3618_v26 = vpop.f32.mrf.mxu2  ;;  %v3442_v30 = vpop.f32.mrf.mxu0 }
 0x225   : > { %v3707_v28 = vpop.f32.mrf.mxu3  ;;  %v3619_v29 = vadd.f32 %v3618_v26, %v3530_v21  ;;  %v3531_v31 = vpop.f32.mrf.mxu1 }
 0x226   : > { %v3532_v32 = vadd.f32 %v3531_v31, %v3442_v30 }
 0x227   : > { %v7973_v33 = vadd.f32 %v3707_v28, %v3619_v29 }
 0x22c   : > { %v3620_v44 = vpop.f32.mrf.mxu2  ;;  %v3445_v50 = vpop.f32.mrf.mxu0 }
 0x22d   : > { %v3709_v46 = vpop.f32.mrf.mxu3  ;;  %v3621_v49 = vadd.f32 %v3620_v44, %v3532_v32  ;;  %v3534_v51 = vpop.f32.mrf.mxu1  ;;  %v6162_v44 = vld [vmem:[%s7787_s8 + $0x7c8] sm:$0xf0] }
 0x22e   : > { %v3535_v54 = vadd.f32 %v3534_v51, %v3445_v50 }
 0x22f   : > { %v7984_v55 = vadd.f32 %v3709_v46, %v3621_v49  ;;  %3484 = vmatmul.bf16.gmra.mxu0 %v6025_v47  ;;  %v6157_v49 = vor.u32 %v6972_v39, %v6154_v40 }
 0x230   : > { %3573 = vmatmul.bf16.gmra.mxu1 %v6029_v48  ;;  %v6153_v48 = vor.u32 %v6980_v38, %v6152_v36 }
 0x231   : > { %3662 = vmatmul.bf16.gmra.mxu2 %v6033_v52 }
 0x232   : > { %3751 = vmatmul.bf16.gmra.mxu3 %v6037_v53  ;;  %v6161_v53 = vor.u32 %v6981_v42, %v6160_v41  ;;  %v7066_v41 = vld [vmem:[%s7785_s7 + $0x270] sm:$0xff] }
 0x233   : > { %v5272_v42 = vld [vmem:[%s7787_s8 + $0x90] sm:$0xf]  ;;  %4213 = vmatpush.bf16.msra.mxu1 %v7066_v41  ;;  %v7057_v41 = vld [vmem:[%s7785_s7 + $0x228] sm:$0xff] }
 0x234   : > { %v3623_v56 = vpop.f32.mrf.mxu2  ;;  %v3447_v60 = vpop.f32.mrf.mxu0 }
 0x235   : > { %v3712_v57 = vpop.f32.mrf.mxu3  ;;  %v3624_v59 = vadd.f32 %v3623_v56, %v3535_v54  ;;  %v3536_v61 = vpop.f32.mrf.mxu1  ;;  %v6165_v54 = vor.u32 %v6973_v43, %v6162_v44  ;;  %v6758_v43 = vld [vmem:[%s7787_s8 + $0xcc] sm:$0xf0]  ;;  %v6750_v44 = vld [vmem:[%s7787_s8 + $0x94] sm:$0xf] }
 0x236   : > { %v3537_v62 = vadd.f32 %v3536_v61, %v3447_v60 }
 0x237   : > { %v7986_v63 = vadd.f32 %v3712_v57, %v3624_v59 }
 0x23c   : > { %v3625_v11 = vpop.f32.mrf.mxu2  ;;  %v3450_v16 = vpop.f32.mrf.mxu0 }
 0x23d   : > { %v3714_v12 = vpop.f32.mrf.mxu3  ;;  %v3626_v15 = vadd.f32 %v3625_v11, %v3537_v62  ;;  %v3539_v17 = vpop.f32.mrf.mxu1  ;;  %v6743_v11 = vld [vmem:[%s7787_s8 + $0x54] sm:$0xf0] }
 0x23e   : > { %v3540_v20 = vadd.f32 %v3539_v17, %v3450_v16  ;;  %v5209_v16 = vor.u32 %v6742_v6, %v5208_v5  ;;  %v5213_v17 = vor.u32 %v6734_v7, %v5210_v9  ;;  %v5217_v23 = vor.u32 %v6743_v11, %v5216_v10 }
 0x23f   : > { %v7996_v21 = vadd.f32 %v3714_v12, %v3626_v15  ;;  %3489 = vmatmul.bf16.gmra.mxu0 %v6089_v13  ;;  %v6735_v12 = vld [vmem:[%s7787_s8 + $0x1c] sm:$0xf] }
 0x240   : > { %3578 = vmatmul.bf16.gmra.mxu1 %v6093_v14  ;;  %v5218_v13 = vld [vmem:[%s7787_s8 + $0x58] sm:$0xf0] }
 0x241   : > { %3667 = vmatmul.bf16.gmra.mxu2 %v6097_v18  ;;  %v5221_v24 = vor.u32 %v6735_v12, %v5218_v13  ;;  %v5336_v13 = vld [vmem:[%s7787_s8 + $0x110] sm:$0xf] }
 0x242   : > { %3756 = vmatmul.bf16.gmra.mxu3 %v6101_v19 }
 0x244   : > { %v3628_v26 = vpop.f32.mrf.mxu2  ;;  %v3452_v30 = vpop.f32.mrf.mxu0 }
 0x245   : > { %v3717_v28 = vpop.f32.mrf.mxu3  ;;  %v3629_v29 = vadd.f32 %v3628_v26, %v3540_v20  ;;  %v3541_v31 = vpop.f32.mrf.mxu1 }
 0x246   : > { %v3542_v32 = vadd.f32 %v3541_v31, %v3452_v30  ;;  %v7082_v30 = vld [vmem:[%s7785_s7 + $0x2f0] sm:$0xff] }
 0x247   : > { %v8001_v34 = vadd.f32 %v3717_v28, %v3629_v29  ;;  %v7074_v28 = vld [vmem:[%s7785_s7 + $0x2b0] sm:$0xff]  ;;  %4391 = vmatpush.bf16.msra.mxu3 %v7082_v30 }
 0x248   : > { %v7058_v29 = vld [vmem:[%s7785_s7 + $0x230] sm:$0xff]  ;;  %4302 = vmatpush.bf16.msra.mxu2 %v7074_v28 }
 0x249   : > { %4124 = vmatpush.bf16.msra.mxu0 %v7058_v29 }
 0x24c   : > { %v3630_v46 = vpop.f32.mrf.mxu2  ;;  %v3455_v51 = vpop.f32.mrf.mxu0 }
 0x24d   : > { %v3719_v47 = vpop.f32.mrf.mxu3  ;;  %v3631_v50 = vadd.f32 %v3630_v46, %v3542_v32  ;;  %v3544_v52 = vpop.f32.mrf.mxu1  ;;  %v5274_v46 = vld [vmem:[%s7787_s8 + $0xd0] sm:$0xf0]  ;;  %4125 = vmatpush.bf16.msra.mxu0 %v7057_v41 }
 0x24e   : > { %v3545_v56 = vadd.f32 %v3544_v52, %v3455_v51 }
 0x24f   : > { %v8012_v57 = vadd.f32 %v3719_v47, %v3631_v50  ;;  %3494 = vmatmul.bf16.gmra.mxu0 %v6153_v48  ;;  %v5280_v47 = vld [vmem:[%s7787_s8 + $0x98] sm:$0xf]  ;;  %v5282_v50 = vld [vmem:[%s7787_s8 + $0xd8] sm:$0xf0] }
 0x250   : > { %3583 = vmatmul.bf16.gmra.mxu1 %v6157_v49  ;;  %v6759_v48 = vld [vmem:[%s7787_s8 + $0xd4] sm:$0xf0]  ;;  %v6751_v49 = vld [vmem:[%s7787_s8 + $0x9c] sm:$0xf] }
 0x251   : > { %3672 = vmatmul.bf16.gmra.mxu2 %v6161_v53  ;;  %v5273_v53 = vor.u32 %v6758_v43, %v5272_v42  ;;  %v7081_v42 = vld [vmem:[%s7785_s7 + $0x2e8] sm:$0xff] }
 0x252   : > { %3761 = vmatmul.bf16.gmra.mxu3 %v6165_v54  ;;  %v5277_v54 = vor.u32 %v6750_v44, %v5274_v46 }
 0x253   : > { %4392 = vmatpush.bf16.msra.mxu3 %v7081_v42 }
 0x254   : > { %v3633_v59 = vpop.f32.mrf.mxu2  ;;  %v3457_v62 = vpop.f32.mrf.mxu0 }
 0x255   : > { %v3722_v60 = vpop.f32.mrf.mxu3  ;;  %v3634_v61 = vadd.f32 %v3633_v59, %v3545_v56  ;;  %v3546_v0 = vpop.f32.mrf.mxu1 }
 0x256   : > { %v3547_v3 = vadd.f32 %v3546_v0, %v3457_v62  ;;  %v5285_v62 = vor.u32 %v6751_v49, %v5282_v50 }
 0x257   : > { %v8014_v4 = vadd.f32 %v3722_v60, %v3634_v61  ;;  %v5281_v61 = vor.u32 %v6759_v48, %v5280_v47 }
 0x25c   : > { %v3635_v14 = vpop.f32.mrf.mxu2  ;;  %v3460_v19 = vpop.f32.mrf.mxu0 }
 0x25d   : > { %v3724_v15 = vpop.f32.mrf.mxu3  ;;  %v3636_v18 = vadd.f32 %v3635_v14, %v3547_v3  ;;  %v3549_v20 = vpop.f32.mrf.mxu1  ;;  %v6774_v14 = vld [vmem:[%s7787_s8 + $0x14c] sm:$0xf0] }
 0x25e   : > { %v3550_v25 = vadd.f32 %v3549_v20, %v3460_v19  ;;  %v6767_v19 = vld [vmem:[%s7787_s8 + $0x11c] sm:$0xf] }
 0x25f   : > { %v8024_v26 = vadd.f32 %v3724_v15, %v3636_v18  ;;  %3775 = vmatmul.bf16.vlgmr.msrb.gmra.mxu0 %v5209_v16  ;;  %v6766_v15 = vld [vmem:[%s7787_s8 + $0x114] sm:$0xf]  ;;  %v6775_v18 = vld [vmem:[%s7787_s8 + $0x154] sm:$0xf0]  ;;  %v5346_v20 = vld [vmem:[%s7787_s8 + $0x158] sm:$0xf0] }
 0x260   : > { %3864 = vmatmul.bf16.vlgmr.msrb.gmra.mxu1 %v5213_v17  ;;  %v5338_v16 = vld [vmem:[%s7787_s8 + $0x150] sm:$0xf0]  ;;  %v5344_v17 = vld [vmem:[%s7787_s8 + $0x118] sm:$0xf] }
 0x261   : > { %3953 = vmatmul.bf16.vlgmr.msrb.gmra.mxu2 %v5217_v23  ;;  %v5341_v28 = vor.u32 %v6766_v15, %v5338_v16 }
 0x262   : > { %4042 = vmatmul.bf16.vlgmr.msrb.gmra.mxu3 %v5221_v24 }
 0x264   : > { %v3638_v31 = vpop.f32.mrf.mxu2  ;;  %v3462_v36 = vpop.f32.mrf.mxu0 }
 0x265   : > { %v3727_v32 = vpop.f32.mrf.mxu3  ;;  %v3639_v35 = vadd.f32 %v3638_v31, %v3550_v25  ;;  %v3551_v38 = vpop.f32.mrf.mxu1  ;;  %v5337_v25 = vor.u32 %v6774_v14, %v5336_v13 }
 0x266   : > { %v3552_v39 = vadd.f32 %v3551_v38, %v3462_v36 }
 0x267   : > { %v8029_v40 = vadd.f32 %v3727_v32, %v3639_v35  ;;  %v5345_v32 = vor.u32 %v6775_v18, %v5344_v17  ;;  %v5349_v35 = vor.u32 %v6767_v19, %v5346_v20 }
 0x26c   : > { %v3640_v51 = vpop.f32.mrf.mxu2  ;;  %v3465_v59 = vpop.f32.mrf.mxu0 }
 0x26d   : > { %v3729_v52 = vpop.f32.mrf.mxu3  ;;  %v3641_v56 = vadd.f32 %v3640_v51, %v3552_v39  ;;  %v3554_v60 = vpop.f32.mrf.mxu1  ;;  %v7073_v39 = vld [vmem:[%s7785_s7 + $0x2a8] sm:$0xff] }
 0x26e   : > { %v3555_v0 = vadd.f32 %v3554_v60, %v3465_v59  ;;  %4303 = vmatpush.bf16.msra.mxu2 %v7073_v39  ;;  %v7065_v51 = vld [vmem:[%s7785_s7 + $0x268] sm:$0xff]  ;;  %v5408_v59 = vld [vmem:[%s7787_s8 + $0x198] sm:$0xf]  ;;  %v5474_v39 = vld [vmem:[%s7787_s8 + $0x258] sm:$0xf0] }
 0x26f   : > { %v8040_v3 = vadd.f32 %v3729_v52, %v3641_v56  ;;  %3780 = vmatmul.bf16.gmra.mxu0 %v5273_v53  ;;  %v5400_v52 = vld [vmem:[%s7787_s8 + $0x190] sm:$0xf]  ;;  %v5402_v56 = vld [vmem:[%s7787_s8 + $0x1d0] sm:$0xf0]  ;;  %4214 = vmatpush.bf16.msra.mxu1 %v7065_v51  ;;  %v6791_v60 = vld [vmem:[%s7787_s8 + $0x1d4] sm:$0xf0] }
 0x270   : > { %3869 = vmatmul.bf16.gmra.mxu1 %v5277_v54  ;;  %v6790_v53 = vld [vmem:[%s7787_s8 + $0x1cc] sm:$0xf0]  ;;  %v6782_v54 = vld [vmem:[%s7787_s8 + $0x194] sm:$0xf]  ;;  %v5409_v13 = vor.u32 %v6791_v60, %v5408_v59  ;;  %v7080_v59 = vld [vmem:[%s7785_s7 + $0x2e0] sm:$0xff] }
 0x271   : > { %3958 = vmatmul.bf16.gmra.mxu2 %v5281_v61  ;;  %v6783_v61 = vld [vmem:[%s7787_s8 + $0x19c] sm:$0xf]  ;;  %4393 = vmatpush.bf16.msra.mxu3 %v7080_v59  ;;  %v6839_v59 = vld [vmem:[%s7787_s8 + $0x354] sm:$0xf0] }
 0x272   : > { %4047 = vmatmul.bf16.gmra.mxu3 %v5285_v62  ;;  %v5410_v62 = vld [vmem:[%s7787_s8 + $0x1d8] sm:$0xf0] }
 0x273   : > { %v5413_v14 = vor.u32 %v6783_v61, %v5410_v62 }
 0x274   : > { %v3643_v5 = vpop.f32.mrf.mxu2  ;;  %v3467_v9 = vpop.f32.mrf.mxu0 }
 0x275   : > { %v3732_v6 = vpop.f32.mrf.mxu3  ;;  %v3644_v7 = vadd.f32 %v3643_v5, %v3555_v0  ;;  %v3556_v10 = vpop.f32.mrf.mxu1 }
 0x276   : > { %v3557_v11 = vadd.f32 %v3556_v10, %v3467_v9 }
 0x277   : > { %v8042_v12 = vadd.f32 %v3732_v6, %v3644_v7  ;;  %v5401_v6 = vor.u32 %v6790_v53, %v5400_v52  ;;  %v5405_v7 = vor.u32 %v6782_v54, %v5402_v56  ;;  %v7072_v54 = vld [vmem:[%s7785_s7 + $0x2a0] sm:$0xff] }
 0x278   : > { %v7056_v56 = vld [vmem:[%s7785_s7 + $0x220] sm:$0xff]  ;;  %4304 = vmatpush.bf16.msra.mxu2 %v7072_v54  ;;  %v5594_v54 = vld [vmem:[%s7787_s8 + $0x350] sm:$0xf0] }
 0x279   : > { %4126 = vmatpush.bf16.msra.mxu0 %v7056_v56  ;;  %v5600_v56 = vld [vmem:[%s7787_s8 + $0x318] sm:$0xf] }
 0x27c   : > { %v3645_v23 = vpop.f32.mrf.mxu2  ;;  %v3470_v30 = vpop.f32.mrf.mxu0 }
 0x27d   : > { %v3734_v24 = vpop.f32.mrf.mxu3  ;;  %v3646_v29 = vadd.f32 %v3645_v23, %v3557_v11  ;;  %v3559_v31 = vpop.f32.mrf.mxu1 }
 0x27e   : > { %v3560_v36 = vadd.f32 %v3559_v31, %v3470_v30  ;;  %v6798_v30 = vld [vmem:[%s7787_s8 + $0x214] sm:$0xf] }
 0x27f   : > { %v8052_v38 = vadd.f32 %v3734_v24, %v3646_v29  ;;  %3785 = vmatmul.bf16.gmra.mxu0 %v5337_v25  ;;  %v6806_v29 = vld [vmem:[%s7787_s8 + $0x24c] sm:$0xf0]  ;;  %v5466_v31 = vld [vmem:[%s7787_s8 + $0x250] sm:$0xf0] }
 0x280   : > { %3874 = vmatmul.bf16.gmra.mxu1 %v5341_v28  ;;  %v5464_v28 = vld [vmem:[%s7787_s8 + $0x210] sm:$0xf] }
 0x281   : > { %3963 = vmatmul.bf16.gmra.mxu2 %v5345_v32  ;;  %v5472_v32 = vld [vmem:[%s7787_s8 + $0x218] sm:$0xf] }
 0x282   : > { %4052 = vmatmul.bf16.gmra.mxu3 %v5349_v35  ;;  %v6807_v35 = vld [vmem:[%s7787_s8 + $0x254] sm:$0xf0] }
 0x284   : > { %v3648_v43 = vpop.f32.mrf.mxu2  ;;  %v3472_v47 = vpop.f32.mrf.mxu0 }
 0x285   : > { %v3737_v44 = vpop.f32.mrf.mxu3  ;;  %v3649_v46 = vadd.f32 %v3648_v43, %v3560_v36  ;;  %v3561_v48 = vpop.f32.mrf.mxu1  ;;  %v6799_v36 = vld [vmem:[%s7787_s8 + $0x21c] sm:$0xf]  ;;  %v5465_v43 = vor.u32 %v6806_v29, %v5464_v28 }
 0x286   : > { %v3562_v49 = vadd.f32 %v3561_v48, %v3472_v47  ;;  %v5477_v51 = vor.u32 %v6799_v36, %v5474_v39 }
 0x287   : > { %v8057_v50 = vadd.f32 %v3737_v44, %v3649_v46  ;;  %v5469_v44 = vor.u32 %v6798_v30, %v5466_v31 }
 0x28c   : > { %v3650_v0 = vpop.f32.mrf.mxu2  ;;  %v3475_v10 = vpop.f32.mrf.mxu0 }
 0x28d   : > { %v3739_v5 = vpop.f32.mrf.mxu3  ;;  %v3651_v9 = vadd.f32 %v3650_v0, %v3562_v49  ;;  %v3564_v11 = vpop.f32.mrf.mxu1  ;;  %v5473_v49 = vor.u32 %v6807_v35, %v5472_v32 }
 0x28e   : > { %v3565_v15 = vadd.f32 %v3564_v11, %v3475_v10  ;;  %v5528_v10 = vld [vmem:[%s7787_s8 + $0x290] sm:$0xf] }
 0x28f   : > { %v8068_v16 = vadd.f32 %v3739_v5, %v3651_v9  ;;  %3790 = vmatmul.bf16.gmra.mxu0 %v5401_v6  ;;  %v7064_v9 = vld [vmem:[%s7785_s7 + $0x260] sm:$0xff]  ;;  %v6822_v11 = vld [vmem:[%s7787_s8 + $0x2cc] sm:$0xf0] }
 0x290   : > { %3879 = vmatmul.bf16.gmra.mxu1 %v5405_v7 }
 0x291   : > { %3968 = vmatmul.bf16.gmra.mxu2 %v5409_v13  ;;  %v6814_v13 = vld [vmem:[%s7787_s8 + $0x294] sm:$0xf]  ;;  %4215 = vmatpush.bf16.msra.mxu1 %v7064_v9 }
 0x292   : > { %4057 = vmatmul.bf16.gmra.mxu3 %v5413_v14  ;;  %v5530_v14 = vld [vmem:[%s7787_s8 + $0x2d0] sm:$0xf0] }
 0x293   : > { %v5533_v28 = vor.u32 %v6814_v13, %v5530_v14  ;;  %v5601_v13 = vor.u32 %v6839_v59, %v5600_v56 }
 0x294   : > { %v3653_v17 = vpop.f32.mrf.mxu2  ;;  %v3477_v20 = vpop.f32.mrf.mxu0 }
 0x295   : > { %v3742_v18 = vpop.f32.mrf.mxu3  ;;  %v3654_v19 = vadd.f32 %v3653_v17, %v3565_v15  ;;  %v3566_v23 = vpop.f32.mrf.mxu1  ;;  %v5536_v15 = vld [vmem:[%s7787_s8 + $0x298] sm:$0xf] }
 0x296   : > { %v3567_v24 = vadd.f32 %v3566_v23, %v3477_v20  ;;  %v6823_v17 = vld [vmem:[%s7787_s8 + $0x2d4] sm:$0xf0] }
 0x297   : > { %v8070_v25 = vadd.f32 %v3742_v18, %v3654_v19  ;;  %v6815_v18 = vld [vmem:[%s7787_s8 + $0x29c] sm:$0xf]  ;;  %v5537_v32 = vor.u32 %v6823_v17, %v5536_v15 }
 0x298   : > { %v5538_v19 = vld [vmem:[%s7787_s8 + $0x2d8] sm:$0xf0] }
 0x299   : > { %v5541_v35 = vor.u32 %v6815_v18, %v5538_v19  ;;  %v7071_v18 = vld [vmem:[%s7785_s7 + $0x298] sm:$0xff] }
 0x29a   : > { %v7055_v19 = vld [vmem:[%s7785_s7 + $0x218] sm:$0xff]  ;;  %4305 = vmatpush.bf16.msra.mxu2 %v7071_v18 }
 0x29b   : > { %4127 = vmatpush.bf16.msra.mxu0 %v7055_v19  ;;  %v5720_v19 = vld [vmem:[%s7787_s8 + $0x410] sm:$0xf] }
 0x29c   : > { %v3655_v41 = vpop.f32.mrf.mxu2  ;;  %v3480_v47 = vpop.f32.mrf.mxu0 }
 0x29d   : > { %v3744_v42 = vpop.f32.mrf.mxu3  ;;  %v3656_v46 = vadd.f32 %v3655_v41, %v3567_v24  ;;  %v3569_v48 = vpop.f32.mrf.mxu1  ;;  %v5529_v24 = vor.u32 %v6822_v11, %v5528_v10 }
 0x29e   : > { %v3570_v52 = vadd.f32 %v3569_v48, %v3480_v47 }
 0x29f   : > { %v8080_v53 = vadd.f32 %v3744_v42, %v3656_v46  ;;  %3795 = vmatmul.bf16.gmra.mxu0 %v5465_v43 }
 0x2a0   : > { %3884 = vmatmul.bf16.gmra.mxu1 %v5469_v44 }
 0x2a1   : > { %3973 = vmatmul.bf16.gmra.mxu2 %v5473_v49  ;;  %v5592_v49 = vld [vmem:[%s7787_s8 + $0x310] sm:$0xf] }
 0x2a2   : > { %4062 = vmatmul.bf16.gmra.mxu3 %v5477_v51  ;;  %v6838_v51 = vld [vmem:[%s7787_s8 + $0x34c] sm:$0xf0] }
 0x2a4   : > { %v3658_v60 = vpop.f32.mrf.mxu2  ;;  %v3482_v0 = vpop.f32.mrf.mxu0 }
 0x2a5   : > { %v3747_v61 = vpop.f32.mrf.mxu3  ;;  %v3659_v62 = vadd.f32 %v3658_v60, %v3570_v52  ;;  %v3571_v5 = vpop.f32.mrf.mxu1  ;;  %v6830_v52 = vld [vmem:[%s7787_s8 + $0x314] sm:$0xf]  ;;  %v6831_v60 = vld [vmem:[%s7787_s8 + $0x31c] sm:$0xf] }
 0x2a6   : > { %v3572_v6 = vadd.f32 %v3571_v5, %v3482_v0  ;;  %v5593_v5 = vor.u32 %v6838_v51, %v5592_v49  ;;  %v5666_v49 = vld [vmem:[%s7787_s8 + $0x3d8] sm:$0xf0] }
 0x2a7   : > { %v8085_v7 = vadd.f32 %v3747_v61, %v3659_v62  ;;  %v5602_v61 = vld [vmem:[%s7787_s8 + $0x358] sm:$0xf0] }
 0x2a8   : > { %v5605_v14 = vor.u32 %v6831_v60, %v5602_v61 }
 0x2ac   : > { %v3660_v20 = vpop.f32.mrf.mxu2  ;;  %v3485_v30 = vpop.f32.mrf.mxu0 }
 0x2ad   : > { %v3749_v23 = vpop.f32.mrf.mxu3  ;;  %v3661_v29 = vadd.f32 %v3660_v20, %v3572_v6  ;;  %v3574_v31 = vpop.f32.mrf.mxu1  ;;  %v5597_v6 = vor.u32 %v6830_v52, %v5594_v54  ;;  %v7079_v20 = vld [vmem:[%s7785_s7 + $0x2d8] sm:$0xff] }
 0x2ae   : > { %v3575_v36 = vadd.f32 %v3574_v31, %v3485_v30  ;;  %4394 = vmatpush.bf16.msra.mxu3 %v7079_v20  ;;  %v6870_v20 = vld [vmem:[%s7787_s8 + $0x44c] sm:$0xf0] }
 0x2af   : > { %v8096_v39 = vadd.f32 %v3749_v23, %v3661_v29  ;;  %3800 = vmatmul.bf16.gmra.mxu0 %v5529_v24 }
 0x2b0   : > { %3889 = vmatmul.bf16.gmra.mxu1 %v5533_v28 }
 0x2b1   : > { %3978 = vmatmul.bf16.gmra.mxu2 %v5537_v32 }
 0x2b2   : > { %4067 = vmatmul.bf16.gmra.mxu3 %v5541_v35  ;;  %v7063_v35 = vld [vmem:[%s7785_s7 + $0x258] sm:$0xff] }
 0x2b3   : > { %4216 = vmatpush.bf16.msra.mxu1 %v7063_v35 }
 0x2b4   : > { %v3663_v41 = vpop.f32.mrf.mxu2  ;;  %v3487_v44 = vpop.f32.mrf.mxu0 }
 0x2b5   : > { %v3752_v42 = vpop.f32.mrf.mxu3  ;;  %v3664_v43 = vadd.f32 %v3663_v41, %v3575_v36  ;;  %v3576_v46 = vpop.f32.mrf.mxu1  ;;  %v5656_v36 = vld [vmem:[%s7787_s8 + $0x390] sm:$0xf] }
 0x2b6   : > { %v3577_v47 = vadd.f32 %v3576_v46, %v3487_v44  ;;  %v6854_v41 = vld [vmem:[%s7787_s8 + $0x3cc] sm:$0xf0]  ;;  %v5664_v44 = vld [vmem:[%s7787_s8 + $0x398] sm:$0xf] }
 0x2b7   : > { %v8098_v48 = vadd.f32 %v3752_v42, %v3664_v43  ;;  %v6846_v42 = vld [vmem:[%s7787_s8 + $0x394] sm:$0xf]  ;;  %v6855_v46 = vld [vmem:[%s7787_s8 + $0x3d4] sm:$0xf0]  ;;  %v5657_v54 = vor.u32 %v6854_v41, %v5656_v36  ;;  %v5721_v41 = vor.u32 %v6870_v20, %v5720_v19 }
 0x2b8   : > { %v5658_v43 = vld [vmem:[%s7787_s8 + $0x3d0] sm:$0xf0] }
 0x2b9   : > { %v5661_v56 = vor.u32 %v6846_v42, %v5658_v43  ;;  %v6878_v19 = vld [vmem:[%s7787_s8 + $0x494] sm:$0xf] }
 0x2ba   : > { %v5786_v20 = vld [vmem:[%s7787_s8 + $0x4d0] sm:$0xf0] }
 0x2bc   : > { %v3665_v62 = vpop.f32.mrf.mxu2  ;;  %v3490_v10 = vpop.f32.mrf.mxu0 }
 0x2bd   : > { %v3754_v0 = vpop.f32.mrf.mxu3  ;;  %v3666_v9 = vadd.f32 %v3665_v62, %v3577_v47  ;;  %v3579_v11 = vpop.f32.mrf.mxu1  ;;  %v6847_v47 = vld [vmem:[%s7787_s8 + $0x39c] sm:$0xf]  ;;  %v5665_v62 = vor.u32 %v6855_v46, %v5664_v44 }
 0x2be   : > { %v3580_v15 = vadd.f32 %v3579_v11, %v3490_v10 }
 0x2bf   : > { %v8108_v17 = vadd.f32 %v3754_v0, %v3666_v9  ;;  %3805 = vmatmul.bf16.gmra.mxu0 %v5593_v5  ;;  %v5669_v0 = vor.u32 %v6847_v47, %v5666_v49 }
 0x2c0   : > { %3894 = vmatmul.bf16.gmra.mxu1 %v5597_v6 }
 0x2c1   : > { %3983 = vmatmul.bf16.gmra.mxu2 %v5601_v13 }
 0x2c2   : > { %4072 = vmatmul.bf16.gmra.mxu3 %v5605_v14 }
 0x2c4   : > { %v3668_v23 = vpop.f32.mrf.mxu2  ;;  %v3492_v29 = vpop.f32.mrf.mxu0 }
 0x2c5   : > { %v3757_v24 = vpop.f32.mrf.mxu3  ;;  %v3669_v28 = vadd.f32 %v3668_v23, %v3580_v15  ;;  %v3581_v30 = vpop.f32.mrf.mxu1  ;;  %v6862_v23 = vld [vmem:[%s7787_s8 + $0x414] sm:$0xf] }
 0x2c6   : > { %v3582_v31 = vadd.f32 %v3581_v30, %v3492_v29  ;;  %v6871_v29 = vld [vmem:[%s7787_s8 + $0x454] sm:$0xf0]  ;;  %v6863_v30 = vld [vmem:[%s7787_s8 + $0x41c] sm:$0xf] }
 0x2c7   : > { %v8113_v32 = vadd.f32 %v3757_v24, %v3669_v28  ;;  %v5722_v24 = vld [vmem:[%s7787_s8 + $0x450] sm:$0xf0]  ;;  %v5728_v28 = vld [vmem:[%s7787_s8 + $0x418] sm:$0xf] }
 0x2c8   : > { %v5725_v42 = vor.u32 %v6862_v23, %v5722_v24  ;;  %v5729_v47 = vor.u32 %v6871_v29, %v5728_v28  ;;  %v5792_v23 = vld [vmem:[%s7787_s8 + $0x498] sm:$0xf]  ;;  %v6879_v28 = vld [vmem:[%s7787_s8 + $0x49c] sm:$0xf] }
 0x2c9   : > { %v6887_v24 = vld [vmem:[%s7787_s8 + $0x4d4] sm:$0xf0]  ;;  %v5794_v29 = vld [vmem:[%s7787_s8 + $0x4d8] sm:$0xf0] }
 0x2cc   : > { %v3670_v51 = vpop.f32.mrf.mxu2  ;;  %v3495_v60 = vpop.f32.mrf.mxu0 }
 0x2cd   : > { %v3759_v52 = vpop.f32.mrf.mxu3  ;;  %v3671_v59 = vadd.f32 %v3670_v51, %v3582_v31  ;;  %v3584_v61 = vpop.f32.mrf.mxu1  ;;  %v5730_v31 = vld [vmem:[%s7787_s8 + $0x458] sm:$0xf0] }
 0x2ce   : > { %v3585_v5 = vadd.f32 %v3584_v61, %v3495_v60  ;;  %v5733_v49 = vor.u32 %v6863_v30, %v5730_v31  ;;  %v7078_v60 = vld [vmem:[%s7785_s7 + $0x2d0] sm:$0xff] }
 0x2cf   : > { %v8124_v6 = vadd.f32 %v3759_v52, %v3671_v59  ;;  %3810 = vmatmul.bf16.gmra.mxu0 %v5657_v54  ;;  %v7054_v59 = vld [vmem:[%s7785_s7 + $0x210] sm:$0xff]  ;;  %4395 = vmatpush.bf16.msra.mxu3 %v7078_v60 }
 0x2d0   : > { %3899 = vmatmul.bf16.gmra.mxu1 %v5661_v56  ;;  %v7070_v56 = vld [vmem:[%s7785_s7 + $0x290] sm:$0xff]  ;;  %4128 = vmatpush.bf16.msra.mxu0 %v7054_v59 }
 0x2d1   : > { %3988 = vmatmul.bf16.gmra.mxu2 %v5665_v62 }
 0x2d2   : > { %4077 = vmatmul.bf16.gmra.mxu3 %v5669_v0  ;;  %4306 = vmatpush.bf16.msra.mxu2 %v7070_v56 }
 0x2d4   : > { %v3673_v9 = vpop.f32.mrf.mxu2  ;;  %v3497_v13 = vpop.f32.mrf.mxu0 }
 0x2d5   : > { %v3762_v10 = vpop.f32.mrf.mxu3  ;;  %v3674_v11 = vadd.f32 %v3673_v9, %v3585_v5  ;;  %v3586_v14 = vpop.f32.mrf.mxu1 }
 0x2d6   : > { %v3587_v15 = vadd.f32 %v3586_v14, %v3497_v13  ;;  %v5784_v14 = vld [vmem:[%s7787_s8 + $0x490] sm:$0xf] }
 0x2d7   : > { %v8126_v18 = vadd.f32 %v3762_v10, %v3674_v11  ;;  %v7062_v11 = vld [vmem:[%s7785_s7 + $0x250] sm:$0xff] }
 0x2d8   : > { %4217 = vmatpush.bf16.msra.mxu1 %v7062_v11  ;;  %v5856_v11 = vld [vmem:[%s7787_s8 + $0x518] sm:$0xf] }
 0x2dc   : > { %v3675_v35 = vpop.f32.mrf.mxu2  ;;  %v3776_v44 = vpop.f32.mrf.mxu0 }
 0x2dd   : > { %v3764_v36 = vpop.f32.mrf.mxu3  ;;  %v3676_v43 = vadd.f32 %v3675_v35, %v3587_v15  ;;  %v3865_v46 = vpop.f32.mrf.mxu1  ;;  %v3777_v51 = vadd.f32 %v3776_v44, %v7917_v45  ;;  %v6886_v15 = vld [vmem:[%s7787_s8 + $0x4cc] sm:$0xf0]  ;;  %v5797_v44 = vor.u32 %v6879_v28, %v5794_v29 }
 0x2de   : > { %v5785_v35 = vor.u32 %v6886_v15, %v5784_v14  ;;  %v6895_v14 = vld [vmem:[%s7787_s8 + $0x51c] sm:$0xf] }
 0x2df   : > { %v8137_v52 = vadd.f32 %v3764_v36, %v3676_v43  ;;  %v3866_v54 = vadd.f32 %v3865_v46, %v3777_v51  ;;  %3815 = vmatmul.bf16.gmra.mxu0 %v5721_v41  ;;  %v5789_v36 = vor.u32 %v6878_v19, %v5786_v20  ;;  %v5793_v43 = vor.u32 %v6887_v24, %v5792_v23  ;;  %v5858_v15 = vld [vmem:[%s7787_s8 + $0x558] sm:$0xf0] }
 0x2e0   : > { %3904 = vmatmul.bf16.gmra.mxu1 %v5725_v42 }
 0x2e1   : > { %3993 = vmatmul.bf16.gmra.mxu2 %v5729_v47 }
 0x2e2   : > { %4082 = vmatmul.bf16.gmra.mxu3 %v5733_v49 }
 0x2e4   : > { %v3954_v61 = vpop.f32.mrf.mxu2  ;;  %v3778_v0 = vpop.f32.mrf.mxu0 }
 0x2e5   : > { %v4043_v45 = vpop.f32.mrf.mxu3  ;;  %v3955_v62 = vadd.f32 %v3954_v61, %v3866_v54  ;;  %v3867_v5 = vpop.f32.mrf.mxu1  ;;  %v3779_v9 = vadd.f32 %v3778_v0, %v7928_v1  ;;  %v6902_v0 = vld [vmem:[%s7787_s8 + $0x54c] sm:$0xf0] }
 0x2e7   : > { %v8143_v10 = vadd.f32 %v4043_v45, %v3955_v62  ;;  %v3868_v13 = vadd.f32 %v3867_v5, %v3779_v9  ;;  %v5848_v62 = vld [vmem:[%s7787_s8 + $0x510] sm:$0xf]  ;;  %v6894_v5 = vld [vmem:[%s7787_s8 + $0x514] sm:$0xf] }
 0x2e8   : > { %v5850_v9 = vld [vmem:[%s7787_s8 + $0x550] sm:$0xf0]  ;;  %v5849_v23 = vor.u32 %v6902_v0, %v5848_v62 }
 0x2e9   : > { %v5853_v24 = vor.u32 %v6894_v5, %v5850_v9  ;;  %v6910_v62 = vld [vmem:[%s7787_s8 + $0x594] sm:$0xf]  ;;  %v5920_v5 = vld [vmem:[%s7787_s8 + $0x598] sm:$0xf] }
 0x2ea   : > { %v5914_v0 = vld [vmem:[%s7787_s8 + $0x5d0] sm:$0xf0]  ;;  %v6919_v9 = vld [vmem:[%s7787_s8 + $0x5d4] sm:$0xf0] }
 0x2ec   : > { %v3956_v30 = vpop.f32.mrf.mxu2  ;;  %v3781_v42 = vpop.f32.mrf.mxu0 }
 0x2ed   : > { %v4045_v31 = vpop.f32.mrf.mxu3  ;;  %v3957_v41 = vadd.f32 %v3956_v30, %v3868_v13  ;;  %v3870_v1 = vpop.f32.mrf.mxu1  ;;  %v3782_v46 = vadd.f32 %v3781_v42, %v7930_v8  ;;  %v6903_v13 = vld [vmem:[%s7787_s8 + $0x554] sm:$0xf0]  ;;  %v7069_v42 = vld [vmem:[%s7785_s7 + $0x288] sm:$0xff] }
 0x2ee   : > { %v5857_v30 = vor.u32 %v6903_v13, %v5856_v11  ;;  %4307 = vmatpush.bf16.msra.mxu2 %v7069_v42  ;;  %v6911_v11 = vld [vmem:[%s7787_s8 + $0x59c] sm:$0xf] }
 0x2ef   : > { %v8155_v47 = vadd.f32 %v4045_v31, %v3957_v41  ;;  %v3871_v49 = vadd.f32 %v3870_v1, %v3782_v46  ;;  %3820 = vmatmul.bf16.gmra.mxu0 %v5785_v35  ;;  %v5861_v31 = vor.u32 %v6895_v14, %v5858_v15  ;;  %v7053_v1 = vld [vmem:[%s7785_s7 + $0x208] sm:$0xff]  ;;  %v5922_v13 = vld [vmem:[%s7787_s8 + $0x5d8] sm:$0xf0] }
 0x2f0   : > { %3909 = vmatmul.bf16.gmra.mxu1 %v5789_v36  ;;  %4129 = vmatpush.bf16.msra.mxu0 %v7053_v1 }
 0x2f1   : > { %3998 = vmatmul.bf16.gmra.mxu2 %v5793_v43  ;;  %v7077_v43 = vld [vmem:[%s7785_s7 + $0x2c8] sm:$0xff] }
 0x2f2   : > { %4087 = vmatmul.bf16.gmra.mxu3 %v5797_v44 }
 0x2f3   : > { %4396 = vmatpush.bf16.msra.mxu3 %v7077_v43 }
 0x2f4   : > { %v3959_v51 = vpop.f32.mrf.mxu2  ;;  %v3783_v59 = vpop.f32.mrf.mxu0 }
 0x2f5   : > { %v4048_v54 = vpop.f32.mrf.mxu3  ;;  %v3960_v56 = vadd.f32 %v3959_v51, %v3871_v49  ;;  %v3872_v60 = vpop.f32.mrf.mxu1  ;;  %v3784_v8 = vadd.f32 %v3783_v59, %v7940_v27  ;;  %v7061_v59 = vld [vmem:[%s7785_s7 + $0x248] sm:$0xff] }
 0x2f6   : > { %4218 = vmatpush.bf16.msra.mxu1 %v7061_v59  ;;  %v5984_v59 = vld [vmem:[%s7787_s8 + $0x618] sm:$0xf] }
 0x2f7   : > { %v8158_v61 = vadd.f32 %v4048_v54, %v3960_v56  ;;  %v3873_v45 = vadd.f32 %v3872_v60, %v3784_v8  ;;  %v5912_v8 = vld [vmem:[%s7787_s8 + $0x590] sm:$0xf] }
 0x2fc   : > { %v3961_v19 = vpop.f32.mrf.mxu2  ;;  %v3786_v27 = vpop.f32.mrf.mxu0 }
 0x2fd   : > { %v4050_v20 = vpop.f32.mrf.mxu3  ;;  %v3962_v28 = vadd.f32 %v3961_v19, %v3873_v45  ;;  %v3875_v29 = vpop.f32.mrf.mxu1  ;;  %v3787_v35 = vadd.f32 %v3786_v27, %v7945_v37  ;;  %v6918_v45 = vld [vmem:[%s7787_s8 + $0x5cc] sm:$0xf0]  ;;  %v5925_v27 = vor.u32 %v6911_v11, %v5922_v13 }
 0x2fe   : > { %v5913_v19 = vor.u32 %v6918_v45, %v5912_v8  ;;  %v6927_v8 = vld [vmem:[%s7787_s8 + $0x61c] sm:$0xf] }
 0x2ff   : > { %v8169_v36 = vadd.f32 %v4050_v20, %v3962_v28  ;;  %v3876_v41 = vadd.f32 %v3875_v29, %v3787_v35  ;;  %3825 = vmatmul.bf16.gmra.mxu0 %v5849_v23  ;;  %v5917_v20 = vor.u32 %v6910_v62, %v5914_v0  ;;  %v5921_v28 = vor.u32 %v6919_v9, %v5920_v5  ;;  %v5986_v45 = vld [vmem:[%s7787_s8 + $0x658] sm:$0xf0] }
 0x300   : > { %3914 = vmatmul.bf16.gmra.mxu1 %v5853_v24 }
 0x301   : > { %4003 = vmatmul.bf16.gmra.mxu2 %v5857_v30 }
 0x302   : > { %4092 = vmatmul.bf16.gmra.mxu3 %v5861_v31 }
 0x304   : > { %v3964_v44 = vpop.f32.mrf.mxu2  ;;  %v3788_v49 = vpop.f32.mrf.mxu0 }
 0x305   : > { %v4053_v37 = vpop.f32.mrf.mxu3  ;;  %v3965_v46 = vadd.f32 %v3964_v44, %v3876_v41  ;;  %v3877_v51 = vpop.f32.mrf.mxu1  ;;  %v3789_v54 = vadd.f32 %v3788_v49, %v7956_v58  ;;  %v6934_v49 = vld [vmem:[%s7787_s8 + $0x64c] sm:$0xf0] }
 0x307   : > { %v8175_v56 = vadd.f32 %v4053_v37, %v3965_v46  ;;  %v3878_v60 = vadd.f32 %v3877_v51, %v3789_v54  ;;  %v5976_v46 = vld [vmem:[%s7787_s8 + $0x610] sm:$0xf]  ;;  %v6926_v51 = vld [vmem:[%s7787_s8 + $0x614] sm:$0xf] }
 0x308   : > { %v5978_v54 = vld [vmem:[%s7787_s8 + $0x650] sm:$0xf0]  ;;  %v5977_v5 = vor.u32 %v6934_v49, %v5976_v46 }
 0x309   : > { %v5981_v9 = vor.u32 %v6926_v51, %v5978_v54  ;;  %v6942_v46 = vld [vmem:[%s7787_s8 + $0x694] sm:$0xf]  ;;  %v6048_v51 = vld [vmem:[%s7787_s8 + $0x698] sm:$0xf] }
 0x30a   : > { %v6042_v49 = vld [vmem:[%s7787_s8 + $0x6d0] sm:$0xf0]  ;;  %v6951_v54 = vld [vmem:[%s7787_s8 + $0x6d4] sm:$0xf0] }
 0x30c   : > { %v3966_v14 = vpop.f32.mrf.mxu2  ;;  %v3791_v24 = vpop.f32.mrf.mxu0 }
 0x30d   : > { %v4055_v15 = vpop.f32.mrf.mxu3  ;;  %v3967_v23 = vadd.f32 %v3966_v14, %v3878_v60  ;;  %v3880_v58 = vpop.f32.mrf.mxu1  ;;  %v3792_v29 = vadd.f32 %v3791_v24, %v7958_v2  ;;  %v6935_v60 = vld [vmem:[%s7787_s8 + $0x654] sm:$0xf0]  ;;  %v7068_v24 = vld [vmem:[%s7785_s7 + $0x280] sm:$0xff] }
 0x30e   : > { %v5985_v14 = vor.u32 %v6935_v60, %v5984_v59  ;;  %4308 = vmatpush.bf16.msra.mxu2 %v7068_v24  ;;  %v6943_v59 = vld [vmem:[%s7787_s8 + $0x69c] sm:$0xf] }
 0x30f   : > { %v8187_v30 = vadd.f32 %v4055_v15, %v3967_v23  ;;  %v3881_v31 = vadd.f32 %v3880_v58, %v3792_v29  ;;  %3830 = vmatmul.bf16.gmra.mxu0 %v5913_v19  ;;  %v5989_v15 = vor.u32 %v6927_v8, %v5986_v45  ;;  %v7052_v58 = vld [vmem:[%s7785_s7 + $0x200] sm:$0xff]  ;;  %v6050_v60 = vld [vmem:[%s7787_s8 + $0x6d8] sm:$0xf0] }
 0x310   : > { %3919 = vmatmul.bf16.gmra.mxu1 %v5917_v20  ;;  %4130 = vmatpush.bf16.msra.mxu0 %v7052_v58 }
 0x311   : > { %4008 = vmatmul.bf16.gmra.mxu2 %v5921_v28  ;;  %v7076_v28 = vld [vmem:[%s7785_s7 + $0x2c0] sm:$0xff] }
 0x312   : > { %4097 = vmatmul.bf16.gmra.mxu3 %v5925_v27 }
 0x313   : > { %4397 = vmatpush.bf16.msra.mxu3 %v7076_v28 }
 0x314   : > { %v3969_v35 = vpop.f32.mrf.mxu2  ;;  %v3793_v1 = vpop.f32.mrf.mxu0 }
 0x315   : > { %v4058_v41 = vpop.f32.mrf.mxu3  ;;  %v3970_v42 = vadd.f32 %v3969_v35, %v3881_v31  ;;  %v3882_v43 = vpop.f32.mrf.mxu1  ;;  %v3794_v2 = vadd.f32 %v3793_v1, %v7968_v22  ;;  %v7060_v1 = vld [vmem:[%s7785_s7 + $0x240] sm:$0xff] }
 0x316   : > { %4219 = vmatpush.bf16.msra.mxu1 %v7060_v1  ;;  %v6112_v1 = vld [vmem:[%s7787_s8 + $0x718] sm:$0xf] }
 0x317   : > { %v8190_v44 = vadd.f32 %v4058_v41, %v3970_v42  ;;  %v3883_v37 = vadd.f32 %v3882_v43, %v3794_v2  ;;  %v6040_v2 = vld [vmem:[%s7787_s8 + $0x690] sm:$0xf] }
 0x31c   : > { %v3971_v62 = vpop.f32.mrf.mxu2  ;;  %v3796_v22 = vpop.f32.mrf.mxu0 }
 0x31d   : > { %v4060_v0 = vpop.f32.mrf.mxu3  ;;  %v3972_v11 = vadd.f32 %v3971_v62, %v3883_v37  ;;  %v3885_v13 = vpop.f32.mrf.mxu1  ;;  %v3797_v19 = vadd.f32 %v3796_v22, %v7973_v33  ;;  %v6950_v37 = vld [vmem:[%s7787_s8 + $0x6cc] sm:$0xf0]  ;;  %v6053_v22 = vor.u32 %v6943_v59, %v6050_v60 }
 0x31e   : > { %v6041_v62 = vor.u32 %v6950_v37, %v6040_v2  ;;  %v6959_v2 = vld [vmem:[%s7787_s8 + $0x71c] sm:$0xf] }
 0x31f   : > { %v8201_v20 = vadd.f32 %v4060_v0, %v3972_v11  ;;  %v3886_v23 = vadd.f32 %v3885_v13, %v3797_v19  ;;  %3835 = vmatmul.bf16.gmra.mxu0 %v5977_v5  ;;  %v6045_v0 = vor.u32 %v6942_v46, %v6042_v49  ;;  %v6049_v11 = vor.u32 %v6951_v54, %v6048_v51  ;;  %v6114_v37 = vld [vmem:[%s7787_s8 + $0x758] sm:$0xf0] }
 0x320   : > { %3924 = vmatmul.bf16.gmra.mxu1 %v5981_v9 }
 0x321   : > { %4013 = vmatmul.bf16.gmra.mxu2 %v5985_v14 }
 0x322   : > { %4102 = vmatmul.bf16.gmra.mxu3 %v5989_v15 }
 0x324   : > { %v3974_v27 = vpop.f32.mrf.mxu2  ;;  %v3798_v31 = vpop.f32.mrf.mxu0 }
 0x325   : > { %v4063_v33 = vpop.f32.mrf.mxu3  ;;  %v3975_v29 = vadd.f32 %v3974_v27, %v3886_v23  ;;  %v3887_v35 = vpop.f32.mrf.mxu1  ;;  %v3799_v41 = vadd.f32 %v3798_v31, %v7984_v55  ;;  %v6966_v31 = vld [vmem:[%s7787_s8 + $0x74c] sm:$0xf0] }
 0x327   : > { %v8207_v42 = vadd.f32 %v4063_v33, %v3975_v29  ;;  %v3888_v43 = vadd.f32 %v3887_v35, %v3799_v41  ;;  %v6104_v29 = vld [vmem:[%s7787_s8 + $0x710] sm:$0xf]  ;;  %v6958_v35 = vld [vmem:[%s7787_s8 + $0x714] sm:$0xf] }
 0x328   : > { %v6106_v41 = vld [vmem:[%s7787_s8 + $0x750] sm:$0xf0]  ;;  %v6105_v51 = vor.u32 %v6966_v31, %v6104_v29 }
 0x329   : > { %v6109_v54 = vor.u32 %v6958_v35, %v6106_v41  ;;  %v6974_v29 = vld [vmem:[%s7787_s8 + $0x794] sm:$0xf]  ;;  %v6176_v35 = vld [vmem:[%s7787_s8 + $0x798] sm:$0xf] }
 0x32a   : > { %v6170_v31 = vld [vmem:[%s7787_s8 + $0x7d0] sm:$0xf0]  ;;  %v6983_v41 = vld [vmem:[%s7787_s8 + $0x7d4] sm:$0xf0] }
 0x32c   : > { %v3976_v8 = vpop.f32.mrf.mxu2  ;;  %v3801_v9 = vpop.f32.mrf.mxu0 }
 0x32d   : > { %v4065_v45 = vpop.f32.mrf.mxu3  ;;  %v3977_v5 = vadd.f32 %v3976_v8, %v3888_v43  ;;  %v3890_v55 = vpop.f32.mrf.mxu1  ;;  %v3802_v13 = vadd.f32 %v3801_v9, %v7986_v63  ;;  %v6967_v43 = vld [vmem:[%s7787_s8 + $0x754] sm:$0xf0] }
 0x32e   : > { %v6113_v8 = vor.u32 %v6967_v43, %v6112_v1  ;;  %v7107_v9 = vld [vmem:[%s7785_s7 + $0x3b8] sm:$0xff] }
 0x32f   : > { %v8219_v14 = vadd.f32 %v4065_v45, %v3977_v5  ;;  %v3891_v15 = vadd.f32 %v3890_v55, %v3802_v13  ;;  %3840 = vmatmul.bf16.gmra.mxu0 %v6041_v62  ;;  %v6117_v45 = vor.u32 %v6959_v2, %v6114_v37  ;;  %v7091_v55 = vld [vmem:[%s7785_s7 + $0x338] sm:$0xff]  ;;  %4657 = vmatpush.bf16.msrb.mxu2 %v7107_v9 }
 0x330   : > { %3929 = vmatmul.bf16.gmra.mxu1 %v6045_v0  ;;  %4479 = vmatpush.bf16.msrb.mxu0 %v7091_v55  ;;  %v6975_v1 = vld [vmem:[%s7787_s8 + $0x79c] sm:$0xf] }
 0x331   : > { %4018 = vmatmul.bf16.gmra.mxu2 %v6049_v11  ;;  %v7115_v11 = vld [vmem:[%s7785_s7 + $0x3f8] sm:$0xff] }
 0x332   : > { %4107 = vmatmul.bf16.gmra.mxu3 %v6053_v22  ;;  %v6178_v43 = vld [vmem:[%s7787_s8 + $0x7d8] sm:$0xf0] }
 0x333   : > { %4746 = vmatpush.bf16.msrb.mxu3 %v7115_v11 }
 0x334   : > { %v3979_v19 = vpop.f32.mrf.mxu2  ;;  %v3803_v58 = vpop.f32.mrf.mxu0 }
 0x335   : > { %v4068_v23 = vpop.f32.mrf.mxu3  ;;  %v3980_v24 = vadd.f32 %v3979_v19, %v3891_v15  ;;  %v3892_v28 = vpop.f32.mrf.mxu1  ;;  %v3804_v63 = vadd.f32 %v3803_v58, %v7996_v21  ;;  %v7099_v58 = vld [vmem:[%s7785_s7 + $0x378] sm:$0xff] }
 0x336   : > { %4568 = vmatpush.bf16.msrb.mxu1 %v7099_v58  ;;  %v5232_v58 = vld [vmem:[%s7787_s8 + $0x28] sm:$0xf] }
 0x337   : > { %v8222_v27 = vadd.f32 %v4068_v23, %v3980_v24  ;;  %v3893_v33 = vadd.f32 %v3892_v28, %v3804_v63  ;;  %v6168_v63 = vld [vmem:[%s7787_s8 + $0x790] sm:$0xf] }
 0x33c   : > { %v3981_v46 = vpop.f32.mrf.mxu2  ;;  %v3806_v21 = vpop.f32.mrf.mxu0 }
 0x33d   : > { %v4070_v49 = vpop.f32.mrf.mxu3  ;;  %v3982_v59 = vadd.f32 %v3981_v46, %v3893_v33  ;;  %v3895_v60 = vpop.f32.mrf.mxu1  ;;  %v3807_v62 = vadd.f32 %v3806_v21, %v8001_v34  ;;  %v6982_v33 = vld [vmem:[%s7787_s8 + $0x7cc] sm:$0xf0]  ;;  %v6181_v21 = vor.u32 %v6975_v1, %v6178_v43 }
 0x33e   : > { %v6169_v46 = vor.u32 %v6982_v33, %v6168_v63  ;;  %v6737_v63 = vld [vmem:[%s7787_s8 + $0x2c] sm:$0xf] }
 0x33f   : > { %v8233_v0 = vadd.f32 %v4070_v49, %v3982_v59  ;;  %v3896_v5 = vadd.f32 %v3895_v60, %v3807_v62  ;;  %3845 = vmatmul.bf16.gmra.mxu0 %v6105_v51  ;;  %v6173_v49 = vor.u32 %v6974_v29, %v6170_v31  ;;  %v6177_v59 = vor.u32 %v6983_v41, %v6176_v35  ;;  %v5234_v33 = vld [vmem:[%s7787_s8 + $0x68] sm:$0xf0] }
 0x340   : > { %3934 = vmatmul.bf16.gmra.mxu1 %v6109_v54 }
 0x341   : > { %4023 = vmatmul.bf16.gmra.mxu2 %v6113_v8 }
 0x342   : > { %4112 = vmatmul.bf16.gmra.mxu3 %v6117_v45 }
 0x344   : > { %v3984_v22 = vpop.f32.mrf.mxu2  ;;  %v3808_v15 = vpop.f32.mrf.mxu0 }
 0x345   : > { %v4073_v34 = vpop.f32.mrf.mxu3  ;;  %v3985_v13 = vadd.f32 %v3984_v22, %v3896_v5  ;;  %v3897_v19 = vpop.f32.mrf.mxu1  ;;  %v3809_v23 = vadd.f32 %v3808_v15, %v8012_v57  ;;  %v6744_v15 = vld [vmem:[%s7787_s8 + $0x5c] sm:$0xf0] }
 0x347   : > { %v8239_v24 = vadd.f32 %v4073_v34, %v3985_v13  ;;  %v3898_v28 = vadd.f32 %v3897_v19, %v3809_v23  ;;  %v5224_v13 = vld [vmem:[%s7787_s8 + $0x20] sm:$0xf]  ;;  %v6736_v19 = vld [vmem:[%s7787_s8 + $0x24] sm:$0xf] }
 0x348   : > { %v5226_v23 = vld [vmem:[%s7787_s8 + $0x60] sm:$0xf0]  ;;  %v5225_v35 = vor.u32 %v6744_v15, %v5224_v13 }
 0x349   : > { %v5229_v41 = vor.u32 %v6736_v19, %v5226_v23  ;;  %v6752_v13 = vld [vmem:[%s7787_s8 + $0xa4] sm:$0xf]  ;;  %v5296_v19 = vld [vmem:[%s7787_s8 + $0xa8] sm:$0xf] }
 0x34a   : > { %v5290_v15 = vld [vmem:[%s7787_s8 + $0xe0] sm:$0xf0]  ;;  %v6761_v23 = vld [vmem:[%s7787_s8 + $0xe4] sm:$0xf0] }
 0x34c   : > { %v3986_v2 = vpop.f32.mrf.mxu2  ;;  %v3811_v54 = vpop.f32.mrf.mxu0 }
 0x34d   : > { %v4075_v37 = vpop.f32.mrf.mxu3  ;;  %v3987_v51 = vadd.f32 %v3986_v2, %v3898_v28  ;;  %v3900_v57 = vpop.f32.mrf.mxu1  ;;  %v3812_v60 = vadd.f32 %v3811_v54, %v8014_v4  ;;  %v6745_v28 = vld [vmem:[%s7787_s8 + $0x64] sm:$0xf0]  ;;  %v7106_v54 = vld [vmem:[%s7785_s7 + $0x3b0] sm:$0xff] }
 0x34e   : > { %v5233_v2 = vor.u32 %v6745_v28, %v5232_v58  ;;  %4658 = vmatpush.bf16.msrb.mxu2 %v7106_v54  ;;  %v6753_v58 = vld [vmem:[%s7787_s8 + $0xac] sm:$0xf] }
 0x34f   : > { %v8251_v8 = vadd.f32 %v4075_v37, %v3987_v51  ;;  %v3901_v45 = vadd.f32 %v3900_v57, %v3812_v60  ;;  %3850 = vmatmul.bf16.gmra.mxu0 %v6169_v46  ;;  %v5237_v37 = vor.u32 %v6737_v63, %v5234_v33  ;;  %v7090_v57 = vld [vmem:[%s7785_s7 + $0x330] sm:$0xff]  ;;  %v5298_v28 = vld [vmem:[%s7787_s8 + $0xe8] sm:$0xf0] }
 0x350   : > { %3939 = vmatmul.bf16.gmra.mxu1 %v6173_v49  ;;  %4480 = vmatpush.bf16.msrb.mxu0 %v7090_v57 }
 0x351   : > { %4028 = vmatmul.bf16.gmra.mxu2 %v6177_v59  ;;  %v7114_v59 = vld [vmem:[%s7785_s7 + $0x3f0] sm:$0xff] }
 0x352   : > { %4117 = vmatmul.bf16.gmra.mxu3 %v6181_v21 }
 0x353   : > { %4747 = vmatpush.bf16.msrb.mxu3 %v7114_v59 }
 0x354   : > { %v3989_v62 = vpop.f32.mrf.mxu2  ;;  %v3813_v55 = vpop.f32.mrf.mxu0 }
 0x355   : > { %v4078_v5 = vpop.f32.mrf.mxu3  ;;  %v3990_v9 = vadd.f32 %v3989_v62, %v3901_v45  ;;  %v3902_v11 = vpop.f32.mrf.mxu1  ;;  %v3814_v4 = vadd.f32 %v3813_v55, %v8024_v26  ;;  %v7098_v55 = vld [vmem:[%s7785_s7 + $0x370] sm:$0xff] }
 0x356   : > { %4569 = vmatpush.bf16.msrb.mxu1 %v7098_v55  ;;  %v5360_v55 = vld [vmem:[%s7787_s8 + $0x128] sm:$0xf] }
 0x357   : > { %v8254_v22 = vadd.f32 %v4078_v5, %v3990_v9  ;;  %v3903_v34 = vadd.f32 %v3902_v11, %v3814_v4  ;;  %v5288_v4 = vld [vmem:[%s7787_s8 + $0xa0] sm:$0xf] }
 0x35c   : > { %v3991_v29 = vpop.f32.mrf.mxu2  ;;  %v3816_v26 = vpop.f32.mrf.mxu0 }
 0x35d   : > { %v4080_v31 = vpop.f32.mrf.mxu3  ;;  %v3992_v1 = vadd.f32 %v3991_v29, %v3903_v34  ;;  %v3905_v43 = vpop.f32.mrf.mxu1  ;;  %v3817_v46 = vadd.f32 %v3816_v26, %v8029_v40  ;;  %v6760_v34 = vld [vmem:[%s7787_s8 + $0xdc] sm:$0xf0]  ;;  %v5301_v26 = vor.u32 %v6753_v58, %v5298_v28 }
 0x35e   : > { %v5289_v29 = vor.u32 %v6760_v34, %v5288_v4  ;;  %v6769_v4 = vld [vmem:[%s7787_s8 + $0x12c] sm:$0xf] }
 0x35f   : > { %v8265_v49 = vadd.f32 %v4080_v31, %v3992_v1  ;;  %v3906_v51 = vadd.f32 %v3905_v43, %v3817_v46  ;;  %4131 = vmatmul.bf16.vlgmr.msra.gmra.mxu0 %v5225_v35  ;;  %v5293_v31 = vor.u32 %v6752_v13, %v5290_v15  ;;  %v5297_v1 = vor.u32 %v6761_v23, %v5296_v19  ;;  %v5362_v34 = vld [vmem:[%s7787_s8 + $0x168] sm:$0xf0] }
 0x360   : > { %4220 = vmatmul.bf16.vlgmr.msra.gmra.mxu1 %v5229_v41 }
 0x361   : > { %4309 = vmatmul.bf16.vlgmr.msra.gmra.mxu2 %v5233_v2 }
 0x362   : > { %4398 = vmatmul.bf16.vlgmr.msra.gmra.mxu3 %v5237_v37 }
 0x364   : > { %v3994_v21 = vpop.f32.mrf.mxu2  ;;  %v3818_v45 = vpop.f32.mrf.mxu0 }
 0x365   : > { %v4083_v40 = vpop.f32.mrf.mxu3  ;;  %v3995_v60 = vadd.f32 %v3994_v21, %v3906_v51  ;;  %v3907_v62 = vpop.f32.mrf.mxu1  ;;  %v3819_v5 = vadd.f32 %v3818_v45, %v8040_v3  ;;  %v6776_v45 = vld [vmem:[%s7787_s8 + $0x15c] sm:$0xf0] }
 0x367   : > { %v8271_v9 = vadd.f32 %v4083_v40, %v3995_v60  ;;  %v3908_v11 = vadd.f32 %v3907_v62, %v3819_v5  ;;  %v5352_v60 = vld [vmem:[%s7787_s8 + $0x120] sm:$0xf]  ;;  %v6768_v62 = vld [vmem:[%s7787_s8 + $0x124] sm:$0xf] }
 0x368   : > { %v5354_v5 = vld [vmem:[%s7787_s8 + $0x160] sm:$0xf0]  ;;  %v5353_v19 = vor.u32 %v6776_v45, %v5352_v60 }
 0x369   : > { %v5357_v23 = vor.u32 %v6768_v62, %v5354_v5  ;;  %v6784_v60 = vld [vmem:[%s7787_s8 + $0x1a4] sm:$0xf]  ;;  %v5424_v62 = vld [vmem:[%s7787_s8 + $0x1a8] sm:$0xf] }
 0x36a   : > { %v5418_v45 = vld [vmem:[%s7787_s8 + $0x1e0] sm:$0xf0]  ;;  %v6793_v5 = vld [vmem:[%s7787_s8 + $0x1e4] sm:$0xf0] }
 0x36c   : > { %v3996_v63 = vpop.f32.mrf.mxu2  ;;  %v3821_v41 = vpop.f32.mrf.mxu0 }
 0x36d   : > { %v4085_v33 = vpop.f32.mrf.mxu3  ;;  %v3997_v35 = vadd.f32 %v3996_v63, %v3908_v11  ;;  %v3910_v3 = vpop.f32.mrf.mxu1  ;;  %v3822_v43 = vadd.f32 %v3821_v41, %v8042_v12  ;;  %v6777_v11 = vld [vmem:[%s7787_s8 + $0x164] sm:$0xf0] }
 0x36e   : > { %v5361_v63 = vor.u32 %v6777_v11, %v5360_v55  ;;  %v7105_v41 = vld [vmem:[%s7785_s7 + $0x3a8] sm:$0xff] }
 0x36f   : > { %v8283_v2 = vadd.f32 %v4085_v33, %v3997_v35  ;;  %v3911_v37 = vadd.f32 %v3910_v3, %v3822_v43  ;;  %4136 = vmatmul.bf16.gmra.mxu0 %v5289_v29  ;;  %v5365_v33 = vor.u32 %v6769_v4, %v5362_v34  ;;  %v7089_v3 = vld [vmem:[%s7785_s7 + $0x328] sm:$0xff]  ;;  %4659 = vmatpush.bf16.msrb.mxu2 %v7105_v41 }
 0x370   : > { %4225 = vmatmul.bf16.gmra.mxu1 %v5293_v31  ;;  %4481 = vmatpush.bf16.msrb.mxu0 %v7089_v3  ;;  %v6785_v55 = vld [vmem:[%s7787_s8 + $0x1ac] sm:$0xf] }
 0x371   : > { %4314 = vmatmul.bf16.gmra.mxu2 %v5297_v1  ;;  %v7113_v1 = vld [vmem:[%s7785_s7 + $0x3e8] sm:$0xff] }
 0x372   : > { %4403 = vmatmul.bf16.gmra.mxu3 %v5301_v26  ;;  %v5426_v11 = vld [vmem:[%s7787_s8 + $0x1e8] sm:$0xf0] }
 0x373   : > { %4748 = vmatpush.bf16.msrb.mxu3 %v7113_v1 }
 0x374   : > { %v3999_v46 = vpop.f32.mrf.mxu2  ;;  %v3823_v57 = vpop.f32.mrf.mxu0 }
 0x375   : > { %v4088_v51 = vpop.f32.mrf.mxu3  ;;  %v4000_v54 = vadd.f32 %v3999_v46, %v3911_v37  ;;  %v3912_v59 = vpop.f32.mrf.mxu1  ;;  %v3824_v12 = vadd.f32 %v3823_v57, %v8052_v38  ;;  %v7097_v57 = vld [vmem:[%s7785_s7 + $0x368] sm:$0xff] }
 0x376   : > { %4570 = vmatpush.bf16.msrb.mxu1 %v7097_v57  ;;  %v5488_v57 = vld [vmem:[%s7787_s8 + $0x228] sm:$0xf] }
 0x377   : > { %v8286_v21 = vadd.f32 %v4088_v51, %v4000_v54  ;;  %v3913_v40 = vadd.f32 %v3912_v59, %v3824_v12  ;;  %v5416_v12 = vld [vmem:[%s7787_s8 + $0x1a0] sm:$0xf] }
 0x37c   : > { %v4001_v13 = vpop.f32.mrf.mxu2  ;;  %v3826_v38 = vpop.f32.mrf.mxu0 }
 0x37d   : > { %v4090_v15 = vpop.f32.mrf.mxu3  ;;  %v4002_v58 = vadd.f32 %v4001_v13, %v3913_v40  ;;  %v3915_v28 = vpop.f32.mrf.mxu1  ;;  %v3827_v29 = vadd.f32 %v3826_v38, %v8057_v50  ;;  %v6792_v40 = vld [vmem:[%s7787_s8 + $0x1dc] sm:$0xf0]  ;;  %v5429_v38 = vor.u32 %v6785_v55, %v5426_v11 }
 0x37e   : > { %v5417_v13 = vor.u32 %v6792_v40, %v5416_v12  ;;  %v6801_v12 = vld [vmem:[%s7787_s8 + $0x22c] sm:$0xf] }
 0x37f   : > { %v8297_v31 = vadd.f32 %v4090_v15, %v4002_v58  ;;  %v3916_v35 = vadd.f32 %v3915_v28, %v3827_v29  ;;  %4141 = vmatmul.bf16.gmra.mxu0 %v5353_v19  ;;  %v5421_v15 = vor.u32 %v6784_v60, %v5418_v45  ;;  %v5425_v58 = vor.u32 %v6793_v5, %v5424_v62  ;;  %v5490_v40 = vld [vmem:[%s7787_s8 + $0x268] sm:$0xf0] }
 0x380   : > { %4230 = vmatmul.bf16.gmra.mxu1 %v5357_v23 }
 0x381   : > { %4319 = vmatmul.bf16.gmra.mxu2 %v5361_v63 }
 0x382   : > { %4408 = vmatmul.bf16.gmra.mxu3 %v5365_v33 }
 0x384   : > { %v4004_v26 = vpop.f32.mrf.mxu2  ;;  %v3828_v37 = vpop.f32.mrf.mxu0 }
 0x385   : > { %v4093_v50 = vpop.f32.mrf.mxu3  ;;  %v4005_v43 = vadd.f32 %v4004_v26, %v3916_v35  ;;  %v3917_v46 = vpop.f32.mrf.mxu1  ;;  %v3829_v51 = vadd.f32 %v3828_v37, %v8068_v16  ;;  %v6808_v37 = vld [vmem:[%s7787_s8 + $0x25c] sm:$0xf0] }
 0x387   : > { %v8303_v54 = vadd.f32 %v4093_v50, %v4005_v43  ;;  %v3918_v59 = vadd.f32 %v3917_v46, %v3829_v51  ;;  %v5480_v43 = vld [vmem:[%s7787_s8 + $0x220] sm:$0xf]  ;;  %v6800_v46 = vld [vmem:[%s7787_s8 + $0x224] sm:$0xf] }
 0x388   : > { %v5482_v51 = vld [vmem:[%s7787_s8 + $0x260] sm:$0xf0]  ;;  %v5481_v62 = vor.u32 %v6808_v37, %v5480_v43 }
 0x389   : > { %v5485_v5 = vor.u32 %v6800_v46, %v5482_v51  ;;  %v6816_v43 = vld [vmem:[%s7787_s8 + $0x2a4] sm:$0xf]  ;;  %v5552_v46 = vld [vmem:[%s7787_s8 + $0x2a8] sm:$0xf] }
 0x38a   : > { %v5546_v37 = vld [vmem:[%s7787_s8 + $0x2e0] sm:$0xf0]  ;;  %v6825_v51 = vld [vmem:[%s7787_s8 + $0x2e4] sm:$0xf0] }
 0x38c   : > { %v4006_v4 = vpop.f32.mrf.mxu2  ;;  %v3831_v23 = vpop.f32.mrf.mxu0 }
 0x38d   : > { %v4095_v34 = vpop.f32.mrf.mxu3  ;;  %v4007_v19 = vadd.f32 %v4006_v4, %v3918_v59  ;;  %v3920_v16 = vpop.f32.mrf.mxu1  ;;  %v3832_v28 = vadd.f32 %v3831_v23, %v8070_v25  ;;  %v6809_v59 = vld [vmem:[%s7787_s8 + $0x264] sm:$0xf0]  ;;  %v7104_v23 = vld [vmem:[%s7785_s7 + $0x3a0] sm:$0xff] }
 0x38e   : > { %v5489_v4 = vor.u32 %v6809_v59, %v5488_v57  ;;  %4660 = vmatpush.bf16.msrb.mxu2 %v7104_v23  ;;  %v6817_v57 = vld [vmem:[%s7787_s8 + $0x2ac] sm:$0xf] }
 0x38f   : > { %v8315_v63 = vadd.f32 %v4095_v34, %v4007_v19  ;;  %v3921_v33 = vadd.f32 %v3920_v16, %v3832_v28  ;;  %4146 = vmatmul.bf16.gmra.mxu0 %v5417_v13  ;;  %v5493_v34 = vor.u32 %v6801_v12, %v5490_v40  ;;  %v7088_v16 = vld [vmem:[%s7785_s7 + $0x320] sm:$0xff]  ;;  %v5554_v59 = vld [vmem:[%s7787_s8 + $0x2e8] sm:$0xf0] }
 0x390   : > { %4235 = vmatmul.bf16.gmra.mxu1 %v5421_v15  ;;  %4482 = vmatpush.bf16.msrb.mxu0 %v7088_v16 }
 0x391   : > { %4324 = vmatmul.bf16.gmra.mxu2 %v5425_v58  ;;  %v7112_v58 = vld [vmem:[%s7785_s7 + $0x3e0] sm:$0xff] }
 0x392   : > { %4413 = vmatmul.bf16.gmra.mxu3 %v5429_v38 }
 0x393   : > { %4749 = vmatpush.bf16.msrb.mxu3 %v7112_v58 }
 0x394   : > { %v4009_v29 = vpop.f32.mrf.mxu2  ;;  %v3833_v3 = vpop.f32.mrf.mxu0 }
 0x395   : > { %v4098_v35 = vpop.f32.mrf.mxu3  ;;  %v4010_v41 = vadd.f32 %v4009_v29, %v3921_v33  ;;  %v3922_v1 = vpop.f32.mrf.mxu1  ;;  %v3834_v25 = vadd.f32 %v3833_v3, %v8080_v53  ;;  %v7096_v3 = vld [vmem:[%s7785_s7 + $0x360] sm:$0xff] }
 0x396   : > { %4571 = vmatpush.bf16.msrb.mxu1 %v7096_v3  ;;  %v5616_v3 = vld [vmem:[%s7787_s8 + $0x328] sm:$0xf] }
 0x397   : > { %v8318_v26 = vadd.f32 %v4098_v35, %v4010_v41  ;;  %v3923_v50 = vadd.f32 %v3922_v1, %v3834_v25  ;;  %v5544_v25 = vld [vmem:[%s7787_s8 + $0x2a0] sm:$0xf] }
 0x39c   : > { %v4011_v60 = vpop.f32.mrf.mxu2  ;;  %v3836_v53 = vpop.f32.mrf.mxu0 }
 0x39d   : > { %v4100_v45 = vpop.f32.mrf.mxu3  ;;  %v4012_v55 = vadd.f32 %v4011_v60, %v3923_v50  ;;  %v3925_v11 = vpop.f32.mrf.mxu1  ;;  %v3837_v13 = vadd.f32 %v3836_v53, %v8085_v7  ;;  %v6824_v50 = vld [vmem:[%s7787_s8 + $0x2dc] sm:$0xf0]  ;;  %v5557_v53 = vor.u32 %v6817_v57, %v5554_v59 }
 0x39e   : > { %v5545_v60 = vor.u32 %v6824_v50, %v5544_v25  ;;  %v6833_v25 = vld [vmem:[%s7787_s8 + $0x32c] sm:$0xf] }
 0x39f   : > { %v8329_v15 = vadd.f32 %v4100_v45, %v4012_v55  ;;  %v3926_v19 = vadd.f32 %v3925_v11, %v3837_v13  ;;  %4151 = vmatmul.bf16.gmra.mxu0 %v5481_v62  ;;  %v5549_v45 = vor.u32 %v6816_v43, %v5546_v37  ;;  %v5553_v55 = vor.u32 %v6825_v51, %v5552_v46  ;;  %v5618_v50 = vld [vmem:[%s7787_s8 + $0x368] sm:$0xf0] }
 0x3a0   : > { %4240 = vmatmul.bf16.gmra.mxu1 %v5485_v5 }
 0x3a1   : > { %4329 = vmatmul.bf16.gmra.mxu2 %v5489_v4 }
 0x3a2   : > { %4418 = vmatmul.bf16.gmra.mxu3 %v5493_v34 }
 0x3a4   : > { %v4014_v38 = vpop.f32.mrf.mxu2  ;;  %v3838_v33 = vpop.f32.mrf.mxu0 }
 0x3a5   : > { %v4103_v7 = vpop.f32.mrf.mxu3  ;;  %v4015_v28 = vadd.f32 %v4014_v38, %v3926_v19  ;;  %v3927_v29 = vpop.f32.mrf.mxu1  ;;  %v3839_v35 = vadd.f32 %v3838_v33, %v8096_v39  ;;  %v6840_v33 = vld [vmem:[%s7787_s8 + $0x35c] sm:$0xf0] }
 0x3a7   : > { %v8335_v41 = vadd.f32 %v4103_v7, %v4015_v28  ;;  %v3928_v1 = vadd.f32 %v3927_v29, %v3839_v35  ;;  %v5608_v28 = vld [vmem:[%s7787_s8 + $0x320] sm:$0xf]  ;;  %v6832_v29 = vld [vmem:[%s7787_s8 + $0x324] sm:$0xf] }
 0x3a8   : > { %v5610_v35 = vld [vmem:[%s7787_s8 + $0x360] sm:$0xf0]  ;;  %v5609_v46 = vor.u32 %v6840_v33, %v5608_v28 }
 0x3a9   : > { %v5613_v51 = vor.u32 %v6832_v29, %v5610_v35  ;;  %v6848_v28 = vld [vmem:[%s7787_s8 + $0x3a4] sm:$0xf]  ;;  %v5680_v29 = vld [vmem:[%s7787_s8 + $0x3a8] sm:$0xf] }
 0x3aa   : > { %v5674_v33 = vld [vmem:[%s7787_s8 + $0x3e0] sm:$0xf0]  ;;  %v6857_v35 = vld [vmem:[%s7787_s8 + $0x3e4] sm:$0xf0] }
 0x3ac   : > { %v4016_v12 = vpop.f32.mrf.mxu2  ;;  %v3841_v5 = vpop.f32.mrf.mxu0 }
 0x3ad   : > { %v4105_v40 = vpop.f32.mrf.mxu3  ;;  %v4017_v62 = vadd.f32 %v4016_v12, %v3928_v1  ;;  %v3930_v39 = vpop.f32.mrf.mxu1  ;;  %v3842_v11 = vadd.f32 %v3841_v5, %v8098_v48  ;;  %v6841_v1 = vld [vmem:[%s7787_s8 + $0x364] sm:$0xf0]  ;;  %v7103_v5 = vld [vmem:[%s7785_s7 + $0x398] sm:$0xff] }
 0x3ae   : > { %v5617_v12 = vor.u32 %v6841_v1, %v5616_v3  ;;  %4661 = vmatpush.bf16.msrb.mxu2 %v7103_v5  ;;  %v6849_v3 = vld [vmem:[%s7787_s8 + $0x3ac] sm:$0xf] }
 0x3af   : > { %v8347_v4 = vadd.f32 %v4105_v40, %v4017_v62  ;;  %v3931_v34 = vadd.f32 %v3930_v39, %v3842_v11  ;;  %4156 = vmatmul.bf16.gmra.mxu0 %v5545_v60  ;;  %v5621_v40 = vor.u32 %v6833_v25, %v5618_v50  ;;  %v7087_v39 = vld [vmem:[%s7785_s7 + $0x318] sm:$0xff]  ;;  %v5682_v1 = vld [vmem:[%s7787_s8 + $0x3e8] sm:$0xf0] }
 0x3b0   : > { %4245 = vmatmul.bf16.gmra.mxu1 %v5549_v45  ;;  %4483 = vmatpush.bf16.msrb.mxu0 %v7087_v39 }
 0x3b1   : > { %4334 = vmatmul.bf16.gmra.mxu2 %v5553_v55  ;;  %v7111_v55 = vld [vmem:[%s7785_s7 + $0x3d8] sm:$0xff] }
 0x3b2   : > { %4423 = vmatmul.bf16.gmra.mxu3 %v5557_v53 }
 0x3b3   : > { %4750 = vmatpush.bf16.msrb.mxu3 %v7111_v55 }
 0x3b4   : > { %v4019_v13 = vpop.f32.mrf.mxu2  ;;  %v3843_v16 = vpop.f32.mrf.mxu0 }
 0x3b5   : > { %v4108_v19 = vpop.f32.mrf.mxu3  ;;  %v4020_v23 = vadd.f32 %v4019_v13, %v3931_v34  ;;  %v3932_v58 = vpop.f32.mrf.mxu1  ;;  %v3844_v48 = vadd.f32 %v3843_v16, %v8108_v17  ;;  %v7095_v16 = vld [vmem:[%s7785_s7 + $0x358] sm:$0xff] }
 0x3b6   : > { %4572 = vmatpush.bf16.msrb.mxu1 %v7095_v16  ;;  %v5744_v16 = vld [vmem:[%s7787_s8 + $0x428] sm:$0xf] }
 0x3b7   : > { %v8350_v38 = vadd.f32 %v4108_v19, %v4020_v23  ;;  %v3933_v7 = vadd.f32 %v3932_v58, %v3844_v48  ;;  %v5672_v48 = vld [vmem:[%s7787_s8 + $0x3a0] sm:$0xf] }
 0x3bc   : > { %v4021_v43 = vpop.f32.mrf.mxu2  ;;  %v3846_v17 = vpop.f32.mrf.mxu0 }
 0x3bd   : > { %v4110_v37 = vpop.f32.mrf.mxu3  ;;  %v4022_v57 = vadd.f32 %v4021_v43, %v3933_v7  ;;  %v3935_v59 = vpop.f32.mrf.mxu1  ;;  %v3847_v60 = vadd.f32 %v3846_v17, %v8113_v32  ;;  %v6856_v7 = vld [vmem:[%s7787_s8 + $0x3dc] sm:$0xf0]  ;;  %v5685_v17 = vor.u32 %v6849_v3, %v5682_v1 }
 0x3be   : > { %v5673_v43 = vor.u32 %v6856_v7, %v5672_v48  ;;  %v6865_v48 = vld [vmem:[%s7787_s8 + $0x42c] sm:$0xf] }
 0x3bf   : > { %v8361_v45 = vadd.f32 %v4110_v37, %v4022_v57  ;;  %v3936_v62 = vadd.f32 %v3935_v59, %v3847_v60  ;;  %4161 = vmatmul.bf16.gmra.mxu0 %v5609_v46  ;;  %v5677_v37 = vor.u32 %v6848_v28, %v5674_v33  ;;  %v5681_v57 = vor.u32 %v6857_v35, %v5680_v29  ;;  %v5746_v7 = vld [vmem:[%s7787_s8 + $0x468] sm:$0xf0] }
 0x3c0   : > { %4250 = vmatmul.bf16.gmra.mxu1 %v5613_v51 }
 0x3c1   : > { %4339 = vmatmul.bf16.gmra.mxu2 %v5617_v12 }
 0x3c2   : > { %4428 = vmatmul.bf16.gmra.mxu3 %v5621_v40 }
 0x3c4   : > { %v4024_v53 = vpop.f32.mrf.mxu2  ;;  %v3848_v34 = vpop.f32.mrf.mxu0 }
 0x3c5   : > { %v4113_v32 = vpop.f32.mrf.mxu3  ;;  %v4025_v11 = vadd.f32 %v4024_v53, %v3936_v62  ;;  %v3937_v13 = vpop.f32.mrf.mxu1  ;;  %v3849_v19 = vadd.f32 %v3848_v34, %v8124_v6  ;;  %v6872_v34 = vld [vmem:[%s7787_s8 + $0x45c] sm:$0xf0] }
 0x3c7   : > { %v8367_v23 = vadd.f32 %v4113_v32, %v4025_v11  ;;  %v3938_v58 = vadd.f32 %v3937_v13, %v3849_v19  ;;  %v5736_v11 = vld [vmem:[%s7787_s8 + $0x420] sm:$0xf]  ;;  %v6864_v13 = vld [vmem:[%s7787_s8 + $0x424] sm:$0xf] }
 0x3c8   : > { %v5738_v19 = vld [vmem:[%s7787_s8 + $0x460] sm:$0xf0]  ;;  %v5737_v29 = vor.u32 %v6872_v34, %v5736_v11 }
 0x3c9   : > { %v5741_v35 = vor.u32 %v6864_v13, %v5738_v19  ;;  %v6880_v11 = vld [vmem:[%s7787_s8 + $0x4a4] sm:$0xf]  ;;  %v5808_v13 = vld [vmem:[%s7787_s8 + $0x4a8] sm:$0xf] }
 0x3ca   : > { %v5802_v34 = vld [vmem:[%s7787_s8 + $0x4e0] sm:$0xf0]  ;;  %v6889_v19 = vld [vmem:[%s7787_s8 + $0x4e4] sm:$0xf0] }
 0x3cc   : > { %v4026_v25 = vpop.f32.mrf.mxu2  ;;  %v3851_v51 = vpop.f32.mrf.mxu0 }
 0x3cd   : > { %v4115_v50 = vpop.f32.mrf.mxu3  ;;  %v4027_v46 = vadd.f32 %v4026_v25, %v3938_v58  ;;  %v3940_v6 = vpop.f32.mrf.mxu1  ;;  %v3852_v59 = vadd.f32 %v3851_v51, %v8126_v18  ;;  %v6873_v58 = vld [vmem:[%s7787_s8 + $0x464] sm:$0xf0]  ;;  %v7102_v51 = vld [vmem:[%s7785_s7 + $0x390] sm:$0xff] }
 0x3ce   : > { %v5745_v25 = vor.u32 %v6873_v58, %v5744_v16  ;;  %4662 = vmatpush.bf16.msrb.mxu2 %v7102_v51  ;;  %v6881_v16 = vld [vmem:[%s7787_s8 + $0x4ac] sm:$0xf] }
 0x3cf   : > { %v8379_v12 = vadd.f32 %v4115_v50, %v4027_v46  ;;  %v3941_v40 = vadd.f32 %v3940_v6, %v3852_v59  ;;  %4166 = vmatmul.bf16.gmra.mxu0 %v5673_v43  ;;  %v5749_v50 = vor.u32 %v6865_v48, %v5746_v7  ;;  %v7086_v6 = vld [vmem:[%s7785_s7 + $0x310] sm:$0xff]  ;;  %v5810_v58 = vld [vmem:[%s7787_s8 + $0x4e8] sm:$0xf0] }
 0x3d0   : > { %4255 = vmatmul.bf16.gmra.mxu1 %v5677_v37  ;;  %4484 = vmatpush.bf16.msrb.mxu0 %v7086_v6 }
 0x3d1   : > { %4344 = vmatmul.bf16.gmra.mxu2 %v5681_v57  ;;  %v7110_v57 = vld [vmem:[%s7785_s7 + $0x3d0] sm:$0xff] }
 0x3d2   : > { %4433 = vmatmul.bf16.gmra.mxu3 %v5685_v17 }
 0x3d3   : > { %4751 = vmatpush.bf16.msrb.mxu3 %v7110_v57 }
 0x3d4   : > { %v4029_v60 = vpop.f32.mrf.mxu2  ;;  %v3853_v39 = vpop.f32.mrf.mxu0 }
 0x3d5   : > { %v4118_v62 = vpop.f32.mrf.mxu3  ;;  %v4030_v5 = vadd.f32 %v4029_v60, %v3941_v40  ;;  %v3942_v55 = vpop.f32.mrf.mxu1  ;;  %v3854_v18 = vadd.f32 %v3853_v39, %v8137_v52  ;;  %v7094_v39 = vld [vmem:[%s7785_s7 + $0x350] sm:$0xff] }
 0x3d6   : > { %4573 = vmatpush.bf16.msrb.mxu1 %v7094_v39  ;;  %v5872_v39 = vld [vmem:[%s7787_s8 + $0x528] sm:$0xf] }
 0x3d7   : > { %v8382_v53 = vadd.f32 %v4118_v62, %v4030_v5  ;;  %v3943_v32 = vadd.f32 %v3942_v55, %v3854_v18  ;;  %v5800_v18 = vld [vmem:[%s7787_s8 + $0x4a0] sm:$0xf] }
 0x3dc   : > { %v4031_v28 = vpop.f32.mrf.mxu2  ;;  %v4132_v52 = vpop.f32.mrf.mxu0 }
 0x3dd   : > { %v4120_v33 = vpop.f32.mrf.mxu3  ;;  %v4032_v3 = vadd.f32 %v4031_v28, %v3943_v32  ;;  %v4221_v1 = vpop.f32.mrf.mxu1  ;;  %v4133_v43 = vadd.f32 %v4132_v52, %v8143_v10  ;;  %v6888_v32 = vld [vmem:[%s7787_s8 + $0x4dc] sm:$0xf0]  ;;  %v5813_v52 = vor.u32 %v6881_v16, %v5810_v58 }
 0x3de   : > { %v5801_v28 = vor.u32 %v6888_v32, %v5800_v18  ;;  %v6897_v18 = vld [vmem:[%s7787_s8 + $0x52c] sm:$0xf] }
 0x3df   : > { %v8393_v37 = vadd.f32 %v4120_v33, %v4032_v3  ;;  %v4222_v46 = vadd.f32 %v4221_v1, %v4133_v43  ;;  %4171 = vmatmul.bf16.gmra.mxu0 %v5737_v29  ;;  %v5805_v33 = vor.u32 %v6880_v11, %v5802_v34  ;;  %v5809_v3 = vor.u32 %v6889_v19, %v5808_v13  ;;  %v5874_v32 = vld [vmem:[%s7787_s8 + $0x568] sm:$0xf0] }
 0x3e0   : > { %4260 = vmatmul.bf16.gmra.mxu1 %v5741_v35 }
 0x3e1   : > { %4349 = vmatmul.bf16.gmra.mxu2 %v5745_v25 }
 0x3e2   : > { %4438 = vmatmul.bf16.gmra.mxu3 %v5749_v50 }
 0x3e4   : > { %v4310_v17 = vpop.f32.mrf.mxu2  ;;  %v4134_v40 = vpop.f32.mrf.mxu0 }
 0x3e5   : > { %v4399_v10 = vpop.f32.mrf.mxu3  ;;  %v4311_v59 = vadd.f32 %v4310_v17, %v4222_v46  ;;  %v4223_v60 = vpop.f32.mrf.mxu1  ;;  %v4135_v62 = vadd.f32 %v4134_v40, %v8155_v47  ;;  %v6904_v40 = vld [vmem:[%s7787_s8 + $0x55c] sm:$0xf0] }
 0x3e7   : > { %v8399_v5 = vadd.f32 %v4399_v10, %v4311_v59  ;;  %v4224_v55 = vadd.f32 %v4223_v60, %v4135_v62  ;;  %v5864_v59 = vld [vmem:[%s7787_s8 + $0x520] sm:$0xf]  ;;  %v6896_v60 = vld [vmem:[%s7787_s8 + $0x524] sm:$0xf] }
 0x3e8   : > { %v5866_v62 = vld [vmem:[%s7787_s8 + $0x560] sm:$0xf0]  ;;  %v5865_v13 = vor.u32 %v6904_v40, %v5864_v59 }
 0x3e9   : > { %v5869_v19 = vor.u32 %v6896_v60, %v5866_v62  ;;  %v6912_v59 = vld [vmem:[%s7787_s8 + $0x5a4] sm:$0xf]  ;;  %v5936_v60 = vld [vmem:[%s7787_s8 + $0x5a8] sm:$0xf] }
 0x3ea   : > { %v5930_v40 = vld [vmem:[%s7787_s8 + $0x5e0] sm:$0xf0]  ;;  %v6921_v62 = vld [vmem:[%s7787_s8 + $0x5e4] sm:$0xf0] }
 0x3ec   : > { %v4312_v48 = vpop.f32.mrf.mxu2  ;;  %v4137_v35 = vpop.f32.mrf.mxu0 }
 0x3ed   : > { %v4401_v7 = vpop.f32.mrf.mxu3  ;;  %v4313_v29 = vadd.f32 %v4312_v48, %v4224_v55  ;;  %v4226_v47 = vpop.f32.mrf.mxu1  ;;  %v4138_v1 = vadd.f32 %v4137_v35, %v8158_v61  ;;  %v6905_v55 = vld [vmem:[%s7787_s8 + $0x564] sm:$0xf0] }
 0x3ee   : > { %v5873_v48 = vor.u32 %v6905_v55, %v5872_v39  ;;  %v7101_v35 = vld [vmem:[%s7785_s7 + $0x388] sm:$0xff] }
 0x3ef   : > { %v8411_v25 = vadd.f32 %v4401_v7, %v4313_v29  ;;  %v4227_v50 = vadd.f32 %v4226_v47, %v4138_v1  ;;  %4176 = vmatmul.bf16.gmra.mxu0 %v5801_v28  ;;  %v5877_v7 = vor.u32 %v6897_v18, %v5874_v32  ;;  %v7085_v47 = vld [vmem:[%s7785_s7 + $0x308] sm:$0xff]  ;;  %4663 = vmatpush.bf16.msrb.mxu2 %v7101_v35 }
 0x3f0   : > { %4265 = vmatmul.bf16.gmra.mxu1 %v5805_v33  ;;  %4485 = vmatpush.bf16.msrb.mxu0 %v7085_v47  ;;  %v6913_v39 = vld [vmem:[%s7787_s8 + $0x5ac] sm:$0xf] }
 0x3f1   : > { %4354 = vmatmul.bf16.gmra.mxu2 %v5809_v3  ;;  %v7109_v3 = vld [vmem:[%s7785_s7 + $0x3c8] sm:$0xff] }
 0x3f2   : > { %4443 = vmatmul.bf16.gmra.mxu3 %v5813_v52  ;;  %v5938_v55 = vld [vmem:[%s7787_s8 + $0x5e8] sm:$0xf0] }
 0x3f3   : > { %4752 = vmatpush.bf16.msrb.mxu3 %v7109_v3 }
 0x3f4   : > { %v4315_v43 = vpop.f32.mrf.mxu2  ;;  %v4139_v6 = vpop.f32.mrf.mxu0 }
 0x3f5   : > { %v4404_v46 = vpop.f32.mrf.mxu3  ;;  %v4316_v51 = vadd.f32 %v4315_v43, %v4227_v50  ;;  %v4228_v57 = vpop.f32.mrf.mxu1  ;;  %v4140_v61 = vadd.f32 %v4139_v6, %v8169_v36  ;;  %v7093_v6 = vld [vmem:[%s7785_s7 + $0x348] sm:$0xff] }
 0x3f6   : > { %4574 = vmatpush.bf16.msrb.mxu1 %v7093_v6  ;;  %v6000_v6 = vld [vmem:[%s7787_s8 + $0x628] sm:$0xf] }
 0x3f7   : > { %v8414_v17 = vadd.f32 %v4404_v46, %v4316_v51  ;;  %v4229_v10 = vadd.f32 %v4228_v57, %v4140_v61  ;;  %v5928_v61 = vld [vmem:[%s7787_s8 + $0x5a0] sm:$0xf] }
 0x3fc   : > { %v4317_v11 = vpop.f32.mrf.mxu2  ;;  %v4142_v36 = vpop.f32.mrf.mxu0 }
 0x3fd   : > { %v4406_v34 = vpop.f32.mrf.mxu3  ;;  %v4318_v16 = vadd.f32 %v4317_v11, %v4229_v10  ;;  %v4231_v58 = vpop.f32.mrf.mxu1  ;;  %v4143_v28 = vadd.f32 %v4142_v36, %v8175_v56  ;;  %v6920_v10 = vld [vmem:[%s7787_s8 + $0x5dc] sm:$0xf0]  ;;  %v5941_v36 = vor.u32 %v6913_v39, %v5938_v55 }
 0x3fe   : > { %v5929_v11 = vor.u32 %v6920_v10, %v5928_v61  ;;  %v6929_v61 = vld [vmem:[%s7787_s8 + $0x62c] sm:$0xf] }
 0x3ff   : > { %v8425_v33 = vadd.f32 %v4406_v34, %v4318_v16  ;;  %v4232_v29 = vadd.f32 %v4231_v58, %v4143_v28  ;;  %4181 = vmatmul.bf16.gmra.mxu0 %v5865_v13  ;;  %v5933_v34 = vor.u32 %v6912_v59, %v5930_v40  ;;  %v5937_v16 = vor.u32 %v6921_v62, %v5936_v60  ;;  %v6002_v10 = vld [vmem:[%s7787_s8 + $0x668] sm:$0xf0] }
 0x400   : > { %4270 = vmatmul.bf16.gmra.mxu1 %v5869_v19 }
 0x401   : > { %4359 = vmatmul.bf16.gmra.mxu2 %v5873_v48 }
 0x402   : > { %4448 = vmatmul.bf16.gmra.mxu3 %v5877_v7 }
 0x404   : > { %v4320_v52 = vpop.f32.mrf.mxu2  ;;  %v4144_v50 = vpop.f32.mrf.mxu0 }
 0x405   : > { %v4409_v56 = vpop.f32.mrf.mxu3  ;;  %v4321_v1 = vadd.f32 %v4320_v52, %v4232_v29  ;;  %v4233_v43 = vpop.f32.mrf.mxu1  ;;  %v4145_v46 = vadd.f32 %v4144_v50, %v8187_v30  ;;  %v6936_v50 = vld [vmem:[%s7787_s8 + $0x65c] sm:$0xf0] }
 0x407   : > { %v8431_v51 = vadd.f32 %v4409_v56, %v4321_v1  ;;  %v4234_v57 = vadd.f32 %v4233_v43, %v4145_v46  ;;  %v5992_v1 = vld [vmem:[%s7787_s8 + $0x620] sm:$0xf]  ;;  %v6928_v43 = vld [vmem:[%s7787_s8 + $0x624] sm:$0xf] }
 0x408   : > { %v5994_v46 = vld [vmem:[%s7787_s8 + $0x660] sm:$0xf0]  ;;  %v5993_v60 = vor.u32 %v6936_v50, %v5992_v1 }
 0x409   : > { %v5997_v62 = vor.u32 %v6928_v43, %v5994_v46  ;;  %v6944_v1 = vld [vmem:[%s7787_s8 + $0x6a4] sm:$0xf]  ;;  %v6064_v43 = vld [vmem:[%s7787_s8 + $0x6a8] sm:$0xf] }
 0x40a   : > { %v6058_v50 = vld [vmem:[%s7787_s8 + $0x6e0] sm:$0xf0]  ;;  %v6953_v46 = vld [vmem:[%s7787_s8 + $0x6e4] sm:$0xf0] }
 0x40c   : > { %v4322_v18 = vpop.f32.mrf.mxu2  ;;  %v4147_v19 = vpop.f32.mrf.mxu0 }
 0x40d   : > { %v4411_v32 = vpop.f32.mrf.mxu3  ;;  %v4323_v13 = vadd.f32 %v4322_v18, %v4234_v57  ;;  %v4236_v30 = vpop.f32.mrf.mxu1  ;;  %v4148_v58 = vadd.f32 %v4147_v19, %v8190_v44  ;;  %v6937_v57 = vld [vmem:[%s7787_s8 + $0x664] sm:$0xf0]  ;;  %v7100_v19 = vld [vmem:[%s7785_s7 + $0x380] sm:$0xff] }
 0x40e   : > { %v6001_v18 = vor.u32 %v6937_v57, %v6000_v6  ;;  %4664 = vmatpush.bf16.msrb.mxu2 %v7100_v19  ;;  %v6945_v6 = vld [vmem:[%s7787_s8 + $0x6ac] sm:$0xf] }
 0x40f   : > { %v8443_v48 = vadd.f32 %v4411_v32, %v4323_v13  ;;  %v4237_v7 = vadd.f32 %v4236_v30, %v4148_v58  ;;  %4186 = vmatmul.bf16.gmra.mxu0 %v5929_v11  ;;  %v6005_v32 = vor.u32 %v6929_v61, %v6002_v10  ;;  %v7084_v30 = vld [vmem:[%s7785_s7 + $0x300] sm:$0xff]  ;;  %v6066_v57 = vld [vmem:[%s7787_s8 + $0x6e8] sm:$0xf0] }
 0x410   : > { %4275 = vmatmul.bf16.gmra.mxu1 %v5933_v34  ;;  %4486 = vmatpush.bf16.msrb.mxu0 %v7084_v30 }
 0x411   : > { %4364 = vmatmul.bf16.gmra.mxu2 %v5937_v16  ;;  %v7108_v16 = vld [vmem:[%s7785_s7 + $0x3c0] sm:$0xff] }
 0x412   : > { %4453 = vmatmul.bf16.gmra.mxu3 %v5941_v36 }
 0x413   : > { %4753 = vmatpush.bf16.msrb.mxu3 %v7108_v16 }
 0x414   : > { %v4325_v28 = vpop.f32.mrf.mxu2  ;;  %v4149_v47 = vpop.f32.mrf.mxu0 }
 0x415   : > { %v4414_v29 = vpop.f32.mrf.mxu3  ;;  %v4326_v35 = vadd.f32 %v4325_v28, %v4237_v7  ;;  %v4238_v3 = vpop.f32.mrf.mxu1  ;;  %v4150_v44 = vadd.f32 %v4149_v47, %v8201_v20  ;;  %v7092_v47 = vld [vmem:[%s7785_s7 + $0x340] sm:$0xff] }
 0x416   : > { %4575 = vmatpush.bf16.msrb.mxu1 %v7092_v47  ;;  %v6128_v47 = vld [vmem:[%s7787_s8 + $0x728] sm:$0xf] }
 0x417   : > { %v8446_v52 = vadd.f32 %v4414_v29, %v4326_v35  ;;  %v4239_v56 = vadd.f32 %v4238_v3, %v4150_v44  ;;  %v6056_v44 = vld [vmem:[%s7787_s8 + $0x6a0] sm:$0xf] }
 0x41c   : > { %v4327_v59 = vpop.f32.mrf.mxu2  ;;  %v4152_v20 = vpop.f32.mrf.mxu0 }
 0x41d   : > { %v4416_v40 = vpop.f32.mrf.mxu3  ;;  %v4328_v39 = vadd.f32 %v4327_v59, %v4239_v56  ;;  %v4241_v55 = vpop.f32.mrf.mxu1  ;;  %v4153_v11 = vadd.f32 %v4152_v20, %v8207_v42  ;;  %v6952_v56 = vld [vmem:[%s7787_s8 + $0x6dc] sm:$0xf0]  ;;  %v6069_v20 = vor.u32 %v6945_v6, %v6066_v57 }
 0x41e   : > { %v6057_v59 = vor.u32 %v6952_v56, %v6056_v44  ;;  %v6961_v44 = vld [vmem:[%s7787_s8 + $0x72c] sm:$0xf] }
 0x41f   : > { %v8457_v34 = vadd.f32 %v4416_v40, %v4328_v39  ;;  %v4242_v13 = vadd.f32 %v4241_v55, %v4153_v11  ;;  %4191 = vmatmul.bf16.gmra.mxu0 %v5993_v60  ;;  %v6061_v40 = vor.u32 %v6944_v1, %v6058_v50  ;;  %v6065_v39 = vor.u32 %v6953_v46, %v6064_v43  ;;  %v6130_v56 = vld [vmem:[%s7787_s8 + $0x768] sm:$0xf0] }
 0x420   : > { %4280 = vmatmul.bf16.gmra.mxu1 %v5997_v62 }
 0x421   : > { %4369 = vmatmul.bf16.gmra.mxu2 %v6001_v18 }
 0x422   : > { %4458 = vmatmul.bf16.gmra.mxu3 %v6005_v32 }
 0x424   : > { %v4330_v36 = vpop.f32.mrf.mxu2  ;;  %v4154_v7 = vpop.f32.mrf.mxu0 }
 0x425   : > { %v4419_v42 = vpop.f32.mrf.mxu3  ;;  %v4331_v58 = vadd.f32 %v4330_v36, %v4242_v13  ;;  %v4243_v28 = vpop.f32.mrf.mxu1  ;;  %v4155_v29 = vadd.f32 %v4154_v7, %v8219_v14  ;;  %v6968_v7 = vld [vmem:[%s7787_s8 + $0x75c] sm:$0xf0] }
 0x427   : > { %v8463_v35 = vadd.f32 %v4419_v42, %v4331_v58  ;;  %v4244_v3 = vadd.f32 %v4243_v28, %v4155_v29  ;;  %v6120_v58 = vld [vmem:[%s7787_s8 + $0x720] sm:$0xf]  ;;  %v6960_v28 = vld [vmem:[%s7787_s8 + $0x724] sm:$0xf] }
 0x428   : > { %v6122_v29 = vld [vmem:[%s7787_s8 + $0x760] sm:$0xf0]  ;;  %v6121_v43 = vor.u32 %v6968_v7, %v6120_v58  ;;  %v6977_v58 = vld [vmem:[%s7787_s8 + $0x7ac] sm:$0xf] }
 0x429   : > { %v6125_v46 = vor.u32 %v6960_v28, %v6122_v29  ;;  %v6194_v7 = vld [vmem:[%s7787_s8 + $0x7e8] sm:$0xf0] }
 0x42c   : > { %v4332_v61 = vpop.f32.mrf.mxu2  ;;  %v4157_v62 = vpop.f32.mrf.mxu0 }
 0x42d   : > { %v4421_v10 = vpop.f32.mrf.mxu3  ;;  %v4333_v60 = vadd.f32 %v4332_v61, %v4244_v3  ;;  %v4246_v14 = vpop.f32.mrf.mxu1  ;;  %v4158_v55 = vadd.f32 %v4157_v62, %v8222_v27  ;;  %v6969_v3 = vld [vmem:[%s7787_s8 + $0x764] sm:$0xf0] }
 0x42f   : > { %v8475_v18 = vadd.f32 %v4421_v10, %v4333_v60  ;;  %v4247_v32 = vadd.f32 %v4246_v14, %v4158_v55  ;;  %4196 = vmatmul.bf16.gmra.mxu0 %v6057_v59  ;;  %v6129_v10 = vor.u32 %v6969_v3, %v6128_v47 }
 0x430   : > { %4285 = vmatmul.bf16.gmra.mxu1 %v6061_v40 }
 0x431   : > { %4374 = vmatmul.bf16.gmra.mxu2 %v6065_v39 }
 0x432   : > { %4463 = vmatmul.bf16.gmra.mxu3 %v6069_v20 }
 0x434   : > { %v4335_v11 = vpop.f32.mrf.mxu2  ;;  %v4159_v30 = vpop.f32.mrf.mxu0 }
 0x435   : > { %v4424_v13 = vpop.f32.mrf.mxu3  ;;  %v4336_v19 = vadd.f32 %v4335_v11, %v4247_v32  ;;  %v4248_v16 = vpop.f32.mrf.mxu1  ;;  %v4160_v27 = vadd.f32 %v4159_v30, %v8233_v0  ;;  %v6133_v0 = vor.u32 %v6961_v44, %v6130_v56  ;;  %v6976_v30 = vld [vmem:[%s7787_s8 + $0x7a4] sm:$0xf] }
 0x437   : > { %v8478_v36 = vadd.f32 %v4424_v13, %v4336_v19  ;;  %v4249_v42 = vadd.f32 %v4248_v16, %v4160_v27  ;;  %v6184_v13 = vld [vmem:[%s7787_s8 + $0x7a0] sm:$0xf]  ;;  %v6186_v16 = vld [vmem:[%s7787_s8 + $0x7e0] sm:$0xf0]  ;;  %v6192_v27 = vld [vmem:[%s7787_s8 + $0x7a8] sm:$0xf] }
 0x438   : > { %v6984_v19 = vld [vmem:[%s7787_s8 + $0x7dc] sm:$0xf0]  ;;  %v6189_v3 = vor.u32 %v6976_v30, %v6186_v16 }
 0x439   : > { %v6185_v47 = vor.u32 %v6984_v19, %v6184_v13  ;;  %v6739_v13 = vld [vmem:[%s7787_s8 + $0x3c] sm:$0xf] }
 0x43a   : > { %v5250_v19 = vld [vmem:[%s7787_s8 + $0x78] sm:$0xf0] }
 0x43c   : > { %v4337_v1 = vpop.f32.mrf.mxu2  ;;  %v4162_v57 = vpop.f32.mrf.mxu0 }
 0x43d   : > { %v4426_v50 = vpop.f32.mrf.mxu3  ;;  %v4338_v6 = vadd.f32 %v4337_v1, %v4249_v42  ;;  %v4251_v61 = vpop.f32.mrf.mxu1  ;;  %v4163_v59 = vadd.f32 %v4162_v57, %v8239_v24  ;;  %v6985_v42 = vld [vmem:[%s7787_s8 + $0x7e4] sm:$0xf0] }
 0x43f   : > { %v8489_v40 = vadd.f32 %v4426_v50, %v4338_v6  ;;  %v4252_v60 = vadd.f32 %v4251_v61, %v4163_v59  ;;  %4201 = vmatmul.bf16.gmra.mxu0 %v6121_v43  ;;  %v6193_v50 = vor.u32 %v6985_v42, %v6192_v27 }
 0x440   : > { %4290 = vmatmul.bf16.gmra.mxu1 %v6125_v46 }
 0x441   : > { %4379 = vmatmul.bf16.gmra.mxu2 %v6129_v10 }
 0x442   : > { %4468 = vmatmul.bf16.gmra.mxu3 %v6133_v0 }
 0x444   : > { %v4340_v62 = vpop.f32.mrf.mxu2  ;;  %v4164_v20 = vpop.f32.mrf.mxu0 }
 0x445   : > { %v4429_v14 = vpop.f32.mrf.mxu3  ;;  %v4341_v39 = vadd.f32 %v4340_v62, %v4252_v60  ;;  %v4253_v55 = vpop.f32.mrf.mxu1  ;;  %v4165_v24 = vadd.f32 %v4164_v20, %v8251_v8  ;;  %v6197_v8 = vor.u32 %v6977_v58, %v6194_v7  ;;  %v6738_v20 = vld [vmem:[%s7787_s8 + $0x34] sm:$0xf] }
 0x447   : > { %v8492_v32 = vadd.f32 %v4429_v14, %v4341_v39  ;;  %v4254_v11 = vadd.f32 %v4253_v55, %v4165_v24  ;;  %v5240_v14 = vld [vmem:[%s7787_s8 + $0x30] sm:$0xf]  ;;  %v5242_v55 = vld [vmem:[%s7787_s8 + $0x70] sm:$0xf0]  ;;  %v5248_v24 = vld [vmem:[%s7787_s8 + $0x38] sm:$0xf] }
 0x448   : > { %v6746_v39 = vld [vmem:[%s7787_s8 + $0x6c] sm:$0xf0]  ;;  %v5245_v42 = vor.u32 %v6738_v20, %v5242_v55 }
 0x449   : > { %v5241_v27 = vor.u32 %v6746_v39, %v5240_v14  ;;  %v6755_v14 = vld [vmem:[%s7787_s8 + $0xbc] sm:$0xf] }
 0x44a   : > { %v5314_v39 = vld [vmem:[%s7787_s8 + $0xf8] sm:$0xf0] }
 0x44c   : > { %v4342_v28 = vpop.f32.mrf.mxu2  ;;  %v4167_v56 = vpop.f32.mrf.mxu0 }
 0x44d   : > { %v4431_v29 = vpop.f32.mrf.mxu3  ;;  %v4343_v44 = vadd.f32 %v4342_v28, %v4254_v11  ;;  %v4256_v1 = vpop.f32.mrf.mxu1  ;;  %v4168_v43 = vadd.f32 %v4167_v56, %v8254_v22  ;;  %v6747_v11 = vld [vmem:[%s7787_s8 + $0x74] sm:$0xf0] }
 0x44f   : > { %v8503_v46 = vadd.f32 %v4431_v29, %v4343_v44  ;;  %v4257_v6 = vadd.f32 %v4256_v1, %v4168_v43  ;;  %4206 = vmatmul.bf16.gmra.mxu0 %v6185_v47  ;;  %v5249_v29 = vor.u32 %v6747_v11, %v5248_v24 }
 0x450   : > { %4295 = vmatmul.bf16.gmra.mxu1 %v6189_v3 }
 0x451   : > { %4384 = vmatmul.bf16.gmra.mxu2 %v6193_v50 }
 0x452   : > { %4473 = vmatmul.bf16.gmra.mxu3 %v6197_v8 }
 0x454   : > { %v4345_v57 = vpop.f32.mrf.mxu2  ;;  %v4169_v0 = vpop.f32.mrf.mxu0 }
 0x455   : > { %v4434_v61 = vpop.f32.mrf.mxu3  ;;  %v4346_v10 = vadd.f32 %v4345_v57, %v4257_v6  ;;  %v4258_v59 = vpop.f32.mrf.mxu1  ;;  %v4170_v22 = vadd.f32 %v4169_v0, %v8265_v49  ;;  %v5253_v49 = vor.u32 %v6739_v13, %v5250_v19  ;;  %v6754_v0 = vld [vmem:[%s7787_s8 + $0xb4] sm:$0xf] }
 0x457   : > { %v8506_v60 = vadd.f32 %v4434_v61, %v4346_v10  ;;  %v4259_v62 = vadd.f32 %v4258_v59, %v4170_v22  ;;  %v5304_v61 = vld [vmem:[%s7787_s8 + $0xb0] sm:$0xf]  ;;  %v5306_v59 = vld [vmem:[%s7787_s8 + $0xf0] sm:$0xf0]  ;;  %v5312_v22 = vld [vmem:[%s7787_s8 + $0xb8] sm:$0xf] }
 0x458   : > { %v6762_v10 = vld [vmem:[%s7787_s8 + $0xec] sm:$0xf0]  ;;  %v5309_v11 = vor.u32 %v6754_v0, %v5306_v59 }
 0x459   : > { %v5305_v24 = vor.u32 %v6762_v10, %v5304_v61  ;;  %v6771_v61 = vld [vmem:[%s7787_s8 + $0x13c] sm:$0xf] }
 0x45a   : > { %v5378_v10 = vld [vmem:[%s7787_s8 + $0x178] sm:$0xf0] }
 0x45c   : > { %v4347_v30 = vpop.f32.mrf.mxu2  ;;  %v4172_v7 = vpop.f32.mrf.mxu0 }
 0x45d   : > { %v4436_v16 = vpop.f32.mrf.mxu3  ;;  %v4348_v58 = vadd.f32 %v4347_v30, %v4259_v62  ;;  %v4261_v28 = vpop.f32.mrf.mxu1  ;;  %v4173_v47 = vadd.f32 %v4172_v7, %v8271_v9  ;;  %v6763_v62 = vld [vmem:[%s7787_s8 + $0xf4] sm:$0xf0] }
 0x45f   : > { %v8517_v3 = vadd.f32 %v4436_v16, %v4348_v58  ;;  %v4262_v44 = vadd.f32 %v4261_v28, %v4173_v47  ;;  %4487 = vmatmul.bf16.vlgmr.msrb.gmra.mxu0 %v5241_v27  ;;  %v5313_v16 = vor.u32 %v6763_v62, %v5312_v22 }
 0x460   : > { %4576 = vmatmul.bf16.vlgmr.msrb.gmra.mxu1 %v5245_v42 }
 0x461   : > { %4665 = vmatmul.bf16.vlgmr.msrb.gmra.mxu2 %v5249_v29 }
 0x462   : > { %4754 = vmatmul.bf16.vlgmr.msrb.gmra.mxu3 %v5253_v49 }
 0x464   : > { %v4350_v56 = vpop.f32.mrf.mxu2  ;;  %v4174_v8 = vpop.f32.mrf.mxu0 }
 0x465   : > { %v4439_v1 = vpop.f32.mrf.mxu3  ;;  %v4351_v50 = vadd.f32 %v4350_v56, %v4262_v44  ;;  %v4263_v43 = vpop.f32.mrf.mxu1  ;;  %v4175_v9 = vadd.f32 %v4174_v8, %v8283_v2  ;;  %v5317_v2 = vor.u32 %v6755_v14, %v5314_v39  ;;  %v6770_v8 = vld [vmem:[%s7787_s8 + $0x134] sm:$0xf] }
 0x467   : > { %v8520_v6 = vadd.f32 %v4439_v1, %v4351_v50  ;;  %v4264_v57 = vadd.f32 %v4263_v43, %v4175_v9  ;;  %v5368_v1 = vld [vmem:[%s7787_s8 + $0x130] sm:$0xf]  ;;  %v5370_v43 = vld [vmem:[%s7787_s8 + $0x170] sm:$0xf0]  ;;  %v5376_v9 = vld [vmem:[%s7787_s8 + $0x138] sm:$0xf] }
 0x468   : > { %v6778_v50 = vld [vmem:[%s7787_s8 + $0x16c] sm:$0xf0]  ;;  %v5373_v62 = vor.u32 %v6770_v8, %v5370_v43 }
 0x469   : > { %v5369_v22 = vor.u32 %v6778_v50, %v5368_v1  ;;  %v6787_v1 = vld [vmem:[%s7787_s8 + $0x1bc] sm:$0xf] }
 0x46a   : > { %v5442_v50 = vld [vmem:[%s7787_s8 + $0x1f8] sm:$0xf0] }
 0x46c   : > { %v4352_v20 = vpop.f32.mrf.mxu2  ;;  %v4177_v19 = vpop.f32.mrf.mxu0 }
 0x46d   : > { %v4441_v55 = vpop.f32.mrf.mxu3  ;;  %v4353_v13 = vadd.f32 %v4352_v20, %v4264_v57  ;;  %v4266_v30 = vpop.f32.mrf.mxu1  ;;  %v4178_v27 = vadd.f32 %v4177_v19, %v8286_v21  ;;  %v6779_v57 = vld [vmem:[%s7787_s8 + $0x174] sm:$0xf0] }
 0x46f   : > { %v8531_v42 = vadd.f32 %v4441_v55, %v4353_v13  ;;  %v4267_v58 = vadd.f32 %v4266_v30, %v4178_v27  ;;  %4492 = vmatmul.bf16.gmra.mxu0 %v5305_v24  ;;  %v5377_v55 = vor.u32 %v6779_v57, %v5376_v9 }
 0x470   : > { %4581 = vmatmul.bf16.gmra.mxu1 %v5309_v11 }
 0x471   : > { %4670 = vmatmul.bf16.gmra.mxu2 %v5313_v16 }
 0x472   : > { %4759 = vmatmul.bf16.gmra.mxu3 %v5317_v2 }
 0x474   : > { %v4355_v7 = vpop.f32.mrf.mxu2  ;;  %v4179_v49 = vpop.f32.mrf.mxu0 }
 0x475   : > { %v4444_v28 = vpop.f32.mrf.mxu3  ;;  %v4356_v29 = vadd.f32 %v4355_v7, %v4267_v58  ;;  %v4268_v47 = vpop.f32.mrf.mxu1  ;;  %v4180_v21 = vadd.f32 %v4179_v49, %v8297_v31  ;;  %v5381_v31 = vor.u32 %v6771_v61, %v5378_v10  ;;  %v6786_v49 = vld [vmem:[%s7787_s8 + $0x1b4] sm:$0xf] }
 0x477   : > { %v8534_v44 = vadd.f32 %v4444_v28, %v4356_v29  ;;  %v4269_v56 = vadd.f32 %v4268_v47, %v4180_v21  ;;  %v5432_v28 = vld [vmem:[%s7787_s8 + $0x1b0] sm:$0xf]  ;;  %v5434_v47 = vld [vmem:[%s7787_s8 + $0x1f0] sm:$0xf0]  ;;  %v5440_v21 = vld [vmem:[%s7787_s8 + $0x1b8] sm:$0xf] }
 0x478   : > { %v6794_v29 = vld [vmem:[%s7787_s8 + $0x1ec] sm:$0xf0]  ;;  %v5437_v57 = vor.u32 %v6786_v49, %v5434_v47 }
 0x479   : > { %v5433_v9 = vor.u32 %v6794_v29, %v5432_v28  ;;  %v6803_v28 = vld [vmem:[%s7787_s8 + $0x23c] sm:$0xf] }
 0x47a   : > { %v5506_v29 = vld [vmem:[%s7787_s8 + $0x278] sm:$0xf0] }
 0x47c   : > { %v4357_v0 = vpop.f32.mrf.mxu2  ;;  %v4182_v39 = vpop.f32.mrf.mxu0 }
 0x47d   : > { %v4446_v59 = vpop.f32.mrf.mxu3  ;;  %v4358_v14 = vadd.f32 %v4357_v0, %v4269_v56  ;;  %v4271_v20 = vpop.f32.mrf.mxu1  ;;  %v4183_v24 = vadd.f32 %v4182_v39, %v8303_v54  ;;  %v6795_v56 = vld [vmem:[%s7787_s8 + $0x1f4] sm:$0xf0] }
 0x47f   : > { %v8545_v11 = vadd.f32 %v4446_v59, %v4358_v14  ;;  %v4272_v13 = vadd.f32 %v4271_v20, %v4183_v24  ;;  %4497 = vmatmul.bf16.gmra.mxu0 %v5369_v22  ;;  %v5441_v59 = vor.u32 %v6795_v56, %v5440_v21 }
 0x480   : > { %4586 = vmatmul.bf16.gmra.mxu1 %v5373_v62 }
 0x481   : > { %4675 = vmatmul.bf16.gmra.mxu2 %v5377_v55 }
 0x482   : > { %4764 = vmatmul.bf16.gmra.mxu3 %v5381_v31 }
 0x484   : > { %v4360_v19 = vpop.f32.mrf.mxu2  ;;  %v4184_v2 = vpop.f32.mrf.mxu0 }
 0x485   : > { %v4449_v30 = vpop.f32.mrf.mxu3  ;;  %v4361_v16 = vadd.f32 %v4360_v19, %v4272_v13  ;;  %v4273_v27 = vpop.f32.mrf.mxu1  ;;  %v4185_v54 = vadd.f32 %v4184_v2, %v8315_v63  ;;  %v5445_v63 = vor.u32 %v6787_v1, %v5442_v50  ;;  %v6802_v2 = vld [vmem:[%s7787_s8 + $0x234] sm:$0xf] }
 0x487   : > { %v8548_v58 = vadd.f32 %v4449_v30, %v4361_v16  ;;  %v4274_v7 = vadd.f32 %v4273_v27, %v4185_v54  ;;  %v5496_v30 = vld [vmem:[%s7787_s8 + $0x230] sm:$0xf]  ;;  %v5498_v27 = vld [vmem:[%s7787_s8 + $0x270] sm:$0xf0]  ;;  %v5504_v54 = vld [vmem:[%s7787_s8 + $0x238] sm:$0xf] }
 0x488   : > { %v6810_v16 = vld [vmem:[%s7787_s8 + $0x26c] sm:$0xf0]  ;;  %v5501_v56 = vor.u32 %v6802_v2, %v5498_v27 }
 0x489   : > { %v5497_v21 = vor.u32 %v6810_v16, %v5496_v30  ;;  %v6819_v30 = vld [vmem:[%s7787_s8 + $0x2bc] sm:$0xf] }
 0x48a   : > { %v5570_v16 = vld [vmem:[%s7787_s8 + $0x2f8] sm:$0xf0] }
 0x48c   : > { %v4362_v8 = vpop.f32.mrf.mxu2  ;;  %v4187_v10 = vpop.f32.mrf.mxu0 }
 0x48d   : > { %v4451_v43 = vpop.f32.mrf.mxu3  ;;  %v4363_v61 = vadd.f32 %v4362_v8, %v4274_v7  ;;  %v4276_v0 = vpop.f32.mrf.mxu1  ;;  %v4188_v22 = vadd.f32 %v4187_v10, %v8318_v26  ;;  %v6811_v7 = vld [vmem:[%s7787_s8 + $0x274] sm:$0xf0] }
 0x48f   : > { %v8559_v62 = vadd.f32 %v4451_v43, %v4363_v61  ;;  %v4277_v14 = vadd.f32 %v4276_v0, %v4188_v22  ;;  %4502 = vmatmul.bf16.gmra.mxu0 %v5433_v9  ;;  %v5505_v43 = vor.u32 %v6811_v7, %v5504_v54 }
 0x490   : > { %4591 = vmatmul.bf16.gmra.mxu1 %v5437_v57 }
 0x491   : > { %4680 = vmatmul.bf16.gmra.mxu2 %v5441_v59 }
 0x492   : > { %4769 = vmatmul.bf16.gmra.mxu3 %v5445_v63 }
 0x494   : > { %v4365_v39 = vpop.f32.mrf.mxu2  ;;  %v4189_v31 = vpop.f32.mrf.mxu0 }
 0x495   : > { %v4454_v20 = vpop.f32.mrf.mxu3  ;;  %v4366_v55 = vadd.f32 %v4365_v39, %v4277_v14  ;;  %v4278_v24 = vpop.f32.mrf.mxu1  ;;  %v4190_v26 = vadd.f32 %v4189_v31, %v8329_v15  ;;  %v5509_v15 = vor.u32 %v6803_v28, %v5506_v29  ;;  %v6818_v31 = vld [vmem:[%s7787_s8 + $0x2b4] sm:$0xf] }
 0x497   : > { %v8562_v13 = vadd.f32 %v4454_v20, %v4366_v55  ;;  %v4279_v19 = vadd.f32 %v4278_v24, %v4190_v26  ;;  %v5560_v20 = vld [vmem:[%s7787_s8 + $0x2b0] sm:$0xf]  ;;  %v5562_v24 = vld [vmem:[%s7787_s8 + $0x2f0] sm:$0xf0]  ;;  %v5568_v26 = vld [vmem:[%s7787_s8 + $0x2b8] sm:$0xf] }
 0x498   : > { %v6826_v55 = vld [vmem:[%s7787_s8 + $0x2ec] sm:$0xf0]  ;;  %v5565_v7 = vor.u32 %v6818_v31, %v5562_v24 }
 0x499   : > { %v5561_v54 = vor.u32 %v6826_v55, %v5560_v20  ;;  %v6835_v20 = vld [vmem:[%s7787_s8 + $0x33c] sm:$0xf] }
 0x49a   : > { %v5634_v55 = vld [vmem:[%s7787_s8 + $0x378] sm:$0xf0] }
 0x49c   : > { %v4367_v49 = vpop.f32.mrf.mxu2  ;;  %v4192_v50 = vpop.f32.mrf.mxu0 }
 0x49d   : > { %v4456_v47 = vpop.f32.mrf.mxu3  ;;  %v4368_v1 = vadd.f32 %v4367_v49, %v4279_v19  ;;  %v4281_v8 = vpop.f32.mrf.mxu1  ;;  %v4193_v9 = vadd.f32 %v4192_v50, %v8335_v41  ;;  %v6827_v19 = vld [vmem:[%s7787_s8 + $0x2f4] sm:$0xf0] }
 0x49f   : > { %v8573_v57 = vadd.f32 %v4456_v47, %v4368_v1  ;;  %v4282_v61 = vadd.f32 %v4281_v8, %v4193_v9  ;;  %4507 = vmatmul.bf16.gmra.mxu0 %v5497_v21  ;;  %v5569_v47 = vor.u32 %v6827_v19, %v5568_v26 }
 0x4a0   : > { %4596 = vmatmul.bf16.gmra.mxu1 %v5501_v56 }
 0x4a1   : > { %4685 = vmatmul.bf16.gmra.mxu2 %v5505_v43 }
 0x4a2   : > { %4774 = vmatmul.bf16.gmra.mxu3 %v5509_v15 }
 0x4a4   : > { %v4370_v10 = vpop.f32.mrf.mxu2  ;;  %v4194_v63 = vpop.f32.mrf.mxu0 }
 0x4a5   : > { %v4459_v0 = vpop.f32.mrf.mxu3  ;;  %v4371_v59 = vadd.f32 %v4370_v10, %v4282_v61  ;;  %v4283_v22 = vpop.f32.mrf.mxu1  ;;  %v4195_v41 = vadd.f32 %v4194_v63, %v8347_v4  ;;  %v5573_v4 = vor.u32 %v6819_v30, %v5570_v16  ;;  %v6834_v63 = vld [vmem:[%s7787_s8 + $0x334] sm:$0xf] }
 0x4a7   : > { %v8576_v14 = vadd.f32 %v4459_v0, %v4371_v59  ;;  %v4284_v39 = vadd.f32 %v4283_v22, %v4195_v41  ;;  %v5624_v0 = vld [vmem:[%s7787_s8 + $0x330] sm:$0xf]  ;;  %v5626_v22 = vld [vmem:[%s7787_s8 + $0x370] sm:$0xf0]  ;;  %v5632_v41 = vld [vmem:[%s7787_s8 + $0x338] sm:$0xf] }
 0x4a8   : > { %v6842_v59 = vld [vmem:[%s7787_s8 + $0x36c] sm:$0xf0]  ;;  %v5629_v19 = vor.u32 %v6834_v63, %v5626_v22 }
 0x4a9   : > { %v5625_v26 = vor.u32 %v6842_v59, %v5624_v0  ;;  %v6851_v0 = vld [vmem:[%s7787_s8 + $0x3bc] sm:$0xf] }
 0x4aa   : > { %v5698_v59 = vld [vmem:[%s7787_s8 + $0x3f8] sm:$0xf0] }
 0x4ac   : > { %v4372_v2 = vpop.f32.mrf.mxu2  ;;  %v4197_v29 = vpop.f32.mrf.mxu0 }
 0x4ad   : > { %v4461_v27 = vpop.f32.mrf.mxu3  ;;  %v4373_v28 = vadd.f32 %v4372_v2, %v4284_v39  ;;  %v4286_v49 = vpop.f32.mrf.mxu1  ;;  %v4198_v21 = vadd.f32 %v4197_v29, %v8350_v38  ;;  %v6843_v39 = vld [vmem:[%s7787_s8 + $0x374] sm:$0xf0] }
 0x4af   : > { %v8587_v56 = vadd.f32 %v4461_v27, %v4373_v28  ;;  %v4287_v1 = vadd.f32 %v4286_v49, %v4198_v21  ;;  %4512 = vmatmul.bf16.gmra.mxu0 %v5561_v54  ;;  %v5633_v27 = vor.u32 %v6843_v39, %v5632_v41 }
 0x4b0   : > { %4601 = vmatmul.bf16.gmra.mxu1 %v5565_v7 }
 0x4b1   : > { %4690 = vmatmul.bf16.gmra.mxu2 %v5569_v47 }
 0x4b2   : > { %4779 = vmatmul.bf16.gmra.mxu3 %v5573_v4 }
 0x4b4   : > { %v4375_v50 = vpop.f32.mrf.mxu2  ;;  %v4199_v15 = vpop.f32.mrf.mxu0 }
 0x4b5   : > { %v4464_v8 = vpop.f32.mrf.mxu3  ;;  %v4376_v43 = vadd.f32 %v4375_v50, %v4287_v1  ;;  %v4288_v9 = vpop.f32.mrf.mxu1  ;;  %v4200_v38 = vadd.f32 %v4199_v15, %v8361_v45  ;;  %v5637_v45 = vor.u32 %v6835_v20, %v5634_v55  ;;  %v6850_v15 = vld [vmem:[%s7787_s8 + $0x3b4] sm:$0xf] }
 0x4b7   : > { %v8590_v61 = vadd.f32 %v4464_v8, %v4376_v43  ;;  %v4289_v10 = vadd.f32 %v4288_v9, %v4200_v38  ;;  %v5688_v8 = vld [vmem:[%s7787_s8 + $0x3b0] sm:$0xf]  ;;  %v5690_v9 = vld [vmem:[%s7787_s8 + $0x3f0] sm:$0xf0]  ;;  %v5696_v38 = vld [vmem:[%s7787_s8 + $0x3b8] sm:$0xf] }
 0x4b8   : > { %v6858_v43 = vld [vmem:[%s7787_s8 + $0x3ec] sm:$0xf0]  ;;  %v5693_v39 = vor.u32 %v6850_v15, %v5690_v9 }
 0x4b9   : > { %v5689_v41 = vor.u32 %v6858_v43, %v5688_v8  ;;  %v6867_v8 = vld [vmem:[%s7787_s8 + $0x43c] sm:$0xf] }
 0x4ba   : > { %v5762_v43 = vld [vmem:[%s7787_s8 + $0x478] sm:$0xf0] }
 0x4bc   : > { %v4377_v31 = vpop.f32.mrf.mxu2  ;;  %v4202_v16 = vpop.f32.mrf.mxu0 }
 0x4bd   : > { %v4466_v24 = vpop.f32.mrf.mxu3  ;;  %v4378_v30 = vadd.f32 %v4377_v31, %v4289_v10  ;;  %v4291_v2 = vpop.f32.mrf.mxu1  ;;  %v4203_v54 = vadd.f32 %v4202_v16, %v8367_v23  ;;  %v6859_v10 = vld [vmem:[%s7787_s8 + $0x3f4] sm:$0xf0] }
 0x4bf   : > { %v8601_v7 = vadd.f32 %v4466_v24, %v4378_v30  ;;  %v4292_v28 = vadd.f32 %v4291_v2, %v4203_v54  ;;  %4517 = vmatmul.bf16.gmra.mxu0 %v5625_v26  ;;  %v5697_v24 = vor.u32 %v6859_v10, %v5696_v38 }
 0x4c0   : > { %4606 = vmatmul.bf16.gmra.mxu1 %v5629_v19 }
 0x4c1   : > { %4695 = vmatmul.bf16.gmra.mxu2 %v5633_v27 }
 0x4c2   : > { %4784 = vmatmul.bf16.gmra.mxu3 %v5637_v45 }
 0x4c4   : > { %v4380_v29 = vpop.f32.mrf.mxu2  ;;  %v4204_v4 = vpop.f32.mrf.mxu0 }
 0x4c5   : > { %v4469_v49 = vpop.f32.mrf.mxu3  ;;  %v4381_v47 = vadd.f32 %v4380_v29, %v4292_v28  ;;  %v4293_v21 = vpop.f32.mrf.mxu1  ;;  %v4205_v23 = vadd.f32 %v4204_v4, %v8379_v12  ;;  %v5701_v12 = vor.u32 %v6851_v0, %v5698_v59  ;;  %v6866_v4 = vld [vmem:[%s7787_s8 + $0x434] sm:$0xf] }
 0x4c7   : > { %v8604_v1 = vadd.f32 %v4469_v49, %v4381_v47  ;;  %v4294_v50 = vadd.f32 %v4293_v21, %v4205_v23  ;;  %v5752_v49 = vld [vmem:[%s7787_s8 + $0x430] sm:$0xf]  ;;  %v5754_v21 = vld [vmem:[%s7787_s8 + $0x470] sm:$0xf0]  ;;  %v5760_v23 = vld [vmem:[%s7787_s8 + $0x438] sm:$0xf] }
 0x4c8   : > { %v6874_v47 = vld [vmem:[%s7787_s8 + $0x46c] sm:$0xf0]  ;;  %v5757_v10 = vor.u32 %v6866_v4, %v5754_v21  ;;  %v5826_v4 = vld [vmem:[%s7787_s8 + $0x4f8] sm:$0xf0] }
 0x4c9   : > { %v5753_v38 = vor.u32 %v6874_v47, %v5752_v49  ;;  %v6891_v49 = vld [vmem:[%s7787_s8 + $0x4f4] sm:$0xf0]  ;;  %v6883_v47 = vld [vmem:[%s7787_s8 + $0x4bc] sm:$0xf] }
 0x4cc   : > { %v4382_v63 = vpop.f32.mrf.mxu2  ;;  %v4207_v55 = vpop.f32.mrf.mxu0 }
 0x4cd   : > { %v4471_v22 = vpop.f32.mrf.mxu3  ;;  %v4383_v20 = vadd.f32 %v4382_v63, %v4294_v50  ;;  %v4296_v31 = vpop.f32.mrf.mxu1  ;;  %v4208_v26 = vadd.f32 %v4207_v55, %v8382_v53  ;;  %v6875_v50 = vld [vmem:[%s7787_s8 + $0x474] sm:$0xf0] }
 0x4cf   : > { %v8615_v19 = vadd.f32 %v4471_v22, %v4383_v20  ;;  %v4297_v30 = vadd.f32 %v4296_v31, %v4208_v26  ;;  %4522 = vmatmul.bf16.gmra.mxu0 %v5689_v41  ;;  %v5761_v22 = vor.u32 %v6875_v50, %v5760_v23 }
 0x4d0   : > { %4611 = vmatmul.bf16.gmra.mxu1 %v5693_v39 }
 0x4d1   : > { %4700 = vmatmul.bf16.gmra.mxu2 %v5697_v24 }
 0x4d2   : > { %4789 = vmatmul.bf16.gmra.mxu3 %v5701_v12 }
 0x4d4   : > { %v4385_v16 = vpop.f32.mrf.mxu2  ;;  %v4209_v45 = vpop.f32.mrf.mxu0 }
 0x4d5   : > { %v4474_v2 = vpop.f32.mrf.mxu3  ;;  %v4386_v27 = vadd.f32 %v4385_v16, %v4297_v30  ;;  %v4298_v54 = vpop.f32.mrf.mxu1  ;;  %v4210_v53 = vadd.f32 %v4209_v45, %v8393_v37  ;;  %v5765_v37 = vor.u32 %v6867_v8, %v5762_v43  ;;  %v819_v30 = vld [vmem:[#allocation2 + $0xb0] sm:$0xff] }
 0x4d7   : > { %v8618_v28 = vadd.f32 %v4474_v2, %v4386_v27  ;;  %v4299_v29 = vadd.f32 %v4298_v54, %v4210_v53  ;;  %v5816_v2 = vld [vmem:[%s7787_s8 + $0x4b0] sm:$0xf]  ;;  %v6882_v54 = vld [vmem:[%s7787_s8 + $0x4b4] sm:$0xf] }
 0x4d8   : > { %v6890_v27 = vld [vmem:[%s7787_s8 + $0x4ec] sm:$0xf0]  ;;  %v5818_v53 = vld [vmem:[%s7787_s8 + $0x4f0] sm:$0xf0] }
 0x4d9   : > { %v5817_v8 = vor.u32 %v6890_v27, %v5816_v2  ;;  %v5821_v43 = vor.u32 %v6882_v54, %v5818_v53  ;;  %v6898_v2 = vld [vmem:[%s7787_s8 + $0x534] sm:$0xf]  ;;  %v6907_v54 = vld [vmem:[%s7787_s8 + $0x574] sm:$0xf0]  ;;  %v6899_v53 = vld [vmem:[%s7787_s8 + $0x53c] sm:$0xf] }
 0x4da   : > { %v5882_v27 = vld [vmem:[%s7787_s8 + $0x570] sm:$0xf0] }
 0x4dc   : > { %v4387_v15 = vpop.f32.mrf.mxu2  ;;  %v4488_v59 = vpop.f32.mrf.mxu0 }
 0x4dd   : > { %v4476_v9 = vpop.f32.mrf.mxu3  ;;  %v4388_v0 = vadd.f32 %v4387_v15, %v4299_v29  ;;  %v4577_v63 = vpop.f32.mrf.mxu1  ;;  %v4489_v39 = vadd.f32 %v4488_v59, %v8399_v5  ;;  %v5824_v29 = vld [vmem:[%s7787_s8 + $0x4b8] sm:$0xf] }
 0x4df   : > { %v8628_v41 = vadd.f32 %v4476_v9, %v4388_v0  ;;  %4527 = vmatmul.bf16.gmra.mxu0 %v5753_v38  ;;  %v4578_v20 = vadd.f32 %v4577_v63, %v4489_v39  ;;  %v820_v0 = vld [vmem:[#allocation2] sm:$0xff] }
 0x4e0   : > { %4616 = vmatmul.bf16.gmra.mxu1 %v5757_v10  ;;  %v5825_v10 = vor.u32 %v6891_v49, %v5824_v29  ;;  %v5890_v29 = vld [vmem:[%s7787_s8 + $0x578] sm:$0xf0] }
 0x4e1   : > { %4705 = vmatmul.bf16.gmra.mxu2 %v5761_v22 }
 0x4e2   : > { %4794 = vmatmul.bf16.gmra.mxu3 %v5765_v37 }
 0x4e4   : > { %v4666_v55 = vpop.f32.mrf.mxu2  ;;  %v4490_v12 = vpop.f32.mrf.mxu0 }
 0x4e5   : > { %v4755_v31 = vpop.f32.mrf.mxu3  ;;  %v4667_v24 = vadd.f32 %v4666_v55, %v4578_v20  ;;  %v4579_v26 = vpop.f32.mrf.mxu1  ;;  %v4491_v5 = vadd.f32 %v4490_v12, %v8411_v25  ;;  %v5829_v25 = vor.u32 %v6883_v47, %v5826_v4 }
 0x4e7   : > { %v4756_v16 = vadd.f32 %v4755_v31, %v4667_v24  ;;  %v4580_v21 = vadd.f32 %v4579_v26, %v4491_v5  ;;  %v821_v24 = vld [vmem:[#allocation2 + $0xd8] sm:$0xff] }
 0x4e9   : > { %v4835_v45 = vadd.f32 %v4756_v16, %v819_v30  ;;  %v5880_v30 = vld [vmem:[%s7787_s8 + $0x530] sm:$0xf] }
 0x4ea   : > { %v6906_v16 = vld [vmem:[%s7787_s8 + $0x56c] sm:$0xf0] }
 0x4eb   : > { %4867 = vst [vmem:[#allocation2 + $0xb0] sm:$0xff] %v4835_v45  ;;  %v5888_v45 = vld [vmem:[%s7787_s8 + $0x538] sm:$0xf] }
 0x4ec   : > { %v4668_v23 = vpop.f32.mrf.mxu2  ;;  %v4493_v9 = vpop.f32.mrf.mxu0 }
 0x4ed   : > { %v4757_v50 = vpop.f32.mrf.mxu3  ;;  %v4669_v15 = vadd.f32 %v4668_v23, %v4580_v21  ;;  %v4582_v38 = vpop.f32.mrf.mxu1  ;;  %v4494_v63 = vadd.f32 %v4493_v9, %v8414_v17  ;;  %v5881_v21 = vor.u32 %v6906_v16, %v5880_v30  ;;  %v5885_v23 = vor.u32 %v6898_v2, %v5882_v27  ;;  %v822_v9 = vld [vmem:[#allocation2 + $0x18] sm:$0xff] }
 0x4ee   : > { %v5952_v30 = vld [vmem:[%s7787_s8 + $0x5b8] sm:$0xf]  ;;  %v5954_v2 = vld [vmem:[%s7787_s8 + $0x5f8] sm:$0xf0] }
 0x4ef   : > { %v4758_v59 = vadd.f32 %v4757_v50, %v4669_v15  ;;  %4532 = vmatmul.bf16.gmra.mxu0 %v5817_v8  ;;  %v4583_v37 = vadd.f32 %v4582_v38, %v4494_v63  ;;  %v5889_v15 = vor.u32 %v6907_v54, %v5888_v45  ;;  %v6923_v16 = vld [vmem:[%s7787_s8 + $0x5f4] sm:$0xf0] }
 0x4f0   : > { %4621 = vmatmul.bf16.gmra.mxu1 %v5821_v43 }
 0x4f1   : > { %v4836_v22 = vadd.f32 %v4758_v59, %v820_v0  ;;  %4710 = vmatmul.bf16.gmra.mxu2 %v5825_v10 }
 0x4f2   : > { %4799 = vmatmul.bf16.gmra.mxu3 %v5829_v25 }
 0x4f3   : > { %4868 = vst [vmem:[#allocation2] sm:$0xff] %v4836_v22 }
 0x4f4   : > { %v4671_v39 = vpop.f32.mrf.mxu2  ;;  %v4495_v31 = vpop.f32.mrf.mxu0 }
 0x4f5   : > { %v4760_v20 = vpop.f32.mrf.mxu3  ;;  %v4672_v55 = vadd.f32 %v4671_v39, %v4583_v37  ;;  %v4584_v17 = vpop.f32.mrf.mxu1  ;;  %v4496_v26 = vadd.f32 %v4495_v31, %v8425_v33  ;;  %v5893_v33 = vor.u32 %v6899_v53, %v5890_v29  ;;  %v823_v39 = vld [vmem:[#allocation2 + $0x50] sm:$0xff] }
 0x4f6   : > { %v5944_v31 = vld [vmem:[%s7787_s8 + $0x5b0] sm:$0xf] }
 0x4f7   : > { %v4761_v12 = vadd.f32 %v4760_v20, %v4672_v55  ;;  %v4585_v49 = vadd.f32 %v4584_v17, %v4496_v26  ;;  %v6922_v17 = vld [vmem:[%s7787_s8 + $0x5ec] sm:$0xf0]  ;;  %v5946_v26 = vld [vmem:[%s7787_s8 + $0x5f0] sm:$0xf0] }
 0x4f8   : > { %v5945_v53 = vor.u32 %v6922_v17, %v5944_v31  ;;  %v6931_v31 = vld [vmem:[%s7787_s8 + $0x63c] sm:$0xf] }
 0x4f9   : > { %v4837_v5 = vadd.f32 %v4761_v12, %v821_v24  ;;  %v6914_v12 = vld [vmem:[%s7787_s8 + $0x5b4] sm:$0xf]  ;;  %v6018_v17 = vld [vmem:[%s7787_s8 + $0x678] sm:$0xf0] }
 0x4fa   : > { %v5949_v29 = vor.u32 %v6914_v12, %v5946_v26 }
 0x4fb   : > { %4869 = vst [vmem:[#allocation2 + $0xd8] sm:$0xff] %v4837_v5  ;;  %v6915_v5 = vld [vmem:[%s7787_s8 + $0x5bc] sm:$0xf] }
 0x4fc   : > { %v4673_v47 = vpop.f32.mrf.mxu2  ;;  %v4498_v8 = vpop.f32.mrf.mxu0 }
 0x4fd   : > { %v4762_v4 = vpop.f32.mrf.mxu3  ;;  %v4674_v50 = vadd.f32 %v4673_v47, %v4585_v49  ;;  %v4587_v43 = vpop.f32.mrf.mxu1  ;;  %v4499_v10 = vadd.f32 %v4498_v8, %v8431_v51 }
 0x4ff   : > { %v4763_v38 = vadd.f32 %v4762_v4, %v4674_v50  ;;  %4537 = vmatmul.bf16.gmra.mxu0 %v5881_v21  ;;  %v4588_v0 = vadd.f32 %v4587_v43, %v4499_v10  ;;  %v5953_v21 = vor.u32 %v6923_v16, %v5952_v30 }
 0x500   : > { %4626 = vmatmul.bf16.gmra.mxu1 %v5885_v23  ;;  %v824_v23 = vld [vmem:[#allocation2 + $0x68] sm:$0xff] }
 0x501   : > { %v4838_v25 = vadd.f32 %v4763_v38, %v822_v9  ;;  %4715 = vmatmul.bf16.gmra.mxu2 %v5889_v15 }
 0x502   : > { %4804 = vmatmul.bf16.gmra.mxu3 %v5893_v33 }
 0x503   : > { %4870 = vst [vmem:[#allocation2 + $0x18] sm:$0xff] %v4838_v25  ;;  %v825_v25 = vld [vmem:[#allocation2 + $0x30] sm:$0xff] }
 0x504   : > { %v4676_v59 = vpop.f32.mrf.mxu2  ;;  %v4500_v37 = vpop.f32.mrf.mxu0 }
 0x505   : > { %v4765_v63 = vpop.f32.mrf.mxu3  ;;  %v4677_v22 = vadd.f32 %v4676_v59, %v4588_v0  ;;  %v4589_v51 = vpop.f32.mrf.mxu1  ;;  %v4501_v55 = vadd.f32 %v4500_v37, %v8443_v48  ;;  %v5957_v48 = vor.u32 %v6915_v5, %v5954_v2 }
 0x507   : > { %v4766_v20 = vadd.f32 %v4765_v63, %v4677_v22  ;;  %v4590_v27 = vadd.f32 %v4589_v51, %v4501_v55  ;;  %v6008_v63 = vld [vmem:[%s7787_s8 + $0x630] sm:$0xf]  ;;  %v6930_v51 = vld [vmem:[%s7787_s8 + $0x634] sm:$0xf]  ;;  %v6939_v55 = vld [vmem:[%s7787_s8 + $0x674] sm:$0xf0] }
 0x508   : > { %v6938_v22 = vld [vmem:[%s7787_s8 + $0x66c] sm:$0xf0] }
 0x509   : > { %v4839_v24 = vadd.f32 %v4766_v20, %v823_v39  ;;  %v6010_v39 = vld [vmem:[%s7787_s8 + $0x670] sm:$0xf0]  ;;  %v6016_v20 = vld [vmem:[%s7787_s8 + $0x638] sm:$0xf]  ;;  %v6009_v30 = vor.u32 %v6938_v22, %v6008_v63 }
 0x50a   : > { %v6013_v16 = vor.u32 %v6930_v51, %v6010_v39 }
 0x50b   : > { %4871 = vst [vmem:[#allocation2 + $0x50] sm:$0xff] %v4839_v24 }
 0x50c   : > { %v4678_v45 = vpop.f32.mrf.mxu2  ;;  %v4503_v47 = vpop.f32.mrf.mxu0 }
 0x50d   : > { %v4767_v54 = vpop.f32.mrf.mxu3  ;;  %v4679_v49 = vadd.f32 %v4678_v45, %v4590_v27  ;;  %v4592_v4 = vpop.f32.mrf.mxu1  ;;  %v4504_v8 = vadd.f32 %v4503_v47, %v8446_v52  ;;  %v6017_v45 = vor.u32 %v6939_v55, %v6016_v20 }
 0x50f   : > { %v4768_v50 = vadd.f32 %v4767_v54, %v4679_v49  ;;  %4542 = vmatmul.bf16.gmra.mxu0 %v5945_v53  ;;  %v4593_v15 = vadd.f32 %v4592_v4, %v4504_v8  ;;  %v826_v54 = vld [vmem:[#allocation2 + $0x48] sm:$0xff] }
 0x510   : > { %4631 = vmatmul.bf16.gmra.mxu1 %v5949_v29 }
 0x511   : > { %v4840_v43 = vadd.f32 %v4768_v50, %v824_v23  ;;  %4720 = vmatmul.bf16.gmra.mxu2 %v5953_v21  ;;  %v827_v50 = vld [vmem:[#allocation2 + $0x80] sm:$0xff] }
 0x512   : > { %4809 = vmatmul.bf16.gmra.mxu3 %v5957_v48 }
 0x513   : > { %4872 = vst [vmem:[#allocation2 + $0x68] sm:$0xff] %v4840_v43 }
 0x514   : > { %v4681_v33 = vpop.f32.mrf.mxu2  ;;  %v4505_v10 = vpop.f32.mrf.mxu0 }
 0x515   : > { %v4770_v9 = vpop.f32.mrf.mxu3  ;;  %v4682_v38 = vadd.f32 %v4681_v33, %v4593_v15  ;;  %v4594_v52 = vpop.f32.mrf.mxu1  ;;  %v4506_v59 = vadd.f32 %v4505_v10, %v8457_v34  ;;  %v6021_v34 = vor.u32 %v6931_v31, %v6018_v17  ;;  %v6072_v15 = vld [vmem:[%s7787_s8 + $0x6b0] sm:$0xf]  ;;  %v6074_v10 = vld [vmem:[%s7787_s8 + $0x6f0] sm:$0xf0] }
 0x516   : > { %v6954_v33 = vld [vmem:[%s7787_s8 + $0x6ec] sm:$0xf0] }
 0x517   : > { %v4771_v0 = vadd.f32 %v4770_v9, %v4682_v38  ;;  %v4595_v24 = vadd.f32 %v4594_v52, %v4506_v59  ;;  %v6946_v38 = vld [vmem:[%s7787_s8 + $0x6b4] sm:$0xf]  ;;  %v6080_v52 = vld [vmem:[%s7787_s8 + $0x6b8] sm:$0xf]  ;;  %v6082_v59 = vld [vmem:[%s7787_s8 + $0x6f8] sm:$0xf0]  ;;  %v6073_v51 = vor.u32 %v6954_v33, %v6072_v15 }
 0x518   : > { %v6077_v39 = vor.u32 %v6946_v38, %v6074_v10 }
 0x519   : > { %v4841_v37 = vadd.f32 %v4771_v0, %v825_v25  ;;  %v6955_v25 = vld [vmem:[%s7787_s8 + $0x6f4] sm:$0xf0]  ;;  %v6947_v0 = vld [vmem:[%s7787_s8 + $0x6bc] sm:$0xf] }
 0x51a   : > { %v6081_v17 = vor.u32 %v6955_v25, %v6080_v52 }
 0x51b   : > { %4873 = vst [vmem:[#allocation2 + $0x30] sm:$0xff] %v4841_v37 }
 0x51c   : > { %v4683_v12 = vpop.f32.mrf.mxu2  ;;  %v4508_v2 = vpop.f32.mrf.mxu0 }
 0x51d   : > { %v4772_v26 = vpop.f32.mrf.mxu3  ;;  %v4684_v5 = vadd.f32 %v4683_v12, %v4595_v24  ;;  %v4597_v27 = vpop.f32.mrf.mxu1  ;;  %v4509_v29 = vadd.f32 %v4508_v2, %v8463_v35  ;;  %v828_v24 = vld [vmem:[#allocation2 + $0x88] sm:$0xff] }
 0x51f   : > { %v4773_v53 = vadd.f32 %v4772_v26, %v4684_v5  ;;  %4547 = vmatmul.bf16.gmra.mxu0 %v6009_v30  ;;  %v4598_v47 = vadd.f32 %v4597_v27, %v4509_v29  ;;  %v6136_v29 = vld [vmem:[%s7787_s8 + $0x730] sm:$0xf] }
 0x520   : > { %4636 = vmatmul.bf16.gmra.mxu1 %v6013_v16 }
 0x521   : > { %v4842_v49 = vadd.f32 %v4773_v53, %v826_v54  ;;  %4725 = vmatmul.bf16.gmra.mxu2 %v6017_v45 }
 0x522   : > { %4814 = vmatmul.bf16.gmra.mxu3 %v6021_v34  ;;  %v829_v34 = vld [vmem:[#allocation2 + $0xe8] sm:$0xff] }
 0x523   : > { %4874 = vst [vmem:[#allocation2 + $0x48] sm:$0xff] %v4842_v49  ;;  %v6970_v49 = vld [vmem:[%s7787_s8 + $0x76c] sm:$0xf0] }
 0x524   : > { %v4686_v4 = vpop.f32.mrf.mxu2  ;;  %v4510_v23 = vpop.f32.mrf.mxu0  ;;  %v6137_v33 = vor.u32 %v6970_v49, %v6136_v29 }
 0x525   : > { %v4775_v21 = vpop.f32.mrf.mxu3  ;;  %v4687_v48 = vadd.f32 %v4686_v4, %v4598_v47  ;;  %v4599_v35 = vpop.f32.mrf.mxu1  ;;  %v4511_v43 = vadd.f32 %v4510_v23, %v8475_v18  ;;  %v6085_v18 = vor.u32 %v6947_v0, %v6082_v59  ;;  %v6962_v4 = vld [vmem:[%s7787_s8 + $0x734] sm:$0xf]  ;;  %v6971_v23 = vld [vmem:[%s7787_s8 + $0x774] sm:$0xf0] }
 0x526   : > { %v830_v0 = vld [vmem:[#allocation2 + $0xb8] sm:$0xff] }
 0x527   : > { %v4776_v8 = vadd.f32 %v4775_v21, %v4687_v48  ;;  %v4600_v63 = vadd.f32 %v4599_v35, %v4511_v43  ;;  %v6138_v21 = vld [vmem:[%s7787_s8 + $0x770] sm:$0xf0]  ;;  %v6144_v48 = vld [vmem:[%s7787_s8 + $0x738] sm:$0xf]  ;;  %v6963_v35 = vld [vmem:[%s7787_s8 + $0x73c] sm:$0xf] }
 0x528   : > { %v6145_v25 = vor.u32 %v6971_v23, %v6144_v48  ;;  %v832_v48 = vld [vmem:[#allocation2 + $0xf0] sm:$0xff] }
 0x529   : > { %v4843_v9 = vadd.f32 %v4776_v8, %v827_v50  ;;  %v6146_v50 = vld [vmem:[%s7787_s8 + $0x778] sm:$0xf0] }
 0x52b   : > { %4875 = vst [vmem:[#allocation2 + $0x80] sm:$0xff] %v4843_v9  ;;  %v6141_v9 = vor.u32 %v6962_v4, %v6138_v21 }
 0x52c   : > { %v4688_v22 = vpop.f32.mrf.mxu2  ;;  %v4513_v55 = vpop.f32.mrf.mxu0 }
 0x52d   : > { %v4777_v37 = vpop.f32.mrf.mxu3  ;;  %v4689_v20 = vadd.f32 %v4688_v22, %v4600_v63  ;;  %v4602_v31 = vpop.f32.mrf.mxu1  ;;  %v4514_v26 = vadd.f32 %v4513_v55, %v8478_v36 }
 0x52f   : > { %v4778_v12 = vadd.f32 %v4777_v37, %v4689_v20  ;;  %4552 = vmatmul.bf16.gmra.mxu0 %v6073_v51  ;;  %v4603_v16 = vadd.f32 %v4602_v31, %v4514_v26  ;;  %v831_v31 = vld [vmem:[#allocation2 + $0x60] sm:$0xff] }
 0x530   : > { %4641 = vmatmul.bf16.gmra.mxu1 %v6077_v39 }
 0x531   : > { %v4844_v30 = vadd.f32 %v4778_v12, %v828_v24  ;;  %4730 = vmatmul.bf16.gmra.mxu2 %v6081_v17  ;;  %v6200_v24 = vld [vmem:[%s7787_s8 + $0x7b0] sm:$0xf] }
 0x532   : > { %4819 = vmatmul.bf16.gmra.mxu3 %v6085_v18  ;;  %v6986_v12 = vld [vmem:[%s7787_s8 + $0x7ec] sm:$0xf0] }
 0x533   : > { %4876 = vst [vmem:[#allocation2 + $0x88] sm:$0xff] %v4844_v30  ;;  %v6978_v30 = vld [vmem:[%s7787_s8 + $0x7b4] sm:$0xf] }
 0x534   : > { %v4691_v5 = vpop.f32.mrf.mxu2  ;;  %v4515_v45 = vpop.f32.mrf.mxu0 }
 0x535   : > { %v4780_v2 = vpop.f32.mrf.mxu3  ;;  %v4692_v27 = vadd.f32 %v4691_v5, %v4603_v16  ;;  %v4604_v36 = vpop.f32.mrf.mxu1  ;;  %v4516_v53 = vadd.f32 %v4515_v45, %v8489_v40  ;;  %v6149_v40 = vor.u32 %v6963_v35, %v6146_v50  ;;  %v6202_v16 = vld [vmem:[%s7787_s8 + $0x7f0] sm:$0xf0]  ;;  %v6208_v5 = vld [vmem:[%s7787_s8 + $0x7b8] sm:$0xf]  ;;  %v6210_v45 = vld [vmem:[%s7787_s8 + $0x7f8] sm:$0xf0] }
 0x536   : > { %v6205_v29 = vor.u32 %v6978_v30, %v6202_v16 }
 0x537   : > { %v4781_v54 = vadd.f32 %v4780_v2, %v4692_v27  ;;  %v4605_v8 = vadd.f32 %v4604_v36, %v4516_v53  ;;  %v6987_v2 = vld [vmem:[%s7787_s8 + $0x7f4] sm:$0xf0]  ;;  %v6979_v27 = vld [vmem:[%s7787_s8 + $0x7bc] sm:$0xf]  ;;  %v6201_v53 = vor.u32 %v6986_v12, %v6200_v24 }
 0x538   : > { %v6209_v21 = vor.u32 %v6987_v2, %v6208_v5  ;;  %v835_v12 = vld [vmem:[#allocation2 + $0x38] sm:$0xff] }
 0x539   : > { %v4845_v47 = vadd.f32 %v4781_v54, %v829_v34 }
 0x53b   : > { %4877 = vst [vmem:[#allocation2 + $0xe8] sm:$0xff] %v4845_v47 }
 0x53c   : > { %v4693_v43 = vpop.f32.mrf.mxu2  ;;  %v4518_v10 = vpop.f32.mrf.mxu0 }
 0x53d   : > { %v4782_v15 = vpop.f32.mrf.mxu3  ;;  %v4694_v38 = vadd.f32 %v4693_v43, %v4605_v8  ;;  %v4607_v52 = vpop.f32.mrf.mxu1  ;;  %v4519_v63 = vadd.f32 %v4518_v10, %v8492_v32  ;;  %v833_v10 = vld [vmem:[#allocation2 + $0x8] sm:$0xff] }
 0x53f   : > { %v4783_v59 = vadd.f32 %v4782_v15, %v4694_v38  ;;  %4557 = vmatmul.bf16.gmra.mxu0 %v6137_v33  ;;  %v4608_v37 = vadd.f32 %v4607_v52, %v4519_v63 }
 0x540   : > { %4646 = vmatmul.bf16.gmra.mxu1 %v6141_v9 }
 0x541   : > { %v4846_v22 = vadd.f32 %v4783_v59, %v830_v0  ;;  %4735 = vmatmul.bf16.gmra.mxu2 %v6145_v25 }
 0x542   : > { %4824 = vmatmul.bf16.gmra.mxu3 %v6149_v40 }
 0x543   : > { %4878 = vst [vmem:[#allocation2 + $0xb8] sm:$0xff] %v4846_v22 }
 0x544   : > { %v4696_v51 = vpop.f32.mrf.mxu2  ;;  %v4520_v55 = vpop.f32.mrf.mxu0 }
 0x545   : > { %v4785_v39 = vpop.f32.mrf.mxu3  ;;  %v4697_v20 = vadd.f32 %v4696_v51, %v4608_v37  ;;  %v4609_v32 = vpop.f32.mrf.mxu1  ;;  %v4521_v18 = vadd.f32 %v4520_v55, %v8503_v46  ;;  %v6213_v46 = vor.u32 %v6979_v27, %v6210_v45  ;;  %v834_v51 = vld [vmem:[#allocation2 + $0x78] sm:$0xff] }
 0x547   : > { %v4786_v17 = vadd.f32 %v4785_v39, %v4697_v20  ;;  %v4610_v36 = vadd.f32 %v4609_v32, %v4521_v18 }
 0x549   : > { %v4847_v26 = vadd.f32 %v4786_v17, %v831_v31 }
 0x54b   : > { %4879 = vst [vmem:[#allocation2 + $0x60] sm:$0xff] %v4847_v26 }
 0x54c   : > { %v4698_v34 = vpop.f32.mrf.mxu2  ;;  %v4523_v47 = vpop.f32.mrf.mxu0 }
 0x54d   : > { %v4787_v54 = vpop.f32.mrf.mxu3  ;;  %v4699_v49 = vadd.f32 %v4698_v34, %v4610_v36  ;;  %v4612_v4 = vpop.f32.mrf.mxu1  ;;  %v4524_v35 = vadd.f32 %v4523_v47, %v8506_v60  ;;  %v836_v34 = vld [vmem:[#allocation2 + $0x58] sm:$0xff] }
 0x54f   : > { %v4788_v23 = vadd.f32 %v4787_v54, %v4699_v49  ;;  %4562 = vmatmul.bf16.gmra.mxu0 %v6201_v53  ;;  %v4613_v8 = vadd.f32 %v4612_v4, %v4524_v35 }
 0x550   : > { %4651 = vmatmul.bf16.gmra.mxu1 %v6205_v29 }
 0x551   : > { %v4848_v50 = vadd.f32 %v4788_v23, %v832_v48  ;;  %4740 = vmatmul.bf16.gmra.mxu2 %v6209_v21  ;;  %v837_v48 = vld [vmem:[#allocation2 + $0x40] sm:$0xff] }
 0x552   : > { %4829 = vmatmul.bf16.gmra.mxu3 %v6213_v46 }
 0x553   : > { %4880 = vst [vmem:[#allocation2 + $0xf0] sm:$0xff] %v4848_v50 }
 0x554   : > { %v4701_v43 = vpop.f32.mrf.mxu2  ;;  %v4525_v9 = vpop.f32.mrf.mxu0 }
 0x555   : > { %v4790_v15 = vpop.f32.mrf.mxu3  ;;  %v4702_v33 = vadd.f32 %v4701_v43, %v4613_v8  ;;  %v4614_v38 = vpop.f32.mrf.mxu1  ;;  %v4526_v25 = vadd.f32 %v4525_v9, %v8517_v3 }
 0x557   : > { %v4791_v52 = vadd.f32 %v4790_v15, %v4702_v33  ;;  %v4615_v0 = vadd.f32 %v4614_v38, %v4526_v25  ;;  %v838_v38 = vld [vmem:[#allocation2 + $0xc8] sm:$0xff] }
 0x559   : > { %v4849_v40 = vadd.f32 %v4791_v52, %v833_v10 }
 0x55b   : > { %4881 = vst [vmem:[#allocation2 + $0x8] sm:$0xff] %v4849_v40 }
 0x55c   : > { %v4703_v60 = vpop.f32.mrf.mxu2  ;;  %v4528_v22 = vpop.f32.mrf.mxu0 }
 0x55d   : > { %v4792_v59 = vpop.f32.mrf.mxu3  ;;  %v4704_v63 = vadd.f32 %v4703_v60, %v4615_v0  ;;  %v4617_v37 = vpop.f32.mrf.mxu1  ;;  %v4529_v20 = vadd.f32 %v4528_v22, %v8520_v6  ;;  %v839_v22 = vld [vmem:[#allocation2 + $0xe0] sm:$0xff] }
 0x55f   : > { %v4793_v39 = vadd.f32 %v4792_v59, %v4704_v63  ;;  %v4618_v32 = vadd.f32 %v4617_v37, %v4529_v20 }
 0x561   : > { %v4850_v55 = vadd.f32 %v4793_v39, %v834_v51 }
 0x563   : > { %4882 = vst [vmem:[#allocation2 + $0x78] sm:$0xff] %v4850_v55 }
 0x564   : > { %v4706_v31 = vpop.f32.mrf.mxu2  ;;  %v4530_v24 = vpop.f32.mrf.mxu0 }
 0x565   : > { %v4795_v17 = vpop.f32.mrf.mxu3  ;;  %v4707_v18 = vadd.f32 %v4706_v31, %v4618_v32  ;;  %v4619_v3 = vpop.f32.mrf.mxu1  ;;  %v4531_v30 = vadd.f32 %v4530_v24, %v8531_v42 }
 0x567   : > { %v4796_v26 = vadd.f32 %v4795_v17, %v4707_v18  ;;  %v4620_v5 = vadd.f32 %v4619_v3, %v4531_v30  ;;  %v840_v18 = vld [vmem:[#allocation2 + $0x90] sm:$0xff] }
 0x569   : > { %v4851_v16 = vadd.f32 %v4796_v26, %v835_v12 }
 0x56b   : > { %4883 = vst [vmem:[#allocation2 + $0x38] sm:$0xff] %v4851_v16 }
 0x56c   : > { %v4708_v2 = vpop.f32.mrf.mxu2  ;;  %v4533_v36 = vpop.f32.mrf.mxu0 }
 0x56d   : > { %v4797_v27 = vpop.f32.mrf.mxu3  ;;  %v4709_v45 = vadd.f32 %v4708_v2, %v4620_v5  ;;  %v4622_v6 = vpop.f32.mrf.mxu1  ;;  %v4534_v53 = vadd.f32 %v4533_v36, %v8534_v44 }
 0x56f   : > { %v4798_v54 = vadd.f32 %v4797_v27, %v4709_v45  ;;  %v4623_v49 = vadd.f32 %v4622_v6, %v4534_v53  ;;  %v841_v27 = vld [vmem:[#allocation2 + $0x70] sm:$0xff] }
 0x571   : > { %v4852_v29 = vadd.f32 %v4798_v54, %v836_v34 }
 0x573   : > { %4884 = vst [vmem:[#allocation2 + $0x58] sm:$0xff] %v4852_v29 }
 0x574   : > { %v4711_v47 = vpop.f32.mrf.mxu2  ;;  %v4535_v46 = vpop.f32.mrf.mxu0 }
 0x575   : > { %v4800_v4 = vpop.f32.mrf.mxu3  ;;  %v4712_v21 = vadd.f32 %v4711_v47, %v4623_v49  ;;  %v4624_v42 = vpop.f32.mrf.mxu1  ;;  %v4536_v35 = vadd.f32 %v4535_v46, %v8545_v11  ;;  %v842_v47 = vld [vmem:[#allocation2 + $0xc0] sm:$0xff] }
 0x577   : > { %v4801_v23 = vadd.f32 %v4800_v4, %v4712_v21  ;;  %v4625_v8 = vadd.f32 %v4624_v42, %v4536_v35 }
 0x579   : > { %v4853_v50 = vadd.f32 %v4801_v23, %v837_v48 }
 0x57b   : > { %4885 = vst [vmem:[#allocation2 + $0x40] sm:$0xff] %v4853_v50 }
 0x57c   : > { %v4713_v43 = vpop.f32.mrf.mxu2  ;;  %v4538_v9 = vpop.f32.mrf.mxu0 }
 0x57d   : > { %v4802_v15 = vpop.f32.mrf.mxu3  ;;  %v4714_v33 = vadd.f32 %v4713_v43, %v4625_v8  ;;  %v4627_v44 = vpop.f32.mrf.mxu1  ;;  %v4539_v52 = vadd.f32 %v4538_v9, %v8548_v58  ;;  %v843_v8 = vld [vmem:[#allocation2 + $0xa8] sm:$0xff] }
 0x57f   : > { %v4803_v10 = vadd.f32 %v4802_v15, %v4714_v33  ;;  %v4628_v40 = vadd.f32 %v4627_v44, %v4539_v52 }
 0x581   : > { %v4854_v25 = vadd.f32 %v4803_v10, %v838_v38 }
 0x583   : > { %4886 = vst [vmem:[#allocation2 + $0xc8] sm:$0xff] %v4854_v25  ;;  %v844_v25 = vld [vmem:[#allocation2 + $0xd0] sm:$0xff] }
 0x584   : > { %v4716_v0 = vpop.f32.mrf.mxu2  ;;  %v4540_v63 = vpop.f32.mrf.mxu0 }
 0x585   : > { %v4805_v60 = vpop.f32.mrf.mxu3  ;;  %v4717_v59 = vadd.f32 %v4716_v0, %v4628_v40  ;;  %v4629_v11 = vpop.f32.mrf.mxu1  ;;  %v4541_v51 = vadd.f32 %v4540_v63, %v8559_v62 }
 0x587   : > { %v4806_v37 = vadd.f32 %v4805_v60, %v4717_v59  ;;  %v4630_v20 = vadd.f32 %v4629_v11, %v4541_v51  ;;  %v845_v51 = vld [vmem:[#allocation2 + $0x10] sm:$0xff] }
 0x589   : > { %v4855_v39 = vadd.f32 %v4806_v37, %v839_v22 }
 0x58b   : > { %4887 = vst [vmem:[#allocation2 + $0xe0] sm:$0xff] %v4855_v39 }
 0x58c   : > { %v4718_v55 = vpop.f32.mrf.mxu2  ;;  %v4543_v17 = vpop.f32.mrf.mxu0 }
 0x58d   : > { %v4807_v32 = vpop.f32.mrf.mxu3  ;;  %v4719_v31 = vadd.f32 %v4718_v55, %v4630_v20  ;;  %v4632_v58 = vpop.f32.mrf.mxu1  ;;  %v4544_v3 = vadd.f32 %v4543_v17, %v8562_v13 }
 0x58f   : > { %v4808_v24 = vadd.f32 %v4807_v32, %v4719_v31  ;;  %v4633_v26 = vadd.f32 %v4632_v58, %v4544_v3 }
 0x591   : > { %v4856_v12 = vadd.f32 %v4808_v24, %v840_v18  ;;  %v846_v24 = vld [vmem:[#allocation2 + $0x28] sm:$0xff] }
 0x593   : > { %4888 = vst [vmem:[#allocation2 + $0x90] sm:$0xff] %v4856_v12 }
 0x594   : > { %v4721_v30 = vpop.f32.mrf.mxu2  ;;  %v4545_v2 = vpop.f32.mrf.mxu0 }
 0x595   : > { %v4810_v16 = vpop.f32.mrf.mxu3  ;;  %v4722_v5 = vadd.f32 %v4721_v30, %v4633_v26  ;;  %v4634_v62 = vpop.f32.mrf.mxu1  ;;  %v4546_v36 = vadd.f32 %v4545_v2, %v8573_v57 }
 0x597   : > { %v4811_v45 = vadd.f32 %v4810_v16, %v4722_v5  ;;  %v4635_v34 = vadd.f32 %v4634_v62, %v4546_v36 }
 0x599   : > { %v4857_v6 = vadd.f32 %v4811_v45, %v841_v27 }
 0x59b   : > { %4889 = vst [vmem:[#allocation2 + $0x70] sm:$0xff] %v4857_v6 }
 0x59c   : > { %v4723_v54 = vpop.f32.mrf.mxu2  ;;  %v4548_v49 = vpop.f32.mrf.mxu0 }
 0x59d   : > { %v4812_v53 = vpop.f32.mrf.mxu3  ;;  %v4724_v29 = vadd.f32 %v4723_v54, %v4635_v34  ;;  %v4637_v13 = vpop.f32.mrf.mxu1  ;;  %v4549_v21 = vadd.f32 %v4548_v49, %v8576_v14 }
 0x59f   : > { %v4813_v4 = vadd.f32 %v4812_v53, %v4724_v29  ;;  %v4638_v42 = vadd.f32 %v4637_v13, %v4549_v21 }
 0x5a1   : > { %v4858_v46 = vadd.f32 %v4813_v4, %v842_v47 }
 0x5a3   : > { %4890 = vst [vmem:[#allocation2 + $0xc0] sm:$0xff] %v4858_v46 }
 0x5a4   : > { %v4726_v48 = vpop.f32.mrf.mxu2  ;;  %v4550_v50 = vpop.f32.mrf.mxu0 }
 0x5a5   : > { %v4815_v23 = vpop.f32.mrf.mxu3  ;;  %v4727_v35 = vadd.f32 %v4726_v48, %v4638_v42  ;;  %v4639_v57 = vpop.f32.mrf.mxu1  ;;  %v4551_v15 = vadd.f32 %v4550_v50, %v8587_v56 }
 0x5a7   : > { %v4816_v43 = vadd.f32 %v4815_v23, %v4727_v35  ;;  %v4640_v9 = vadd.f32 %v4639_v57, %v4551_v15 }
 0x5a9   : > { %v4859_v33 = vadd.f32 %v4816_v43, %v843_v8 }
 0x5ab   : > { %4891 = vst [vmem:[#allocation2 + $0xa8] sm:$0xff] %v4859_v33 }
 0x5ac   : > { %v4728_v44 = vpop.f32.mrf.mxu2  ;;  %v4553_v52 = vpop.f32.mrf.mxu0 }
 0x5ad   : > { %v4817_v38 = vpop.f32.mrf.mxu3  ;;  %v4729_v10 = vadd.f32 %v4728_v44, %v4640_v9  ;;  %v4642_v14 = vpop.f32.mrf.mxu1  ;;  %v4554_v0 = vadd.f32 %v4553_v52, %v8590_v61  ;;  %v850_v44 = vld [vmem:[#allocation2 + $0x98] sm:$0xff] }
 0x5af   : > { %v4818_v40 = vadd.f32 %v4817_v38, %v4729_v10  ;;  %v4643_v59 = vadd.f32 %v4642_v14, %v4554_v0 }
 0x5b1   : > { %v4860_v60 = vadd.f32 %v4818_v40, %v844_v25 }
 0x5b3   : > { %4892 = vst [vmem:[#allocation2 + $0xd0] sm:$0xff] %v4860_v60 }
 0x5b4   : > { %v4731_v63 = vpop.f32.mrf.mxu2  ;;  %v4555_v37 = vpop.f32.mrf.mxu0 }
 0x5b5   : > { %v4820_v11 = vpop.f32.mrf.mxu3  ;;  %v4732_v22 = vadd.f32 %v4731_v63, %v4643_v59  ;;  %v4644_v56 = vpop.f32.mrf.mxu1  ;;  %v4556_v20 = vadd.f32 %v4555_v37, %v8601_v7  ;;  %v847_v7 = vld [vmem:[#allocation2 + $0xa0] sm:$0xff] }
 0x5b7   : > { %v4821_v39 = vadd.f32 %v4820_v11, %v4732_v22  ;;  %v4645_v32 = vadd.f32 %v4644_v56, %v4556_v20 }
 0x5b9   : > { %v4861_v55 = vadd.f32 %v4821_v39, %v845_v51 }
 0x5bb   : > { %4893 = vst [vmem:[#allocation2 + $0x10] sm:$0xff] %v4861_v55 }
 0x5bc   : > { %v4733_v31 = vpop.f32.mrf.mxu2  ;;  %v4558_v18 = vpop.f32.mrf.mxu0 }
 0x5bd   : > { %v4822_v17 = vpop.f32.mrf.mxu3  ;;  %v4734_v58 = vadd.f32 %v4733_v31, %v4645_v32  ;;  %v4647_v61 = vpop.f32.mrf.mxu1  ;;  %v4559_v12 = vadd.f32 %v4558_v18, %v8604_v1  ;;  %v848_v1 = vld [vmem:[#allocation2 + $0xf8] sm:$0xff] }
 0x5bf   : > { %v4823_v3 = vadd.f32 %v4822_v17, %v4734_v58  ;;  %v4648_v30 = vadd.f32 %v4647_v61, %v4559_v12 }
 0x5c1   : > { %v4862_v26 = vadd.f32 %v4823_v3, %v846_v24 }
 0x5c3   : > { %4894 = vst [vmem:[#allocation2 + $0x28] sm:$0xff] %v4862_v26 }
 0x5c4   : > { %v4736_v16 = vpop.f32.mrf.mxu2  ;;  %v4560_v62 = vpop.f32.mrf.mxu0 }
 0x5c5   : > { %v4825_v5 = vpop.f32.mrf.mxu3  ;;  %v4737_v2 = vadd.f32 %v4736_v16, %v4648_v30  ;;  %v4649_v27 = vpop.f32.mrf.mxu1  ;;  %v4561_v36 = vadd.f32 %v4560_v62, %v8615_v19  ;;  %v849_v19 = vld [vmem:[#allocation2 + $0x20] sm:$0xff] }
 0x5c7   : > { %v4826_v45 = vadd.f32 %v4825_v5, %v4737_v2  ;;  %v4650_v34 = vadd.f32 %v4649_v27, %v4561_v36 }
 0x5c9   : > { %v4863_v6 = vadd.f32 %v4826_v45, %v847_v7 }
 0x5cb   : > { %4895 = vst [vmem:[#allocation2 + $0xa0] sm:$0xff] %v4863_v6 }
 0x5cc   : > { %v4738_v54 = vpop.f32.mrf.mxu2  ;;  %v4563_v49 = vpop.f32.mrf.mxu0 }
 0x5cd   : > { %v4827_v53 = vpop.f32.mrf.mxu3  ;;  %v4739_v29 = vadd.f32 %v4738_v54, %v4650_v34  ;;  %v4564_v47 = vadd.f32 %v4563_v49, %v8618_v28  ;;  %v4652_v4 = vpop.f32.mrf.mxu1 }
 0x5cf   : > { %v4828_v13 = vadd.f32 %v4827_v53, %v4739_v29  ;;  %v4653_v46 = vadd.f32 %v4652_v4, %v4564_v47 }
 0x5d1   : > { %v4864_v21 = vadd.f32 %v4828_v13, %v848_v1 }
 0x5d3   : > { %4896 = vst [vmem:[#allocation2 + $0xf8] sm:$0xff] %v4864_v21 }
 0x5d4   : > { %v4741_v42 = vpop.f32.mrf.mxu2  ;;  %v4565_v35 = vpop.f32.mrf.mxu0 }
 0x5d5   : > { %v4830_v48 = vpop.f32.mrf.mxu3  ;;  %v4742_v23 = vadd.f32 %v4741_v42, %v4653_v46  ;;  %v4566_v57 = vadd.f32 %v4565_v35, %v8628_v41  ;;  %v4654_v43 = vpop.f32.mrf.mxu1 }
 0x5d7   : > { %v4831_v50 = vadd.f32 %v4830_v48, %v4742_v23  ;;  %v4655_v15 = vadd.f32 %v4654_v43, %v4566_v57 }
 0x5d9   : > { %v4865_v8 = vadd.f32 %v4831_v50, %v849_v19 }
 0x5db   : > { %4897 = vst [vmem:[#allocation2 + $0x20] sm:$0xff] %v4865_v8 }
 0x5dc   : > { %v4743_v33 = vpop.f32.mrf.mxu2 }
 0x5dd   : > { %v4744_v9 = vadd.f32 %v4743_v33, %v4655_v15  ;;  %v4832_v28 = vpop.f32.mrf.mxu3 }
 0x5df   : > { %v4833_v38 = vadd.f32 %v4832_v28, %v4744_v9  ;;  %4902 = sbr.rel (%p6726_p11) target bundleno = 1575 (0x627), region = 63 }
 0x5e1   : > { %v4866_v10 = vadd.f32 %v4833_v38, %v850_v44 }
 0x5e3   : > { %4898 = vst [vmem:[#allocation2 + $0x98] sm:$0xff] %v4866_v10 }
 0x5e4   : > { %v4903_v52 = vld [vmem:[#allocation2 + $0xb0] sm:$0xff]  ;;  %v8722_v14 = vld [vmem:[%s8937_s2] ss:$0 sm:$0xff]  ;;  %v4905_v25 = vld [vmem:[#allocation2 + $0xd8] sm:$0xff] }
 0x5e5   : > { %v4904_v41 = vld [vmem:[#allocation2] sm:$0xff]  ;;  %v4906_v40 = vld [vmem:[#allocation2 + $0x18] sm:$0xff]  ;;  %v8725_v0 = vadd.f32 %v8722_v14, %v4903_v52  ;;  %v8731_v59 = vadd.f32 %v8722_v14, %v4905_v25  ;;  %v4907_v63 = vld [vmem:[#allocation2 + $0x50] sm:$0xff] }
 0x5e6   : > { %v8728_v60 = vadd.f32 %v8722_v14, %v4904_v41  ;;  %v4908_v11 = vld [vmem:[#allocation2 + $0x68] sm:$0xff]  ;;  %v8734_v22 = vadd.f32 %v8722_v14, %v4906_v40  ;;  %v4909_v37 = vld [vmem:[#allocation2 + $0x30] sm:$0xff]  ;;  %v8738_v56 = vadd.f32 %v8722_v14, %v4907_v63  ;;  %v4911_v20 = vld [vmem:[#allocation2 + $0x80] sm:$0xff] }
 0x5e7   : > { %4971 = vst [vmem:[#allocation2 + $0xb0] sm:$0xff] %v8725_v0  ;;  %v4910_v51 = vld [vmem:[#allocation2 + $0x48] sm:$0xff]  ;;  %v8742_v39 = vadd.f32 %v8722_v14, %v4908_v11  ;;  %v8746_v55 = vadd.f32 %v8722_v14, %v4909_v37  ;;  %v8754_v58 = vadd.f32 %v8722_v14, %v4911_v20  ;;  %v4914_v18 = vld [vmem:[#allocation2 + $0xb8] sm:$0xff]  ;;  %v4915_v24 = vld [vmem:[#allocation2 + $0x60] sm:$0xff] }
 0x5e8   : > { %4972 = vst [vmem:[#allocation2] sm:$0xff] %v8728_v60  ;;  %v4912_v32 = vld [vmem:[#allocation2 + $0x88] sm:$0xff]  ;;  %v8750_v31 = vadd.f32 %v8722_v14, %v4910_v51  ;;  %v4916_v12 = vld [vmem:[#allocation2 + $0xf0] sm:$0xff]  ;;  %v8766_v26 = vadd.f32 %v8722_v14, %v4914_v18  ;;  %v8770_v16 = vadd.f32 %v8722_v14, %v4915_v24  ;;  %v4918_v5 = vld [vmem:[#allocation2 + $0x78] sm:$0xff] }
 0x5e9   : > { %4973 = vst [vmem:[#allocation2 + $0xd8] sm:$0xff] %v8731_v59  ;;  %v4913_v17 = vld [vmem:[#allocation2 + $0xe8] sm:$0xff]  ;;  %v8758_v61 = vadd.f32 %v8722_v14, %v4912_v32  ;;  %v8774_v2 = vadd.f32 %v8722_v14, %v4916_v12  ;;  %v4919_v62 = vld [vmem:[#allocation2 + $0x38] sm:$0xff]  ;;  %v8782_v45 = vadd.f32 %v8722_v14, %v4918_v5  ;;  %v4921_v36 = vld [vmem:[#allocation2 + $0x40] sm:$0xff] }
 0x5ea   : > { %4974 = vst [vmem:[#allocation2 + $0x18] sm:$0xff] %v8734_v22  ;;  %v8762_v3 = vadd.f32 %v8722_v14, %v4913_v17  ;;  %v4917_v30 = vld [vmem:[#allocation2 + $0x8] sm:$0xff]  ;;  %v4920_v27 = vld [vmem:[#allocation2 + $0x58] sm:$0xff]  ;;  %v8786_v6 = vadd.f32 %v8722_v14, %v4919_v62  ;;  %v4923_v53 = vld [vmem:[#allocation2 + $0xe0] sm:$0xff]  ;;  %v4957_v29 = vadd.f32 %v8722_v14, %v4921_v36 }
 0x5eb   : > { %4975 = vst [vmem:[#allocation2 + $0x50] sm:$0xff] %v8738_v56  ;;  %v8778_v7 = vadd.f32 %v8722_v14, %v4917_v30  ;;  %v4922_v34 = vld [vmem:[#allocation2 + $0xc8] sm:$0xff]  ;;  %v4956_v54 = vadd.f32 %v8722_v14, %v4920_v27  ;;  %v4924_v49 = vld [vmem:[#allocation2 + $0x90] sm:$0xff]  ;;  %v4959_v47 = vadd.f32 %v8722_v14, %v4923_v53  ;;  %v4926_v4 = vld [vmem:[#allocation2 + $0xc0] sm:$0xff] }
 0x5ec   : > { %4976 = vst [vmem:[#allocation2 + $0x68] sm:$0xff] %v8742_v39  ;;  %v4958_v1 = vadd.f32 %v8722_v14, %v4922_v34  ;;  %v4925_v13 = vld [vmem:[#allocation2 + $0x70] sm:$0xff]  ;;  %v4960_v21 = vadd.f32 %v8722_v14, %v4924_v49  ;;  %v4927_v46 = vld [vmem:[#allocation2 + $0xa8] sm:$0xff]  ;;  %v4962_v23 = vadd.f32 %v8722_v14, %v4926_v4  ;;  %v4931_v8 = vld [vmem:[#allocation2 + $0xa0] sm:$0xff] }
 0x5ed   : > { %4977 = vst [vmem:[#allocation2 + $0x30] sm:$0xff] %v8746_v55  ;;  %v4961_v42 = vadd.f32 %v8722_v14, %v4925_v13  ;;  %v4928_v48 = vld [vmem:[#allocation2 + $0xd0] sm:$0xff]  ;;  %v4963_v19 = vadd.f32 %v8722_v14, %v4927_v46  ;;  %v4930_v50 = vld [vmem:[#allocation2 + $0x28] sm:$0xff]  ;;  %v4932_v15 = vld [vmem:[#allocation2 + $0xf8] sm:$0xff]  ;;  %v4967_v44 = vadd.f32 %v8722_v14, %v4931_v8 }
 0x5ee   : > { %4978 = vst [vmem:[#allocation2 + $0x48] sm:$0xff] %v8750_v31  ;;  %v4929_v35 = vld [vmem:[#allocation2 + $0x10] sm:$0xff]  ;;  %v4964_v57 = vadd.f32 %v8722_v14, %v4928_v48  ;;  %v4966_v33 = vadd.f32 %v8722_v14, %v4930_v50  ;;  %v4933_v9 = vld [vmem:[#allocation2 + $0x20] sm:$0xff]  ;;  %v4934_v28 = vld [vmem:[#allocation2 + $0x98] sm:$0xff]  ;;  %v4968_v38 = vadd.f32 %v8722_v14, %v4932_v15 }
 0x5ef   : > { %4979 = vst [vmem:[#allocation2 + $0x80] sm:$0xff] %v8754_v58  ;;  %v4965_v43 = vadd.f32 %v8722_v14, %v4929_v35  ;;  %v4969_v10 = vadd.f32 %v8722_v14, %v4933_v9  ;;  %v4970_v52 = vadd.f32 %v8722_v14, %v4934_v28 }
 0x5f0   : > { %4980 = vst [vmem:[#allocation2 + $0x88] sm:$0xff] %v8758_v61 }
 0x5f1   : > { %4981 = vst [vmem:[#allocation2 + $0xe8] sm:$0xff] %v8762_v3 }
 0x5f2   : > { %4982 = vst [vmem:[#allocation2 + $0xb8] sm:$0xff] %v8766_v26 }
 0x5f3   : > { %4983 = vst [vmem:[#allocation2 + $0x60] sm:$0xff] %v8770_v16 }
 0x5f4   : > { %4984 = vst [vmem:[#allocation2 + $0xf0] sm:$0xff] %v8774_v2 }
 0x5f5   : > { %4985 = vst [vmem:[#allocation2 + $0x8] sm:$0xff] %v8778_v7 }
 0x5f6   : > { %4986 = vst [vmem:[#allocation2 + $0x78] sm:$0xff] %v8782_v45 }
 0x5f7   : > { %4987 = vst [vmem:[#allocation2 + $0x38] sm:$0xff] %v8786_v6 }
 0x5f8   : > { %4988 = vst [vmem:[#allocation2 + $0x58] sm:$0xff] %v4956_v54 }
 0x5f9   : > { %4989 = vst [vmem:[#allocation2 + $0x40] sm:$0xff] %v4957_v29 }
 0x5fa   : > { %4990 = vst [vmem:[#allocation2 + $0xc8] sm:$0xff] %v4958_v1 }
 0x5fb   : > { %4991 = vst [vmem:[#allocation2 + $0xe0] sm:$0xff] %v4959_v47 }
 0x5fc   : > { %4992 = vst [vmem:[#allocation2 + $0x90] sm:$0xff] %v4960_v21 }
 0x5fd   : > { %4993 = vst [vmem:[#allocation2 + $0x70] sm:$0xff] %v4961_v42 }
 0x5fe   : > { %4994 = vst [vmem:[#allocation2 + $0xc0] sm:$0xff] %v4962_v23 }
 0x5ff   : > { %4995 = vst [vmem:[#allocation2 + $0xa8] sm:$0xff] %v4963_v19 }
 0x600   : > { %4996 = vst [vmem:[#allocation2 + $0xd0] sm:$0xff] %v4964_v57 }
 0x601   : > { %4997 = vst [vmem:[#allocation2 + $0x10] sm:$0xff] %v4965_v43 }
 0x602   : > { %4998 = vst [vmem:[#allocation2 + $0x28] sm:$0xff] %v4966_v33 }
 0x603   : > { %4999 = vst [vmem:[#allocation2 + $0xa0] sm:$0xff] %v4967_v44 }
 0x604   : > { %5000 = vst [vmem:[#allocation2 + $0xf8] sm:$0xff] %v4968_v38 }
 0x605   : > { %5001 = vst [vmem:[#allocation2 + $0x20] sm:$0xff] %v4969_v10 }
 0x606   : > { %5002 = vst [vmem:[#allocation2 + $0x98] sm:$0xff] %v4970_v52 }
 0x607   : > { %5035 = vst [vmem:[%s8938_s3] sm:$0xff] %v8725_v0 }
 0x608   : > { %5036 = vst [vmem:[%s8938_s3 + $0x8] sm:$0xff] %v8728_v60 }
 0x609   : > { %5037 = vst [vmem:[%s8938_s3 + $0x10] sm:$0xff] %v8731_v59 }
 0x60a   : > { %5038 = vst [vmem:[%s8938_s3 + $0x18] sm:$0xff] %v8734_v22 }
 0x60b   : > { %5039 = vst [vmem:[%s8938_s3 + $0x20] sm:$0xff] %v8738_v56 }
 0x60c   : > { %5040 = vst [vmem:[%s8938_s3 + $0x28] sm:$0xff] %v8742_v39 }
 0x60d   : > { %5041 = vst [vmem:[%s8938_s3 + $0x30] sm:$0xff] %v8746_v55 }
 0x60e   : > { %5042 = vst [vmem:[%s8938_s3 + $0x38] sm:$0xff] %v8750_v31 }
 0x60f   : > { %5043 = vst [vmem:[%s8938_s3 + $0x40] sm:$0xff] %v8754_v58 }
 0x610   : > { %5044 = vst [vmem:[%s8938_s3 + $0x48] sm:$0xff] %v8758_v61 }
 0x611   : > { %5045 = vst [vmem:[%s8938_s3 + $0x50] sm:$0xff] %v8762_v3 }
 0x612   : > { %5046 = vst [vmem:[%s8938_s3 + $0x58] sm:$0xff] %v8766_v26 }
 0x613   : > { %5047 = vst [vmem:[%s8938_s3 + $0x60] sm:$0xff] %v8770_v16 }
 0x614   : > { %5048 = vst [vmem:[%s8938_s3 + $0x68] sm:$0xff] %v8774_v2 }
 0x615   : > { %5049 = vst [vmem:[%s8938_s3 + $0x70] sm:$0xff] %v8778_v7 }
 0x616   : > { %5050 = vst [vmem:[%s8938_s3 + $0x78] sm:$0xff] %v8782_v45 }
 0x617   : > { %5051 = vst [vmem:[%s8938_s3 + $0x80] sm:$0xff] %v8786_v6 }
 0x618   : > { %5052 = vst [vmem:[%s8938_s3 + $0x88] sm:$0xff] %v4956_v54 }
 0x619   : > { %5053 = vst [vmem:[%s8938_s3 + $0x90] sm:$0xff] %v4957_v29 }
 0x61a   : > { %5054 = vst [vmem:[%s8938_s3 + $0x98] sm:$0xff] %v4958_v1 }
 0x61b   : > { %5055 = vst [vmem:[%s8938_s3 + $0xa0] sm:$0xff] %v4959_v47 }
 0x61c   : > { %5056 = vst [vmem:[%s8938_s3 + $0xa8] sm:$0xff] %v4960_v21 }
 0x61d   : > { %5057 = vst [vmem:[%s8938_s3 + $0xb0] sm:$0xff] %v4961_v42 }
 0x61e   : > { %5058 = vst [vmem:[%s8938_s3 + $0xb8] sm:$0xff] %v4962_v23 }
 0x61f   : > { %5059 = vst [vmem:[%s8938_s3 + $0xc0] sm:$0xff] %v4963_v19 }
 0x620   : > { %5060 = vst [vmem:[%s8938_s3 + $0xc8] sm:$0xff] %v4964_v57 }
 0x621   : > { %5061 = vst [vmem:[%s8938_s3 + $0xd0] sm:$0xff] %v4965_v43 }
 0x622   : > { %5062 = vst [vmem:[%s8938_s3 + $0xd8] sm:$0xff] %v4966_v33 }
 0x623   : > { %5063 = vst [vmem:[%s8938_s3 + $0xe0] sm:$0xff] %v4967_v44 }
 0x624   : > { %5064 = vst [vmem:[%s8938_s3 + $0xe8] sm:$0xff] %v4968_v38 }
 0x625   : > { %5065 = vst [vmem:[%s8938_s3 + $0xf0] sm:$0xff] %v4969_v10 }
 0x626   : > { %5066 = vst [vmem:[%s8938_s3 + $0xf8] sm:$0xff] %v4970_v52 }
 0x627 PF: > { %s13_s16 = sadd.s32 1, %s7196_s16   ;;  %s8939_s12 = smov %s7184_s13 }
 0x628   : > { %p10_p12 = scmp.ge.s32.totalorder %s13_s16, 4   ;;  %s8940_s13 = smov %s7254_s20 }
 0x629   : > { %s8941_s14 = smov %s7192_s15  ;;  %s8942_s15 = smov %s8944_s17 }
 0x62a   :  { %12 = sbr.rel (!%p10_p12) target bundleno = 3 (0x3), region = 104 }

</bundles_post_ra>
